<compile_context>
chip_gen: v5e
topology: v5e:2x2
jax: 0.10.0
libtpu: 0.0.40
codegen_flags: <defaults>
</compile_context>

<pallas_src>
import functools

import jax
import jax.numpy as jnp
from jax.experimental import pallas as pl
from jax.experimental.pallas import tpu as pltpu

EPS = 1e-5
EXPANSION = 4  # BottleNeck.expansion
_VMEM_LIMIT_BYTES = 32 * 1024 * 1024


def _compiler_params():
    return pltpu.CompilerParams(
        dimension_semantics=("parallel",),
        vmem_limit_bytes=_VMEM_LIMIT_BYTES,
    )


def _pick_row_tile(m):
    """Largest row tile (multiple of 8) dividing m; falls back to full extent."""
    for t in (1024, 512, 256, 128, 64, 32, 16, 8):
        if m % t == 0:
            return t
    return m


# ----------------------------------------------------------------------------------
# Kernels.  Per-tile BN statistics are written as an (8, C) block per grid step:
# row 0 = sum, row 1 = sum of squares, rows 2..7 are padding for the (8, 128) tiling.
# ----------------------------------------------------------------------------------
def _stage1_kernel(x_ref, w1_ref, wsc_ref, z1_ref, st1_ref, stsc_ref):
    """1x1 conv (residual path) + shortcut 1x1 conv statistics on one row tile."""
    xb = x_ref[...].astype(jnp.bfloat16)
    z1 = jnp.dot(xb, w1_ref[...], preferred_element_type=jnp.float32)
    zsc = jnp.dot(xb, wsc_ref[...], preferred_element_type=jnp.float32)

    z1_ref[...] = z1

    st1_ref[...] = jnp.zeros_like(st1_ref)
    st1_ref[0:1, :] = jnp.sum(z1, axis=0, keepdims=True)
    st1_ref[1:2, :] = jnp.sum(z1 * z1, axis=0, keepdims=True)

    stsc_ref[...] = jnp.zeros_like(stsc_ref)
    stsc_ref[0:1, :] = jnp.sum(zsc, axis=0, keepdims=True)
    stsc_ref[1:2, :] = jnp.sum(zsc * zsc, axis=0, keepdims=True)


def _stage2_kernel(H, W, z1_ref, a1_ref, w2_ref, z2_ref, st2_ref, xp_ref, acc_ref):
    """BN1 (folded affine) + ReLU, then 3x3 conv (pad=1) on one image."""
    C = z1_ref.shape[-1]

    z1 = z1_ref[...]                                              # (H*W, C) f32
    y1 = jnp.maximum(z1 * a1_ref[0:1, :] + a1_ref[1:2, :], 0.0)   # BN1 + ReLU

    # Zero only the 1-pixel halo of the padded scratch; interior is overwritten.
    xp_ref[0:1, :, :] = jnp.zeros((1, W + 2, C), jnp.float32)
    xp_ref[H + 1:H + 2, :, :] = jnp.zeros((1, W + 2, C), jnp.float32)
    xp_ref[:, 0:1, :] = jnp.zeros((H + 2, 1, C), jnp.float32)
    xp_ref[:, W + 1:W + 2, :] = jnp.zeros((H + 2, 1, C), jnp.float32)
    xp_ref[1:H + 1, 1:W + 1, :] = y1.reshape(H, W, C)

    # 3x3 conv: 3 strided slab reads (one per dx) + 9 bf16 matmuls accumulated
    # into an f32 VMEM scratch accumulator.
    acc_ref[...] = jnp.zeros_like(acc_ref)
    for dx in range(3):
        slab = xp_ref[:, dx:dx + W, :]                            # (H+2, W, C)
        for dy in range(3):
            xs = slab[dy:dy + H].reshape(H * W, C).astype(jnp.bfloat16)
            acc_ref[...] += jnp.dot(xs, w2_ref[dy, dx],
                                    preferred_element_type=jnp.float32)

    z2 = acc_ref[...]
    z2_ref[...] = z2

    st2_ref[...] = jnp.zeros_like(st2_ref)
    st2_ref[0:1, :] = jnp.sum(z2, axis=0, keepdims=True)
    st2_ref[1:2, :] = jnp.sum(z2 * z2, axis=0, keepdims=True)


def _stage3_kernel(z2_ref, a2_ref, w3_ref, z3_ref, st3_ref):
    """BN2 (folded affine) + ReLU, then 1x1 expansion conv on one row tile."""
    y2 = jnp.maximum(z2_ref[...] * a2_ref[0:1, :] + a2_ref[1:2, :], 0.0)
    z3 = jnp.dot(y2.astype(jnp.bfloat16), w3_ref[...],
                 preferred_element_type=jnp.float32)

    z3_ref[...] = z3

    st3_ref[...] = jnp.zeros_like(st3_ref)
    st3_ref[0:1, :] = jnp.sum(z3, axis=0, keepdims=True)
    st3_ref[1:2, :] = jnp.sum(z3 * z3, axis=0, keepdims=True)


def _stage4_kernel(z3_ref, x_ref, wsc_ref, a3_ref, asc_ref, o_ref):
    """BN3 + (recomputed) shortcut conv + BNsc + residual add + final ReLU."""
    y3 = z3_ref[...] * a3_ref[0:1, :] + a3_ref[1:2, :]

    xb = x_ref[...].astype(jnp.bfloat16)
    zsc = jnp.dot(xb, wsc_ref[...], preferred_element_type=jnp.float32)
    sc = zsc * asc_ref[0:1, :] + asc_ref[1:2, :]

    o_ref[...] = jnp.maximum(y3 + sc, 0.0).astype(o_ref.dtype)


# ----------------------------------------------------------------------------------
# Wrapper.
# ----------------------------------------------------------------------------------
def _fold_bn(pstats, count, gamma, beta):
    """Reduce per-tile (sum, sumsq) partials and fold BN into a (scale, shift) pair."""
    c = pstats.shape[-1]
    p = pstats.reshape(-1, 8, c)
    s = jnp.sum(p[:, 0, :], axis=0)
    ss = jnp.sum(p[:, 1, :], axis=0)
    mean = s / count
    var = ss / count - mean * mean            # biased variance (PyTorch training BN)
    scale = gamma.reshape(-1) * jax.lax.rsqrt(var + EPS)
    shift = beta.reshape(-1) - mean * scale
    return jnp.stack([scale, shift], axis=0).astype(jnp.float32)   # (2, C)


def bottleneck_forward(x_nchw, params, stride=1):
    assert stride == 1, "kernel currently implements the stride=1 bottleneck"

    # TODO(synk): in a full network, keep activations NHWC across blocks and drop
    # these boundary transposes (each is a full HBM round trip of the activation).
    x = jnp.transpose(x_nchw, (0, 2, 3, 1)).astype(jnp.float32)    # NCHW -> NHWC
    N, H, W, Cin = x.shape
    C = params["w1"].shape[1]
    Cout = C * EXPANSION
    M = N * H * W
    HW = H * W
    assert HW % 8 == 0 or N == 1, "per-image row block must be 8-row aligned"

    TM = _pick_row_tile(M)
    nt = M // TM
    cp = _compiler_params()

    x_flat = x.reshape(M, Cin)
    w1 = params["w1"].astype(jnp.bfloat16)
    w2 = params["w2"].astype(jnp.bfloat16)
    w3 = params["w3"].astype(jnp.bfloat16)
    wsc = params["wsc"].astype(jnp.bfloat16)

    # ---- stage 1: conv1 (1x1) + BN1 / BNsc statistics ------------------------------
    z1, st1, stsc = pl.pallas_call(
        _stage1_kernel,
        grid=(nt,),
        in_specs=[pl.BlockSpec((TM, Cin), lambda i: (i, 0)),
                  pl.BlockSpec((Cin, C), lambda i: (0, 0)),
                  pl.BlockSpec((Cin, Cout), lambda i: (0, 0))],
        out_specs=[pl.BlockSpec((TM, C), lambda i: (i, 0)),
                   pl.BlockSpec((8, C), lambda i: (i, 0)),
                   pl.BlockSpec((8, Cout), lambda i: (i, 0))],
        out_shape=[jax.ShapeDtypeStruct((M, C), jnp.float32),
                   jax.ShapeDtypeStruct((nt * 8, C), jnp.float32),
                   jax.ShapeDtypeStruct((nt * 8, Cout), jnp.float32)],
        compiler_params=cp,
    )(x_flat, w1, wsc)
    a1 = _fold_bn(st1, M, params["g1"], params["b1"])
    asc = _fold_bn(stsc, M, params["gsc"], params["bsc"])

    # ---- stage 2: BN1+ReLU -> 3x3 conv -> BN2 statistics ---------------------------
    z2, st2 = pl.pallas_call(
        functools.partial(_stage2_kernel, H, W),
        grid=(N,),
        in_specs=[pl.BlockSpec((HW, C), lambda n: (n, 0)),
                  pl.BlockSpec((2, C), lambda n: (0, 0)),
                  pl.BlockSpec((3, 3, C, C), lambda n: (0, 0, 0, 0))],
        out_specs=[pl.BlockSpec((HW, C), lambda n: (n, 0)),
                   pl.BlockSpec((8, C), lambda n: (n, 0))],
        out_shape=[jax.ShapeDtypeStruct((M, C), jnp.float32),
                   jax.ShapeDtypeStruct((N * 8, C), jnp.float32)],
        scratch_shapes=[pltpu.VMEM((H + 2, W + 2, C), jnp.float32),
                        pltpu.VMEM((HW, C), jnp.float32)],
        compiler_params=cp,
    )(z1, a1, w2)
    a2 = _fold_bn(st2, M, params["g2"], params["b2"])

    # ---- stage 3: BN2+ReLU -> conv3 (1x1 expansion) -> BN3 statistics --------------
    z3, st3 = pl.pallas_call(
        _stage3_kernel,
        grid=(nt,),
        in_specs=[pl.BlockSpec((TM, C), lambda i: (i, 0)),
                  pl.BlockSpec((2, C), lambda i: (0, 0)),
                  pl.BlockSpec((C, Cout), lambda i: (0, 0))],
        out_specs=[pl.BlockSpec((TM, Cout), lambda i: (i, 0)),
                   pl.BlockSpec((8, Cout), lambda i: (i, 0))],
        out_shape=[jax.ShapeDtypeStruct((M, Cout), jnp.float32),
                   jax.ShapeDtypeStruct((nt * 8, Cout), jnp.float32)],
        compiler_params=cp,
    )(z2, a2, w3)
    a3 = _fold_bn(st3, M, params["g3"], params["b3"])

    # ---- stage 4: BN3 + shortcut (recomputed) + residual add + final ReLU ----------
    out_flat = pl.pallas_call(
        _stage4_kernel,
        grid=(nt,),
        in_specs=[pl.BlockSpec((TM, Cout), lambda i: (i, 0)),
                  pl.BlockSpec((TM, Cin), lambda i: (i, 0)),
                  pl.BlockSpec((Cin, Cout), lambda i: (0, 0)),
                  pl.BlockSpec((2, Cout), lambda i: (0, 0)),
                  pl.BlockSpec((2, Cout), lambda i: (0, 0))],
        out_specs=pl.BlockSpec((TM, Cout), lambda i: (i, 0)),
        out_shape=jax.ShapeDtypeStruct((M, Cout), jnp.float32),
        compiler_params=cp,
    )(z3, x_flat, wsc, a3, asc)

    out = out_flat.reshape(N, H, W, Cout)
    return jnp.transpose(out, (0, 3, 1, 2)).astype(x_nchw.dtype)   # back to NCHW


def init_params(key, in_channels, out_channels):
    """Deterministic synthetic parameters (shapes follow BottleNeck.__init__).

    Conv weights are stored in kernel-friendly layouts:
      w1  : (Cin, C)        <-> torch (C, Cin, 1, 1)
      w2  : (3, 3, C, C)    <-> torch (C, C, 3, 3) permuted to HWIO
      w3  : (C, 4C)         <-> torch (4C, C, 1, 1)
      wsc : (Cin, 4C)       <-> torch (4C, Cin, 1, 1)
    BatchNorm affine params match PyTorch init: gamma=1, beta=0.
    """
    C = out_channels
    Co = C * EXPANSION
    ks = jax.random.split(key, 4)

    def _w(k, shape, fan_in):
        return jax.random.normal(k, shape, jnp.float32) * (2.0 / fan_in) ** 0.5

    return {
        "w1": _w(ks[0], (in_channels, C), in_channels),
        "g1": jnp.ones((1, C), jnp.float32),
        "b1": jnp.zeros((1, C), jnp.float32),
        "w2": _w(ks[1], (3, 3, C, C), 9 * C),
        "g2": jnp.ones((1, C), jnp.float32),
        "b2": jnp.zeros((1, C), jnp.float32),
        "w3": _w(ks[2], (C, Co), C),
        "g3": jnp.ones((1, Co), jnp.float32),
        "b3": jnp.zeros((1, Co), jnp.float32),
        "wsc": _w(ks[3], (in_channels, Co), in_channels),
        "gsc": jnp.ones((1, Co), jnp.float32),
        "bsc": jnp.zeros((1, Co), jnp.float32),
    }


# ---------------- pure-JAX reference (mirrors the kernel's bf16 matmul inputs) ------
def _conv_ref(x, w_hwio, stride, pad):
    return jax.lax.conv_general_dilated(
        x.astype(jnp.bfloat16), w_hwio.astype(jnp.bfloat16),
        window_strides=(stride, stride),
        padding=[(pad, pad), (pad, pad)],
        dimension_numbers=("NHWC", "HWIO", "NHWC"),
        preferred_element_type=jnp.float32)


def _bn_ref(x, g, b):
    mean = jnp.mean(x, axis=(0, 1, 2), keepdims=True)
    var = jnp.mean((x - mean) ** 2, axis=(0, 1, 2), keepdims=True)
    return ((x - mean) * jax.lax.rsqrt(var + EPS)
            * g.reshape(1, 1, 1, -1) + b.reshape(1, 1, 1, -1))


def bottleneck_ref(x_nchw, p):
    x = jnp.transpose(x_nchw, (0, 2, 3, 1)).astype(jnp.float32)
    y = _conv_ref(x, p["w1"][None, None], 1, 0)
    y = jax.nn.relu(_bn_ref(y, p["g1"], p["b1"]))
    y = _conv_ref(y, p["w2"], 1, 1)
    y = jax.nn.relu(_bn_ref(y, p["g2"], p["b2"]))
    y = _conv_ref(y, p["w3"][None, None], 1, 0)
    y = _bn_ref(y, p["g3"], p["b3"])
    sc = _conv_ref(x, p["wsc"][None, None], 1, 0)
    sc = _bn_ref(sc, p["gsc"], p["bsc"])
    out = jax.nn.relu(y + sc)
    return jnp.transpose(out, (0, 3, 1, 2))


if __name__ == "__main__":
    key = jax.random.PRNGKey(0)
    kx, kp = jax.random.split(key)

    N, Cin, H, W = 2, 4, 16, 16          # small NCHW input, like the PyTorch module
    out_channels = 4                      # -> output channels = 4 * expansion = 16

    x = jax.random.normal(kx, (N, Cin, H, W), jnp.float32)
    params = init_params(kp, Cin, out_channels)

    fwd = jax.jit(functools.partial(bottleneck_forward, stride=1))
    y = jax.block_until_ready(fwd(x, params))

    assert y.shape == (N, out_channels * EXPANSION, H, W), y.shape

    y_ref = bottleneck_ref(x, params)
    max_err = float(jnp.max(jnp.abs(y - y_ref)))
    assert max_err < 5e-3, f"mismatch vs reference: {max_err}"

    print("KERNEL_OK")
</pallas_src>

<mosaic_0001>
module attributes {stable_mosaic.version = 11 : i64} {
  func.func @_stage2_kernel(%arg0: i32, %arg1: memref<256x4xf32, #tpu.memory_space<vmem>>, %arg2: memref<2x4xf32, #tpu.memory_space<vmem>>, %arg3: memref<3x3x4x4xbf16, #tpu.memory_space<vmem>>, %arg4: memref<256x4xf32, #tpu.memory_space<vmem>>, %arg5: memref<8x4xf32, #tpu.memory_space<vmem>>, %arg6: memref<18x18x4xf32, #tpu.memory_space<vmem>>, %arg7: memref<256x4xf32, #tpu.memory_space<vmem>>) attributes {dimension_semantics = [#tpu.dimension_semantics<parallel>], iteration_bounds = array<i64: 2>, scalar_prefetch = 0 : i64, scratch_operands = 2 : i64, tpu.core_type = #tpu.core_type<tc>, window_params = [{transform_indices = @transform_0, window_bounds = array<i64: 256, 4>}, {pipeline_mode = #tpu.pipeline_mode<synchronous>, transform_indices = @transform_1, window_bounds = array<i64: 2, 4>}, {pipeline_mode = #tpu.pipeline_mode<synchronous>, transform_indices = @transform_2, window_bounds = array<i64: 3, 3, 4, 4>}, {transform_indices = @transform_3, window_bounds = array<i64: 256, 4>}, {transform_indices = @transform_4, window_bounds = array<i64: 8, 4>}]} {
    %c0 = arith.constant 0 : index
    %c0_0 = arith.constant 0 : index
    %0 = vector.load %arg1[%c0, %c0_0] : memref<256x4xf32, #tpu.memory_space<vmem>>, vector<256x4xf32>
    %c0_1 = arith.constant 0 : index
    %c0_2 = arith.constant 0 : index
    %1 = vector.load %arg2[%c0_1, %c0_2] : memref<2x4xf32, #tpu.memory_space<vmem>>, vector<1x4xf32>
    %2 = vector.broadcast %1 : vector<1x4xf32> to vector<256x4xf32>
    %3 = arith.mulf %0, %2 : vector<256x4xf32>
    %c1 = arith.constant 1 : index
    %c0_3 = arith.constant 0 : index
    %4 = vector.load %arg2[%c1, %c0_3] : memref<2x4xf32, #tpu.memory_space<vmem>>, vector<1x4xf32>
    %5 = vector.broadcast %4 : vector<1x4xf32> to vector<256x4xf32>
    %6 = arith.addf %3, %5 : vector<256x4xf32>
    %cst = arith.constant 0.000000e+00 : f32
    %7 = vector.broadcast %cst : f32 to vector<256x4xf32>
    %8 = arith.maximumf %6, %7 : vector<256x4xf32>
    %cst_4 = arith.constant 0.000000e+00 : f32
    %9 = vector.broadcast %cst_4 : f32 to vector<1x18x4xf32>
    %c0_5 = arith.constant 0 : index
    %c0_6 = arith.constant 0 : index
    %c0_7 = arith.constant 0 : index
    %10 = vector.load %arg6[%c0_5, %c0_6, %c0_7] : memref<18x18x4xf32, #tpu.memory_space<vmem>>, vector<1x18x4xf32>
    tpu.vector_store %arg6[%c0_5, %c0_6, %c0_7], %9 {strides = array<i32>} : memref<18x18x4xf32, #tpu.memory_space<vmem>>, vector<1x18x4xf32>,
    %cst_8 = arith.constant 0.000000e+00 : f32
    %11 = vector.broadcast %cst_8 : f32 to vector<1x18x4xf32>
    %c17 = arith.constant 17 : index
    %c0_9 = arith.constant 0 : index
    %c0_10 = arith.constant 0 : index
    %12 = vector.load %arg6[%c17, %c0_9, %c0_10] : memref<18x18x4xf32, #tpu.memory_space<vmem>>, vector<1x18x4xf32>
    tpu.vector_store %arg6[%c17, %c0_9, %c0_10], %11 {strides = array<i32>} : memref<18x18x4xf32, #tpu.memory_space<vmem>>, vector<1x18x4xf32>,
    %cst_11 = arith.constant 0.000000e+00 : f32
    %13 = vector.broadcast %cst_11 : f32 to vector<18x1x4xf32>
    %c0_12 = arith.constant 0 : index
    %c0_13 = arith.constant 0 : index
    %c0_14 = arith.constant 0 : index
    %14 = vector.load %arg6[%c0_12, %c0_13, %c0_14] : memref<18x18x4xf32, #tpu.memory_space<vmem>>, vector<18x1x4xf32>
    tpu.vector_store %arg6[%c0_12, %c0_13, %c0_14], %13 {strides = array<i32>} : memref<18x18x4xf32, #tpu.memory_space<vmem>>, vector<18x1x4xf32>,
    %cst_15 = arith.constant 0.000000e+00 : f32
    %15 = vector.broadcast %cst_15 : f32 to vector<18x1x4xf32>
    %c0_16 = arith.constant 0 : index
    %c17_17 = arith.constant 17 : index
    %c0_18 = arith.constant 0 : index
    %16 = vector.load %arg6[%c0_16, %c17_17, %c0_18] : memref<18x18x4xf32, #tpu.memory_space<vmem>>, vector<18x1x4xf32>
    tpu.vector_store %arg6[%c0_16, %c17_17, %c0_18], %15 {strides = array<i32>} : memref<18x18x4xf32, #tpu.memory_space<vmem>>, vector<18x1x4xf32>,
    %17 = vector.shape_cast %8 : vector<256x4xf32> to vector<16x16x4xf32>
    %c1_19 = arith.constant 1 : index
    %c1_20 = arith.constant 1 : index
    %c0_21 = arith.constant 0 : index
    %18 = vector.load %arg6[%c1_19, %c1_20, %c0_21] : memref<18x18x4xf32, #tpu.memory_space<vmem>>, vector<16x16x4xf32>
    tpu.vector_store %arg6[%c1_19, %c1_20, %c0_21], %17 {strides = array<i32>} : memref<18x18x4xf32, #tpu.memory_space<vmem>>, vector<16x16x4xf32>,
    %cst_22 = arith.constant 0.000000e+00 : f32
    %19 = vector.broadcast %cst_22 : f32 to vector<256x4xf32>
    %c0_23 = arith.constant 0 : index
    %c0_24 = arith.constant 0 : index
    %20 = vector.load %arg7[%c0_23, %c0_24] : memref<256x4xf32, #tpu.memory_space<vmem>>, vector<256x4xf32>
    tpu.vector_store %arg7[%c0_23, %c0_24], %19 {strides = array<i32>} : memref<256x4xf32, #tpu.memory_space<vmem>>, vector<256x4xf32>,
    %c0_25 = arith.constant 0 : index
    %c0_26 = arith.constant 0 : index
    %c0_27 = arith.constant 0 : index
    %21 = vector.load %arg6[%c0_25, %c0_26, %c0_27] : memref<18x18x4xf32, #tpu.memory_space<vmem>>, vector<18x16x4xf32>
    %22 = vector.extract_strided_slice %21 {offsets = [0, 0, 0], sizes = [16, 16, 4], strides = [1, 1, 1]} : vector<18x16x4xf32> to vector<16x16x4xf32>
    %23 = vector.shape_cast %22 : vector<16x16x4xf32> to vector<256x4xf32>
    %24 = arith.truncf %23 : vector<256x4xf32> to vector<256x4xbf16>
    %c0_28 = arith.constant 0 : index
    %c0_29 = arith.constant 0 : index
    %25 = vector.load %arg7[%c0_28, %c0_29] : memref<256x4xf32, #tpu.memory_space<vmem>>, vector<256x4xf32>
    %c0_30 = arith.constant 0 : index
    %c0_31 = arith.constant 0 : index
    %c0_32 = arith.constant 0 : index
    %c0_33 = arith.constant 0 : index
    %26 = vector.load %arg3[%c0_30, %c0_31, %c0_32, %c0_33] : memref<3x3x4x4xbf16, #tpu.memory_space<vmem>>, vector<1x1x4x4xbf16>
    %27 = vector.shape_cast %26 : vector<1x1x4x4xbf16> to vector<4x4xbf16>
    %cst_34 = arith.constant dense<0.000000e+00> : vector<256x4xf32>
    %28 = tpu.matmul %24, %27, %cst_34 {dimension_numbers = #tpu.dot_dimension_numbers<[1], [0], [0], [1], [0, 0, 1, 1], [], []>} : vector<256x4xbf16>, vector<4x4xbf16>, vector<256x4xf32> -> vector<256x4xf32>
    %29 = arith.addf %25, %28 : vector<256x4xf32>
    %c0_35 = arith.constant 0 : index
    %c0_36 = arith.constant 0 : index
    %30 = vector.load %arg7[%c0_35, %c0_36] : memref<256x4xf32, #tpu.memory_space<vmem>>, vector<256x4xf32>
    tpu.vector_store %arg7[%c0_35, %c0_36], %29 {strides = array<i32>} : memref<256x4xf32, #tpu.memory_space<vmem>>, vector<256x4xf32>,
    %31 = vector.extract_strided_slice %21 {offsets = [1, 0, 0], sizes = [16, 16, 4], strides = [1, 1, 1]} : vector<18x16x4xf32> to vector<16x16x4xf32>
    %32 = vector.shape_cast %31 : vector<16x16x4xf32> to vector<256x4xf32>
    %33 = arith.truncf %32 : vector<256x4xf32> to vector<256x4xbf16>
    %c0_37 = arith.constant 0 : index
    %c0_38 = arith.constant 0 : index
    %34 = vector.load %arg7[%c0_37, %c0_38] : memref<256x4xf32, #tpu.memory_space<vmem>>, vector<256x4xf32>
    %c1_39 = arith.constant 1 : index
    %c0_40 = arith.constant 0 : index
    %c0_41 = arith.constant 0 : index
    %c0_42 = arith.constant 0 : index
    %35 = vector.load %arg3[%c1_39, %c0_40, %c0_41, %c0_42] : memref<3x3x4x4xbf16, #tpu.memory_space<vmem>>, vector<1x1x4x4xbf16>
    %36 = vector.shape_cast %35 : vector<1x1x4x4xbf16> to vector<4x4xbf16>
    %cst_43 = arith.constant dense<0.000000e+00> : vector<256x4xf32>
    %37 = tpu.matmul %33, %36, %cst_43 {dimension_numbers = #tpu.dot_dimension_numbers<[1], [0], [0], [1], [0, 0, 1, 1], [], []>} : vector<256x4xbf16>, vector<4x4xbf16>, vector<256x4xf32> -> vector<256x4xf32>
    %38 = arith.addf %34, %37 : vector<256x4xf32>
    %c0_44 = arith.constant 0 : index
    %c0_45 = arith.constant 0 : index
    %39 = vector.load %arg7[%c0_44, %c0_45] : memref<256x4xf32, #tpu.memory_space<vmem>>, vector<256x4xf32>
    tpu.vector_store %arg7[%c0_44, %c0_45], %38 {strides = array<i32>} : memref<256x4xf32, #tpu.memory_space<vmem>>, vector<256x4xf32>,
    %40 = vector.extract_strided_slice %21 {offsets = [2, 0, 0], sizes = [16, 16, 4], strides = [1, 1, 1]} : vector<18x16x4xf32> to vector<16x16x4xf32>
    %41 = vector.shape_cast %40 : vector<16x16x4xf32> to vector<256x4xf32>
    %42 = arith.truncf %41 : vector<256x4xf32> to vector<256x4xbf16>
    %c0_46 = arith.constant 0 : index
    %c0_47 = arith.constant 0 : index
    %43 = vector.load %arg7[%c0_46, %c0_47] : memref<256x4xf32, #tpu.memory_space<vmem>>, vector<256x4xf32>
    %c2 = arith.constant 2 : index
    %c0_48 = arith.constant 0 : index
    %c0_49 = arith.constant 0 : index
    %c0_50 = arith.constant 0 : index
    %44 = vector.load %arg3[%c2, %c0_48, %c0_49, %c0_50] : memref<3x3x4x4xbf16, #tpu.memory_space<vmem>>, vector<1x1x4x4xbf16>
    %45 = vector.shape_cast %44 : vector<1x1x4x4xbf16> to vector<4x4xbf16>
    %cst_51 = arith.constant dense<0.000000e+00> : vector<256x4xf32>
    %46 = tpu.matmul %42, %45, %cst_51 {dimension_numbers = #tpu.dot_dimension_numbers<[1], [0], [0], [1], [0, 0, 1, 1], [], []>} : vector<256x4xbf16>, vector<4x4xbf16>, vector<256x4xf32> -> vector<256x4xf32>
    %47 = arith.addf %43, %46 : vector<256x4xf32>
    %c0_52 = arith.constant 0 : index
    %c0_53 = arith.constant 0 : index
    %48 = vector.load %arg7[%c0_52, %c0_53] : memref<256x4xf32, #tpu.memory_space<vmem>>, vector<256x4xf32>
    tpu.vector_store %arg7[%c0_52, %c0_53], %47 {strides = array<i32>} : memref<256x4xf32, #tpu.memory_space<vmem>>, vector<256x4xf32>,
    %c0_54 = arith.constant 0 : index
    %c1_55 = arith.constant 1 : index
    %c0_56 = arith.constant 0 : index
    %49 = vector.load %arg6[%c0_54, %c1_55, %c0_56] : memref<18x18x4xf32, #tpu.memory_space<vmem>>, vector<18x16x4xf32>
    %50 = vector.extract_strided_slice %49 {offsets = [0, 0, 0], sizes = [16, 16, 4], strides = [1, 1, 1]} : vector<18x16x4xf32> to vector<16x16x4xf32>
    %51 = vector.shape_cast %50 : vector<16x16x4xf32> to vector<256x4xf32>
    %52 = arith.truncf %51 : vector<256x4xf32> to vector<256x4xbf16>
    %c0_57 = arith.constant 0 : index
    %c0_58 = arith.constant 0 : index
    %53 = vector.load %arg7[%c0_57, %c0_58] : memref<256x4xf32, #tpu.memory_space<vmem>>, vector<256x4xf32>
    %c0_59 = arith.constant 0 : index
    %c1_60 = arith.constant 1 : index
    %c0_61 = arith.constant 0 : index
    %c0_62 = arith.constant 0 : index
    %54 = vector.load %arg3[%c0_59, %c1_60, %c0_61, %c0_62] : memref<3x3x4x4xbf16, #tpu.memory_space<vmem>>, vector<1x1x4x4xbf16>
    %55 = vector.shape_cast %54 : vector<1x1x4x4xbf16> to vector<4x4xbf16>
    %cst_63 = arith.constant dense<0.000000e+00> : vector<256x4xf32>
    %56 = tpu.matmul %52, %55, %cst_63 {dimension_numbers = #tpu.dot_dimension_numbers<[1], [0], [0], [1], [0, 0, 1, 1], [], []>} : vector<256x4xbf16>, vector<4x4xbf16>, vector<256x4xf32> -> vector<256x4xf32>
    %57 = arith.addf %53, %56 : vector<256x4xf32>
    %c0_64 = arith.constant 0 : index
    %c0_65 = arith.constant 0 : index
    %58 = vector.load %arg7[%c0_64, %c0_65] : memref<256x4xf32, #tpu.memory_space<vmem>>, vector<256x4xf32>
    tpu.vector_store %arg7[%c0_64, %c0_65], %57 {strides = array<i32>} : memref<256x4xf32, #tpu.memory_space<vmem>>, vector<256x4xf32>,
    %59 = vector.extract_strided_slice %49 {offsets = [1, 0, 0], sizes = [16, 16, 4], strides = [1, 1, 1]} : vector<18x16x4xf32> to vector<16x16x4xf32>
    %60 = vector.shape_cast %59 : vector<16x16x4xf32> to vector<256x4xf32>
    %61 = arith.truncf %60 : vector<256x4xf32> to vector<256x4xbf16>
    %c0_66 = arith.constant 0 : index
    %c0_67 = arith.constant 0 : index
    %62 = vector.load %arg7[%c0_66, %c0_67] : memref<256x4xf32, #tpu.memory_space<vmem>>, vector<256x4xf32>
    %c1_68 = arith.constant 1 : index
    %c1_69 = arith.constant 1 : index
    %c0_70 = arith.constant 0 : index
    %c0_71 = arith.constant 0 : index
    %63 = vector.load %arg3[%c1_68, %c1_69, %c0_70, %c0_71] : memref<3x3x4x4xbf16, #tpu.memory_space<vmem>>, vector<1x1x4x4xbf16>
    %64 = vector.shape_cast %63 : vector<1x1x4x4xbf16> to vector<4x4xbf16>
    %cst_72 = arith.constant dense<0.000000e+00> : vector<256x4xf32>
    %65 = tpu.matmul %61, %64, %cst_72 {dimension_numbers = #tpu.dot_dimension_numbers<[1], [0], [0], [1], [0, 0, 1, 1], [], []>} : vector<256x4xbf16>, vector<4x4xbf16>, vector<256x4xf32> -> vector<256x4xf32>
    %66 = arith.addf %62, %65 : vector<256x4xf32>
    %c0_73 = arith.constant 0 : index
    %c0_74 = arith.constant 0 : index
    %67 = vector.load %arg7[%c0_73, %c0_74] : memref<256x4xf32, #tpu.memory_space<vmem>>, vector<256x4xf32>
    tpu.vector_store %arg7[%c0_73, %c0_74], %66 {strides = array<i32>} : memref<256x4xf32, #tpu.memory_space<vmem>>, vector<256x4xf32>,
    %68 = vector.extract_strided_slice %49 {offsets = [2, 0, 0], sizes = [16, 16, 4], strides = [1, 1, 1]} : vector<18x16x4xf32> to vector<16x16x4xf32>
    %69 = vector.shape_cast %68 : vector<16x16x4xf32> to vector<256x4xf32>
    %70 = arith.truncf %69 : vector<256x4xf32> to vector<256x4xbf16>
    %c0_75 = arith.constant 0 : index
    %c0_76 = arith.constant 0 : index
    %71 = vector.load %arg7[%c0_75, %c0_76] : memref<256x4xf32, #tpu.memory_space<vmem>>, vector<256x4xf32>
    %c2_77 = arith.constant 2 : index
    %c1_78 = arith.constant 1 : index
    %c0_79 = arith.constant 0 : index
    %c0_80 = arith.constant 0 : index
    %72 = vector.load %arg3[%c2_77, %c1_78, %c0_79, %c0_80] : memref<3x3x4x4xbf16, #tpu.memory_space<vmem>>, vector<1x1x4x4xbf16>
    %73 = vector.shape_cast %72 : vector<1x1x4x4xbf16> to vector<4x4xbf16>
    %cst_81 = arith.constant dense<0.000000e+00> : vector<256x4xf32>
    %74 = tpu.matmul %70, %73, %cst_81 {dimension_numbers = #tpu.dot_dimension_numbers<[1], [0], [0], [1], [0, 0, 1, 1], [], []>} : vector<256x4xbf16>, vector<4x4xbf16>, vector<256x4xf32> -> vector<256x4xf32>
    %75 = arith.addf %71, %74 : vector<256x4xf32>
    %c0_82 = arith.constant 0 : index
    %c0_83 = arith.constant 0 : index
    %76 = vector.load %arg7[%c0_82, %c0_83] : memref<256x4xf32, #tpu.memory_space<vmem>>, vector<256x4xf32>
    tpu.vector_store %arg7[%c0_82, %c0_83], %75 {strides = array<i32>} : memref<256x4xf32, #tpu.memory_space<vmem>>, vector<256x4xf32>,
    %c0_84 = arith.constant 0 : index
    %c2_85 = arith.constant 2 : index
    %c0_86 = arith.constant 0 : index
    %77 = vector.load %arg6[%c0_84, %c2_85, %c0_86] : memref<18x18x4xf32, #tpu.memory_space<vmem>>, vector<18x16x4xf32>
    %78 = vector.extract_strided_slice %77 {offsets = [0, 0, 0], sizes = [16, 16, 4], strides = [1, 1, 1]} : vector<18x16x4xf32> to vector<16x16x4xf32>
    %79 = vector.shape_cast %78 : vector<16x16x4xf32> to vector<256x4xf32>
    %80 = arith.truncf %79 : vector<256x4xf32> to vector<256x4xbf16>
    %c0_87 = arith.constant 0 : index
    %c0_88 = arith.constant 0 : index
    %81 = vector.load %arg7[%c0_87, %c0_88] : memref<256x4xf32, #tpu.memory_space<vmem>>, vector<256x4xf32>
    %c0_89 = arith.constant 0 : index
    %c2_90 = arith.constant 2 : index
    %c0_91 = arith.constant 0 : index
    %c0_92 = arith.constant 0 : index
    %82 = vector.load %arg3[%c0_89, %c2_90, %c0_91, %c0_92] : memref<3x3x4x4xbf16, #tpu.memory_space<vmem>>, vector<1x1x4x4xbf16>
    %83 = vector.shape_cast %82 : vector<1x1x4x4xbf16> to vector<4x4xbf16>
    %cst_93 = arith.constant dense<0.000000e+00> : vector<256x4xf32>
    %84 = tpu.matmul %80, %83, %cst_93 {dimension_numbers = #tpu.dot_dimension_numbers<[1], [0], [0], [1], [0, 0, 1, 1], [], []>} : vector<256x4xbf16>, vector<4x4xbf16>, vector<256x4xf32> -> vector<256x4xf32>
    %85 = arith.addf %81, %84 : vector<256x4xf32>
    %c0_94 = arith.constant 0 : index
    %c0_95 = arith.constant 0 : index
    %86 = vector.load %arg7[%c0_94, %c0_95] : memref<256x4xf32, #tpu.memory_space<vmem>>, vector<256x4xf32>
    tpu.vector_store %arg7[%c0_94, %c0_95], %85 {strides = array<i32>} : memref<256x4xf32, #tpu.memory_space<vmem>>, vector<256x4xf32>,
    %87 = vector.extract_strided_slice %77 {offsets = [1, 0, 0], sizes = [16, 16, 4], strides = [1, 1, 1]} : vector<18x16x4xf32> to vector<16x16x4xf32>
    %88 = vector.shape_cast %87 : vector<16x16x4xf32> to vector<256x4xf32>
    %89 = arith.truncf %88 : vector<256x4xf32> to vector<256x4xbf16>
    %c0_96 = arith.constant 0 : index
    %c0_97 = arith.constant 0 : index
    %90 = vector.load %arg7[%c0_96, %c0_97] : memref<256x4xf32, #tpu.memory_space<vmem>>, vector<256x4xf32>
    %c1_98 = arith.constant 1 : index
    %c2_99 = arith.constant 2 : index
    %c0_100 = arith.constant 0 : index
    %c0_101 = arith.constant 0 : index
    %91 = vector.load %arg3[%c1_98, %c2_99, %c0_100, %c0_101] : memref<3x3x4x4xbf16, #tpu.memory_space<vmem>>, vector<1x1x4x4xbf16>
    %92 = vector.shape_cast %91 : vector<1x1x4x4xbf16> to vector<4x4xbf16>
    %cst_102 = arith.constant dense<0.000000e+00> : vector<256x4xf32>
    %93 = tpu.matmul %89, %92, %cst_102 {dimension_numbers = #tpu.dot_dimension_numbers<[1], [0], [0], [1], [0, 0, 1, 1], [], []>} : vector<256x4xbf16>, vector<4x4xbf16>, vector<256x4xf32> -> vector<256x4xf32>
    %94 = arith.addf %90, %93 : vector<256x4xf32>
    %c0_103 = arith.constant 0 : index
    %c0_104 = arith.constant 0 : index
    %95 = vector.load %arg7[%c0_103, %c0_104] : memref<256x4xf32, #tpu.memory_space<vmem>>, vector<256x4xf32>
    tpu.vector_store %arg7[%c0_103, %c0_104], %94 {strides = array<i32>} : memref<256x4xf32, #tpu.memory_space<vmem>>, vector<256x4xf32>,
    %96 = vector.extract_strided_slice %77 {offsets = [2, 0, 0], sizes = [16, 16, 4], strides = [1, 1, 1]} : vector<18x16x4xf32> to vector<16x16x4xf32>
    %97 = vector.shape_cast %96 : vector<16x16x4xf32> to vector<256x4xf32>
    %98 = arith.truncf %97 : vector<256x4xf32> to vector<256x4xbf16>
    %c0_105 = arith.constant 0 : index
    %c0_106 = arith.constant 0 : index
    %99 = vector.load %arg7[%c0_105, %c0_106] : memref<256x4xf32, #tpu.memory_space<vmem>>, vector<256x4xf32>
    %c2_107 = arith.constant 2 : index
    %c2_108 = arith.constant 2 : index
    %c0_109 = arith.constant 0 : index
    %c0_110 = arith.constant 0 : index
    %100 = vector.load %arg3[%c2_107, %c2_108, %c0_109, %c0_110] : memref<3x3x4x4xbf16, #tpu.memory_space<vmem>>, vector<1x1x4x4xbf16>
    %101 = vector.shape_cast %100 : vector<1x1x4x4xbf16> to vector<4x4xbf16>
    %cst_111 = arith.constant dense<0.000000e+00> : vector<256x4xf32>
    %102 = tpu.matmul %98, %101, %cst_111 {dimension_numbers = #tpu.dot_dimension_numbers<[1], [0], [0], [1], [0, 0, 1, 1], [], []>} : vector<256x4xbf16>, vector<4x4xbf16>, vector<256x4xf32> -> vector<256x4xf32>
    %103 = arith.addf %99, %102 : vector<256x4xf32>
    %c0_112 = arith.constant 0 : index
    %c0_113 = arith.constant 0 : index
    %104 = vector.load %arg7[%c0_112, %c0_113] : memref<256x4xf32, #tpu.memory_space<vmem>>, vector<256x4xf32>
    tpu.vector_store %arg7[%c0_112, %c0_113], %103 {strides = array<i32>} : memref<256x4xf32, #tpu.memory_space<vmem>>, vector<256x4xf32>,
    %c0_114 = arith.constant 0 : index
    %c0_115 = arith.constant 0 : index
    %105 = vector.load %arg7[%c0_114, %c0_115] : memref<256x4xf32, #tpu.memory_space<vmem>>, vector<256x4xf32>
    %c0_116 = arith.constant 0 : index
    %c0_117 = arith.constant 0 : index
    %106 = vector.load %arg4[%c0_116, %c0_117] : memref<256x4xf32, #tpu.memory_space<vmem>>, vector<256x4xf32>
    tpu.vector_store %arg4[%c0_116, %c0_117], %105 {strides = array<i32>} : memref<256x4xf32, #tpu.memory_space<vmem>>, vector<256x4xf32>,
    %cst_118 = arith.constant 0.000000e+00 : f32
    %107 = vector.broadcast %cst_118 : f32 to vector<8x4xf32>
    %c0_119 = arith.constant 0 : index
    %c0_120 = arith.constant 0 : index
    %108 = vector.load %arg5[%c0_119, %c0_120] : memref<8x4xf32, #tpu.memory_space<vmem>>, vector<8x4xf32>
    tpu.vector_store %arg5[%c0_119, %c0_120], %107 {strides = array<i32>} : memref<8x4xf32, #tpu.memory_space<vmem>>, vector<8x4xf32>,
    %cst_121 = arith.constant dense<0.000000e+00> : vector<4xf32>
    %109 = vector.multi_reduction <add>, %105, %cst_121 [0] : vector<256x4xf32> to vector<4xf32>
    %110 = vector.shape_cast %109 : vector<4xf32> to vector<1x4xf32>
    %c0_122 = arith.constant 0 : index
    %c0_123 = arith.constant 0 : index
    %111 = vector.load %arg5[%c0_122, %c0_123] : memref<8x4xf32, #tpu.memory_space<vmem>>, vector<1x4xf32>
    tpu.vector_store %arg5[%c0_122, %c0_123], %110 {strides = array<i32>} : memref<8x4xf32, #tpu.memory_space<vmem>>, vector<1x4xf32>,
    %112 = arith.mulf %105, %105 : vector<256x4xf32>
    %cst_124 = arith.constant dense<0.000000e+00> : vector<4xf32>
    %113 = vector.multi_reduction <add>, %112, %cst_124 [0] : vector<256x4xf32> to vector<4xf32>
    %114 = vector.shape_cast %113 : vector<4xf32> to vector<1x4xf32>
    %c1_125 = arith.constant 1 : index
    %c0_126 = arith.constant 0 : index
    %115 = vector.load %arg5[%c1_125, %c0_126] : memref<8x4xf32, #tpu.memory_space<vmem>>, vector<1x4xf32>
    tpu.vector_store %arg5[%c1_125, %c0_126], %114 {strides = array<i32>} : memref<8x4xf32, #tpu.memory_space<vmem>>, vector<1x4xf32>,
    return
  }
  func.func @transform_0(%arg0: i32) -> (i32, i32) {
    %c0_i32 = arith.constant 0 : i32
    %c0_i32_0 = arith.constant 0 : i32
    return %arg0, %c0_i32 : i32, i32
  }
  func.func @transform_1(%arg0: i32) -> (i32, i32) {
    %c0_i32 = arith.constant 0 : i32
    %c0_i32_0 = arith.constant 0 : i32
    %c0_i32_1 = arith.constant 0 : i32
    return %c0_i32, %c0_i32_0 : i32, i32
  }
  func.func @transform_2(%arg0: i32) -> (i32, i32, i32, i32) {
    %c0_i32 = arith.constant 0 : i32
    %c0_i32_0 = arith.constant 0 : i32
    %c0_i32_1 = arith.constant 0 : i32
    %c0_i32_2 = arith.constant 0 : i32
    %c0_i32_3 = arith.constant 0 : i32
    return %c0_i32, %c0_i32_0, %c0_i32_1, %c0_i32_2 : i32, i32, i32, i32
  }
  func.func @transform_3(%arg0: i32) -> (i32, i32) {
    %c0_i32 = arith.constant 0 : i32
    %c0_i32_0 = arith.constant 0 : i32
    return %arg0, %c0_i32 : i32, i32
  }
  func.func @transform_4(%arg0: i32) -> (i32, i32) {
    %c0_i32 = arith.constant 0 : i32
    %c0_i32_0 = arith.constant 0 : i32
    return %arg0, %c0_i32 : i32, i32
  }
}

module attributes {stable_mosaic.version = 11 : i64} {
  func.func @_stage1_kernel(%arg0: i32, %arg1: memref<512x4xf32, #tpu.memory_space<vmem>>, %arg2: memref<4x4xbf16, #tpu.memory_space<vmem>>, %arg3: memref<4x16xbf16, #tpu.memory_space<vmem>>, %arg4: memref<512x4xf32, #tpu.memory_space<vmem>>, %arg5: memref<8x4xf32, #tpu.memory_space<vmem>>, %arg6: memref<8x16xf32, #tpu.memory_space<vmem>>) attributes {dimension_semantics = [#tpu.dimension_semantics<parallel>], iteration_bounds = array<i64: 1>, scalar_prefetch = 0 : i64, scratch_operands = 0 : i64, tpu.core_type = #tpu.core_type<tc>, window_params = [{transform_indices = @transform_0, window_bounds = array<i64: 512, 4>}, {pipeline_mode = #tpu.pipeline_mode<synchronous>, transform_indices = @transform_1, window_bounds = array<i64: 4, 4>}, {pipeline_mode = #tpu.pipeline_mode<synchronous>, transform_indices = @transform_2, window_bounds = array<i64: 4, 16>}, {transform_indices = @transform_3, window_bounds = array<i64: 512, 4>}, {transform_indices = @transform_4, window_bounds = array<i64: 8, 4>}, {transform_indices = @transform_5, window_bounds = array<i64: 8, 16>}]} {
    %c0 = arith.constant 0 : index
    %c0_0 = arith.constant 0 : index
    %0 = vector.load %arg1[%c0, %c0_0] : memref<512x4xf32, #tpu.memory_space<vmem>>, vector<512x4xf32>
    %1 = arith.truncf %0 : vector<512x4xf32> to vector<512x4xbf16>
    %c0_1 = arith.constant 0 : index
    %c0_2 = arith.constant 0 : index
    %2 = vector.load %arg2[%c0_1, %c0_2] : memref<4x4xbf16, #tpu.memory_space<vmem>>, vector<4x4xbf16>
    %cst = arith.constant dense<0.000000e+00> : vector<512x4xf32>
    %3 = tpu.matmul %1, %2, %cst {dimension_numbers = #tpu.dot_dimension_numbers<[1], [0], [0], [1], [0, 0, 1, 1], [], []>} : vector<512x4xbf16>, vector<4x4xbf16>, vector<512x4xf32> -> vector<512x4xf32>
    %c0_3 = arith.constant 0 : index
    %c0_4 = arith.constant 0 : index
    %4 = vector.load %arg3[%c0_3, %c0_4] : memref<4x16xbf16, #tpu.memory_space<vmem>>, vector<4x16xbf16>
    %cst_5 = arith.constant dense<0.000000e+00> : vector<512x16xf32>
    %5 = tpu.matmul %1, %4, %cst_5 {dimension_numbers = #tpu.dot_dimension_numbers<[1], [0], [0], [1], [0, 0, 1, 1], [], []>} : vector<512x4xbf16>, vector<4x16xbf16>, vector<512x16xf32> -> vector<512x16xf32>
    %c0_6 = arith.constant 0 : index
    %c0_7 = arith.constant 0 : index
    %6 = vector.load %arg4[%c0_6, %c0_7] : memref<512x4xf32, #tpu.memory_space<vmem>>, vector<512x4xf32>
    tpu.vector_store %arg4[%c0_6, %c0_7], %3 {strides = array<i32>} : memref<512x4xf32, #tpu.memory_space<vmem>>, vector<512x4xf32>,
    %cst_8 = arith.constant 0.000000e+00 : f32
    %7 = vector.broadcast %cst_8 : f32 to vector<8x4xf32>
    %c0_9 = arith.constant 0 : index
    %c0_10 = arith.constant 0 : index
    %8 = vector.load %arg5[%c0_9, %c0_10] : memref<8x4xf32, #tpu.memory_space<vmem>>, vector<8x4xf32>
    tpu.vector_store %arg5[%c0_9, %c0_10], %7 {strides = array<i32>} : memref<8x4xf32, #tpu.memory_space<vmem>>, vector<8x4xf32>,
    %cst_11 = arith.constant dense<0.000000e+00> : vector<4xf32>
    %9 = vector.multi_reduction <add>, %3, %cst_11 [0] : vector<512x4xf32> to vector<4xf32>
    %10 = vector.shape_cast %9 : vector<4xf32> to vector<1x4xf32>
    %c0_12 = arith.constant 0 : index
    %c0_13 = arith.constant 0 : index
    %11 = vector.load %arg5[%c0_12, %c0_13] : memref<8x4xf32, #tpu.memory_space<vmem>>, vector<1x4xf32>
    tpu.vector_store %arg5[%c0_12, %c0_13], %10 {strides = array<i32>} : memref<8x4xf32, #tpu.memory_space<vmem>>, vector<1x4xf32>,
    %12 = arith.mulf %3, %3 : vector<512x4xf32>
    %cst_14 = arith.constant dense<0.000000e+00> : vector<4xf32>
    %13 = vector.multi_reduction <add>, %12, %cst_14 [0] : vector<512x4xf32> to vector<4xf32>
    %14 = vector.shape_cast %13 : vector<4xf32> to vector<1x4xf32>
    %c1 = arith.constant 1 : index
    %c0_15 = arith.constant 0 : index
    %15 = vector.load %arg5[%c1, %c0_15] : memref<8x4xf32, #tpu.memory_space<vmem>>, vector<1x4xf32>
    tpu.vector_store %arg5[%c1, %c0_15], %14 {strides = array<i32>} : memref<8x4xf32, #tpu.memory_space<vmem>>, vector<1x4xf32>,
    %cst_16 = arith.constant 0.000000e+00 : f32
    %16 = vector.broadcast %cst_16 : f32 to vector<8x16xf32>
    %c0_17 = arith.constant 0 : index
    %c0_18 = arith.constant 0 : index
    %17 = vector.load %arg6[%c0_17, %c0_18] : memref<8x16xf32, #tpu.memory_space<vmem>>, vector<8x16xf32>
    tpu.vector_store %arg6[%c0_17, %c0_18], %16 {strides = array<i32>} : memref<8x16xf32, #tpu.memory_space<vmem>>, vector<8x16xf32>,
    %cst_19 = arith.constant dense<0.000000e+00> : vector<16xf32>
    %18 = vector.multi_reduction <add>, %5, %cst_19 [0] : vector<512x16xf32> to vector<16xf32>
    %19 = vector.shape_cast %18 : vector<16xf32> to vector<1x16xf32>
    %c0_20 = arith.constant 0 : index
    %c0_21 = arith.constant 0 : index
    %20 = vector.load %arg6[%c0_20, %c0_21] : memref<8x16xf32, #tpu.memory_space<vmem>>, vector<1x16xf32>
    tpu.vector_store %arg6[%c0_20, %c0_21], %19 {strides = array<i32>} : memref<8x16xf32, #tpu.memory_space<vmem>>, vector<1x16xf32>,
    %21 = arith.mulf %5, %5 : vector<512x16xf32>
    %cst_22 = arith.constant dense<0.000000e+00> : vector<16xf32>
    %22 = vector.multi_reduction <add>, %21, %cst_22 [0] : vector<512x16xf32> to vector<16xf32>
    %23 = vector.shape_cast %22 : vector<16xf32> to vector<1x16xf32>
    %c1_23 = arith.constant 1 : index
    %c0_24 = arith.constant 0 : index
    %24 = vector.load %arg6[%c1_23, %c0_24] : memref<8x16xf32, #tpu.memory_space<vmem>>, vector<1x16xf32>
    tpu.vector_store %arg6[%c1_23, %c0_24], %23 {strides = array<i32>} : memref<8x16xf32, #tpu.memory_space<vmem>>, vector<1x16xf32>,
    return
  }
  func.func @transform_0(%arg0: i32) -> (i32, i32) {
    %c0_i32 = arith.constant 0 : i32
    %c0_i32_0 = arith.constant 0 : i32
    return %arg0, %c0_i32 : i32, i32
  }
  func.func @transform_1(%arg0: i32) -> (i32, i32) {
    %c0_i32 = arith.constant 0 : i32
    %c0_i32_0 = arith.constant 0 : i32
    %c0_i32_1 = arith.constant 0 : i32
    return %c0_i32, %c0_i32_0 : i32, i32
  }
  func.func @transform_2(%arg0: i32) -> (i32, i32) {
    %c0_i32 = arith.constant 0 : i32
    %c0_i32_0 = arith.constant 0 : i32
    %c0_i32_1 = arith.constant 0 : i32
    return %c0_i32, %c0_i32_0 : i32, i32
  }
  func.func @transform_3(%arg0: i32) -> (i32, i32) {
    %c0_i32 = arith.constant 0 : i32
    %c0_i32_0 = arith.constant 0 : i32
    return %arg0, %c0_i32 : i32, i32
  }
  func.func @transform_4(%arg0: i32) -> (i32, i32) {
    %c0_i32 = arith.constant 0 : i32
    %c0_i32_0 = arith.constant 0 : i32
    return %arg0, %c0_i32 : i32, i32
  }
  func.func @transform_5(%arg0: i32) -> (i32, i32) {
    %c0_i32 = arith.constant 0 : i32
    %c0_i32_0 = arith.constant 0 : i32
    return %arg0, %c0_i32 : i32, i32
  }
}

module attributes {stable_mosaic.version = 11 : i64} {
  func.func @_stage4_kernel(%arg0: i32, %arg1: memref<512x16xf32, #tpu.memory_space<vmem>>, %arg2: memref<512x4xf32, #tpu.memory_space<vmem>>, %arg3: memref<4x16xbf16, #tpu.memory_space<vmem>>, %arg4: memref<2x16xf32, #tpu.memory_space<vmem>>, %arg5: memref<2x16xf32, #tpu.memory_space<vmem>>, %arg6: memref<512x16xf32, #tpu.memory_space<vmem>>) attributes {dimension_semantics = [#tpu.dimension_semantics<parallel>], iteration_bounds = array<i64: 1>, scalar_prefetch = 0 : i64, scratch_operands = 0 : i64, tpu.core_type = #tpu.core_type<tc>, window_params = [{transform_indices = @transform_0, window_bounds = array<i64: 512, 16>}, {transform_indices = @transform_1, window_bounds = array<i64: 512, 4>}, {pipeline_mode = #tpu.pipeline_mode<synchronous>, transform_indices = @transform_2, window_bounds = array<i64: 4, 16>}, {pipeline_mode = #tpu.pipeline_mode<synchronous>, transform_indices = @transform_3, window_bounds = array<i64: 2, 16>}, {pipeline_mode = #tpu.pipeline_mode<synchronous>, transform_indices = @transform_4, window_bounds = array<i64: 2, 16>}, {transform_indices = @transform_5, window_bounds = array<i64: 512, 16>}]} {
    %c0 = arith.constant 0 : index
    %c0_0 = arith.constant 0 : index
    %0 = vector.load %arg1[%c0, %c0_0] : memref<512x16xf32, #tpu.memory_space<vmem>>, vector<512x16xf32>
    %c0_1 = arith.constant 0 : index
    %c0_2 = arith.constant 0 : index
    %1 = vector.load %arg4[%c0_1, %c0_2] : memref<2x16xf32, #tpu.memory_space<vmem>>, vector<1x16xf32>
    %2 = vector.broadcast %1 : vector<1x16xf32> to vector<512x16xf32>
    %3 = arith.mulf %0, %2 : vector<512x16xf32>
    %c1 = arith.constant 1 : index
    %c0_3 = arith.constant 0 : index
    %4 = vector.load %arg4[%c1, %c0_3] : memref<2x16xf32, #tpu.memory_space<vmem>>, vector<1x16xf32>
    %5 = vector.broadcast %4 : vector<1x16xf32> to vector<512x16xf32>
    %6 = arith.addf %3, %5 : vector<512x16xf32>
    %c0_4 = arith.constant 0 : index
    %c0_5 = arith.constant 0 : index
    %7 = vector.load %arg2[%c0_4, %c0_5] : memref<512x4xf32, #tpu.memory_space<vmem>>, vector<512x4xf32>
    %8 = arith.truncf %7 : vector<512x4xf32> to vector<512x4xbf16>
    %c0_6 = arith.constant 0 : index
    %c0_7 = arith.constant 0 : index
    %9 = vector.load %arg3[%c0_6, %c0_7] : memref<4x16xbf16, #tpu.memory_space<vmem>>, vector<4x16xbf16>
    %cst = arith.constant dense<0.000000e+00> : vector<512x16xf32>
    %10 = tpu.matmul %8, %9, %cst {dimension_numbers = #tpu.dot_dimension_numbers<[1], [0], [0], [1], [0, 0, 1, 1], [], []>} : vector<512x4xbf16>, vector<4x16xbf16>, vector<512x16xf32> -> vector<512x16xf32>
    %c0_8 = arith.constant 0 : index
    %c0_9 = arith.constant 0 : index
    %11 = vector.load %arg5[%c0_8, %c0_9] : memref<2x16xf32, #tpu.memory_space<vmem>>, vector<1x16xf32>
    %12 = vector.broadcast %11 : vector<1x16xf32> to vector<512x16xf32>
    %13 = arith.mulf %10, %12 : vector<512x16xf32>
    %c1_10 = arith.constant 1 : index
    %c0_11 = arith.constant 0 : index
    %14 = vector.load %arg5[%c1_10, %c0_11] : memref<2x16xf32, #tpu.memory_space<vmem>>, vector<1x16xf32>
    %15 = vector.broadcast %14 : vector<1x16xf32> to vector<512x16xf32>
    %16 = arith.addf %13, %15 : vector<512x16xf32>
    %17 = arith.addf %6, %16 : vector<512x16xf32>
    %cst_12 = arith.constant 0.000000e+00 : f32
    %18 = vector.broadcast %cst_12 : f32 to vector<512x16xf32>
    %19 = arith.maximumf %17, %18 : vector<512x16xf32>
    %c0_13 = arith.constant 0 : index
    %c0_14 = arith.constant 0 : index
    %20 = vector.load %arg6[%c0_13, %c0_14] : memref<512x16xf32, #tpu.memory_space<vmem>>, vector<512x16xf32>
    tpu.vector_store %arg6[%c0_13, %c0_14], %19 {strides = array<i32>} : memref<512x16xf32, #tpu.memory_space<vmem>>, vector<512x16xf32>,
    return
  }
  func.func @transform_0(%arg0: i32) -> (i32, i32) {
    %c0_i32 = arith.constant 0 : i32
    %c0_i32_0 = arith.constant 0 : i32
    return %arg0, %c0_i32 : i32, i32
  }
  func.func @transform_1(%arg0: i32) -> (i32, i32) {
    %c0_i32 = arith.constant 0 : i32
    %c0_i32_0 = arith.constant 0 : i32
    return %arg0, %c0_i32 : i32, i32
  }
  func.func @transform_2(%arg0: i32) -> (i32, i32) {
    %c0_i32 = arith.constant 0 : i32
    %c0_i32_0 = arith.constant 0 : i32
    %c0_i32_1 = arith.constant 0 : i32
    return %c0_i32, %c0_i32_0 : i32, i32
  }
  func.func @transform_3(%arg0: i32) -> (i32, i32) {
    %c0_i32 = arith.constant 0 : i32
    %c0_i32_0 = arith.constant 0 : i32
    %c0_i32_1 = arith.constant 0 : i32
    return %c0_i32, %c0_i32_0 : i32, i32
  }
  func.func @transform_4(%arg0: i32) -> (i32, i32) {
    %c0_i32 = arith.constant 0 : i32
    %c0_i32_0 = arith.constant 0 : i32
    %c0_i32_1 = arith.constant 0 : i32
    return %c0_i32, %c0_i32_0 : i32, i32
  }
  func.func @transform_5(%arg0: i32) -> (i32, i32) {
    %c0_i32 = arith.constant 0 : i32
    %c0_i32_0 = arith.constant 0 : i32
    return %arg0, %c0_i32 : i32, i32
  }
}

module attributes {stable_mosaic.version = 11 : i64} {
  func.func @_stage3_kernel(%arg0: i32, %arg1: memref<512x4xf32, #tpu.memory_space<vmem>>, %arg2: memref<2x4xf32, #tpu.memory_space<vmem>>, %arg3: memref<4x16xbf16, #tpu.memory_space<vmem>>, %arg4: memref<512x16xf32, #tpu.memory_space<vmem>>, %arg5: memref<8x16xf32, #tpu.memory_space<vmem>>) attributes {dimension_semantics = [#tpu.dimension_semantics<parallel>], iteration_bounds = array<i64: 1>, scalar_prefetch = 0 : i64, scratch_operands = 0 : i64, tpu.core_type = #tpu.core_type<tc>, window_params = [{transform_indices = @transform_0, window_bounds = array<i64: 512, 4>}, {pipeline_mode = #tpu.pipeline_mode<synchronous>, transform_indices = @transform_1, window_bounds = array<i64: 2, 4>}, {pipeline_mode = #tpu.pipeline_mode<synchronous>, transform_indices = @transform_2, window_bounds = array<i64: 4, 16>}, {transform_indices = @transform_3, window_bounds = array<i64: 512, 16>}, {transform_indices = @transform_4, window_bounds = array<i64: 8, 16>}]} {
    %c0 = arith.constant 0 : index
    %c0_0 = arith.constant 0 : index
    %0 = vector.load %arg1[%c0, %c0_0] : memref<512x4xf32, #tpu.memory_space<vmem>>, vector<512x4xf32>
    %c0_1 = arith.constant 0 : index
    %c0_2 = arith.constant 0 : index
    %1 = vector.load %arg2[%c0_1, %c0_2] : memref<2x4xf32, #tpu.memory_space<vmem>>, vector<1x4xf32>
    %2 = vector.broadcast %1 : vector<1x4xf32> to vector<512x4xf32>
    %3 = arith.mulf %0, %2 : vector<512x4xf32>
    %c1 = arith.constant 1 : index
    %c0_3 = arith.constant 0 : index
    %4 = vector.load %arg2[%c1, %c0_3] : memref<2x4xf32, #tpu.memory_space<vmem>>, vector<1x4xf32>
    %5 = vector.broadcast %4 : vector<1x4xf32> to vector<512x4xf32>
    %6 = arith.addf %3, %5 : vector<512x4xf32>
    %cst = arith.constant 0.000000e+00 : f32
    %7 = vector.broadcast %cst : f32 to vector<512x4xf32>
    %8 = arith.maximumf %6, %7 : vector<512x4xf32>
    %9 = arith.truncf %8 : vector<512x4xf32> to vector<512x4xbf16>
    %c0_4 = arith.constant 0 : index
    %c0_5 = arith.constant 0 : index
    %10 = vector.load %arg3[%c0_4, %c0_5] : memref<4x16xbf16, #tpu.memory_space<vmem>>, vector<4x16xbf16>
    %cst_6 = arith.constant dense<0.000000e+00> : vector<512x16xf32>
    %11 = tpu.matmul %9, %10, %cst_6 {dimension_numbers = #tpu.dot_dimension_numbers<[1], [0], [0], [1], [0, 0, 1, 1], [], []>} : vector<512x4xbf16>, vector<4x16xbf16>, vector<512x16xf32> -> vector<512x16xf32>
    %c0_7 = arith.constant 0 : index
    %c0_8 = arith.constant 0 : index
    %12 = vector.load %arg4[%c0_7, %c0_8] : memref<512x16xf32, #tpu.memory_space<vmem>>, vector<512x16xf32>
    tpu.vector_store %arg4[%c0_7, %c0_8], %11 {strides = array<i32>} : memref<512x16xf32, #tpu.memory_space<vmem>>, vector<512x16xf32>,
    %cst_9 = arith.constant 0.000000e+00 : f32
    %13 = vector.broadcast %cst_9 : f32 to vector<8x16xf32>
    %c0_10 = arith.constant 0 : index
    %c0_11 = arith.constant 0 : index
    %14 = vector.load %arg5[%c0_10, %c0_11] : memref<8x16xf32, #tpu.memory_space<vmem>>, vector<8x16xf32>
    tpu.vector_store %arg5[%c0_10, %c0_11], %13 {strides = array<i32>} : memref<8x16xf32, #tpu.memory_space<vmem>>, vector<8x16xf32>,
    %cst_12 = arith.constant dense<0.000000e+00> : vector<16xf32>
    %15 = vector.multi_reduction <add>, %11, %cst_12 [0] : vector<512x16xf32> to vector<16xf32>
    %16 = vector.shape_cast %15 : vector<16xf32> to vector<1x16xf32>
    %c0_13 = arith.constant 0 : index
    %c0_14 = arith.constant 0 : index
    %17 = vector.load %arg5[%c0_13, %c0_14] : memref<8x16xf32, #tpu.memory_space<vmem>>, vector<1x16xf32>
    tpu.vector_store %arg5[%c0_13, %c0_14], %16 {strides = array<i32>} : memref<8x16xf32, #tpu.memory_space<vmem>>, vector<1x16xf32>,
    %18 = arith.mulf %11, %11 : vector<512x16xf32>
    %cst_15 = arith.constant dense<0.000000e+00> : vector<16xf32>
    %19 = vector.multi_reduction <add>, %18, %cst_15 [0] : vector<512x16xf32> to vector<16xf32>
    %20 = vector.shape_cast %19 : vector<16xf32> to vector<1x16xf32>
    %c1_16 = arith.constant 1 : index
    %c0_17 = arith.constant 0 : index
    %21 = vector.load %arg5[%c1_16, %c0_17] : memref<8x16xf32, #tpu.memory_space<vmem>>, vector<1x16xf32>
    tpu.vector_store %arg5[%c1_16, %c0_17], %20 {strides = array<i32>} : memref<8x16xf32, #tpu.memory_space<vmem>>, vector<1x16xf32>,
    return
  }
  func.func @transform_0(%arg0: i32) -> (i32, i32) {
    %c0_i32 = arith.constant 0 : i32
    %c0_i32_0 = arith.constant 0 : i32
    return %arg0, %c0_i32 : i32, i32
  }
  func.func @transform_1(%arg0: i32) -> (i32, i32) {
    %c0_i32 = arith.constant 0 : i32
    %c0_i32_0 = arith.constant 0 : i32
    %c0_i32_1 = arith.constant 0 : i32
    return %c0_i32, %c0_i32_0 : i32, i32
  }
  func.func @transform_2(%arg0: i32) -> (i32, i32) {
    %c0_i32 = arith.constant 0 : i32
    %c0_i32_0 = arith.constant 0 : i32
    %c0_i32_1 = arith.constant 0 : i32
    return %c0_i32, %c0_i32_0 : i32, i32
  }
  func.func @transform_3(%arg0: i32) -> (i32, i32) {
    %c0_i32 = arith.constant 0 : i32
    %c0_i32_0 = arith.constant 0 : i32
    return %arg0, %c0_i32 : i32, i32
  }
  func.func @transform_4(%arg0: i32) -> (i32, i32) {
    %c0_i32 = arith.constant 0 : i32
    %c0_i32_0 = arith.constant 0 : i32
    return %arg0, %c0_i32 : i32, i32
  }
}

</mosaic_0001>

<bundles_post_ra>
// kernel: bottleneck_forward.7
= control target key start
LH: loop header
LB: loop body
LE: loop exit
PB: predicated region body
PF: predicated region fallthrough
CT: control target
= control target key end

     0   :  { %vm411_vm0 = vcmask 1041408   ;;  %vm314_vm1 = vcmask 31744   ;;  %vm844_vm2 = vcmask 130048   ;;  %s1924_s2 = inlined_call_operand.vmem [shape: bf16[4,16], index: 2, kind: input, shape index: {}]   ;;  %s1925_s1 = inlined_call_operand.vmem [shape: f32[512,4], index: 1, kind: input, shape index: {}]   ;;  %s1926_s3 = inlined_call_operand.vmem [shape: f32[2,16], index: 3, kind: input, shape index: {}]   ;;  %s1927_s4 = inlined_call_operand.vmem [shape: f32[2,16], index: 4, kind: input, shape index: {}]   ;;  %s1928_s0 = inlined_call_operand.vmem [shape: f32[512,16], index: 0, kind: input, shape index: {}]   ;;  %s1929_s5 = inlined_call_operand.vmem [shape: f32[512,16], index: 5, kind: output, shape index: {}]  }
   0x1   :  { %v313_v0 = vld [vmem:[%s1924_s2] sm:$0x3]  ;;  %v218_v2 = vld [vmem:[%s1925_s1 + $0x8] sm:$0xff]  ;;  %v219_v14 = vld [vmem:[%s1925_s1 + $0x10] sm:$0xff] }
   0x2   :  { %v217_v1 = vld [vmem:[%s1925_s1] sm:$0xff]  ;;  %v413_v3 = vsel %vm411_vm0, %v313_v0, 0  ;;  %v234_v6 = vld [vmem:[%s1925_s1 + $0x88] sm:$0xff]  ;;  %v220_v15 = vld [vmem:[%s1925_s1 + $0x18] sm:$0xff] }
   0x3   :  { %v281_v4 = vpack.c.bf16 %v218_v2, %v217_v1  ;;  %v233_v5 = vld [vmem:[%s1925_s1 + $0x80] sm:$0xff]  ;;  %422 = vmatpush.bf16.msra.mxu0 %v413_v3  ;;  %945 = vmatpush.bf16.msra.mxu1 %v413_v3  ;;  %v250_v9 = vld [vmem:[%s1925_s1 + $0x108] sm:$0xff]  ;;  %v235_v16 = vld [vmem:[%s1925_s1 + $0x90] sm:$0xff]  ;;  %v282_v22 = vpack.c.bf16 %v220_v15, %v219_v14 }
   0x4   :  { %v249_v7 = vld [vmem:[%s1925_s1 + $0x100] sm:$0xff]  ;;  %v289_v8 = vpack.c.bf16 %v234_v6, %v233_v5  ;;  %v266_v11 = vld [vmem:[%s1925_s1 + $0x188] sm:$0xff]  ;;  %946 = vmatpush.bf16.msra.mxu2 %v413_v3  ;;  %947 = vmatpush.bf16.msra.mxu3 %v413_v3  ;;  %v236_v17 = vld [vmem:[%s1925_s1 + $0x98] sm:$0xff] }
   0x5   :  { %v265_v10 = vld [vmem:[%s1925_s1 + $0x180] sm:$0xff]  ;;  %v297_v12 = vpack.c.bf16 %v250_v9, %v249_v7  ;;  %v251_v18 = vld [vmem:[%s1925_s1 + $0x110] sm:$0xff]  ;;  %v252_v19 = vld [vmem:[%s1925_s1 + $0x118] sm:$0xff]  ;;  %v290_v23 = vpack.c.bf16 %v236_v17, %v235_v16 }
   0x6   :  { %v305_v13 = vpack.c.bf16 %v266_v11, %v265_v10  ;;  %913 = vmatmul.msk.bf16.vlgmr.msra.gmra.mxu0 %vm314_vm1, %v281_v4  ;;  %921 = vmatmul.msk.bf16.vlgmr.msra.gmra.mxu1 %vm314_vm1, %v289_v8  ;;  %v267_v20 = vld [vmem:[%s1925_s1 + $0x190] sm:$0xff]  ;;  %v268_v21 = vld [vmem:[%s1925_s1 + $0x198] sm:$0xff]  ;;  %v298_v24 = vpack.c.bf16 %v252_v19, %v251_v18  ;;  %v221_v26 = vld [vmem:[%s1925_s1 + $0x20] sm:$0xff] }
   0x7   :  { %929 = vmatmul.msk.bf16.vlgmr.msra.gmra.mxu2 %vm314_vm1, %v297_v12  ;;  %v306_v25 = vpack.c.bf16 %v268_v21, %v267_v20  ;;  %v222_v27 = vld [vmem:[%s1925_s1 + $0x28] sm:$0xff]  ;;  %v237_v28 = vld [vmem:[%s1925_s1 + $0xa0] sm:$0xff]  ;;  %v223_v38 = vld [vmem:[%s1925_s1 + $0x30] sm:$0xff] }
   0x8   :  { %937 = vmatmul.msk.bf16.vlgmr.msra.gmra.mxu3 %vm314_vm1, %v305_v13  ;;  %v238_v29 = vld [vmem:[%s1925_s1 + $0xa8] sm:$0xff]  ;;  %v253_v30 = vld [vmem:[%s1925_s1 + $0x120] sm:$0xff]  ;;  %v283_v34 = vpack.c.bf16 %v222_v27, %v221_v26  ;;  %v224_v39 = vld [vmem:[%s1925_s1 + $0x38] sm:$0xff] }
   0x9   :  { %v254_v31 = vld [vmem:[%s1925_s1 + $0x128] sm:$0xff]  ;;  %v269_v32 = vld [vmem:[%s1925_s1 + $0x1a0] sm:$0xff]  ;;  %v291_v35 = vpack.c.bf16 %v238_v29, %v237_v28  ;;  %v239_v40 = vld [vmem:[%s1925_s1 + $0xb0] sm:$0xff]  ;;  %v284_v46 = vpack.c.bf16 %v224_v39, %v223_v38 }
   0xa   :  { %v270_v33 = vld [vmem:[%s1925_s1 + $0x1a8] sm:$0xff]  ;;  %v299_v36 = vpack.c.bf16 %v254_v31, %v253_v30  ;;  %v240_v41 = vld [vmem:[%s1925_s1 + $0xb8] sm:$0xff]  ;;  %v255_v42 = vld [vmem:[%s1925_s1 + $0x130] sm:$0xff] }
   0xb   :  { %v307_v37 = vpack.c.bf16 %v270_v33, %v269_v32  ;;  %v256_v43 = vld [vmem:[%s1925_s1 + $0x138] sm:$0xff]  ;;  %v271_v44 = vld [vmem:[%s1925_s1 + $0x1b0] sm:$0xff]  ;;  %v292_v47 = vpack.c.bf16 %v240_v41, %v239_v40  ;;  %v225_v50 = vld [vmem:[%s1925_s1 + $0x40] sm:$0xff] }
   0xc   :  { %v272_v45 = vld [vmem:[%s1925_s1 + $0x1b8] sm:$0xff]  ;;  %v300_v48 = vpack.c.bf16 %v256_v43, %v255_v42  ;;  %v226_v51 = vld [vmem:[%s1925_s1 + $0x48] sm:$0xff]  ;;  %v241_v52 = vld [vmem:[%s1925_s1 + $0xc0] sm:$0xff] }
   0xd   :  { %v308_v49 = vpack.c.bf16 %v272_v45, %v271_v44  ;;  %v242_v53 = vld [vmem:[%s1925_s1 + $0xc8] sm:$0xff]  ;;  %v257_v54 = vld [vmem:[%s1925_s1 + $0x140] sm:$0xff]  ;;  %v285_v58 = vpack.c.bf16 %v226_v51, %v225_v50  ;;  %v227_v62 = vld [vmem:[%s1925_s1 + $0x50] sm:$0xff] }
   0xe   :  { %v258_v55 = vld [vmem:[%s1925_s1 + $0x148] sm:$0xff]  ;;  %v273_v56 = vld [vmem:[%s1925_s1 + $0x1c0] sm:$0xff]  ;;  %v293_v59 = vpack.c.bf16 %v242_v53, %v241_v52  ;;  %v228_v63 = vld [vmem:[%s1925_s1 + $0x58] sm:$0xff] }
   0xf   :  { %v274_v57 = vld [vmem:[%s1925_s1 + $0x1c8] sm:$0xff]  ;;  %v301_v60 = vpack.c.bf16 %v258_v55, %v257_v54  ;;  %v243_v0 = vld [vmem:[%s1925_s1 + $0xd0] sm:$0xff]  ;;  %v244_v1 = vld [vmem:[%s1925_s1 + $0xd8] sm:$0xff]  ;;  %v286_v6 = vpack.c.bf16 %v228_v63, %v227_v62 }
  0x10   :  { %v309_v61 = vpack.c.bf16 %v274_v57, %v273_v56  ;;  %v259_v2 = vld [vmem:[%s1925_s1 + $0x150] sm:$0xff]  ;;  %v260_v3 = vld [vmem:[%s1925_s1 + $0x158] sm:$0xff]  ;;  %v294_v7 = vpack.c.bf16 %v244_v1, %v243_v0  ;;  %v229_v10 = vld [vmem:[%s1925_s1 + $0x60] sm:$0xff] }
  0x11   :  { %v275_v4 = vld [vmem:[%s1925_s1 + $0x1d0] sm:$0xff]  ;;  %v276_v5 = vld [vmem:[%s1925_s1 + $0x1d8] sm:$0xff]  ;;  %v302_v8 = vpack.c.bf16 %v260_v3, %v259_v2  ;;  %v230_v11 = vld [vmem:[%s1925_s1 + $0x68] sm:$0xff] }
  0x12   :  { %v310_v9 = vpack.c.bf16 %v276_v5, %v275_v4  ;;  %v245_v12 = vld [vmem:[%s1925_s1 + $0xe0] sm:$0xff]  ;;  %v246_v13 = vld [vmem:[%s1925_s1 + $0xe8] sm:$0xff]  ;;  %v287_v18 = vpack.c.bf16 %v230_v11, %v229_v10  ;;  %v263_v26 = vld [vmem:[%s1925_s1 + $0x170] sm:$0xff] }
  0x13   :  { %v261_v14 = vld [vmem:[%s1925_s1 + $0x160] sm:$0xff]  ;;  %v262_v15 = vld [vmem:[%s1925_s1 + $0x168] sm:$0xff]  ;;  %v295_v19 = vpack.c.bf16 %v246_v13, %v245_v12  ;;  %v264_v27 = vld [vmem:[%s1925_s1 + $0x178] sm:$0xff] }
  0x14   :  { %v277_v16 = vld [vmem:[%s1925_s1 + $0x1e0] sm:$0xff]  ;;  %v278_v17 = vld [vmem:[%s1925_s1 + $0x1e8] sm:$0xff]  ;;  %v303_v20 = vpack.c.bf16 %v262_v15, %v261_v14  ;;  %v279_v28 = vld [vmem:[%s1925_s1 + $0x1f0] sm:$0xff]  ;;  %v304_v32 = vpack.c.bf16 %v264_v27, %v263_v26 }
  0x15   :  { %v311_v21 = vpack.c.bf16 %v278_v17, %v277_v16  ;;  %v280_v29 = vld [vmem:[%s1925_s1 + $0x1f8] sm:$0xff]  ;;  %v1228_v38 = vld [vmem:[%s1926_s3 + $0x1] ss:$0 sm:$0xff]  ;;  %v1233_v39 = vld [vmem:[%s1927_s4] ss:$0 sm:$0xff] }
  0x16   :  { %914 = vmatmul.msk.bf16.gmra.mxu0 %vm314_vm1, %v282_v22  ;;  %922 = vmatmul.msk.bf16.gmra.mxu1 %vm314_vm1, %v290_v23  ;;  %v231_v22 = vld [vmem:[%s1925_s1 + $0x70] sm:$0xff]  ;;  %v232_v23 = vld [vmem:[%s1925_s1 + $0x78] sm:$0xff]  ;;  %v312_v33 = vpack.c.bf16 %v280_v29, %v279_v28  ;;  %v1239_v41 = vld [vmem:[%s1927_s4 + $0x1] ss:$0 sm:$0xff] }
  0x17   :  { %930 = vmatmul.msk.bf16.gmra.mxu2 %vm314_vm1, %v298_v24  ;;  %v247_v24 = vld [vmem:[%s1925_s1 + $0xf0] sm:$0xff]  ;;  %v288_v30 = vpack.c.bf16 %v232_v23, %v231_v22  ;;  %v22_v50 = vld [vmem:[%s1928_s0 + $0x8] sm:$0xff] }
  0x18   :  { %938 = vmatmul.msk.bf16.gmra.mxu3 %vm314_vm1, %v306_v25  ;;  %v248_v25 = vld [vmem:[%s1925_s1 + $0xf8] sm:$0xff]  ;;  %v38_v51 = vld [vmem:[%s1928_s0 + $0x88] sm:$0xff]  ;;  %v23_v14 = vld [vmem:[%s1928_s0 + $0x10] sm:$0xff] }
  0x19   :  { %v296_v31 = vpack.c.bf16 %v248_v25, %v247_v24  ;;  %v54_v10 = vld [vmem:[%s1928_s0 + $0x108] sm:$0xff]  ;;  %v39_v15 = vld [vmem:[%s1928_s0 + $0x90] sm:$0xff] }
  0x1a   :  { %v70_v11 = vld [vmem:[%s1928_s0 + $0x188] sm:$0xff] }
  0x26   :  { %915 = vmatmul.msk.bf16.gmra.mxu0 %vm314_vm1, %v283_v34  ;;  %923 = vmatmul.msk.bf16.gmra.mxu1 %vm314_vm1, %v291_v35  ;;  %v1216_v34 = vld [vmem:[%s1926_s3] ss:$0 sm:$0xff] }
  0x27   :  { %931 = vmatmul.msk.bf16.gmra.mxu2 %vm314_vm1, %v299_v36  ;;  %v21_v35 = vld [vmem:[%s1928_s0] sm:$0xff]  ;;  %v89_v24 = vmul.f32 %v1216_v34, %v23_v14  ;;  %v105_v25 = vmul.f32 %v1216_v34, %v39_v15  ;;  %v56_v14 = vld [vmem:[%s1928_s0 + $0x118] sm:$0xff] }
  0x28   :  { %939 = vmatmul.msk.bf16.gmra.mxu3 %vm314_vm1, %v307_v37  ;;  %v37_v36 = vld [vmem:[%s1928_s0 + $0x80] sm:$0xff]  ;;  %v87_v37 = vmul.f32 %v1216_v34, %v21_v35  ;;  %v72_v15 = vld [vmem:[%s1928_s0 + $0x198] sm:$0xff] }
  0x29   :  { %v103_v40 = vmul.f32 %v1216_v34, %v37_v36 }
  0x2a   :  { %v153_v44 = vadd.f32 %v1228_v38, %v87_v37 }
  0x36   :  { %916 = vmatmul.msk.bf16.gmra.mxu0 %vm314_vm1, %v284_v46  ;;  %924 = vmatmul.msk.bf16.gmra.mxu1 %vm314_vm1, %v292_v47  ;;  %v169_v46 = vadd.f32 %v1228_v38, %v103_v40 }
  0x37   :  { %932 = vmatmul.msk.bf16.gmra.mxu2 %vm314_vm1, %v300_v48  ;;  %v53_v48 = vld [vmem:[%s1928_s0 + $0x100] sm:$0xff] }
  0x38   :  { %940 = vmatmul.msk.bf16.gmra.mxu3 %vm314_vm1, %v308_v49  ;;  %v69_v49 = vld [vmem:[%s1928_s0 + $0x180] sm:$0xff]  ;;  %v119_v54 = vmul.f32 %v1216_v34, %v53_v48 }
  0x39   :  { %v135_v55 = vmul.f32 %v1216_v34, %v69_v49 }
  0x3a   :  { %v185_v0 = vadd.f32 %v1228_v38, %v119_v54 }
  0x3b   :  { %v201_v2 = vadd.f32 %v1228_v38, %v135_v55 }
  0x46   :  { %917 = vmatmul.msk.bf16.gmra.mxu0 %vm314_vm1, %v285_v58  ;;  %925 = vmatmul.msk.bf16.gmra.mxu1 %vm314_vm1, %v293_v59  ;;  %v88_v58 = vmul.f32 %v1216_v34, %v22_v50  ;;  %v104_v59 = vmul.f32 %v1216_v34, %v38_v51  ;;  %v24_v50 = vld [vmem:[%s1928_s0 + $0x18] sm:$0xff] }
  0x47   :  { %933 = vmatmul.msk.bf16.gmra.mxu2 %vm314_vm1, %v301_v60  ;;  %v40_v51 = vld [vmem:[%s1928_s0 + $0x98] sm:$0xff] }
  0x48   :  { %941 = vmatmul.msk.bf16.gmra.mxu3 %vm314_vm1, %v309_v61 }
  0x56   :  { %918 = vmatmul.msk.bf16.gmra.mxu0 %vm314_vm1, %v286_v6  ;;  %926 = vmatmul.msk.bf16.gmra.mxu1 %vm314_vm1, %v294_v7  ;;  %v154_v6 = vadd.f32 %v1228_v38, %v88_v58 }
  0x57   :  { %934 = vmatmul.msk.bf16.gmra.mxu2 %vm314_vm1, %v302_v8  ;;  %v170_v8 = vadd.f32 %v1228_v38, %v104_v59 }
  0x58   :  { %942 = vmatmul.msk.bf16.gmra.mxu3 %vm314_vm1, %v310_v9 }
  0x66   :  { %919 = vmatmul.msk.bf16.gmra.mxu0 %vm314_vm1, %v287_v18  ;;  %927 = vmatmul.msk.bf16.gmra.mxu1 %vm314_vm1, %v295_v19 }
  0x67   :  { %935 = vmatmul.msk.bf16.gmra.mxu2 %vm314_vm1, %v303_v20  ;;  %v120_v20 = vmul.f32 %v1216_v34, %v54_v10 }
  0x68   :  { %943 = vmatmul.msk.bf16.gmra.mxu3 %vm314_vm1, %v311_v21  ;;  %v136_v21 = vmul.f32 %v1216_v34, %v70_v11 }
  0x6a   :  { %v202_v35 = vadd.f32 %v1228_v38, %v136_v21 }
  0x76   :  { %920 = vmatmul.msk.bf16.gmra.mxu0 %vm314_vm1, %v288_v30  ;;  %928 = vmatmul.msk.bf16.gmra.mxu1 %vm314_vm1, %v296_v31 }
  0x77   :  { %936 = vmatmul.msk.bf16.gmra.mxu2 %vm314_vm1, %v304_v32  ;;  %v186_v32 = vadd.f32 %v1228_v38, %v120_v20 }
  0x78   :  { %944 = vmatmul.msk.bf16.gmra.mxu3 %vm314_vm1, %v312_v33 }
  0x83   :  { %v424_v42 = vpop.f32.mrf.mxu0  ;;  %v464_v43 = vpop.f32.mrf.mxu1 }
  0x84   :  { %v586_v45 = vmul.f32 %v1233_v39, %v424_v42  ;;  %v602_v47 = vmul.f32 %v1233_v39, %v464_v43  ;;  %v155_v42 = vadd.f32 %v1228_v38, %v89_v24  ;;  %v122_v24 = vmul.f32 %v1216_v34, %v56_v14 }
  0x86   :  { %v652_v52 = vadd.f32 %v1239_v41, %v586_v45  ;;  %v668_v53 = vadd.f32 %v1239_v41, %v602_v47  ;;  %v71_v47 = vld [vmem:[%s1928_s0 + $0x190] sm:$0xff] }
  0x88   :  { %v716_v56 = vadd.f32 %v652_v52, %v153_v44  ;;  %v732_v57 = vadd.f32 %v668_v53, %v169_v46  ;;  %v171_v44 = vadd.f32 %v1228_v38, %v105_v25  ;;  %v55_v46 = vld [vmem:[%s1928_s0 + $0x110] sm:$0xff]  ;;  %v138_v25 = vmul.f32 %v1216_v34, %v72_v15 }
  0x8a   :  { %v780_v60 = vmax.f32 %v716_v56, 0.0  ;;  %v796_v61 = vmax.f32 %v732_v57, 0.0  ;;  %v504_v62 = vpop.f32.mrf.mxu2  ;;  %v121_v56 = vmul.f32 %v1216_v34, %v55_v46  ;;  %v137_v57 = vmul.f32 %v1216_v34, %v71_v47 }
  0x8b   :  { %v544_v63 = vpop.f32.mrf.mxu3  ;;  %v618_v1 = vmul.f32 %v1233_v39, %v504_v62  ;;  %v426_v4 = vpop.f32.mrf.mxu0 }
  0x8c   :  { %v634_v3 = vmul.f32 %v1233_v39, %v544_v63  ;;  %v466_v5 = vpop.f32.mrf.mxu1  ;;  %845 = vst.msk [vmem:[%s1929_s5] sm:$0xff] %vm844_vm2, %v780_v60  ;;  %v587_v7 = vmul.f32 %v1233_v39, %v426_v4  ;;  %v90_v60 = vmul.f32 %v1216_v34, %v24_v50  ;;  %v187_v4 = vadd.f32 %v1228_v38, %v121_v56  ;;  %v57_v50 = vld [vmem:[%s1928_s0 + $0x120] sm:$0xff] }
  0x8d   :  { %v603_v9 = vmul.f32 %v1233_v39, %v466_v5  ;;  %861 = vst.msk [vmem:[%s1929_s5 + $0x80] sm:$0xff] %vm844_vm2, %v796_v61  ;;  %v684_v12 = vadd.f32 %v1239_v41, %v618_v1  ;;  %v106_v61 = vmul.f32 %v1216_v34, %v40_v51  ;;  %v73_v51 = vld [vmem:[%s1928_s0 + $0x1a0] sm:$0xff] }
  0x8e   :  { %v700_v13 = vadd.f32 %v1239_v41, %v634_v3  ;;  %v653_v16 = vadd.f32 %v1239_v41, %v587_v7  ;;  %v156_v10 = vadd.f32 %v1228_v38, %v90_v60  ;;  %v123_v60 = vmul.f32 %v1216_v34, %v57_v50 }
  0x8f   :  { %v669_v17 = vadd.f32 %v1239_v41, %v603_v9  ;;  %v748_v18 = vadd.f32 %v684_v12, %v185_v0  ;;  %v172_v12 = vadd.f32 %v1228_v38, %v106_v61  ;;  %v139_v61 = vmul.f32 %v1216_v34, %v73_v51 }
  0x90   :  { %v764_v19 = vadd.f32 %v700_v13, %v201_v2  ;;  %v717_v22 = vadd.f32 %v653_v16, %v154_v6  ;;  %v203_v6 = vadd.f32 %v1228_v38, %v137_v57 }
  0x91   :  { %v733_v23 = vadd.f32 %v669_v17, %v170_v8  ;;  %v812_v26 = vmax.f32 %v748_v18, 0.0  ;;  %v25_v18 = vld [vmem:[%s1928_s0 + $0x20] sm:$0xff] }
  0x92   :  { %v828_v27 = vmax.f32 %v764_v19, 0.0  ;;  %v781_v28 = vmax.f32 %v717_v22, 0.0  ;;  %v506_v30 = vpop.f32.mrf.mxu2  ;;  %v41_v19 = vld [vmem:[%s1928_s0 + $0xa0] sm:$0xff] }
  0x93   :  { %v797_v29 = vmax.f32 %v733_v23, 0.0  ;;  %v546_v31 = vpop.f32.mrf.mxu3  ;;  %877 = vst.msk [vmem:[%s1929_s5 + $0x100] sm:$0xff] %vm844_vm2, %v812_v26  ;;  %v619_v33 = vmul.f32 %v1233_v39, %v506_v30  ;;  %v429_v37 = vpop.f32.mrf.mxu0 }
  0x94   :  { %v635_v36 = vmul.f32 %v1233_v39, %v546_v31  ;;  %v469_v40 = vpop.f32.mrf.mxu1  ;;  %893 = vst.msk [vmem:[%s1929_s5 + $0x180] sm:$0xff] %vm844_vm2, %v828_v27  ;;  %v588_v43 = vmul.f32 %v1233_v39, %v429_v37  ;;  %v188_v37 = vadd.f32 %v1228_v38, %v122_v24 }
  0x95   :  { %v604_v45 = vmul.f32 %v1233_v39, %v469_v40  ;;  %846 = vst.msk [vmem:[%s1929_s5 + $0x8] sm:$0xff] %vm844_vm2, %v781_v28  ;;  %v685_v48 = vadd.f32 %v1239_v41, %v619_v33  ;;  %v91_v28 = vmul.f32 %v1216_v34, %v25_v18  ;;  %v58_v18 = vld [vmem:[%s1928_s0 + $0x128] sm:$0xff] }
  0x96   :  { %v701_v49 = vadd.f32 %v1239_v41, %v635_v36  ;;  %862 = vst.msk [vmem:[%s1929_s5 + $0x88] sm:$0xff] %vm844_vm2, %v797_v29  ;;  %v654_v52 = vadd.f32 %v1239_v41, %v588_v43  ;;  %v107_v29 = vmul.f32 %v1216_v34, %v41_v19  ;;  %v74_v19 = vld [vmem:[%s1928_s0 + $0x1a8] sm:$0xff] }
  0x97   :  { %v670_v53 = vadd.f32 %v1239_v41, %v604_v45  ;;  %v749_v54 = vadd.f32 %v685_v48, %v186_v32  ;;  %v157_v46 = vadd.f32 %v1228_v38, %v91_v28  ;;  %v124_v28 = vmul.f32 %v1216_v34, %v58_v18 }
  0x98   :  { %v765_v55 = vadd.f32 %v701_v49, %v202_v35  ;;  %v718_v58 = vadd.f32 %v654_v52, %v155_v42  ;;  %v204_v42 = vadd.f32 %v1228_v38, %v138_v25  ;;  %v173_v48 = vadd.f32 %v1228_v38, %v107_v29 }
  0x99   :  { %v734_v59 = vadd.f32 %v670_v53, %v171_v44  ;;  %v813_v62 = vmax.f32 %v749_v54, 0.0  ;;  %v26_v54 = vld [vmem:[%s1928_s0 + $0x28] sm:$0xff]  ;;  %v140_v29 = vmul.f32 %v1216_v34, %v74_v19 }
  0x9a   :  { %v829_v63 = vmax.f32 %v765_v55, 0.0  ;;  %v782_v0 = vmax.f32 %v718_v58, 0.0  ;;  %v509_v2 = vpop.f32.mrf.mxu2  ;;  %v42_v55 = vld [vmem:[%s1928_s0 + $0xa8] sm:$0xff] }
  0x9b   :  { %v798_v1 = vmax.f32 %v734_v59, 0.0  ;;  %v549_v3 = vpop.f32.mrf.mxu3  ;;  %878 = vst.msk [vmem:[%s1929_s5 + $0x108] sm:$0xff] %vm844_vm2, %v813_v62  ;;  %v620_v5 = vmul.f32 %v1233_v39, %v509_v2  ;;  %v431_v8 = vpop.f32.mrf.mxu0 }
  0x9c   :  { %v636_v7 = vmul.f32 %v1233_v39, %v549_v3  ;;  %v471_v9 = vpop.f32.mrf.mxu1  ;;  %894 = vst.msk [vmem:[%s1929_s5 + $0x188] sm:$0xff] %vm844_vm2, %v829_v63  ;;  %v589_v11 = vmul.f32 %v1233_v39, %v431_v8  ;;  %v189_v8 = vadd.f32 %v1228_v38, %v123_v60 }
  0x9d   :  { %v605_v13 = vmul.f32 %v1233_v39, %v471_v9  ;;  %847 = vst.msk [vmem:[%s1929_s5 + $0x10] sm:$0xff] %vm844_vm2, %v782_v0  ;;  %v686_v16 = vadd.f32 %v1239_v41, %v620_v5  ;;  %v92_v0 = vmul.f32 %v1216_v34, %v26_v54  ;;  %v59_v54 = vld [vmem:[%s1928_s0 + $0x130] sm:$0xff] }
  0x9e   :  { %v702_v17 = vadd.f32 %v1239_v41, %v636_v7  ;;  %863 = vst.msk [vmem:[%s1929_s5 + $0x90] sm:$0xff] %vm844_vm2, %v798_v1  ;;  %v655_v20 = vadd.f32 %v1239_v41, %v589_v11  ;;  %v108_v1 = vmul.f32 %v1216_v34, %v42_v55  ;;  %v75_v55 = vld [vmem:[%s1928_s0 + $0x1b0] sm:$0xff] }
  0x9f   :  { %v671_v21 = vadd.f32 %v1239_v41, %v605_v13  ;;  %v750_v22 = vadd.f32 %v686_v16, %v187_v4  ;;  %v158_v14 = vadd.f32 %v1228_v38, %v92_v0  ;;  %v125_v0 = vmul.f32 %v1216_v34, %v59_v54 }
  0xa0   :  { %v766_v23 = vadd.f32 %v702_v17, %v203_v6  ;;  %v719_v26 = vadd.f32 %v655_v20, %v156_v10  ;;  %v205_v10 = vadd.f32 %v1228_v38, %v139_v61  ;;  %v174_v16 = vadd.f32 %v1228_v38, %v108_v1 }
  0xa1   :  { %v735_v27 = vadd.f32 %v671_v21, %v172_v12  ;;  %v814_v30 = vmax.f32 %v750_v22, 0.0  ;;  %v27_v22 = vld [vmem:[%s1928_s0 + $0x30] sm:$0xff]  ;;  %v141_v1 = vmul.f32 %v1216_v34, %v75_v55 }
  0xa2   :  { %v830_v31 = vmax.f32 %v766_v23, 0.0  ;;  %v783_v32 = vmax.f32 %v719_v26, 0.0  ;;  %v511_v35 = vpop.f32.mrf.mxu2  ;;  %v43_v23 = vld [vmem:[%s1928_s0 + $0xb0] sm:$0xff] }
  0xa3   :  { %v799_v33 = vmax.f32 %v735_v27, 0.0  ;;  %v551_v36 = vpop.f32.mrf.mxu3  ;;  %879 = vst.msk [vmem:[%s1929_s5 + $0x110] sm:$0xff] %vm844_vm2, %v814_v30  ;;  %v621_v40 = vmul.f32 %v1233_v39, %v511_v35  ;;  %v434_v44 = vpop.f32.mrf.mxu0 }
  0xa4   :  { %v637_v43 = vmul.f32 %v1233_v39, %v551_v36  ;;  %v474_v45 = vpop.f32.mrf.mxu1  ;;  %895 = vst.msk [vmem:[%s1929_s5 + $0x190] sm:$0xff] %vm844_vm2, %v830_v31  ;;  %v590_v47 = vmul.f32 %v1233_v39, %v434_v44  ;;  %v190_v44 = vadd.f32 %v1228_v38, %v124_v28 }
  0xa5   :  { %v606_v49 = vmul.f32 %v1233_v39, %v474_v45  ;;  %848 = vst.msk [vmem:[%s1929_s5 + $0x18] sm:$0xff] %vm844_vm2, %v783_v32  ;;  %v687_v52 = vadd.f32 %v1239_v41, %v621_v40  ;;  %v93_v32 = vmul.f32 %v1216_v34, %v27_v22  ;;  %v60_v22 = vld [vmem:[%s1928_s0 + $0x138] sm:$0xff] }
  0xa6   :  { %v703_v53 = vadd.f32 %v1239_v41, %v637_v43  ;;  %864 = vst.msk [vmem:[%s1929_s5 + $0x98] sm:$0xff] %vm844_vm2, %v799_v33  ;;  %v656_v56 = vadd.f32 %v1239_v41, %v590_v47  ;;  %v109_v33 = vmul.f32 %v1216_v34, %v43_v23  ;;  %v76_v23 = vld [vmem:[%s1928_s0 + $0x1b8] sm:$0xff] }
  0xa7   :  { %v672_v57 = vadd.f32 %v1239_v41, %v606_v49  ;;  %v751_v58 = vadd.f32 %v687_v52, %v188_v37  ;;  %v159_v50 = vadd.f32 %v1228_v38, %v93_v32  ;;  %v126_v32 = vmul.f32 %v1216_v34, %v60_v22 }
  0xa8   :  { %v767_v59 = vadd.f32 %v703_v53, %v204_v42  ;;  %v720_v62 = vadd.f32 %v656_v56, %v157_v46  ;;  %v206_v46 = vadd.f32 %v1228_v38, %v140_v29  ;;  %v175_v52 = vadd.f32 %v1228_v38, %v109_v33 }
  0xa9   :  { %v736_v63 = vadd.f32 %v672_v57, %v173_v48  ;;  %v815_v2 = vmax.f32 %v751_v58, 0.0  ;;  %v28_v58 = vld [vmem:[%s1928_s0 + $0x38] sm:$0xff]  ;;  %v142_v33 = vmul.f32 %v1216_v34, %v76_v23 }
  0xaa   :  { %v831_v3 = vmax.f32 %v767_v59, 0.0  ;;  %v784_v4 = vmax.f32 %v720_v62, 0.0  ;;  %v514_v6 = vpop.f32.mrf.mxu2  ;;  %v44_v59 = vld [vmem:[%s1928_s0 + $0xb8] sm:$0xff] }
  0xab   :  { %v800_v5 = vmax.f32 %v736_v63, 0.0  ;;  %v554_v7 = vpop.f32.mrf.mxu3  ;;  %880 = vst.msk [vmem:[%s1929_s5 + $0x118] sm:$0xff] %vm844_vm2, %v815_v2  ;;  %v622_v9 = vmul.f32 %v1233_v39, %v514_v6  ;;  %v436_v12 = vpop.f32.mrf.mxu0 }
  0xac   :  { %v638_v11 = vmul.f32 %v1233_v39, %v554_v7  ;;  %v476_v13 = vpop.f32.mrf.mxu1  ;;  %896 = vst.msk [vmem:[%s1929_s5 + $0x198] sm:$0xff] %vm844_vm2, %v831_v3  ;;  %v591_v15 = vmul.f32 %v1233_v39, %v436_v12  ;;  %v191_v12 = vadd.f32 %v1228_v38, %v125_v0 }
  0xad   :  { %v607_v17 = vmul.f32 %v1233_v39, %v476_v13  ;;  %849 = vst.msk [vmem:[%s1929_s5 + $0x20] sm:$0xff] %vm844_vm2, %v784_v4  ;;  %v688_v20 = vadd.f32 %v1239_v41, %v622_v9  ;;  %v94_v4 = vmul.f32 %v1216_v34, %v28_v58  ;;  %v61_v58 = vld [vmem:[%s1928_s0 + $0x140] sm:$0xff] }
  0xae   :  { %v704_v21 = vadd.f32 %v1239_v41, %v638_v11  ;;  %865 = vst.msk [vmem:[%s1929_s5 + $0xa0] sm:$0xff] %vm844_vm2, %v800_v5  ;;  %v657_v24 = vadd.f32 %v1239_v41, %v591_v15  ;;  %v110_v5 = vmul.f32 %v1216_v34, %v44_v59  ;;  %v77_v59 = vld [vmem:[%s1928_s0 + $0x1c0] sm:$0xff] }
  0xaf   :  { %v673_v25 = vadd.f32 %v1239_v41, %v607_v17  ;;  %v752_v26 = vadd.f32 %v688_v20, %v189_v8  ;;  %v160_v18 = vadd.f32 %v1228_v38, %v94_v4  ;;  %v127_v4 = vmul.f32 %v1216_v34, %v61_v58 }
  0xb0   :  { %v768_v27 = vadd.f32 %v704_v21, %v205_v10  ;;  %v721_v30 = vadd.f32 %v657_v24, %v158_v14  ;;  %v207_v14 = vadd.f32 %v1228_v38, %v141_v1  ;;  %v176_v20 = vadd.f32 %v1228_v38, %v110_v5 }
  0xb1   :  { %v737_v31 = vadd.f32 %v673_v25, %v174_v16  ;;  %v816_v35 = vmax.f32 %v752_v26, 0.0  ;;  %v29_v26 = vld [vmem:[%s1928_s0 + $0x40] sm:$0xff]  ;;  %v143_v5 = vmul.f32 %v1216_v34, %v77_v59 }
  0xb2   :  { %v832_v36 = vmax.f32 %v768_v27, 0.0  ;;  %v785_v37 = vmax.f32 %v721_v30, 0.0  ;;  %v516_v42 = vpop.f32.mrf.mxu2  ;;  %v45_v27 = vld [vmem:[%s1928_s0 + $0xc0] sm:$0xff] }
  0xb3   :  { %v801_v40 = vmax.f32 %v737_v31, 0.0  ;;  %v556_v43 = vpop.f32.mrf.mxu3  ;;  %881 = vst.msk [vmem:[%s1929_s5 + $0x120] sm:$0xff] %vm844_vm2, %v816_v35  ;;  %v623_v45 = vmul.f32 %v1233_v39, %v516_v42  ;;  %v439_v48 = vpop.f32.mrf.mxu0 }
  0xb4   :  { %v639_v47 = vmul.f32 %v1233_v39, %v556_v43  ;;  %v479_v49 = vpop.f32.mrf.mxu1  ;;  %897 = vst.msk [vmem:[%s1929_s5 + $0x1a0] sm:$0xff] %vm844_vm2, %v832_v36  ;;  %v592_v51 = vmul.f32 %v1233_v39, %v439_v48  ;;  %v192_v48 = vadd.f32 %v1228_v38, %v126_v32 }
  0xb5   :  { %v608_v53 = vmul.f32 %v1233_v39, %v479_v49  ;;  %850 = vst.msk [vmem:[%s1929_s5 + $0x28] sm:$0xff] %vm844_vm2, %v785_v37  ;;  %v689_v56 = vadd.f32 %v1239_v41, %v623_v45  ;;  %v95_v37 = vmul.f32 %v1216_v34, %v29_v26  ;;  %v62_v26 = vld [vmem:[%s1928_s0 + $0x148] sm:$0xff] }
  0xb6   :  { %v705_v57 = vadd.f32 %v1239_v41, %v639_v47  ;;  %866 = vst.msk [vmem:[%s1929_s5 + $0xa8] sm:$0xff] %vm844_vm2, %v801_v40  ;;  %v658_v60 = vadd.f32 %v1239_v41, %v592_v51  ;;  %v111_v40 = vmul.f32 %v1216_v34, %v45_v27  ;;  %v78_v27 = vld [vmem:[%s1928_s0 + $0x1c8] sm:$0xff] }
  0xb7   :  { %v674_v61 = vadd.f32 %v1239_v41, %v608_v53  ;;  %v753_v62 = vadd.f32 %v689_v56, %v190_v44  ;;  %v161_v54 = vadd.f32 %v1228_v38, %v95_v37  ;;  %v128_v37 = vmul.f32 %v1216_v34, %v62_v26 }
  0xb8   :  { %v769_v63 = vadd.f32 %v705_v57, %v206_v46  ;;  %v722_v2 = vadd.f32 %v658_v60, %v159_v50  ;;  %v208_v50 = vadd.f32 %v1228_v38, %v142_v33  ;;  %v177_v56 = vadd.f32 %v1228_v38, %v111_v40 }
  0xb9   :  { %v738_v3 = vadd.f32 %v674_v61, %v175_v52  ;;  %v817_v6 = vmax.f32 %v753_v62, 0.0  ;;  %v30_v62 = vld [vmem:[%s1928_s0 + $0x48] sm:$0xff]  ;;  %v144_v40 = vmul.f32 %v1216_v34, %v78_v27 }
  0xba   :  { %v833_v7 = vmax.f32 %v769_v63, 0.0  ;;  %v786_v8 = vmax.f32 %v722_v2, 0.0  ;;  %v519_v10 = vpop.f32.mrf.mxu2  ;;  %v46_v63 = vld [vmem:[%s1928_s0 + $0xc8] sm:$0xff] }
  0xbb   :  { %v802_v9 = vmax.f32 %v738_v3, 0.0  ;;  %v559_v11 = vpop.f32.mrf.mxu3  ;;  %882 = vst.msk [vmem:[%s1929_s5 + $0x128] sm:$0xff] %vm844_vm2, %v817_v6  ;;  %v624_v13 = vmul.f32 %v1233_v39, %v519_v10  ;;  %v441_v16 = vpop.f32.mrf.mxu0 }
  0xbc   :  { %v640_v15 = vmul.f32 %v1233_v39, %v559_v11  ;;  %v481_v17 = vpop.f32.mrf.mxu1  ;;  %898 = vst.msk [vmem:[%s1929_s5 + $0x1a8] sm:$0xff] %vm844_vm2, %v833_v7  ;;  %v593_v19 = vmul.f32 %v1233_v39, %v441_v16  ;;  %v193_v16 = vadd.f32 %v1228_v38, %v127_v4 }
  0xbd   :  { %v609_v21 = vmul.f32 %v1233_v39, %v481_v17  ;;  %851 = vst.msk [vmem:[%s1929_s5 + $0x30] sm:$0xff] %vm844_vm2, %v786_v8  ;;  %v690_v24 = vadd.f32 %v1239_v41, %v624_v13  ;;  %v96_v8 = vmul.f32 %v1216_v34, %v30_v62  ;;  %v63_v62 = vld [vmem:[%s1928_s0 + $0x150] sm:$0xff] }
  0xbe   :  { %v706_v25 = vadd.f32 %v1239_v41, %v640_v15  ;;  %867 = vst.msk [vmem:[%s1929_s5 + $0xb0] sm:$0xff] %vm844_vm2, %v802_v9  ;;  %v659_v28 = vadd.f32 %v1239_v41, %v593_v19  ;;  %v112_v9 = vmul.f32 %v1216_v34, %v46_v63  ;;  %v79_v63 = vld [vmem:[%s1928_s0 + $0x1d0] sm:$0xff] }
  0xbf   :  { %v675_v29 = vadd.f32 %v1239_v41, %v609_v21  ;;  %v754_v30 = vadd.f32 %v690_v24, %v191_v12  ;;  %v162_v22 = vadd.f32 %v1228_v38, %v96_v8  ;;  %v129_v8 = vmul.f32 %v1216_v34, %v63_v62 }
  0xc0   :  { %v770_v31 = vadd.f32 %v706_v25, %v207_v14  ;;  %v723_v35 = vadd.f32 %v659_v28, %v160_v18  ;;  %v209_v18 = vadd.f32 %v1228_v38, %v143_v5  ;;  %v178_v24 = vadd.f32 %v1228_v38, %v112_v9 }
  0xc1   :  { %v739_v36 = vadd.f32 %v675_v29, %v176_v20  ;;  %v818_v42 = vmax.f32 %v754_v30, 0.0  ;;  %v31_v30 = vld [vmem:[%s1928_s0 + $0x50] sm:$0xff]  ;;  %v145_v9 = vmul.f32 %v1216_v34, %v79_v63 }
  0xc2   :  { %v834_v43 = vmax.f32 %v770_v31, 0.0  ;;  %v787_v44 = vmax.f32 %v723_v35, 0.0  ;;  %v521_v46 = vpop.f32.mrf.mxu2  ;;  %v47_v31 = vld [vmem:[%s1928_s0 + $0xd0] sm:$0xff] }
  0xc3   :  { %v803_v45 = vmax.f32 %v739_v36, 0.0  ;;  %v561_v47 = vpop.f32.mrf.mxu3  ;;  %883 = vst.msk [vmem:[%s1929_s5 + $0x130] sm:$0xff] %vm844_vm2, %v818_v42  ;;  %v625_v49 = vmul.f32 %v1233_v39, %v521_v46  ;;  %v444_v52 = vpop.f32.mrf.mxu0 }
  0xc4   :  { %v641_v51 = vmul.f32 %v1233_v39, %v561_v47  ;;  %v484_v53 = vpop.f32.mrf.mxu1  ;;  %899 = vst.msk [vmem:[%s1929_s5 + $0x1b0] sm:$0xff] %vm844_vm2, %v834_v43  ;;  %v594_v55 = vmul.f32 %v1233_v39, %v444_v52  ;;  %v194_v52 = vadd.f32 %v1228_v38, %v128_v37 }
  0xc5   :  { %v610_v57 = vmul.f32 %v1233_v39, %v484_v53  ;;  %852 = vst.msk [vmem:[%s1929_s5 + $0x38] sm:$0xff] %vm844_vm2, %v787_v44  ;;  %v691_v60 = vadd.f32 %v1239_v41, %v625_v49  ;;  %v97_v44 = vmul.f32 %v1216_v34, %v31_v30  ;;  %v64_v30 = vld [vmem:[%s1928_s0 + $0x158] sm:$0xff] }
  0xc6   :  { %v707_v61 = vadd.f32 %v1239_v41, %v641_v51  ;;  %868 = vst.msk [vmem:[%s1929_s5 + $0xb8] sm:$0xff] %vm844_vm2, %v803_v45  ;;  %v660_v0 = vadd.f32 %v1239_v41, %v594_v55  ;;  %v113_v45 = vmul.f32 %v1216_v34, %v47_v31  ;;  %v80_v31 = vld [vmem:[%s1928_s0 + $0x1d8] sm:$0xff] }
  0xc7   :  { %v676_v1 = vadd.f32 %v1239_v41, %v610_v57  ;;  %v755_v2 = vadd.f32 %v691_v60, %v192_v48  ;;  %v163_v58 = vadd.f32 %v1228_v38, %v97_v44  ;;  %v130_v44 = vmul.f32 %v1216_v34, %v64_v30 }
  0xc8   :  { %v771_v3 = vadd.f32 %v707_v61, %v208_v50  ;;  %v724_v6 = vadd.f32 %v660_v0, %v161_v54  ;;  %v210_v54 = vadd.f32 %v1228_v38, %v144_v40  ;;  %v179_v60 = vadd.f32 %v1228_v38, %v113_v45 }
  0xc9   :  { %v740_v7 = vadd.f32 %v676_v1, %v177_v56  ;;  %v819_v10 = vmax.f32 %v755_v2, 0.0  ;;  %v32_v2 = vld [vmem:[%s1928_s0 + $0x58] sm:$0xff]  ;;  %v146_v45 = vmul.f32 %v1216_v34, %v80_v31 }
  0xca   :  { %v835_v11 = vmax.f32 %v771_v3, 0.0  ;;  %v788_v12 = vmax.f32 %v724_v6, 0.0  ;;  %v524_v14 = vpop.f32.mrf.mxu2  ;;  %v48_v3 = vld [vmem:[%s1928_s0 + $0xd8] sm:$0xff] }
  0xcb   :  { %v804_v13 = vmax.f32 %v740_v7, 0.0  ;;  %v564_v15 = vpop.f32.mrf.mxu3  ;;  %884 = vst.msk [vmem:[%s1929_s5 + $0x138] sm:$0xff] %vm844_vm2, %v819_v10  ;;  %v626_v17 = vmul.f32 %v1233_v39, %v524_v14  ;;  %v446_v20 = vpop.f32.mrf.mxu0 }
  0xcc   :  { %v642_v19 = vmul.f32 %v1233_v39, %v564_v15  ;;  %v486_v21 = vpop.f32.mrf.mxu1  ;;  %900 = vst.msk [vmem:[%s1929_s5 + $0x1b8] sm:$0xff] %vm844_vm2, %v835_v11  ;;  %v595_v23 = vmul.f32 %v1233_v39, %v446_v20  ;;  %v195_v20 = vadd.f32 %v1228_v38, %v129_v8 }
  0xcd   :  { %v611_v25 = vmul.f32 %v1233_v39, %v486_v21  ;;  %853 = vst.msk [vmem:[%s1929_s5 + $0x40] sm:$0xff] %vm844_vm2, %v788_v12  ;;  %v692_v28 = vadd.f32 %v1239_v41, %v626_v17  ;;  %v98_v12 = vmul.f32 %v1216_v34, %v32_v2  ;;  %v65_v2 = vld [vmem:[%s1928_s0 + $0x160] sm:$0xff] }
  0xce   :  { %v708_v29 = vadd.f32 %v1239_v41, %v642_v19  ;;  %869 = vst.msk [vmem:[%s1929_s5 + $0xc0] sm:$0xff] %vm844_vm2, %v804_v13  ;;  %v661_v32 = vadd.f32 %v1239_v41, %v595_v23  ;;  %v114_v13 = vmul.f32 %v1216_v34, %v48_v3  ;;  %v81_v3 = vld [vmem:[%s1928_s0 + $0x1e0] sm:$0xff] }
  0xcf   :  { %v677_v33 = vadd.f32 %v1239_v41, %v611_v25  ;;  %v756_v35 = vadd.f32 %v692_v28, %v193_v16  ;;  %v164_v26 = vadd.f32 %v1228_v38, %v98_v12  ;;  %v131_v12 = vmul.f32 %v1216_v34, %v65_v2 }
  0xd0   :  { %v772_v36 = vadd.f32 %v708_v29, %v209_v18  ;;  %v725_v42 = vadd.f32 %v661_v32, %v162_v22  ;;  %v211_v22 = vadd.f32 %v1228_v38, %v145_v9  ;;  %v180_v28 = vadd.f32 %v1228_v38, %v114_v13 }
  0xd1   :  { %v741_v43 = vadd.f32 %v677_v33, %v178_v24  ;;  %v820_v46 = vmax.f32 %v756_v35, 0.0  ;;  %v33_v35 = vld [vmem:[%s1928_s0 + $0x60] sm:$0xff]  ;;  %v147_v13 = vmul.f32 %v1216_v34, %v81_v3 }
  0xd2   :  { %v836_v47 = vmax.f32 %v772_v36, 0.0  ;;  %v789_v48 = vmax.f32 %v725_v42, 0.0  ;;  %v526_v50 = vpop.f32.mrf.mxu2  ;;  %v49_v36 = vld [vmem:[%s1928_s0 + $0xe0] sm:$0xff] }
  0xd3   :  { %v805_v49 = vmax.f32 %v741_v43, 0.0  ;;  %v566_v51 = vpop.f32.mrf.mxu3  ;;  %885 = vst.msk [vmem:[%s1929_s5 + $0x140] sm:$0xff] %vm844_vm2, %v820_v46  ;;  %v627_v53 = vmul.f32 %v1233_v39, %v526_v50  ;;  %v449_v56 = vpop.f32.mrf.mxu0 }
  0xd4   :  { %v643_v55 = vmul.f32 %v1233_v39, %v566_v51  ;;  %v489_v57 = vpop.f32.mrf.mxu1  ;;  %901 = vst.msk [vmem:[%s1929_s5 + $0x1c0] sm:$0xff] %vm844_vm2, %v836_v47  ;;  %v596_v59 = vmul.f32 %v1233_v39, %v449_v56  ;;  %v196_v56 = vadd.f32 %v1228_v38, %v130_v44 }
  0xd5   :  { %v612_v61 = vmul.f32 %v1233_v39, %v489_v57  ;;  %854 = vst.msk [vmem:[%s1929_s5 + $0x48] sm:$0xff] %vm844_vm2, %v789_v48  ;;  %v693_v0 = vadd.f32 %v1239_v41, %v627_v53  ;;  %v99_v48 = vmul.f32 %v1216_v34, %v33_v35  ;;  %v66_v35 = vld [vmem:[%s1928_s0 + $0x168] sm:$0xff] }
  0xd6   :  { %v709_v1 = vadd.f32 %v1239_v41, %v643_v55  ;;  %870 = vst.msk [vmem:[%s1929_s5 + $0xc8] sm:$0xff] %vm844_vm2, %v805_v49  ;;  %v662_v4 = vadd.f32 %v1239_v41, %v596_v59  ;;  %v115_v49 = vmul.f32 %v1216_v34, %v49_v36  ;;  %v82_v36 = vld [vmem:[%s1928_s0 + $0x1e8] sm:$0xff] }
  0xd7   :  { %v678_v5 = vadd.f32 %v1239_v41, %v612_v61  ;;  %v757_v6 = vadd.f32 %v693_v0, %v194_v52  ;;  %v165_v62 = vadd.f32 %v1228_v38, %v99_v48  ;;  %v132_v48 = vmul.f32 %v1216_v34, %v66_v35 }
  0xd8   :  { %v773_v7 = vadd.f32 %v709_v1, %v210_v54  ;;  %v726_v10 = vadd.f32 %v662_v4, %v163_v58  ;;  %v212_v58 = vadd.f32 %v1228_v38, %v146_v45  ;;  %v181_v0 = vadd.f32 %v1228_v38, %v115_v49 }
  0xd9   :  { %v742_v11 = vadd.f32 %v678_v5, %v179_v60  ;;  %v821_v14 = vmax.f32 %v757_v6, 0.0  ;;  %v34_v6 = vld [vmem:[%s1928_s0 + $0x68] sm:$0xff]  ;;  %v148_v49 = vmul.f32 %v1216_v34, %v82_v36 }
  0xda   :  { %v837_v15 = vmax.f32 %v773_v7, 0.0  ;;  %v790_v16 = vmax.f32 %v726_v10, 0.0  ;;  %v529_v18 = vpop.f32.mrf.mxu2  ;;  %v50_v7 = vld [vmem:[%s1928_s0 + $0xe8] sm:$0xff] }
  0xdb   :  { %v806_v17 = vmax.f32 %v742_v11, 0.0  ;;  %v569_v19 = vpop.f32.mrf.mxu3  ;;  %886 = vst.msk [vmem:[%s1929_s5 + $0x148] sm:$0xff] %vm844_vm2, %v821_v14  ;;  %v628_v21 = vmul.f32 %v1233_v39, %v529_v18  ;;  %v451_v24 = vpop.f32.mrf.mxu0 }
  0xdc   :  { %v644_v23 = vmul.f32 %v1233_v39, %v569_v19  ;;  %v491_v25 = vpop.f32.mrf.mxu1  ;;  %902 = vst.msk [vmem:[%s1929_s5 + $0x1c8] sm:$0xff] %vm844_vm2, %v837_v15  ;;  %v597_v27 = vmul.f32 %v1233_v39, %v451_v24  ;;  %v197_v24 = vadd.f32 %v1228_v38, %v131_v12 }
  0xdd   :  { %v613_v29 = vmul.f32 %v1233_v39, %v491_v25  ;;  %855 = vst.msk [vmem:[%s1929_s5 + $0x50] sm:$0xff] %vm844_vm2, %v790_v16  ;;  %v694_v32 = vadd.f32 %v1239_v41, %v628_v21  ;;  %v100_v16 = vmul.f32 %v1216_v34, %v34_v6  ;;  %v83_v6 = vld [vmem:[%s1928_s0 + $0x1f0] sm:$0xff] }
  0xde   :  { %v710_v33 = vadd.f32 %v1239_v41, %v644_v23  ;;  %871 = vst.msk [vmem:[%s1929_s5 + $0xd0] sm:$0xff] %vm844_vm2, %v806_v17  ;;  %v663_v37 = vadd.f32 %v1239_v41, %v597_v27  ;;  %v116_v17 = vmul.f32 %v1216_v34, %v50_v7 }
  0xdf   :  { %v679_v40 = vadd.f32 %v1239_v41, %v613_v29  ;;  %v758_v42 = vadd.f32 %v694_v32, %v195_v20  ;;  %v166_v30 = vadd.f32 %v1228_v38, %v100_v16 }
  0xe0   :  { %v774_v43 = vadd.f32 %v710_v33, %v211_v22  ;;  %v727_v46 = vadd.f32 %v663_v37, %v164_v26  ;;  %v213_v26 = vadd.f32 %v1228_v38, %v147_v13  ;;  %v182_v32 = vadd.f32 %v1228_v38, %v116_v17 }
  0xe1   :  { %v743_v47 = vadd.f32 %v679_v40, %v180_v28  ;;  %v822_v50 = vmax.f32 %v758_v42, 0.0  ;;  %v35_v42 = vld [vmem:[%s1928_s0 + $0x70] sm:$0xff] }
  0xe2   :  { %v838_v51 = vmax.f32 %v774_v43, 0.0  ;;  %v791_v52 = vmax.f32 %v727_v46, 0.0  ;;  %v531_v54 = vpop.f32.mrf.mxu2  ;;  %v51_v43 = vld [vmem:[%s1928_s0 + $0xf0] sm:$0xff] }
  0xe3   :  { %v807_v53 = vmax.f32 %v743_v47, 0.0  ;;  %v571_v55 = vpop.f32.mrf.mxu3  ;;  %887 = vst.msk [vmem:[%s1929_s5 + $0x150] sm:$0xff] %vm844_vm2, %v822_v50  ;;  %v629_v57 = vmul.f32 %v1233_v39, %v531_v54  ;;  %v454_v60 = vpop.f32.mrf.mxu0 }
  0xe4   :  { %v645_v59 = vmul.f32 %v1233_v39, %v571_v55  ;;  %v494_v61 = vpop.f32.mrf.mxu1  ;;  %903 = vst.msk [vmem:[%s1929_s5 + $0x1d0] sm:$0xff] %vm844_vm2, %v838_v51  ;;  %v598_v63 = vmul.f32 %v1233_v39, %v454_v60  ;;  %v198_v60 = vadd.f32 %v1228_v38, %v132_v48 }
  0xe5   :  { %v614_v1 = vmul.f32 %v1233_v39, %v494_v61  ;;  %856 = vst.msk [vmem:[%s1929_s5 + $0x58] sm:$0xff] %vm844_vm2, %v791_v52  ;;  %v695_v4 = vadd.f32 %v1239_v41, %v629_v57  ;;  %v101_v52 = vmul.f32 %v1216_v34, %v35_v42  ;;  %v68_v42 = vld [vmem:[%s1928_s0 + $0x178] sm:$0xff] }
  0xe6   :  { %v711_v5 = vadd.f32 %v1239_v41, %v645_v59  ;;  %872 = vst.msk [vmem:[%s1929_s5 + $0xd8] sm:$0xff] %vm844_vm2, %v807_v53  ;;  %v664_v8 = vadd.f32 %v1239_v41, %v598_v63  ;;  %v117_v53 = vmul.f32 %v1216_v34, %v51_v43  ;;  %v84_v43 = vld [vmem:[%s1928_s0 + $0x1f8] sm:$0xff] }
  0xe7   :  { %v680_v9 = vadd.f32 %v1239_v41, %v614_v1  ;;  %v759_v10 = vadd.f32 %v695_v4, %v196_v56  ;;  %v167_v1 = vadd.f32 %v1228_v38, %v101_v52 }
  0xe8   :  { %v775_v11 = vadd.f32 %v711_v5, %v212_v58  ;;  %v728_v14 = vadd.f32 %v664_v8, %v165_v62  ;;  %v214_v62 = vadd.f32 %v1228_v38, %v148_v49  ;;  %v183_v3 = vadd.f32 %v1228_v38, %v117_v53  ;;  %v67_v5 = vld [vmem:[%s1928_s0 + $0x170] sm:$0xff]  ;;  %v36_v38 = vld [vmem:[%s1928_s0 + $0x78] sm:$0xff] }
  0xe9   :  { %v744_v15 = vadd.f32 %v680_v9, %v181_v0  ;;  %v823_v18 = vmax.f32 %v759_v10, 0.0  ;;  %v952_v10 = vld [vmem:[%s1927_s4 + $0x1] ss:$0 sm:$0xff] }
  0xea   :  { %v839_v19 = vmax.f32 %v775_v11, 0.0  ;;  %v792_v20 = vmax.f32 %v728_v14, 0.0  ;;  %v534_v22 = vpop.f32.mrf.mxu2  ;;  %v953_v14 = vld [vmem:[%s1926_s3] ss:$0 sm:$0xff] }
  0xeb   :  { %v808_v21 = vmax.f32 %v744_v15, 0.0  ;;  %v574_v23 = vpop.f32.mrf.mxu3  ;;  %888 = vst.msk [vmem:[%s1929_s5 + $0x158] sm:$0xff] %vm844_vm2, %v823_v18  ;;  %v630_v25 = vmul.f32 %v1233_v39, %v534_v22  ;;  %v456_v28 = vpop.f32.mrf.mxu0  ;;  %v133_v15 = vmul.f32 %v953_v14, %v67_v5  ;;  %v149_v16 = vmul.f32 %v953_v14, %v83_v6 }
  0xec   :  { %v646_v27 = vmul.f32 %v1233_v39, %v574_v23  ;;  %v496_v29 = vpop.f32.mrf.mxu1  ;;  %904 = vst.msk [vmem:[%s1929_s5 + $0x1d8] sm:$0xff] %vm844_vm2, %v839_v19  ;;  %v599_v31 = vmul.f32 %v1233_v39, %v456_v28  ;;  %v102_v19 = vmul.f32 %v953_v14, %v36_v38  ;;  %v955_v28 = vld [vmem:[%s1927_s4] ss:$0 sm:$0xff] }
  0xed   :  { %v615_v33 = vmul.f32 %v1233_v39, %v496_v29  ;;  %857 = vst.msk [vmem:[%s1929_s5 + $0x60] sm:$0xff] %vm844_vm2, %v792_v20  ;;  %v696_v37 = vadd.f32 %v1239_v41, %v630_v25 }
  0xee   :  { %v712_v40 = vadd.f32 %v1239_v41, %v646_v27  ;;  %873 = vst.msk [vmem:[%s1929_s5 + $0xe0] sm:$0xff] %vm844_vm2, %v808_v21  ;;  %v665_v44 = vadd.f32 %v1239_v41, %v599_v31 }
  0xef   :  { %v681_v45 = vadd.f32 %v1239_v41, %v615_v33  ;;  %v760_v46 = vadd.f32 %v696_v37, %v197_v24 }
  0xf0   :  { %v776_v47 = vadd.f32 %v712_v40, %v213_v26  ;;  %v729_v50 = vadd.f32 %v665_v44, %v166_v30  ;;  %v954_v26 = vld [vmem:[%s1926_s3 + $0x1] ss:$0 sm:$0xff] }
  0xf1   :  { %v745_v51 = vadd.f32 %v681_v45, %v182_v32  ;;  %v824_v54 = vmax.f32 %v760_v46, 0.0  ;;  %v199_v27 = vadd.f32 %v954_v26, %v133_v15  ;;  %v215_v30 = vadd.f32 %v954_v26, %v149_v16 }
  0xf2   :  { %v840_v55 = vmax.f32 %v776_v47, 0.0  ;;  %v793_v56 = vmax.f32 %v729_v50, 0.0  ;;  %v536_v58 = vpop.f32.mrf.mxu2  ;;  %v168_v35 = vadd.f32 %v954_v26, %v102_v19  ;;  %v134_v50 = vmul.f32 %v953_v14, %v68_v42 }
  0xf3   :  { %v809_v57 = vmax.f32 %v745_v51, 0.0  ;;  %v576_v59 = vpop.f32.mrf.mxu3  ;;  %889 = vst.msk [vmem:[%s1929_s5 + $0x160] sm:$0xff] %vm844_vm2, %v824_v54  ;;  %v631_v61 = vmul.f32 %v1233_v39, %v536_v58  ;;  %v459_v34 = vpop.f32.mrf.mxu0  ;;  %v150_v51 = vmul.f32 %v953_v14, %v84_v43 }
  0xf4   :  { %v647_v63 = vmul.f32 %v1233_v39, %v576_v59  ;;  %v499_v0 = vpop.f32.mrf.mxu1  ;;  %905 = vst.msk [vmem:[%s1929_s5 + $0x1e0] sm:$0xff] %vm844_vm2, %v840_v55  ;;  %v600_v2 = vmul.f32 %v1233_v39, %v459_v34 }
  0xf5   :  { %v616_v4 = vmul.f32 %v1233_v39, %v499_v0  ;;  %858 = vst.msk [vmem:[%s1929_s5 + $0x68] sm:$0xff] %vm844_vm2, %v793_v56  ;;  %v697_v7 = vadd.f32 %v1239_v41, %v631_v61  ;;  %v52_v39 = vld [vmem:[%s1928_s0 + $0xf8] sm:$0xff] }
  0xf6   :  { %v713_v8 = vadd.f32 %v1239_v41, %v647_v63  ;;  %874 = vst.msk [vmem:[%s1929_s5 + $0xe8] sm:$0xff] %vm844_vm2, %v809_v57  ;;  %v666_v9 = vadd.f32 %v1239_v41, %v600_v2  ;;  %v118_v20 = vmul.f32 %v953_v14, %v52_v39 }
  0xf7   :  { %v682_v11 = vadd.f32 %v952_v10, %v616_v4  ;;  %v761_v12 = vadd.f32 %v697_v7, %v198_v60  ;;  %v200_v60 = vadd.f32 %v954_v26, %v134_v50 }
  0xf8   :  { %v777_v13 = vadd.f32 %v713_v8, %v214_v62  ;;  %v730_v17 = vadd.f32 %v666_v9, %v167_v1  ;;  %v184_v37 = vadd.f32 %v954_v26, %v118_v20  ;;  %v216_v62 = vadd.f32 %v954_v26, %v150_v51 }
  0xf9   :  { %v746_v18 = vadd.f32 %v682_v11, %v183_v3  ;;  %v825_v21 = vmax.f32 %v761_v12, 0.0 }
  0xfa   :  { %v841_v22 = vmax.f32 %v777_v13, 0.0  ;;  %v794_v41 = vmax.f32 %v730_v17, 0.0  ;;  %v539_v24 = vpop.f32.mrf.mxu2 }
  0xfb   :  { %v810_v23 = vmax.f32 %v746_v18, 0.0  ;;  %v579_v25 = vpop.f32.mrf.mxu3  ;;  %890 = vst.msk [vmem:[%s1929_s5 + $0x168] sm:$0xff] %vm844_vm2, %v825_v21  ;;  %v632_v29 = vmul.f32 %v955_v28, %v539_v24  ;;  %v461_v32 = vpop.f32.mrf.mxu0 }
  0xfc   :  { %v648_v31 = vmul.f32 %v955_v28, %v579_v25  ;;  %v501_v33 = vpop.f32.mrf.mxu1  ;;  %906 = vst.msk [vmem:[%s1929_s5 + $0x1e8] sm:$0xff] %vm844_vm2, %v841_v22  ;;  %v601_v36 = vmul.f32 %v955_v28, %v461_v32 }
  0xfd   :  { %v617_v40 = vmul.f32 %v955_v28, %v501_v33  ;;  %859 = vst.msk [vmem:[%s1929_s5 + $0x70] sm:$0xff] %vm844_vm2, %v794_v41  ;;  %v698_v44 = vadd.f32 %v952_v10, %v632_v29 }
  0xfe   :  { %v714_v45 = vadd.f32 %v952_v10, %v648_v31  ;;  %875 = vst.msk [vmem:[%s1929_s5 + $0xf0] sm:$0xff] %vm844_vm2, %v810_v23  ;;  %v667_v46 = vadd.f32 %v952_v10, %v601_v36 }
  0xff   :  { %v683_v47 = vadd.f32 %v952_v10, %v617_v40  ;;  %v762_v48 = vadd.f32 %v698_v44, %v199_v27 }
 0x100   :  { %v778_v49 = vadd.f32 %v714_v45, %v215_v30  ;;  %v731_v52 = vadd.f32 %v667_v46, %v168_v35 }
 0x101   :  { %v747_v53 = vadd.f32 %v683_v47, %v184_v37  ;;  %v826_v54 = vmax.f32 %v762_v48, 0.0 }
 0x102   :  { %v842_v55 = vmax.f32 %v778_v49, 0.0  ;;  %v795_v56 = vmax.f32 %v731_v52, 0.0  ;;  %v541_v58 = vpop.f32.mrf.mxu2 }
 0x103   :  { %v811_v57 = vmax.f32 %v747_v53, 0.0  ;;  %v581_v59 = vpop.f32.mrf.mxu3  ;;  %891 = vst.msk [vmem:[%s1929_s5 + $0x170] sm:$0xff] %vm844_vm2, %v826_v54  ;;  %v633_v61 = vmul.f32 %v955_v28, %v541_v58 }
 0x104   :  { %v649_v63 = vmul.f32 %v955_v28, %v581_v59  ;;  %907 = vst.msk [vmem:[%s1929_s5 + $0x1f0] sm:$0xff] %vm844_vm2, %v842_v55 }
 0x105   :  { %860 = vst.msk [vmem:[%s1929_s5 + $0x78] sm:$0xff] %vm844_vm2, %v795_v56  ;;  %v699_v34 = vadd.f32 %v952_v10, %v633_v61 }
 0x106   :  { %v715_v0 = vadd.f32 %v952_v10, %v649_v63  ;;  %876 = vst.msk [vmem:[%s1929_s5 + $0xf8] sm:$0xff] %vm844_vm2, %v811_v57 }
 0x107   :  { %v763_v1 = vadd.f32 %v699_v34, %v200_v60 }
 0x108   :  { %v779_v2 = vadd.f32 %v715_v0, %v216_v62 }
 0x109   :  { %v827_v3 = vmax.f32 %v763_v1, 0.0 }
 0x10a   :  { %v843_v4 = vmax.f32 %v779_v2, 0.0 }
 0x10b   :  { %892 = vst.msk [vmem:[%s1929_s5 + $0x178] sm:$0xff] %vm844_vm2, %v827_v3 }
 0x10c   :  { %908 = vst.msk [vmem:[%s1929_s5 + $0x1f8] sm:$0xff] %vm844_vm2, %v843_v4 }

// kernel: bottleneck_forward.4
= control target key start
LH: loop header
LB: loop body
LE: loop exit
PB: predicated region body
PF: predicated region fallthrough
CT: control target
= control target key end

     0   :  { %vm212_vm0 = vcmask 1041408   ;;  %vm115_vm1 = vcmask 31744   ;;  %vm956_vm2 = vcmask 130048   ;;  %vm756_vm3 = vcmask 24576   ;;  %s2862_s1 = inlined_call_operand.vmem [shape: bf16[4,4], index: 1, kind: input, shape index: {}]   ;;  %s2863_s2 = inlined_call_operand.vmem [shape: bf16[4,16], index: 2, kind: input, shape index: {}]   ;;  %s2864_s0 = inlined_call_operand.vmem [shape: f32[512,4], index: 0, kind: input, shape index: {}]   ;;  %s2865_s3 = inlined_call_operand.vmem [shape: f32[512,4], index: 3, kind: output, shape index: {0}]   ;;  %s2866_s4 = inlined_call_operand.vmem [shape: f32[8,4], index: 4, kind: output, shape index: {1}]   ;;  %s2867_s5 = inlined_call_operand.vmem [shape: f32[8,16], index: 5, kind: output, shape index: {2}]  }
   0x1   :  { %v114_v0 = vld [vmem:[%s2862_s1] sm:$0x3]  ;;  %v19_v5 = vld [vmem:[%s2864_s0 + $0x8] sm:$0xff]  ;;  %v20_v7 = vld [vmem:[%s2864_s0 + $0x10] sm:$0xff]  ;;  %vm1091_vm4 = vcmask 122880  }
   0x2   :  { %v385_v1 = vld [vmem:[%s2863_s2] sm:$0x3]  ;;  %v214_v3 = vsel %vm212_vm0, %v114_v0, 0  ;;  %v21_v8 = vld [vmem:[%s2864_s0 + $0x18] sm:$0xff]  ;;  %v51_v11 = vld [vmem:[%s2864_s0 + $0x108] sm:$0xff] }
   0x3   :  { %v18_v2 = vld [vmem:[%s2864_s0] sm:$0xff]  ;;  %v387_v4 = vsel %vm212_vm0, %v385_v1, 0  ;;  %223 = vmatpush.bf16.msra.mxu0 %v214_v3  ;;  %1367 = vmatpush.bf16.msra.mxu2 %v214_v3  ;;  %v83_v9 = vpack.c.bf16 %v21_v8, %v20_v7  ;;  %v23_v14 = vld [vmem:[%s2864_s0 + $0x28] sm:$0xff]  ;;  %v52_v16 = vld [vmem:[%s2864_s0 + $0x110] sm:$0xff] }
   0x4   :  { %396 = vmatpush.bf16.msra.mxu1 %v387_v4  ;;  %v82_v6 = vpack.c.bf16 %v19_v5, %v18_v2  ;;  %1368 = vmatpush.bf16.msra.mxu3 %v387_v4  ;;  %v50_v10 = vld [vmem:[%s2864_s0 + $0x100] sm:$0xff]  ;;  %v53_v17 = vld [vmem:[%s2864_s0 + $0x118] sm:$0xff]  ;;  %v24_v19 = vld [vmem:[%s2864_s0 + $0x30] sm:$0xff] }
   0x5   :  { %v98_v12 = vpack.c.bf16 %v51_v11, %v50_v10  ;;  %v22_v13 = vld [vmem:[%s2864_s0 + $0x20] sm:$0xff]  ;;  %v99_v18 = vpack.c.bf16 %v53_v17, %v52_v16  ;;  %v25_v20 = vld [vmem:[%s2864_s0 + $0x38] sm:$0xff]  ;;  %v55_v23 = vld [vmem:[%s2864_s0 + $0x128] sm:$0xff] }
   0x6   :  { %1303 = vmatmul.msk.bf16.vlgmr.msra.gmra.mxu0 %vm115_vm1, %v82_v6  ;;  %v84_v15 = vpack.c.bf16 %v23_v14, %v22_v13  ;;  %v85_v21 = vpack.c.bf16 %v25_v20, %v24_v19  ;;  %v54_v22 = vld [vmem:[%s2864_s0 + $0x120] sm:$0xff]  ;;  %v27_v26 = vld [vmem:[%s2864_s0 + $0x48] sm:$0xff]  ;;  %v56_v28 = vld [vmem:[%s2864_s0 + $0x130] sm:$0xff] }
   0x7   :  { %1335 = vmatmul.msk.bf16.vlgmr.msra.gmra.mxu1 %vm115_vm1, %v82_v6  ;;  %1319 = vmatmul.msk.bf16.vlgmr.msra.gmra.mxu2 %vm115_vm1, %v98_v12  ;;  %v100_v24 = vpack.c.bf16 %v55_v23, %v54_v22  ;;  %v26_v25 = vld [vmem:[%s2864_s0 + $0x40] sm:$0xff]  ;;  %v57_v29 = vld [vmem:[%s2864_s0 + $0x138] sm:$0xff]  ;;  %v28_v31 = vld [vmem:[%s2864_s0 + $0x50] sm:$0xff] }
   0x8   :  { %1351 = vmatmul.msk.bf16.vlgmr.msra.gmra.mxu3 %vm115_vm1, %v98_v12  ;;  %v86_v27 = vpack.c.bf16 %v27_v26, %v26_v25  ;;  %v101_v30 = vpack.c.bf16 %v57_v29, %v56_v28  ;;  %v29_v32 = vld [vmem:[%s2864_s0 + $0x58] sm:$0xff]  ;;  %v58_v34 = vld [vmem:[%s2864_s0 + $0x140] sm:$0xff]  ;;  %v59_v35 = vld [vmem:[%s2864_s0 + $0x148] sm:$0xff] }
   0x9   :  { %v87_v33 = vpack.c.bf16 %v29_v32, %v28_v31  ;;  %v102_v36 = vpack.c.bf16 %v59_v35, %v58_v34  ;;  %v30_v37 = vld [vmem:[%s2864_s0 + $0x60] sm:$0xff]  ;;  %v31_v38 = vld [vmem:[%s2864_s0 + $0x68] sm:$0xff]  ;;  %v60_v40 = vld [vmem:[%s2864_s0 + $0x150] sm:$0xff] }
   0xa   :  { %v88_v39 = vpack.c.bf16 %v31_v38, %v30_v37  ;;  %v61_v41 = vld [vmem:[%s2864_s0 + $0x158] sm:$0xff]  ;;  %v32_v43 = vld [vmem:[%s2864_s0 + $0x70] sm:$0xff]  ;;  %v62_v46 = vld [vmem:[%s2864_s0 + $0x160] sm:$0xff] }
   0xb   :  { %v103_v42 = vpack.c.bf16 %v61_v41, %v60_v40  ;;  %v33_v44 = vld [vmem:[%s2864_s0 + $0x78] sm:$0xff]  ;;  %v63_v47 = vld [vmem:[%s2864_s0 + $0x168] sm:$0xff]  ;;  %v34_v49 = vld [vmem:[%s2864_s0 + $0x80] sm:$0xff] }
   0xc   :  { %v89_v45 = vpack.c.bf16 %v33_v44, %v32_v43  ;;  %v104_v48 = vpack.c.bf16 %v63_v47, %v62_v46  ;;  %v35_v50 = vld [vmem:[%s2864_s0 + $0x88] sm:$0xff]  ;;  %v64_v54 = vld [vmem:[%s2864_s0 + $0x170] sm:$0xff]  ;;  %v65_v55 = vld [vmem:[%s2864_s0 + $0x178] sm:$0xff] }
   0xd   :  { %v90_v51 = vpack.c.bf16 %v35_v50, %v34_v49  ;;  %v105_v56 = vpack.c.bf16 %v65_v55, %v64_v54  ;;  %v36_v11 = vld [vmem:[%s2864_s0 + $0x90] sm:$0xff]  ;;  %v37_v12 = vld [vmem:[%s2864_s0 + $0x98] sm:$0xff]  ;;  %v66_v22 = vld [vmem:[%s2864_s0 + $0x180] sm:$0xff] }
   0xe   :  { %v91_v13 = vpack.c.bf16 %v37_v12, %v36_v11  ;;  %v67_v23 = vld [vmem:[%s2864_s0 + $0x188] sm:$0xff]  ;;  %v38_v43 = vld [vmem:[%s2864_s0 + $0xa0] sm:$0xff] }
   0xf   :  { %v106_v26 = vpack.c.bf16 %v67_v23, %v66_v22  ;;  %v39_v44 = vld [vmem:[%s2864_s0 + $0xa8] sm:$0xff] }
  0x16   :  { %1304 = vmatmul.msk.bf16.gmra.mxu0 %vm115_vm1, %v83_v9 }
  0x17   :  { %1336 = vmatmul.msk.bf16.gmra.mxu1 %vm115_vm1, %v83_v9  ;;  %1320 = vmatmul.msk.bf16.gmra.mxu2 %vm115_vm1, %v99_v18 }
  0x18   :  { %1352 = vmatmul.msk.bf16.gmra.mxu3 %vm115_vm1, %v99_v18 }
  0x26   :  { %1305 = vmatmul.msk.bf16.gmra.mxu0 %vm115_vm1, %v84_v15 }
  0x27   :  { %1337 = vmatmul.msk.bf16.gmra.mxu1 %vm115_vm1, %v84_v15  ;;  %1321 = vmatmul.msk.bf16.gmra.mxu2 %vm115_vm1, %v100_v24 }
  0x28   :  { %1353 = vmatmul.msk.bf16.gmra.mxu3 %vm115_vm1, %v100_v24 }
  0x36   :  { %1306 = vmatmul.msk.bf16.gmra.mxu0 %vm115_vm1, %v85_v21 }
  0x37   :  { %1338 = vmatmul.msk.bf16.gmra.mxu1 %vm115_vm1, %v85_v21  ;;  %1322 = vmatmul.msk.bf16.gmra.mxu2 %vm115_vm1, %v101_v30 }
  0x38   :  { %1354 = vmatmul.msk.bf16.gmra.mxu3 %vm115_vm1, %v101_v30 }
  0x46   :  { %1307 = vmatmul.msk.bf16.gmra.mxu0 %vm115_vm1, %v86_v27 }
  0x47   :  { %1339 = vmatmul.msk.bf16.gmra.mxu1 %vm115_vm1, %v86_v27  ;;  %1323 = vmatmul.msk.bf16.gmra.mxu2 %vm115_vm1, %v102_v36 }
  0x48   :  { %1355 = vmatmul.msk.bf16.gmra.mxu3 %vm115_vm1, %v102_v36 }
  0x56   :  { %1308 = vmatmul.msk.bf16.gmra.mxu0 %vm115_vm1, %v87_v33 }
  0x57   :  { %1340 = vmatmul.msk.bf16.gmra.mxu1 %vm115_vm1, %v87_v33  ;;  %1324 = vmatmul.msk.bf16.gmra.mxu2 %vm115_vm1, %v103_v42 }
  0x58   :  { %1356 = vmatmul.msk.bf16.gmra.mxu3 %vm115_vm1, %v103_v42 }
  0x66   :  { %1309 = vmatmul.msk.bf16.gmra.mxu0 %vm115_vm1, %v88_v39 }
  0x67   :  { %1341 = vmatmul.msk.bf16.gmra.mxu1 %vm115_vm1, %v88_v39  ;;  %1325 = vmatmul.msk.bf16.gmra.mxu2 %vm115_vm1, %v104_v48 }
  0x68   :  { %1357 = vmatmul.msk.bf16.gmra.mxu3 %vm115_vm1, %v104_v48 }
  0x76   :  { %1310 = vmatmul.msk.bf16.gmra.mxu0 %vm115_vm1, %v89_v45 }
  0x77   :  { %1342 = vmatmul.msk.bf16.gmra.mxu1 %vm115_vm1, %v89_v45  ;;  %1326 = vmatmul.msk.bf16.gmra.mxu2 %vm115_vm1, %v105_v56  ;;  %v92_v45 = vpack.c.bf16 %v39_v44, %v38_v43 }
  0x78   :  { %1358 = vmatmul.msk.bf16.gmra.mxu3 %vm115_vm1, %v105_v56  ;;  %v68_v56 = vld [vmem:[%s2864_s0 + $0x190] sm:$0xff] }
  0x83   :  { %v225_v52 = vpop.f32.mrf.mxu0 }
  0x84   :  { %v398_v53 = vpop.f32.mrf.mxu1  ;;  %558 = vst.msk [vmem:[%s2865_s3] sm:$0xff] %vm115_vm1, %v225_v52  ;;  %v758_v57 = vmul.f32 %v225_v52, %v225_v52  ;;  %v623_v59 = vsel %vm115_vm1, %v225_v52, 0.0 }
  0x85   :  { %v1093_v58 = vmul.f32 %v398_v53, %v398_v53  ;;  %v958_v60 = vsel %vm956_vm2, %v398_v53, 0.0 }
  0x86   :  { %1311 = vmatmul.msk.bf16.gmra.mxu0 %vm115_vm1, %v90_v51  ;;  %v822_v5 = vsel %vm115_vm1, %v758_v57, 0.0  ;;  %v69_v57 = vld [vmem:[%s2864_s0 + $0x198] sm:$0xff] }
  0x87   :  { %1343 = vmatmul.msk.bf16.gmra.mxu1 %vm115_vm1, %v90_v51  ;;  %v1157_v6 = vsel %vm956_vm2, %v1093_v58, 0.0  ;;  %1327 = vmatmul.msk.bf16.gmra.mxu2 %vm115_vm1, %v106_v26 }
  0x88   :  { %1359 = vmatmul.msk.bf16.gmra.mxu3 %vm115_vm1, %v106_v26  ;;  %v70_v26 = vld [vmem:[%s2864_s0 + $0x1a0] sm:$0xff] }
  0x8a   :  { %v1589_v35 = vpop.f32.mrf.mxu2 }
  0x8b   :  { %v227_v61 = vpop.f32.mrf.mxu0  ;;  %v1591_v36 = vpop.f32.mrf.mxu3  ;;  %590 = vst.msk [vmem:[%s2865_s3 + $0x100] sm:$0xff] %vm115_vm1, %v1589_v35 }
  0x8c   :  { %v400_v62 = vpop.f32.mrf.mxu1  ;;  %559 = vst.msk [vmem:[%s2865_s3 + $0x8] sm:$0xff] %vm115_vm1, %v227_v61  ;;  %v624_v63 = vsel %vm115_vm1, %v227_v61, 0.0  ;;  %v759_v0 = vmul.f32 %v227_v61, %v227_v61 }
  0x8d   :  { %v959_v1 = vsel %vm956_vm2, %v400_v62, 0.0  ;;  %v1094_v2 = vmul.f32 %v400_v62, %v400_v62  ;;  %v625_v4 = vadd.f32 %v624_v63, %v623_v59  ;;  %v107_v62 = vpack.c.bf16 %v69_v57, %v68_v56 }
  0x8e   :  { %v960_v3 = vadd.f32 %v959_v1, %v958_v60  ;;  %v823_v7 = vsel %vm115_vm1, %v759_v0, 0.0 }
  0x8f   :  { %v1158_v8 = vsel %vm956_vm2, %v1094_v2, 0.0  ;;  %v824_v10 = vadd.f32 %v823_v7, %v822_v5 }
  0x90   :  { %v1159_v9 = vadd.f32 %v1158_v8, %v1157_v6 }
  0x92   :  { %v1612_v52 = vpop.f32.mrf.mxu2 }
  0x93   :  { %v230_v14 = vpop.f32.mrf.mxu0  ;;  %v1614_v53 = vpop.f32.mrf.mxu3  ;;  %591 = vst.msk [vmem:[%s2865_s3 + $0x108] sm:$0xff] %vm115_vm1, %v1612_v52 }
  0x94   :  { %v403_v15 = vpop.f32.mrf.mxu1  ;;  %560 = vst.msk [vmem:[%s2865_s3 + $0x10] sm:$0xff] %vm115_vm1, %v230_v14  ;;  %v626_v16 = vsel %vm115_vm1, %v230_v14, 0.0  ;;  %v760_v17 = vmul.f32 %v230_v14, %v230_v14  ;;  %v41_v14 = vld [vmem:[%s2864_s0 + $0xb8] sm:$0xff] }
  0x95   :  { %v961_v18 = vsel %vm956_vm2, %v403_v15, 0.0  ;;  %v1095_v19 = vmul.f32 %v403_v15, %v403_v15  ;;  %v627_v20 = vadd.f32 %v626_v16, %v625_v4 }
  0x96   :  { %v962_v21 = vadd.f32 %v961_v18, %v960_v3  ;;  %v825_v24 = vsel %vm115_vm1, %v760_v17, 0.0  ;;  %1312 = vmatmul.msk.bf16.gmra.mxu0 %vm115_vm1, %v91_v13 }
  0x97   :  { %v1160_v25 = vsel %vm956_vm2, %v1095_v19, 0.0  ;;  %1344 = vmatmul.msk.bf16.gmra.mxu1 %vm115_vm1, %v91_v13  ;;  %v826_v27 = vadd.f32 %v825_v24, %v824_v10  ;;  %1328 = vmatmul.msk.bf16.gmra.mxu2 %vm115_vm1, %v107_v62  ;;  %v40_v13 = vld [vmem:[%s2864_s0 + $0xb0] sm:$0xff] }
  0x98   :  { %v1161_v28 = vadd.f32 %v1160_v25, %v1159_v9  ;;  %1360 = vmatmul.msk.bf16.gmra.mxu3 %vm115_vm1, %v107_v62  ;;  %v93_v15 = vpack.c.bf16 %v41_v14, %v40_v13 }
  0x9a   :  { %v1639_v5 = vpop.f32.mrf.mxu2 }
  0x9b   :  { %v232_v29 = vpop.f32.mrf.mxu0  ;;  %v1641_v6 = vpop.f32.mrf.mxu3  ;;  %592 = vst.msk [vmem:[%s2865_s3 + $0x110] sm:$0xff] %vm115_vm1, %v1639_v5 }
  0x9c   :  { %v405_v30 = vpop.f32.mrf.mxu1  ;;  %561 = vst.msk [vmem:[%s2865_s3 + $0x18] sm:$0xff] %vm115_vm1, %v232_v29  ;;  %v628_v31 = vsel %vm115_vm1, %v232_v29, 0.0  ;;  %v761_v32 = vmul.f32 %v232_v29, %v232_v29 }
  0x9d   :  { %v963_v33 = vsel %vm956_vm2, %v405_v30, 0.0  ;;  %v1096_v34 = vmul.f32 %v405_v30, %v405_v30  ;;  %v629_v38 = vadd.f32 %v628_v31, %v627_v20 }
  0x9e   :  { %v964_v37 = vadd.f32 %v963_v33, %v962_v21  ;;  %v827_v39 = vsel %vm115_vm1, %v761_v32, 0.0 }
  0x9f   :  { %v1162_v40 = vsel %vm956_vm2, %v1096_v34, 0.0  ;;  %v828_v42 = vadd.f32 %v827_v39, %v826_v27  ;;  %v71_v27 = vld [vmem:[%s2864_s0 + $0x1a8] sm:$0xff] }
  0xa0   :  { %v1163_v41 = vadd.f32 %v1162_v40, %v1161_v28  ;;  %v108_v32 = vpack.c.bf16 %v71_v27, %v70_v26  ;;  %v45_v26 = vld [vmem:[%s2864_s0 + $0xd8] sm:$0xff] }
  0xa2   :  { %v1662_v22 = vpop.f32.mrf.mxu2 }
  0xa3   :  { %v235_v46 = vpop.f32.mrf.mxu0  ;;  %v1664_v23 = vpop.f32.mrf.mxu3  ;;  %593 = vst.msk [vmem:[%s2865_s3 + $0x118] sm:$0xff] %vm115_vm1, %v1662_v22 }
  0xa4   :  { %v408_v47 = vpop.f32.mrf.mxu1  ;;  %562 = vst.msk [vmem:[%s2865_s3 + $0x20] sm:$0xff] %vm115_vm1, %v235_v46  ;;  %v630_v48 = vsel %vm115_vm1, %v235_v46, 0.0  ;;  %v762_v49 = vmul.f32 %v235_v46, %v235_v46 }
  0xa5   :  { %v965_v50 = vsel %vm956_vm2, %v408_v47, 0.0  ;;  %v1097_v51 = vmul.f32 %v408_v47, %v408_v47  ;;  %v631_v54 = vadd.f32 %v630_v48, %v629_v38 }
  0xa6   :  { %v966_v55 = vadd.f32 %v965_v50, %v964_v37  ;;  %v829_v58 = vsel %vm115_vm1, %v762_v49, 0.0  ;;  %1313 = vmatmul.msk.bf16.gmra.mxu0 %vm115_vm1, %v92_v45  ;;  %v42_v49 = vld [vmem:[%s2864_s0 + $0xc0] sm:$0xff]  ;;  %v43_v50 = vld [vmem:[%s2864_s0 + $0xc8] sm:$0xff] }
  0xa7   :  { %v1164_v59 = vsel %vm956_vm2, %v1097_v51, 0.0  ;;  %1345 = vmatmul.msk.bf16.gmra.mxu1 %vm115_vm1, %v92_v45  ;;  %v830_v60 = vadd.f32 %v829_v58, %v828_v42  ;;  %1329 = vmatmul.msk.bf16.gmra.mxu2 %vm115_vm1, %v108_v32  ;;  %v94_v51 = vpack.c.bf16 %v43_v50, %v42_v49 }
  0xa8   :  { %v1165_v61 = vadd.f32 %v1164_v59, %v1163_v41  ;;  %1361 = vmatmul.msk.bf16.gmra.mxu3 %vm115_vm1, %v108_v32 }
  0xaa   :  { %v1689_v41 = vpop.f32.mrf.mxu2 }
  0xab   :  { %v237_v63 = vpop.f32.mrf.mxu0  ;;  %v1691_v42 = vpop.f32.mrf.mxu3  ;;  %594 = vst.msk [vmem:[%s2865_s3 + $0x120] sm:$0xff] %vm115_vm1, %v1689_v41 }
  0xac   :  { %v410_v0 = vpop.f32.mrf.mxu1  ;;  %563 = vst.msk [vmem:[%s2865_s3 + $0x28] sm:$0xff] %vm115_vm1, %v237_v63  ;;  %v632_v1 = vsel %vm115_vm1, %v237_v63, 0.0  ;;  %v763_v2 = vmul.f32 %v237_v63, %v237_v63 }
  0xad   :  { %v967_v3 = vsel %vm956_vm2, %v410_v0, 0.0  ;;  %v1098_v4 = vmul.f32 %v410_v0, %v410_v0  ;;  %v633_v8 = vadd.f32 %v632_v1, %v631_v54  ;;  %v72_v0 = vld [vmem:[%s2864_s0 + $0x1b0] sm:$0xff]  ;;  %v73_v1 = vld [vmem:[%s2864_s0 + $0x1b8] sm:$0xff] }
  0xae   :  { %v968_v7 = vadd.f32 %v967_v3, %v966_v55  ;;  %v831_v9 = vsel %vm115_vm1, %v763_v2, 0.0 }
  0xaf   :  { %v1166_v10 = vsel %vm956_vm2, %v1098_v4, 0.0  ;;  %v832_v12 = vadd.f32 %v831_v9, %v830_v60 }
  0xb0   :  { %v1167_v11 = vadd.f32 %v1166_v10, %v1165_v61 }
  0xb2   :  { %v1712_v60 = vpop.f32.mrf.mxu2 }
  0xb3   :  { %v240_v16 = vpop.f32.mrf.mxu0  ;;  %v1714_v61 = vpop.f32.mrf.mxu3  ;;  %595 = vst.msk [vmem:[%s2865_s3 + $0x128] sm:$0xff] %vm115_vm1, %v1712_v60 }
  0xb4   :  { %v413_v17 = vpop.f32.mrf.mxu1  ;;  %564 = vst.msk [vmem:[%s2865_s3 + $0x30] sm:$0xff] %vm115_vm1, %v240_v16  ;;  %v634_v18 = vsel %vm115_vm1, %v240_v16, 0.0  ;;  %v764_v19 = vmul.f32 %v240_v16, %v240_v16 }
  0xb5   :  { %v969_v20 = vsel %vm956_vm2, %v413_v17, 0.0  ;;  %v1099_v21 = vmul.f32 %v413_v17, %v413_v17  ;;  %v635_v24 = vadd.f32 %v634_v18, %v633_v8  ;;  %v109_v8 = vpack.c.bf16 %v73_v1, %v72_v0 }
  0xb6   :  { %v970_v25 = vadd.f32 %v969_v20, %v968_v7  ;;  %v833_v28 = vsel %vm115_vm1, %v764_v19, 0.0  ;;  %1314 = vmatmul.msk.bf16.gmra.mxu0 %vm115_vm1, %v93_v15 }
  0xb7   :  { %v1168_v29 = vsel %vm956_vm2, %v1099_v21, 0.0  ;;  %1346 = vmatmul.msk.bf16.gmra.mxu1 %vm115_vm1, %v93_v15  ;;  %v834_v30 = vadd.f32 %v833_v28, %v832_v12  ;;  %1330 = vmatmul.msk.bf16.gmra.mxu2 %vm115_vm1, %v109_v8 }
  0xb8   :  { %v1169_v31 = vadd.f32 %v1168_v29, %v1167_v11  ;;  %1362 = vmatmul.msk.bf16.gmra.mxu3 %vm115_vm1, %v109_v8 }
  0xba   :  { %v1739_v15 = vpop.f32.mrf.mxu2 }
  0xbb   :  { %v242_v33 = vpop.f32.mrf.mxu0  ;;  %v1741_v16 = vpop.f32.mrf.mxu3  ;;  %596 = vst.msk [vmem:[%s2865_s3 + $0x130] sm:$0xff] %vm115_vm1, %v1739_v15 }
  0xbc   :  { %v415_v34 = vpop.f32.mrf.mxu1  ;;  %565 = vst.msk [vmem:[%s2865_s3 + $0x38] sm:$0xff] %vm115_vm1, %v242_v33  ;;  %v636_v37 = vsel %vm115_vm1, %v242_v33, 0.0  ;;  %v765_v38 = vmul.f32 %v242_v33, %v242_v33 }
  0xbd   :  { %v971_v39 = vsel %vm956_vm2, %v415_v34, 0.0  ;;  %v1100_v40 = vmul.f32 %v415_v34, %v415_v34  ;;  %v637_v44 = vadd.f32 %v636_v37, %v635_v24 }
  0xbe   :  { %v972_v43 = vadd.f32 %v971_v39, %v970_v25  ;;  %v835_v45 = vsel %vm115_vm1, %v765_v38, 0.0  ;;  %v44_v25 = vld [vmem:[%s2864_s0 + $0xd0] sm:$0xff] }
  0xbf   :  { %v1170_v46 = vsel %vm956_vm2, %v1100_v40, 0.0  ;;  %v836_v48 = vadd.f32 %v835_v45, %v834_v30  ;;  %v95_v27 = vpack.c.bf16 %v45_v26, %v44_v25  ;;  %v74_v40 = vld [vmem:[%s2864_s0 + $0x1c0] sm:$0xff] }
  0xc0   :  { %v1171_v47 = vadd.f32 %v1170_v46, %v1169_v31 }
  0xc2   :  { %v1762_v34 = vpop.f32.mrf.mxu2 }
  0xc3   :  { %v245_v54 = vpop.f32.mrf.mxu0  ;;  %v1764_v37 = vpop.f32.mrf.mxu3  ;;  %597 = vst.msk [vmem:[%s2865_s3 + $0x138] sm:$0xff] %vm115_vm1, %v1762_v34 }
  0xc4   :  { %v418_v55 = vpop.f32.mrf.mxu1  ;;  %566 = vst.msk [vmem:[%s2865_s3 + $0x40] sm:$0xff] %vm115_vm1, %v245_v54  ;;  %v638_v56 = vsel %vm115_vm1, %v245_v54, 0.0  ;;  %v766_v57 = vmul.f32 %v245_v54, %v245_v54 }
  0xc5   :  { %v973_v58 = vsel %vm956_vm2, %v418_v55, 0.0  ;;  %v1101_v59 = vmul.f32 %v418_v55, %v418_v55  ;;  %v639_v62 = vadd.f32 %v638_v56, %v637_v44 }
  0xc6   :  { %v974_v63 = vadd.f32 %v973_v58, %v972_v43  ;;  %v837_v2 = vsel %vm115_vm1, %v766_v57, 0.0  ;;  %1315 = vmatmul.msk.bf16.gmra.mxu0 %vm115_vm1, %v94_v51  ;;  %v75_v43 = vld [vmem:[%s2864_s0 + $0x1c8] sm:$0xff] }
  0xc7   :  { %v1172_v3 = vsel %vm956_vm2, %v1101_v59, 0.0  ;;  %1347 = vmatmul.msk.bf16.gmra.mxu1 %vm115_vm1, %v94_v51  ;;  %v838_v4 = vadd.f32 %v837_v2, %v836_v48  ;;  %v110_v48 = vpack.c.bf16 %v75_v43, %v74_v40 }
  0xc8   :  { %v1173_v7 = vadd.f32 %v1172_v3, %v1171_v47  ;;  %v46_v3 = vld [vmem:[%s2864_s0 + $0xe0] sm:$0xff] }
  0xc9   :  { %1331 = vmatmul.msk.bf16.gmra.mxu2 %vm115_vm1, %v110_v48  ;;  %1363 = vmatmul.msk.bf16.gmra.mxu3 %vm115_vm1, %v110_v48 }
  0xca   :  { %v1789_v57 = vpop.f32.mrf.mxu2 }
  0xcb   :  { %v247_v9 = vpop.f32.mrf.mxu0  ;;  %v1791_v58 = vpop.f32.mrf.mxu3  ;;  %598 = vst.msk [vmem:[%s2865_s3 + $0x140] sm:$0xff] %vm115_vm1, %v1789_v57 }
  0xcc   :  { %v420_v10 = vpop.f32.mrf.mxu1  ;;  %567 = vst.msk [vmem:[%s2865_s3 + $0x48] sm:$0xff] %vm115_vm1, %v247_v9  ;;  %v640_v11 = vsel %vm115_vm1, %v247_v9, 0.0  ;;  %v767_v12 = vmul.f32 %v247_v9, %v247_v9 }
  0xcd   :  { %v975_v13 = vsel %vm956_vm2, %v420_v10, 0.0  ;;  %v1102_v14 = vmul.f32 %v420_v10, %v420_v10  ;;  %v641_v17 = vadd.f32 %v640_v11, %v639_v62 }
  0xce   :  { %v976_v18 = vadd.f32 %v975_v13, %v974_v63  ;;  %v839_v19 = vsel %vm115_vm1, %v767_v12, 0.0 }
  0xcf   :  { %v1174_v20 = vsel %vm956_vm2, %v1102_v14, 0.0  ;;  %v840_v21 = vadd.f32 %v839_v19, %v838_v4  ;;  %v47_v4 = vld [vmem:[%s2864_s0 + $0xe8] sm:$0xff] }
  0xd0   :  { %v1175_v24 = vadd.f32 %v1174_v20, %v1173_v7  ;;  %v96_v7 = vpack.c.bf16 %v47_v4, %v46_v3  ;;  %v76_v20 = vld [vmem:[%s2864_s0 + $0x1d0] sm:$0xff]  ;;  %v78_v4 = vld [vmem:[%s2864_s0 + $0x1e0] sm:$0xff] }
  0xd2   :  { %v1812_v14 = vpop.f32.mrf.mxu2 }
  0xd3   :  { %v250_v28 = vpop.f32.mrf.mxu0  ;;  %599 = vst.msk [vmem:[%s2865_s3 + $0x148] sm:$0xff] %vm115_vm1, %v1812_v14 }
  0xd4   :  { %v423_v29 = vpop.f32.mrf.mxu1  ;;  %568 = vst.msk [vmem:[%s2865_s3 + $0x50] sm:$0xff] %vm115_vm1, %v250_v28  ;;  %v642_v30 = vsel %vm115_vm1, %v250_v28, 0.0  ;;  %v768_v31 = vmul.f32 %v250_v28, %v250_v28 }
  0xd5   :  { %v977_v32 = vsel %vm956_vm2, %v423_v29, 0.0  ;;  %v1103_v33 = vmul.f32 %v423_v29, %v423_v29  ;;  %v643_v38 = vadd.f32 %v642_v30, %v641_v17  ;;  %v1814_v17 = vpop.f32.mrf.mxu3 }
  0xd6   :  { %v978_v39 = vadd.f32 %v977_v32, %v976_v18  ;;  %v841_v44 = vsel %vm115_vm1, %v768_v31, 0.0  ;;  %1316 = vmatmul.msk.bf16.gmra.mxu0 %vm115_vm1, %v95_v27 }
  0xd7   :  { %v1176_v45 = vsel %vm956_vm2, %v1103_v33, 0.0  ;;  %1348 = vmatmul.msk.bf16.gmra.mxu1 %vm115_vm1, %v95_v27  ;;  %v842_v46 = vadd.f32 %v841_v44, %v840_v21  ;;  %v77_v21 = vld [vmem:[%s2864_s0 + $0x1d8] sm:$0xff] }
  0xd8   :  { %v1177_v47 = vadd.f32 %v1176_v45, %v1175_v24  ;;  %v111_v28 = vpack.c.bf16 %v77_v21, %v76_v20 }
  0xda   :  { %1332 = vmatmul.msk.bf16.gmra.mxu2 %vm115_vm1, %v111_v28  ;;  %1364 = vmatmul.msk.bf16.gmra.mxu3 %vm115_vm1, %v111_v28 }
  0xdb   :  { %v252_v49 = vpop.f32.mrf.mxu0 }
  0xdc   :  { %v425_v50 = vpop.f32.mrf.mxu1  ;;  %569 = vst.msk [vmem:[%s2865_s3 + $0x58] sm:$0xff] %vm115_vm1, %v252_v49  ;;  %v644_v51 = vsel %vm115_vm1, %v252_v49, 0.0  ;;  %v769_v54 = vmul.f32 %v252_v49, %v252_v49  ;;  %v48_v49 = vld [vmem:[%s2864_s0 + $0xf0] sm:$0xff] }
  0xdd   :  { %v979_v55 = vsel %vm956_vm2, %v425_v50, 0.0  ;;  %v1104_v56 = vmul.f32 %v425_v50, %v425_v50  ;;  %v645_v59 = vadd.f32 %v644_v51, %v643_v38  ;;  %v1841_v40 = vpop.f32.mrf.mxu3  ;;  %v49_v50 = vld [vmem:[%s2864_s0 + $0xf8] sm:$0xff] }
  0xde   :  { %v980_v62 = vadd.f32 %v979_v55, %v978_v39  ;;  %v843_v63 = vsel %vm115_vm1, %v769_v54, 0.0  ;;  %v1839_v39 = vpop.f32.mrf.mxu2  ;;  %v97_v51 = vpack.c.bf16 %v49_v50, %v48_v49 }
  0xdf   :  { %v1178_v0 = vsel %vm956_vm2, %v1104_v56, 0.0  ;;  %v844_v1 = vadd.f32 %v843_v63, %v842_v46  ;;  %600 = vst.msk [vmem:[%s2865_s3 + $0x150] sm:$0xff] %vm115_vm1, %v1839_v39 }
  0xe0   :  { %v1179_v2 = vadd.f32 %v1178_v0, %v1177_v47 }
  0xe3   :  { %v255_v8 = vpop.f32.mrf.mxu0 }
  0xe4   :  { %v428_v9 = vpop.f32.mrf.mxu1  ;;  %570 = vst.msk [vmem:[%s2865_s3 + $0x60] sm:$0xff] %vm115_vm1, %v255_v8  ;;  %v646_v10 = vsel %vm115_vm1, %v255_v8, 0.0  ;;  %v770_v11 = vmul.f32 %v255_v8, %v255_v8 }
  0xe5   :  { %v981_v12 = vsel %vm956_vm2, %v428_v9, 0.0  ;;  %v1105_v13 = vmul.f32 %v428_v9, %v428_v9  ;;  %v647_v18 = vadd.f32 %v646_v10, %v645_v59 }
  0xe6   :  { %v982_v19 = vadd.f32 %v981_v12, %v980_v62  ;;  %v845_v24 = vsel %vm115_vm1, %v770_v11, 0.0  ;;  %1317 = vmatmul.msk.bf16.gmra.mxu0 %vm115_vm1, %v96_v7  ;;  %v1862_v0 = vpop.f32.mrf.mxu2 }
  0xe7   :  { %v1180_v25 = vsel %vm956_vm2, %v1105_v13, 0.0  ;;  %1349 = vmatmul.msk.bf16.gmra.mxu1 %vm115_vm1, %v96_v7  ;;  %v846_v26 = vadd.f32 %v845_v24, %v844_v1  ;;  %v1864_v1 = vpop.f32.mrf.mxu3  ;;  %601 = vst.msk [vmem:[%s2865_s3 + $0x158] sm:$0xff] %vm115_vm1, %v1862_v0  ;;  %v79_v7 = vld [vmem:[%s2864_s0 + $0x1e8] sm:$0xff] }
  0xe8   :  { %v1181_v27 = vadd.f32 %v1180_v25, %v1179_v2  ;;  %v112_v12 = vpack.c.bf16 %v79_v7, %v78_v4 }
  0xea   :  { %1333 = vmatmul.msk.bf16.gmra.mxu2 %vm115_vm1, %v112_v12  ;;  %1365 = vmatmul.msk.bf16.gmra.mxu3 %vm115_vm1, %v112_v12 }
  0xeb   :  { %v257_v29 = vpop.f32.mrf.mxu0 }
  0xec   :  { %v430_v30 = vpop.f32.mrf.mxu1  ;;  %571 = vst.msk [vmem:[%s2865_s3 + $0x68] sm:$0xff] %vm115_vm1, %v257_v29  ;;  %v648_v31 = vsel %vm115_vm1, %v257_v29, 0.0  ;;  %v771_v32 = vmul.f32 %v257_v29, %v257_v29 }
  0xed   :  { %v983_v33 = vsel %vm956_vm2, %v430_v30, 0.0  ;;  %v1106_v38 = vmul.f32 %v430_v30, %v430_v30  ;;  %v649_v43 = vadd.f32 %v648_v31, %v647_v18 }
  0xee   :  { %v984_v44 = vadd.f32 %v983_v33, %v982_v19  ;;  %v847_v45 = vsel %vm115_vm1, %v771_v32, 0.0  ;;  %v1889_v25 = vpop.f32.mrf.mxu2 }
  0xef   :  { %v1182_v46 = vsel %vm956_vm2, %v1106_v38, 0.0  ;;  %v848_v47 = vadd.f32 %v847_v45, %v846_v26  ;;  %v1891_v26 = vpop.f32.mrf.mxu3  ;;  %602 = vst.msk [vmem:[%s2865_s3 + $0x160] sm:$0xff] %vm115_vm1, %v1889_v25 }
  0xf0   :  { %v1183_v48 = vadd.f32 %v1182_v46, %v1181_v27 }
  0xf3   :  { %v260_v54 = vpop.f32.mrf.mxu0 }
  0xf4   :  { %v433_v55 = vpop.f32.mrf.mxu1  ;;  %572 = vst.msk [vmem:[%s2865_s3 + $0x70] sm:$0xff] %vm115_vm1, %v260_v54  ;;  %v650_v56 = vsel %vm115_vm1, %v260_v54, 0.0  ;;  %v772_v59 = vmul.f32 %v260_v54, %v260_v54  ;;  %v81_v54 = vld [vmem:[%s2864_s0 + $0x1f8] sm:$0xff] }
  0xf5   :  { %v985_v62 = vsel %vm956_vm2, %v433_v55, 0.0  ;;  %v1107_v63 = vmul.f32 %v433_v55, %v433_v55  ;;  %v651_v2 = vadd.f32 %v650_v56, %v649_v43 }
  0xf6   :  { %v986_v3 = vadd.f32 %v985_v62, %v984_v44  ;;  %v849_v8 = vsel %vm115_vm1, %v772_v59, 0.0  ;;  %1318 = vmatmul.msk.bf16.gmra.mxu0 %vm115_vm1, %v97_v51 }
  0xf7   :  { %v1184_v9 = vsel %vm956_vm2, %v1107_v63, 0.0  ;;  %1350 = vmatmul.msk.bf16.gmra.mxu1 %vm115_vm1, %v97_v51  ;;  %v850_v10 = vadd.f32 %v849_v8, %v848_v47  ;;  %v1906_v47 = vpop.f32.mrf.mxu2  ;;  %v80_v51 = vld [vmem:[%s2864_s0 + $0x1f0] sm:$0xff] }
  0xf8   :  { %v1185_v11 = vadd.f32 %v1184_v9, %v1183_v48  ;;  %v1908_v48 = vpop.f32.mrf.mxu3  ;;  %603 = vst.msk [vmem:[%s2865_s3 + $0x168] sm:$0xff] %vm115_vm1, %v1906_v47  ;;  %v113_v63 = vpack.c.bf16 %v81_v54, %v80_v51 }
  0xfa   :  { %1334 = vmatmul.msk.bf16.gmra.mxu2 %vm115_vm1, %v113_v63  ;;  %1366 = vmatmul.msk.bf16.gmra.mxu3 %vm115_vm1, %v113_v63 }
  0xfb   :  { %v262_v13 = vpop.f32.mrf.mxu0 }
  0xfc   :  { %v435_v18 = vpop.f32.mrf.mxu1  ;;  %573 = vst.msk [vmem:[%s2865_s3 + $0x78] sm:$0xff] %vm115_vm1, %v262_v13  ;;  %v652_v19 = vsel %vm115_vm1, %v262_v13, 0.0  ;;  %v773_v20 = vmul.f32 %v262_v13, %v262_v13 }
  0xfd   :  { %v987_v21 = vsel %vm956_vm2, %v435_v18, 0.0  ;;  %v1108_v24 = vmul.f32 %v435_v18, %v435_v18  ;;  %v653_v27 = vadd.f32 %v652_v19, %v651_v2 }
  0xfe   :  { %v988_v28 = vadd.f32 %v987_v21, %v986_v3  ;;  %v851_v29 = vsel %vm115_vm1, %v773_v20, 0.0 }
  0xff   :  { %v1186_v30 = vsel %vm956_vm2, %v1108_v24, 0.0  ;;  %v852_v31 = vadd.f32 %v851_v29, %v850_v10  ;;  %v1931_v10 = vpop.f32.mrf.mxu2 }
 0x100   :  { %v1187_v32 = vadd.f32 %v1186_v30, %v1185_v11  ;;  %v1933_v11 = vpop.f32.mrf.mxu3  ;;  %604 = vst.msk [vmem:[%s2865_s3 + $0x170] sm:$0xff] %vm115_vm1, %v1931_v10 }
 0x101   :  { %2900 = vst [vmem:[#allocation2_spill] sm:$0xff] %v1933_v11 }
 0x103   :  { %v265_v33 = vpop.f32.mrf.mxu0 }
 0x104   :  { %v438_v38 = vpop.f32.mrf.mxu1  ;;  %574 = vst.msk [vmem:[%s2865_s3 + $0x80] sm:$0xff] %vm115_vm1, %v265_v33  ;;  %v654_v43 = vsel %vm115_vm1, %v265_v33, 0.0  ;;  %v774_v44 = vmul.f32 %v265_v33, %v265_v33 }
 0x105   :  { %v989_v45 = vsel %vm956_vm2, %v438_v38, 0.0  ;;  %v1109_v46 = vmul.f32 %v438_v38, %v438_v38  ;;  %v655_v49 = vadd.f32 %v654_v43, %v653_v27 }
 0x106   :  { %v990_v50 = vadd.f32 %v989_v45, %v988_v28  ;;  %v853_v55 = vsel %vm115_vm1, %v774_v44, 0.0 }
 0x107   :  { %v1188_v56 = vsel %vm956_vm2, %v1109_v46, 0.0  ;;  %v854_v59 = vadd.f32 %v853_v55, %v852_v31 }
 0x108   :  { %v1189_v62 = vadd.f32 %v1188_v56, %v1187_v32  ;;  %v1948_v32 = vpop.f32.mrf.mxu2  ;;  %v1957_v45 = vpop.f32.mrf.mxu3 }
 0x109   :  { %2901 = vst [vmem:[#allocation3_spill] sm:$0xff] %v1948_v32 }
 0x10a   :  { %605 = vst.msk [vmem:[%s2865_s3 + $0x178] sm:$0xff] %vm115_vm1, %v1948_v32 }
 0x10b   :  { %v267_v2 = vpop.f32.mrf.mxu0  ;;  %2902 = vst [vmem:[#allocation4_spill] sm:$0xff] %v1957_v45  ;;  %v2187_v45 = vsel %vm115_vm1, %v1689_v41, 0.0 }
 0x10c   :  { %v440_v3 = vpop.f32.mrf.mxu1  ;;  %575 = vst.msk [vmem:[%s2865_s3 + $0x88] sm:$0xff] %vm115_vm1, %v267_v2  ;;  %v656_v4 = vsel %vm115_vm1, %v267_v2, 0.0  ;;  %v775_v7 = vmul.f32 %v267_v2, %v267_v2 }
 0x10d   :  { %v991_v8 = vsel %vm956_vm2, %v440_v3, 0.0  ;;  %v1110_v9 = vmul.f32 %v440_v3, %v440_v3  ;;  %v657_v12 = vadd.f32 %v656_v4, %v655_v49 }
 0x10e   :  { %v992_v13 = vadd.f32 %v991_v8, %v990_v50  ;;  %v855_v18 = vsel %vm115_vm1, %v775_v7, 0.0 }
 0x10f   :  { %v1190_v19 = vsel %vm956_vm2, %v1110_v9, 0.0  ;;  %v856_v20 = vadd.f32 %v855_v18, %v854_v59 }
 0x110   :  { %v1191_v21 = vadd.f32 %v1190_v19, %v1189_v62  ;;  %v1965_v62 = vpop.f32.mrf.mxu2  ;;  %v1974_v9 = vpop.f32.mrf.mxu3 }
 0x111   :  { %2903 = vst [vmem:[#allocation5_spill] sm:$0xff] %v1965_v62 }
 0x112   :  { %606 = vst.msk [vmem:[%s2865_s3 + $0x180] sm:$0xff] %vm115_vm1, %v1965_v62 }
 0x113   :  { %v270_v24 = vpop.f32.mrf.mxu0  ;;  %2904 = vst [vmem:[#allocation6_spill] sm:$0xff] %v1974_v9  ;;  %v2162_v9 = vsel %vm956_vm2, %v1641_v6, 0.0 }
 0x114   :  { %v443_v27 = vpop.f32.mrf.mxu1  ;;  %576 = vst.msk [vmem:[%s2865_s3 + $0x90] sm:$0xff] %vm115_vm1, %v270_v24  ;;  %v658_v28 = vsel %vm115_vm1, %v270_v24, 0.0  ;;  %v776_v29 = vmul.f32 %v270_v24, %v270_v24 }
 0x115   :  { %v993_v30 = vsel %vm956_vm2, %v443_v27, 0.0  ;;  %v1111_v31 = vmul.f32 %v443_v27, %v443_v27  ;;  %v659_v33 = vadd.f32 %v658_v28, %v657_v12 }
 0x116   :  { %v994_v38 = vadd.f32 %v993_v30, %v992_v13  ;;  %v857_v43 = vsel %vm115_vm1, %v776_v29, 0.0 }
 0x117   :  { %v1192_v44 = vsel %vm956_vm2, %v1111_v31, 0.0  ;;  %v858_v46 = vadd.f32 %v857_v43, %v856_v20 }
 0x118   :  { %v1193_v49 = vadd.f32 %v1192_v44, %v1191_v21  ;;  %v1982_v24 = vpop.f32.mrf.mxu2 }
 0x119   :  { %2905 = vst [vmem:[#allocation7_spill] sm:$0xff] %v1982_v24 }
 0x11a   :  { %607 = vst.msk [vmem:[%s2865_s3 + $0x188] sm:$0xff] %vm115_vm1, %v1982_v24 }
 0x11b   :  { %v272_v50 = vpop.f32.mrf.mxu0 }
 0x11c   :  { %v445_v51 = vpop.f32.mrf.mxu1  ;;  %577 = vst.msk [vmem:[%s2865_s3 + $0x98] sm:$0xff] %vm115_vm1, %v272_v50  ;;  %v660_v54 = vsel %vm115_vm1, %v272_v50, 0.0  ;;  %v777_v55 = vmul.f32 %v272_v50, %v272_v50 }
 0x11d   :  { %v995_v56 = vsel %vm956_vm2, %v445_v51, 0.0  ;;  %v1112_v59 = vmul.f32 %v445_v51, %v445_v51  ;;  %v661_v63 = vadd.f32 %v660_v54, %v659_v33 }
 0x11e   :  { %v996_v2 = vadd.f32 %v995_v56, %v994_v38  ;;  %v859_v3 = vsel %vm115_vm1, %v777_v55, 0.0  ;;  %v1999_v38 = vpop.f32.mrf.mxu3 }
 0x11f   :  { %v1194_v4 = vsel %vm956_vm2, %v1112_v59, 0.0  ;;  %v860_v7 = vadd.f32 %v859_v3, %v858_v46  ;;  %2906 = vst [vmem:[#allocation8_spill] sm:$0xff] %v1999_v38 }
 0x120   :  { %v1195_v8 = vadd.f32 %v1194_v4, %v1193_v49  ;;  %v2010_v46 = vpop.f32.mrf.mxu2 }
 0x121   :  { %2907 = vst [vmem:[#allocation9_spill] sm:$0xff] %v2010_v46 }
 0x122   :  { %608 = vst.msk [vmem:[%s2865_s3 + $0x190] sm:$0xff] %vm115_vm1, %v2010_v46  ;;  %v2130_v46 = vsel %vm115_vm1, %v1612_v52, 0.0 }
 0x123   :  { %v275_v12 = vpop.f32.mrf.mxu0 }
 0x124   :  { %v448_v13 = vpop.f32.mrf.mxu1  ;;  %578 = vst.msk [vmem:[%s2865_s3 + $0xa0] sm:$0xff] %vm115_vm1, %v275_v12  ;;  %v662_v18 = vsel %vm115_vm1, %v275_v12, 0.0  ;;  %v778_v19 = vmul.f32 %v275_v12, %v275_v12 }
 0x125   :  { %v997_v20 = vsel %vm956_vm2, %v448_v13, 0.0  ;;  %v1113_v21 = vmul.f32 %v448_v13, %v448_v13  ;;  %v1984_v27 = vadd.f32 %v662_v18, %v661_v63  ;;  %v790_v18 = vmul.f32 %v1589_v35, %v1589_v35 }
 0x126   :  { %v1986_v28 = vadd.f32 %v997_v20, %v996_v2  ;;  %v861_v29 = vsel %vm115_vm1, %v778_v19, 0.0  ;;  %v2026_v51 = vpop.f32.mrf.mxu3  ;;  %v1125_v19 = vmul.f32 %v1591_v36, %v1591_v36  ;;  %v791_v20 = vmul.f32 %v1612_v52, %v1612_v52 }
 0x127   :  { %v1196_v30 = vsel %vm956_vm2, %v1113_v21, 0.0  ;;  %v1995_v31 = vadd.f32 %v861_v29, %v860_v7  ;;  %2908 = vst [vmem:[#allocation10_spill] sm:$0xff] %v2026_v51  ;;  %v1126_v29 = vmul.f32 %v1614_v53, %v1614_v53  ;;  %v2151_v52 = vsel %vm115_vm1, %v1639_v5, 0.0 }
 0x128   :  { %v1997_v33 = vadd.f32 %v1196_v30, %v1195_v8  ;;  %v2028_v54 = vpop.f32.mrf.mxu2  ;;  %v2133_v38 = vsel %vm115_vm1, %v791_v20, 0.0  ;;  %v1129_v20 = vmul.f32 %v1691_v42, %v1691_v42 }
 0x129   :  { %2909 = vst [vmem:[#allocation11_spill] sm:$0xff] %v2028_v54 }
 0x12a   :  { %609 = vst.msk [vmem:[%s2865_s3 + $0x198] sm:$0xff] %vm115_vm1, %v2028_v54  ;;  %v793_v54 = vmul.f32 %v1662_v22, %v1662_v22 }
 0x12b   :  { %v2001_v43 = vpop.f32.mrf.mxu0 }
 0x12c   :  { %v2003_v44 = vpop.f32.mrf.mxu1  ;;  %579 = vst.msk [vmem:[%s2865_s3 + $0xa8] sm:$0xff] %vm115_vm1, %v2001_v43  ;;  %v2174_v62 = vsel %vm115_vm1, %v793_v54, 0.0  ;;  %v1131_v54 = vmul.f32 %v1741_v16, %v1741_v16 }
 0x12d   :  { %2917 = vst [vmem:[#allocation19_spill] sm:$0xff] %v2174_v62  ;;  %v2211_v62 = vsel %vm115_vm1, %v1712_v60, 0.0 }
 0x12e   :  { %v2046_v63 = vpop.f32.mrf.mxu3 }
 0x12f   :  { %2911 = vst [vmem:[#allocation13_spill] sm:$0xff] %v2046_v63  ;;  %v2119_v63 = vsel %vm956_vm2, %v1591_v36, 0.0  ;;  %v1128_v36 = vmul.f32 %v1664_v23, %v1664_v23 }
 0x130   :  { %v2044_v59 = vpop.f32.mrf.mxu2 }
 0x131   :  { %2910 = vst [vmem:[#allocation12_spill] sm:$0xff] %v2044_v59 }
 0x132   :  { %610 = vst.msk [vmem:[%s2865_s3 + $0x1a0] sm:$0xff] %vm115_vm1, %v2044_v59  ;;  %v1127_v59 = vmul.f32 %v1641_v6, %v1641_v6  ;;  %v1130_v6 = vmul.f32 %v1714_v61, %v1714_v61 }
 0x133   :  { %v2017_v49 = vpop.f32.mrf.mxu0 }
 0x134   :  { %v2019_v50 = vpop.f32.mrf.mxu1  ;;  %580 = vst.msk [vmem:[%s2865_s3 + $0xb0] sm:$0xff] %vm115_vm1, %v2017_v49 }
 0x136   :  { %v2069_v7 = vpop.f32.mrf.mxu3 }
 0x137   :  { %2913 = vst [vmem:[#allocation15_spill] sm:$0xff] %v2069_v7  ;;  %v792_v7 = vmul.f32 %v1639_v5, %v1639_v5  ;;  %v795_v5 = vmul.f32 %v1712_v60, %v1712_v60  ;;  %v2230_v60 = vsel %vm956_vm2, %v1130_v6, 0.0  ;;  %v2250_v6 = vsel %vm956_vm2, %v1131_v54, 0.0 }
 0x138   :  { %v2062_v4 = vpop.f32.mrf.mxu2  ;;  %2926 = vst [vmem:[#allocation28_spill] sm:$0xff] %v2250_v6  ;;  %v1134_v54 = vmul.f32 %v1814_v17, %v1814_v17 }
 0x139   :  { %2912 = vst [vmem:[#allocation14_spill] sm:$0xff] %v2062_v4  ;;  %v2158_v24 = vsel %vm115_vm1, %v792_v7, 0.0  ;;  %v2178_v7 = vsel %vm956_vm2, %v1664_v23, 0.0  ;;  %v2198_v23 = vsel %vm956_vm2, %v1691_v42, 0.0  ;;  %v2218_v42 = vsel %vm956_vm2, %v1714_v61, 0.0 }
 0x13a   :  { %611 = vst.msk [vmem:[%s2865_s3 + $0x1a8] sm:$0xff] %vm115_vm1, %v2062_v4  ;;  %v798_v61 = vmul.f32 %v1789_v57, %v1789_v57 }
 0x13b   :  { %v2035_v55 = vpop.f32.mrf.mxu0  ;;  %2922 = vst [vmem:[#allocation24_spill] sm:$0xff] %v2218_v42 }
 0x13c   :  { %v2037_v56 = vpop.f32.mrf.mxu1  ;;  %581 = vst.msk [vmem:[%s2865_s3 + $0xb8] sm:$0xff] %vm115_vm1, %v2035_v55 }
 0x13e   :  { %v2093_v21 = vpop.f32.mrf.mxu3 }
 0x13f   :  { %2915 = vst [vmem:[#allocation17_spill] sm:$0xff] %v2093_v21  ;;  %v2115_v21 = vsel %vm115_vm1, %v790_v18, 0.0  ;;  %v2137_v18 = vsel %vm956_vm2, %v1614_v53, 0.0  ;;  %v794_v53 = vmul.f32 %v1689_v41, %v1689_v41  ;;  %v797_v41 = vmul.f32 %v1762_v34, %v1762_v34 }
 0x140   :  { %v2080_v13 = vpop.f32.mrf.mxu2 }
 0x141   :  { %2914 = vst [vmem:[#allocation16_spill] sm:$0xff] %v2080_v13  ;;  %v2194_v32 = vsel %vm115_vm1, %v794_v53, 0.0  ;;  %v2214_v53 = vsel %vm115_vm1, %v795_v5, 0.0  ;;  %v2234_v5 = vsel %vm115_vm1, %v1739_v15, 0.0 }
 0x142   :  { %612 = vst.msk [vmem:[%s2865_s3 + $0x1b0] sm:$0xff] %vm115_vm1, %v2080_v13  ;;  %v2103_v13 = vsel %vm115_vm1, %v1589_v35, 0.0  ;;  %v2122_v35 = vsel %vm956_vm2, %v1125_v19, 0.0  ;;  %v2147_v19 = vsel %vm956_vm2, %v1126_v29, 0.0  ;;  %v2165_v29 = vsel %vm956_vm2, %v1127_v59, 0.0 }
 0x143   :  { %v2053_v2 = vpop.f32.mrf.mxu0  ;;  %v2183_v59 = vsel %vm956_vm2, %v1128_v36, 0.0  ;;  %2919 = vst [vmem:[#allocation21_spill] sm:$0xff] %v2194_v32  ;;  %v2201_v36 = vsel %vm956_vm2, %v1129_v20, 0.0  ;;  %v1132_v20 = vmul.f32 %v1764_v37, %v1764_v37 }
 0x144   :  { %v2055_v3 = vpop.f32.mrf.mxu1  ;;  %582 = vst.msk [vmem:[%s2865_s3 + $0xc0] sm:$0xff] %vm115_vm1, %v2053_v2 }
 0x145   :  { %2918 = vst [vmem:[#allocation20_spill] sm:$0xff] %v2183_v59  ;;  %v2273_v6 = vsel %vm956_vm2, %v1132_v20, 0.0 }
 0x146   :  { %2920 = vst [vmem:[#allocation22_spill] sm:$0xff] %v2201_v36  ;;  %v2227_v36 = vpop.f32.mrf.mxu3 }
 0x147   :  { %2921 = vst [vmem:[#allocation23_spill] sm:$0xff] %v2214_v53  ;;  %v1133_v53 = vmul.f32 %v1791_v58, %v1791_v58 }
 0x148   :  { %v2126_v51 = vpop.f32.mrf.mxu2  ;;  %2923 = vst [vmem:[#allocation25_spill] sm:$0xff] %v2227_v36  ;;  %v2247_v36 = vsel %vm956_vm2, %v1741_v16, 0.0  ;;  %v2268_v16 = vsel %vm956_vm2, %v1764_v37, 0.0  ;;  %v2288_v37 = vsel %vm956_vm2, %v1791_v58, 0.0  ;;  %v1115_v58 = vmul.f32 %v2019_v50, %v2019_v50 }
 0x149   :  { %2916 = vst [vmem:[#allocation18_spill] sm:$0xff] %v2126_v51  ;;  %v2291_v20 = vsel %vm956_vm2, %v1133_v53, 0.0  ;;  %v2309_v53 = vsel %vm956_vm2, %v1134_v54, 0.0  ;;  %v2329_v54 = vsel %vm956_vm2, %v1841_v40, 0.0 }
 0x14a   :  { %613 = vst.msk [vmem:[%s2865_s3 + $0x1b8] sm:$0xff] %vm115_vm1, %v2126_v51  ;;  %v2171_v51 = vsel %vm115_vm1, %v1662_v22, 0.0  ;;  %v796_v22 = vmul.f32 %v1739_v15, %v1739_v15  ;;  %v799_v15 = vmul.f32 %v1812_v14, %v1812_v14 }
 0x14b   :  { %v2071_v8 = vpop.f32.mrf.mxu0  ;;  %2928 = vst [vmem:[#allocation30_spill] sm:$0xff] %v2268_v16 }
 0x14c   :  { %v2073_v12 = vpop.f32.mrf.mxu1  ;;  %583 = vst.msk [vmem:[%s2865_s3 + $0xc8] sm:$0xff] %vm115_vm1, %v2071_v8  ;;  %v2243_v32 = vsel %vm115_vm1, %v796_v22, 0.0  ;;  %v2261_v22 = vsel %vm115_vm1, %v1762_v34, 0.0  ;;  %v779_v34 = vmul.f32 %v2001_v43, %v2001_v43 }
 0x14d   :  { %2925 = vst [vmem:[#allocation27_spill] sm:$0xff] %v2243_v32  ;;  %v2264_v32 = vsel %vm115_vm1, %v797_v41, 0.0  ;;  %v1114_v41 = vmul.f32 %v2003_v44, %v2003_v44 }
 0x14e   :  { %2927 = vst [vmem:[#allocation29_spill] sm:$0xff] %v2264_v32  ;;  %v2284_v32 = vsel %vm115_vm1, %v798_v61, 0.0  ;;  %v780_v61 = vmul.f32 %v2017_v49, %v2017_v49 }
 0x14f   :  { %2929 = vst [vmem:[#allocation31_spill] sm:$0xff] %v2273_v6  ;;  %v2298_v6 = vsel %vm115_vm1, %v799_v15, 0.0  ;;  %v664_v15 = vsel %vm115_vm1, %v2001_v43, 0.0  ;;  %v666_v43 = vsel %vm115_vm1, %v2017_v49, 0.0  ;;  %v2352_v49 = vpop.f32.mrf.mxu3 }
 0x150   :  { %v2240_v42 = vpop.f32.mrf.mxu2  ;;  %2931 = vst [vmem:[#allocation33_spill] sm:$0xff] %v2284_v32 }
 0x151   :  { %2924 = vst [vmem:[#allocation26_spill] sm:$0xff] %v2240_v42 }
 0x152   :  { %614 = vst.msk [vmem:[%s2865_s3 + $0x1c0] sm:$0xff] %vm115_vm1, %v2240_v42  ;;  %v2277_v42 = vsel %vm115_vm1, %v1789_v57, 0.0  ;;  %v2295_v57 = vsel %vm115_vm1, %v1812_v14, 0.0  ;;  %v2313_v14 = vsel %vm115_vm1, %v1839_v39, 0.0 }
 0x153   :  { %v2097_v30 = vpop.f32.mrf.mxu0  ;;  %2930 = vst [vmem:[#allocation32_spill] sm:$0xff] %v2277_v42  ;;  %v2302_v42 = vsel %vm956_vm2, %v1814_v17, 0.0  ;;  %v999_v17 = vsel %vm956_vm2, %v2003_v44, 0.0  ;;  %v781_v44 = vmul.f32 %v2035_v55, %v2035_v55 }
 0x154   :  { %v2099_v4 = vpop.f32.mrf.mxu1  ;;  %584 = vst.msk [vmem:[%s2865_s3 + $0xd0] sm:$0xff] %vm115_vm1, %v2097_v30  ;;  %v1000_v32 = vadd.f32 %v999_v17, %v1986_v28  ;;  %v1117_v28 = vmul.f32 %v2055_v3, %v2055_v3  ;;  %v1003_v17 = vsel %vm956_vm2, %v2037_v56, 0.0 }
 0x155   :  { %2932 = vst [vmem:[#allocation34_spill] sm:$0xff] %v2288_v37  ;;  %v1200_v37 = vsel %vm956_vm2, %v1115_v58, 0.0 }
 0x156   :  { %2933 = vst [vmem:[#allocation35_spill] sm:$0xff] %v2291_v20 }
 0x157   :  { %2934 = vst [vmem:[#allocation36_spill] sm:$0xff] %v2295_v57  ;;  %v865_v57 = vsel %vm115_vm1, %v780_v61, 0.0 }
 0x158   :  { %2935 = vst [vmem:[#allocation37_spill] sm:$0xff] %v2298_v6 }
 0x159   :  { %2936 = vst [vmem:[#allocation38_spill] sm:$0xff] %v2302_v42  ;;  %v2325_v42 = vmul.f32 %v1839_v39, %v1839_v39  ;;  %v1001_v39 = vsel %vm956_vm2, %v2019_v50, 0.0 }
 0x15a   :  { %2937 = vst [vmem:[#allocation39_spill] sm:$0xff] %v2309_v53  ;;  %v863_v53 = vsel %vm115_vm1, %v779_v34, 0.0  ;;  %v1116_v34 = vmul.f32 %v2037_v56, %v2037_v56  ;;  %v1002_v58 = vadd.f32 %v1001_v39, %v1000_v32  ;;  %v783_v32 = vmul.f32 %v2071_v8, %v2071_v8 }
 0x15b   :  { %v2205_v11 = vpop.f32.mrf.mxu0  ;;  %2938 = vst [vmem:[#allocation40_spill] sm:$0xff] %v2313_v14  ;;  %v1198_v14 = vsel %vm956_vm2, %v1114_v41, 0.0  ;;  %v665_v41 = vadd.f32 %v664_v15, %v1984_v27  ;;  %v864_v50 = vadd.f32 %v863_v53, %v1995_v31  ;;  %v782_v27 = vmul.f32 %v2053_v2, %v2053_v2 }
 0x15c   :  { %v2207_v59 = vpop.f32.mrf.mxu1  ;;  %585 = vst.msk [vmem:[%s2865_s3 + $0xd8] sm:$0xff] %vm115_vm1, %v2205_v11  ;;  %v1199_v16 = vadd.f32 %v1198_v14, %v1997_v33  ;;  %v668_v15 = vsel %vm115_vm1, %v2035_v55, 0.0  ;;  %v867_v31 = vsel %vm115_vm1, %v781_v44, 0.0  ;;  %v1202_v33 = vsel %vm956_vm2, %v1116_v34, 0.0 }
 0x15d   :  { %2939 = vst [vmem:[#allocation41_spill] sm:$0xff] %v2329_v54  ;;  %v2346_v54 = vpop.f32.mrf.mxu2  ;;  %v667_v61 = vadd.f32 %v666_v43, %v665_v41  ;;  %v670_v53 = vsel %vm115_vm1, %v2053_v2, 0.0  ;;  %v1005_v14 = vsel %vm956_vm2, %v2055_v3, 0.0  ;;  %v1118_v55 = vmul.f32 %v2073_v12, %v2073_v12 }
 0x15e   :  { %2940 = vst [vmem:[#allocation42_spill] sm:$0xff] %v2346_v54  ;;  %v1004_v56 = vadd.f32 %v1003_v17, %v1002_v58  ;;  %v784_v2 = vmul.f32 %v2097_v30, %v2097_v30  ;;  %v1119_v3 = vmul.f32 %v2099_v4, %v2099_v4  ;;  %v871_v58 = vsel %vm115_vm1, %v783_v32, 0.0 }
 0x15f   :  { %2941 = vst [vmem:[#allocation43_spill] sm:$0xff] %v2352_v49  ;;  %v866_v49 = vadd.f32 %v865_v57, %v864_v50  ;;  %v669_v43 = vadd.f32 %v668_v15, %v667_v61  ;;  %v1206_v15 = vsel %vm956_vm2, %v1118_v55, 0.0  ;;  %v785_v17 = vmul.f32 %v2205_v11, %v2205_v11  ;;  %v2412_v55 = vpop.f32.mrf.mxu3 }
 0x160   :  { %615 = vst.msk [vmem:[%s2865_s3 + $0x1c8] sm:$0xff] %vm115_vm1, %v2346_v54  ;;  %v1201_v54 = vadd.f32 %v1200_v37, %v1199_v16  ;;  %v869_v16 = vsel %vm115_vm1, %v782_v27, 0.0  ;;  %v1204_v37 = vsel %vm956_vm2, %v1117_v28, 0.0  ;;  %v1006_v50 = vadd.f32 %v1005_v14, %v1004_v56 }
 0x161   :  { %v868_v44 = vadd.f32 %v867_v31, %v866_v49  ;;  %v671_v41 = vadd.f32 %v670_v53, %v669_v43  ;;  %v672_v27 = vsel %vm115_vm1, %v2071_v8, 0.0  ;;  %v1007_v49 = vsel %vm956_vm2, %v2073_v12, 0.0 }
 0x162   :  { %v1203_v34 = vadd.f32 %v1202_v33, %v1201_v54  ;;  %v674_v8 = vsel %vm115_vm1, %v2097_v30, 0.0  ;;  %v1009_v12 = vsel %vm956_vm2, %v2099_v4, 0.0  ;;  %v1120_v31 = vmul.f32 %v2207_v59, %v2207_v59 }
 0x163   :  { %v2319_v6 = vpop.f32.mrf.mxu0  ;;  %v870_v28 = vadd.f32 %v869_v16, %v868_v44  ;;  %v673_v33 = vadd.f32 %v672_v27, %v671_v41  ;;  %v1008_v53 = vadd.f32 %v1007_v49, %v1006_v50  ;;  %v873_v14 = vsel %vm115_vm1, %v784_v2, 0.0 }
 0x164   :  { %v2321_v20 = vpop.f32.mrf.mxu1  ;;  %586 = vst.msk [vmem:[%s2865_s3 + $0xe0] sm:$0xff] %vm115_vm1, %v2319_v6  ;;  %v1205_v61 = vadd.f32 %v1204_v37, %v1203_v34  ;;  %v1208_v32 = vsel %vm956_vm2, %v1119_v3, 0.0  ;;  %v786_v30 = vmul.f32 %v2319_v6, %v2319_v6  ;;  %v676_v44 = vsel %vm115_vm1, %v2205_v11, 0.0 }
 0x165   :  { %v2393_v54 = vpop.f32.mrf.mxu2  ;;  %v872_v43 = vadd.f32 %v871_v58, %v870_v28  ;;  %v1121_v4 = vmul.f32 %v2321_v20, %v2321_v20  ;;  %v675_v16 = vadd.f32 %v674_v8, %v673_v33  ;;  %v1010_v37 = vadd.f32 %v1009_v12, %v1008_v53 }
 0x166   :  { %616 = vst.msk [vmem:[%s2865_s3 + $0x1d0] sm:$0xff] %vm115_vm1, %v2393_v54  ;;  %v1207_v56 = vadd.f32 %v1206_v15, %v1205_v61  ;;  %v1011_v34 = vsel %vm956_vm2, %v2207_v59, 0.0  ;;  %v875_v41 = vsel %vm115_vm1, %v785_v17, 0.0  ;;  %v1210_v50 = vsel %vm956_vm2, %v1120_v31, 0.0 }
 0x167   :  { %v874_v2 = vadd.f32 %v873_v14, %v872_v43  ;;  %v678_v28 = vsel %vm115_vm1, %v2319_v6, 0.0  ;;  %v1013_v61 = vsel %vm956_vm2, %v2321_v20, 0.0  ;;  %v677_v11 = vadd.f32 %v676_v44, %v675_v16 }
 0x168   :  { %v1209_v3 = vadd.f32 %v1208_v32, %v1207_v56  ;;  %v1012_v59 = vadd.f32 %v1011_v34, %v1010_v37  ;;  %v877_v8 = vsel %vm115_vm1, %v786_v30, 0.0  ;;  %v1212_v12 = vsel %vm956_vm2, %v1121_v4, 0.0 }
 0x169   :  { %v876_v53 = vadd.f32 %v875_v41, %v874_v2  ;;  %v679_v32 = vadd.f32 %v678_v28, %v677_v11  ;;  %v2449_v34 = vsel %vm115_vm1, %v2325_v42, 0.0  ;;  %v1135_v2 = vmul.f32 %v1841_v40, %v1841_v40 }
 0x16a   :  { %v1211_v14 = vadd.f32 %v1210_v50, %v1209_v3  ;;  %v1014_v43 = vadd.f32 %v1013_v61, %v1012_v59  ;;  %v2455_v50 = vpop.f32.mrf.mxu3 }
 0x16b   :  { %v297_v57 = vpop.f32.mrf.mxu0  ;;  %v878_v4 = vadd.f32 %v877_v8, %v876_v53  ;;  %v1136_v53 = vmul.f32 %v1864_v1, %v1864_v1 }
 0x16c   :  { %v470_v39 = vpop.f32.mrf.mxu1  ;;  %587 = vst.msk [vmem:[%s2865_s3 + $0xe8] sm:$0xff] %vm115_vm1, %v297_v57  ;;  %v787_v58 = vmul.f32 %v297_v57, %v297_v57  ;;  %v680_v6 = vsel %vm115_vm1, %v297_v57, 0.0  ;;  %v1213_v16 = vadd.f32 %v1212_v12, %v1211_v14 }
 0x16d   :  { %v1122_v15 = vmul.f32 %v470_v39, %v470_v39  ;;  %v2434_v17 = vpop.f32.mrf.mxu2  ;;  %v1015_v31 = vsel %vm956_vm2, %v470_v39, 0.0  ;;  %v681_v37 = vadd.f32 %v680_v6, %v679_v32 }
 0x16e   :  { %617 = vst.msk [vmem:[%s2865_s3 + $0x1d8] sm:$0xff] %vm115_vm1, %v2434_v17  ;;  %v879_v56 = vsel %vm115_vm1, %v787_v58, 0.0  ;;  %v1016_v44 = vadd.f32 %v1015_v31, %v1014_v43 }
 0x16f   :  { %v1214_v30 = vsel %vm956_vm2, %v1122_v15, 0.0 }
 0x170   :  { %v1215_v28 = vadd.f32 %v1214_v30, %v1213_v16  ;;  %v2487_v16 = vsel %vm956_vm2, %v1864_v1, 0.0  ;;  %v2503_v1 = vsel %vm115_vm1, %v1889_v25, 0.0 }
 0x173   :  { %v300_v27 = vpop.f32.mrf.mxu0 }
 0x174   :  { %v473_v49 = vpop.f32.mrf.mxu1  ;;  %588 = vst.msk [vmem:[%s2865_s3 + $0xf0] sm:$0xff] %vm115_vm1, %v300_v27  ;;  %v788_v20 = vmul.f32 %v300_v27, %v300_v27  ;;  %v682_v57 = vsel %vm115_vm1, %v300_v27, 0.0  ;;  %v880_v27 = vadd.f32 %v879_v56, %v878_v4  ;;  %v2483_v4 = vsel %vm115_vm1, %v1862_v0, 0.0 }
 0x175   :  { %v1123_v33 = vmul.f32 %v473_v49, %v473_v49  ;;  %v1017_v39 = vsel %vm956_vm2, %v473_v49, 0.0  ;;  %v683_v49 = vadd.f32 %v682_v57, %v681_v37  ;;  %v802_v37 = vmul.f32 %v1889_v25, %v1889_v25 }
 0x176   :  { %v881_v3 = vsel %vm115_vm1, %v788_v20, 0.0  ;;  %v1018_v61 = vadd.f32 %v1017_v39, %v1016_v44  ;;  %v2463_v20 = vpop.f32.mrf.mxu2  ;;  %v2479_v39 = vsel %vm956_vm2, %v1135_v2, 0.0  ;;  %v803_v25 = vmul.f32 %v1906_v47, %v1906_v47 }
 0x177   :  { %v1216_v41 = vsel %vm956_vm2, %v1123_v33, 0.0  ;;  %v882_v8 = vadd.f32 %v881_v3, %v880_v27  ;;  %v801_v33 = vmul.f32 %v1862_v0, %v1862_v0  ;;  %618 = vst.msk [vmem:[%s2865_s3 + $0x1e0] sm:$0xff] %vm115_vm1, %v2463_v20  ;;  %v2499_v0 = vsel %vm956_vm2, %v1136_v53, 0.0 }
 0x178   :  { %v1217_v12 = vadd.f32 %v1216_v41, %v1215_v28  ;;  %v1137_v41 = vmul.f32 %v1891_v26, %v1891_v26  ;;  %v2512_v27 = vsel %vm115_vm1, %v802_v37, 0.0  ;;  %v2516_v28 = vsel %vm956_vm2, %v1891_v26, 0.0 }
 0x179   :  { %v2496_v3 = vsel %vm115_vm1, %v801_v33, 0.0 }
 0x17a   :  { %v2531_v26 = vsel %vm956_vm2, %v1137_v41, 0.0 }
 0x17b   :  { %v302_v58 = vpop.f32.mrf.mxu0 }
 0x17c   :  { %v475_v15 = vpop.f32.mrf.mxu1  ;;  %589 = vst.msk [vmem:[%s2865_s3 + $0xf8] sm:$0xff] %vm115_vm1, %v302_v58  ;;  %v684_v42 = vsel %vm115_vm1, %v302_v58, 0.0  ;;  %v789_v40 = vmul.f32 %v302_v58, %v302_v58 }
 0x17d   :  { %v1019_v11 = vsel %vm956_vm2, %v475_v15, 0.0  ;;  %v1124_v59 = vmul.f32 %v475_v15, %v475_v15  ;;  %v685_v6 = vadd.f32 %v684_v42, %v683_v49  ;;  %v1138_v49 = vmul.f32 %v1908_v48, %v1908_v48 }
 0x17e   :  { %v1020_v31 = vadd.f32 %v1019_v11, %v1018_v61  ;;  %v883_v14 = vsel %vm115_vm1, %v789_v40, 0.0  ;;  %v2526_v61 = vpop.f32.mrf.mxu3  ;;  %v2528_v58 = vpop.f32.mrf.mxu2  ;;  %v2535_v15 = vsel %vm115_vm1, %v1906_v47, 0.0  ;;  %v2943_v40 = vld [vmem:[#allocation20_spill] sm:$0xff] }
 0x17f   :  { %v1218_v32 = vsel %vm956_vm2, %v1124_v59, 0.0  ;;  %v687_v43 = vadd.f32 %v2103_v13, %v685_v6  ;;  %v884_v56 = vadd.f32 %v883_v14, %v882_v8  ;;  %619 = vst.msk [vmem:[%s2865_s3 + $0x1e8] sm:$0xff] %vm115_vm1, %v2528_v58  ;;  %v2556_v59 = vsel %vm956_vm2, %v1138_v49, 0.0  ;;  %v2947_v14 = vld [vmem:[#allocation22_spill] sm:$0xff] }
 0x180   :  { %v1022_v30 = vadd.f32 %v2119_v63, %v1020_v31  ;;  %v1219_v57 = vadd.f32 %v1218_v32, %v1217_v12  ;;  %v2560_v8 = vsel %vm115_vm1, %v1931_v10, 0.0  ;;  %v2944_v12 = vld [vmem:[#allocation2_spill] sm:$0xff]  ;;  %v2945_v31 = vld [vmem:[#allocation21_spill] sm:$0xff] }
 0x181   :  { %v689_v13 = vadd.f32 %v2130_v46, %v687_v43  ;;  %v886_v44 = vadd.f32 %v2115_v21, %v884_v56  ;;  %v1139_v6 = vmul.f32 %v2944_v12, %v2944_v12  ;;  %v2573_v56 = vsel %vm956_vm2, %v2944_v12, 0.0  ;;  %v2953_v49 = vld [vmem:[#allocation30_spill] sm:$0xff] }
 0x182   :  { %v1024_v63 = vadd.f32 %v2137_v18, %v1022_v30  ;;  %v1221_v2 = vadd.f32 %v2122_v35, %v1219_v57  ;;  %v2949_v57 = vld [vmem:[#allocation4_spill] sm:$0xff]  ;;  %v2958_v12 = vld [vmem:[#allocation34_spill] sm:$0xff] }
 0x183   :  { %v691_v46 = vadd.f32 %v2151_v52, %v689_v13  ;;  %v888_v21 = vadd.f32 %v2133_v38, %v886_v44  ;;  %v1140_v37 = vmul.f32 %v2949_v57, %v2949_v57  ;;  %v2950_v13 = vld [vmem:[#allocation23_spill] sm:$0xff]  ;;  %v2584_v41 = vsel %vm956_vm2, %v1139_v6, 0.0 }
 0x184   :  { %v1026_v18 = vadd.f32 %v2162_v9, %v1024_v63  ;;  %v1223_v35 = vadd.f32 %v2147_v19, %v1221_v2 }
 0x185   :  { %v693_v52 = vadd.f32 %v2171_v51, %v691_v46  ;;  %v890_v38 = vadd.f32 %v2158_v24, %v888_v21  ;;  %v2539_v51 = vsel %vm956_vm2, %v1908_v48, 0.0  ;;  %v804_v24 = vmul.f32 %v1931_v10, %v1931_v10  ;;  %v2948_v10 = vld [vmem:[#allocation3_spill] sm:$0xff] }
 0x186   :  { %v1028_v9 = vadd.f32 %v2178_v7, %v1026_v18  ;;  %v1225_v19 = vadd.f32 %v2165_v29, %v1223_v35  ;;  %v2942_v7 = vld [vmem:[#allocation19_spill] sm:$0xff]  ;;  %v2553_v48 = vsel %vm115_vm1, %v803_v25, 0.0  ;;  %v805_v30 = vmul.f32 %v2948_v10, %v2948_v10  ;;  %v2951_v18 = vld [vmem:[#allocation5_spill] sm:$0xff] }
 0x187   :  { %v695_v29 = vadd.f32 %v2187_v45, %v693_v52  ;;  %v892_v42 = vadd.f32 %v2942_v7, %v890_v38  ;;  %v2569_v43 = vsel %vm115_vm1, %v804_v24, 0.0  ;;  %v2588_v46 = vsel %vm115_vm1, %v2948_v10, 0.0  ;;  %v2952_v25 = vld [vmem:[#allocation27_spill] sm:$0xff]  ;;  %v2954_v52 = vld [vmem:[#allocation28_spill] sm:$0xff]  ;;  %v2955_v7 = vld [vmem:[#allocation6_spill] sm:$0xff] }
 0x188   :  { %v1030_v47 = vadd.f32 %v2198_v23, %v1028_v9  ;;  %v1227_v11 = vadd.f32 %v2943_v40, %v1225_v19  ;;  %v2946_v23 = vld [vmem:[#allocation24_spill] sm:$0xff]  ;;  %v2592_v21 = vsel %vm956_vm2, %v2949_v57, 0.0  ;;  %v2600_v9 = vpop.f32.mrf.mxu2  ;;  %v2603_v19 = vsel %vm115_vm1, %v805_v30, 0.0  ;;  %v2957_v40 = vld [vmem:[#allocation29_spill] sm:$0xff] }
 0x189   :  { %v697_v45 = vadd.f32 %v2211_v62, %v695_v29  ;;  %v894_v33 = vadd.f32 %v2945_v31, %v892_v42  ;;  %v2606_v24 = vsel %vm956_vm2, %v1140_v37, 0.0  ;;  %v2610_v29 = vsel %vm115_vm1, %v2951_v18, 0.0  ;;  %620 = vst.msk [vmem:[%s2865_s3 + $0x1f0] sm:$0xff] %vm115_vm1, %v2600_v9  ;;  %v2956_v42 = vld [vmem:[#allocation32_spill] sm:$0xff] }
 0x18a   :  { %v1032_v53 = vadd.f32 %v2946_v23, %v1030_v47  ;;  %v1229_v32 = vadd.f32 %v2947_v14, %v1227_v11  ;;  %v2960_v14 = vld [vmem:[#allocation7_spill] sm:$0xff]  ;;  %v2961_v10 = vld [vmem:[#allocation8_spill] sm:$0xff] }
 0x18b   :  { %v699_v62 = vadd.f32 %v2234_v5, %v697_v45  ;;  %v896_v44 = vadd.f32 %v2950_v13, %v894_v33  ;;  %v806_v5 = vmul.f32 %v2951_v18, %v2951_v18  ;;  %v2959_v45 = vld [vmem:[#allocation31_spill] sm:$0xff]  ;;  %v2623_v33 = vpop.f32.mrf.mxu3  ;;  %v1142_v30 = vmul.f32 %v2961_v10, %v2961_v10  ;;  %v2962_v57 = vld [vmem:[#allocation36_spill] sm:$0xff] }
 0x18c   :  { %v1034_v63 = vadd.f32 %v2247_v36, %v1032_v53  ;;  %v1231_v2 = vadd.f32 %v2230_v60, %v1229_v32  ;;  %v2630_v53 = vsel %vm956_vm2, %v2955_v7, 0.0  ;;  %v807_v32 = vmul.f32 %v2960_v14, %v2960_v14 }
 0x18d   :  { %v701_v35 = vadd.f32 %v2261_v22, %v699_v62  ;;  %v898_v36 = vadd.f32 %v2952_v25, %v896_v44  ;;  %v1141_v22 = vmul.f32 %v2955_v7, %v2955_v7  ;;  %v2626_v23 = vsel %vm115_vm1, %v806_v5, 0.0  ;;  %v2963_v62 = vld [vmem:[#allocation33_spill] sm:$0xff]  ;;  %v2964_v44 = vld [vmem:[#allocation38_spill] sm:$0xff] }
 0x18e   :  { %v1036_v60 = vadd.f32 %v2953_v49, %v1034_v63  ;;  %v1233_v38 = vadd.f32 %v2954_v52, %v1231_v2  ;;  %v2965_v2 = vld [vmem:[#allocation35_spill] sm:$0xff]  ;;  %v2649_v25 = vsel %vm956_vm2, %v2961_v10, 0.0 }
 0x18f   :  { %v703_v47 = vadd.f32 %v2956_v42, %v701_v35  ;;  %v900_v11 = vadd.f32 %v2957_v40, %v898_v36  ;;  %v2641_v5 = vsel %vm956_vm2, %v1141_v22, 0.0  ;;  %v2645_v35 = vsel %vm115_vm1, %v2960_v14, 0.0  ;;  %v2966_v36 = vld [vmem:[#allocation9_spill] sm:$0xff]  ;;  %v2970_v40 = vld [vmem:[#allocation39_spill] sm:$0xff] }
 0x190   :  { %v1038_v6 = vadd.f32 %v2958_v12, %v1036_v60  ;;  %v1235_v31 = vadd.f32 %v2959_v45, %v1233_v38  ;;  %v808_v49 = vmul.f32 %v2966_v36, %v2966_v36  ;;  %v2967_v60 = vld [vmem:[#allocation40_spill] sm:$0xff]  ;;  %v2968_v38 = vld [vmem:[#allocation37_spill] sm:$0xff]  ;;  %v2661_v12 = vsel %vm956_vm2, %v1142_v30, 0.0  ;;  %v2971_v45 = vld [vmem:[#allocation10_spill] sm:$0xff] }
 0x191   :  { %v705_v37 = vadd.f32 %v2962_v57, %v703_v47  ;;  %v902_v13 = vadd.f32 %v2963_v62, %v900_v11  ;;  %v2969_v42 = vld [vmem:[#allocation41_spill] sm:$0xff]  ;;  %v2658_v11 = vsel %vm115_vm1, %v807_v32, 0.0  ;;  %v2673_v32 = vpop.f32.mrf.mxu2  ;;  %v1057_v62 = vsel %vm956_vm2, %v2971_v45, 0.0 }
 0x192   :  { %v1040_v63 = vadd.f32 %v2964_v44, %v1038_v6  ;;  %v1237_v18 = vadd.f32 %v2965_v2, %v1235_v31  ;;  %v2665_v6 = vsel %vm115_vm1, %v2966_v36, 0.0  ;;  %v1143_v31 = vmul.f32 %v2971_v45, %v2971_v45  ;;  %621 = vst.msk [vmem:[%s2865_s3 + $0x1f8] sm:$0xff] %vm115_vm1, %v2673_v32 }
 0x193   :  { %v707_v52 = vadd.f32 %v2967_v60, %v705_v37  ;;  %v904_v7 = vadd.f32 %v2968_v38, %v902_v13  ;;  %v2676_v30 = vsel %vm115_vm1, %v808_v49, 0.0  ;;  %v2972_v13 = vld [vmem:[#allocation11_spill] sm:$0xff]  ;;  %v2974_v60 = vld [vmem:[#allocation12_spill] sm:$0xff] }
 0x194   :  { %v1042_v47 = vadd.f32 %v2969_v42, %v1040_v63  ;;  %v1239_v22 = vadd.f32 %v2970_v40, %v1237_v18  ;;  %v809_v44 = vmul.f32 %v2972_v13, %v2972_v13  ;;  %v2973_v63 = vld [vmem:[#allocation13_spill] sm:$0xff]  ;;  %v1256_v18 = vsel %vm956_vm2, %v1143_v31, 0.0  ;;  %v2975_v40 = vld [vmem:[#allocation15_spill] sm:$0xff] }
 0x195   :  { %v709_v14 = vadd.f32 %v2483_v4, %v707_v52  ;;  %v906_v10 = vadd.f32 %v2449_v34, %v904_v7  ;;  %v1144_v4 = vmul.f32 %v2973_v63, %v2973_v63  ;;  %v724_v36 = vsel %vm115_vm1, %v2972_v13, 0.0 }
 0x196   :  { %v1044_v57 = vadd.f32 %v2487_v16, %v1042_v47  ;;  %v1241_v37 = vadd.f32 %v2479_v39, %v1239_v22  ;;  %v1059_v49 = vsel %vm956_vm2, %v2973_v63, 0.0  ;;  %v810_v52 = vmul.f32 %v2974_v60, %v2974_v60 }
 0x197   :  { %v908_v34 = vadd.f32 %v2496_v3, %v906_v10  ;;  %v711_v39 = vadd.f32 %v2503_v1, %v709_v14  ;;  %v923_v7 = vsel %vm115_vm1, %v809_v44, 0.0  ;;  %v1258_v42 = vsel %vm956_vm2, %v1144_v4, 0.0  ;;  %v2976_v14 = vld [vmem:[#allocation14_spill] sm:$0xff] }
 0x198   :  { %v1243_v16 = vadd.f32 %v2499_v0, %v1241_v37  ;;  %v1046_v2 = vadd.f32 %v2516_v28, %v1044_v57  ;;  %v2704_v28 = vpop.f32.mrf.mxu3  ;;  %v726_v47 = vsel %vm115_vm1, %v2974_v60, 0.0  ;;  %v1145_v22 = vmul.f32 %v2975_v40, %v2975_v40  ;;  %v2977_v57 = vld [vmem:[#allocation17_spill] sm:$0xff] }
 0x199   :  { %v713_v38 = vadd.f32 %v2535_v15, %v711_v39  ;;  %v910_v3 = vadd.f32 %v2512_v27, %v908_v34  ;;  %v925_v45 = vsel %vm115_vm1, %v810_v52, 0.0  ;;  %v1061_v31 = vsel %vm956_vm2, %v2975_v40, 0.0  ;;  %v2981_v40 = vld [vmem:[#allocation43_spill] sm:$0xff] }
 0x19a   :  { %v1048_v1 = vadd.f32 %v2539_v51, %v1046_v2  ;;  %v1245_v0 = vadd.f32 %v2531_v26, %v1243_v16  ;;  %v811_v10 = vmul.f32 %v2976_v14, %v2976_v14  ;;  %v1146_v37 = vmul.f32 %v2977_v57, %v2977_v57  ;;  %v2978_v16 = vld [vmem:[#allocation16_spill] sm:$0xff] }
 0x19b   :  { %v715_v15 = vadd.f32 %v2560_v8, %v713_v38  ;;  %v912_v27 = vadd.f32 %v2553_v48, %v910_v3  ;;  %v728_v44 = vsel %vm115_vm1, %v2976_v14, 0.0  ;;  %v1063_v63 = vsel %vm956_vm2, %v2977_v57, 0.0 }
 0x19c   :  { %v1050_v51 = vadd.f32 %v2573_v56, %v1048_v1  ;;  %v1247_v26 = vadd.f32 %v2556_v59, %v1245_v0  ;;  %v1260_v59 = vsel %vm956_vm2, %v1145_v22, 0.0  ;;  %v1370_v39 = vmov 0.0   ;;  %v2980_v1 = vld [vmem:[#allocation18_spill] sm:$0xff] }
 0x19d   :  { %v717_v13 = vadd.f32 %v2588_v46, %v715_v15  ;;  %v914_v8 = vadd.f32 %v2569_v43, %v912_v27  ;;  %622 = vst.msk [vmem:[%s2866_s4] sm:$0xff] %vm115_vm1, %v1370_v39  ;;  %v812_v2 = vmul.f32 %v2978_v16, %v2978_v16  ;;  %v730_v38 = vsel %vm115_vm1, %v2978_v16, 0.0 }
 0x19e   :  { %v1052_v48 = vadd.f32 %v2592_v21, %v1050_v51  ;;  %v1249_v56 = vadd.f32 %v2584_v41, %v1247_v26  ;;  %v927_v41 = vsel %vm115_vm1, %v811_v10, 0.0  ;;  %v1262_v21 = vsel %vm956_vm2, %v1146_v37, 0.0  ;;  %957 = vst.msk [vmem:[%s2867_s5] sm:$0xff] %vm956_vm2, %v1370_v39  ;;  %v2982_v37 = vld [vmem:[#allocation26_spill] sm:$0xff] }
 0x19f   :  { %v719_v4 = vadd.f32 %v2610_v29, %v717_v13  ;;  %v916_v34 = vadd.f32 %v2603_v19, %v914_v8  ;;  %v2979_v29 = vld [vmem:[#allocation25_spill] sm:$0xff]  ;;  %v813_v0 = vmul.f32 %v2980_v1, %v2980_v1  ;;  %v1148_v22 = vmul.f32 %v2981_v40, %v2981_v40 }
 0x1a0   :  { %v1054_v46 = vadd.f32 %v2630_v53, %v1052_v48  ;;  %v1251_v43 = vadd.f32 %v2606_v24, %v1249_v56  ;;  %v1147_v19 = vmul.f32 %v2979_v29, %v2979_v29  ;;  %v1065_v3 = vsel %vm956_vm2, %v2979_v29, 0.0 }
 0x1a1   :  { %v721_v24 = vadd.f32 %v2645_v35, %v719_v4  ;;  %v918_v53 = vadd.f32 %v2626_v23, %v916_v34  ;;  %v929_v27 = vsel %vm115_vm1, %v812_v2, 0.0  ;;  %v732_v26 = vsel %vm115_vm1, %v2980_v1, 0.0 }
 0x1a2   :  { %v1056_v60 = vadd.f32 %v2649_v25, %v1054_v46  ;;  %v1253_v52 = vadd.f32 %v2641_v5, %v1251_v43  ;;  %v2765_v5 = vpop.f32.mrf.mxu3  ;;  %v1264_v51 = vsel %vm956_vm2, %v1147_v19, 0.0  ;;  %v1067_v14 = vsel %vm956_vm2, %v2981_v40, 0.0 }
 0x1a3   :  { %v723_v35 = vadd.f32 %v2665_v6, %v721_v24  ;;  %v920_v23 = vadd.f32 %v2658_v11, %v918_v53  ;;  %v814_v13 = vmul.f32 %v2982_v37, %v2982_v37  ;;  %v1149_v8 = vmul.f32 %v2412_v55, %v2412_v55 }
 0x1a4   :  { %v1058_v15 = vadd.f32 %v1057_v62, %v1056_v60  ;;  %v1255_v25 = vadd.f32 %v2661_v12, %v1253_v52  ;;  %v931_v62 = vsel %vm115_vm1, %v813_v0, 0.0  ;;  %v1266_v12 = vsel %vm956_vm2, %v1148_v22, 0.0 }
 0x1a5   :  { %v725_v10 = vadd.f32 %v724_v36, %v723_v35  ;;  %v922_v6 = vadd.f32 %v2676_v30, %v920_v23  ;;  %v734_v36 = vsel %vm115_vm1, %v2982_v37, 0.0  ;;  %v1069_v30 = vsel %vm956_vm2, %v2412_v55, 0.0 }
 0x1a6   :  { %v1060_v57 = vadd.f32 %v1059_v49, %v1058_v15  ;;  %v1257_v11 = vadd.f32 %v1256_v18, %v1255_v25  ;;  %v2983_v18 = vld [vmem:[#allocation42_spill] sm:$0xff]  ;;  %v1150_v46 = vmul.f32 %v2455_v50, %v2455_v50  ;;  %v816_v55 = vmul.f32 %v2393_v54, %v2393_v54 }
 0x1a7   :  { %v727_v48 = vadd.f32 %v726_v47, %v725_v10  ;;  %v924_v56 = vadd.f32 %v923_v7, %v922_v6  ;;  %v815_v49 = vmul.f32 %v2983_v18, %v2983_v18  ;;  %v933_v7 = vsel %vm115_vm1, %v814_v13, 0.0 }
 0x1a8   :  { %v1062_v4 = vadd.f32 %v1061_v31, %v1060_v57  ;;  %v1259_v34 = vadd.f32 %v1258_v42, %v1257_v11  ;;  %v1268_v42 = vsel %vm956_vm2, %v1149_v8, 0.0  ;;  %v736_v47 = vsel %vm115_vm1, %v2983_v18, 0.0 }
 0x1a9   :  { %v729_v43 = vadd.f32 %v728_v44, %v727_v48  ;;  %v926_v39 = vadd.f32 %v925_v45, %v924_v56  ;;  %v935_v53 = vsel %vm115_vm1, %v815_v49, 0.0  ;;  %v1071_v45 = vsel %vm956_vm2, %v2455_v50, 0.0 }
 0x1aa   :  { %v1064_v16 = vadd.f32 %v1063_v63, %v1062_v4  ;;  %v1261_v2 = vadd.f32 %v1260_v59, %v1259_v34  ;;  %v1270_v59 = vsel %vm956_vm2, %v1150_v46, 0.0  ;;  %v1151_v44 = vmul.f32 %v2526_v61, %v2526_v61  ;;  %v553_v0 = vpop.f32.mrf.mxu3 }
 0x1ab   :  { %v731_v31 = vadd.f32 %v730_v38, %v729_v43  ;;  %v928_v29 = vadd.f32 %v927_v41, %v926_v39  ;;  %v738_v41 = vsel %vm115_vm1, %v2393_v54, 0.0  ;;  %v1073_v38 = vsel %vm956_vm2, %v2526_v61, 0.0 }
 0x1ac   :  { %v1066_v19 = vadd.f32 %v1065_v3, %v1064_v16  ;;  %v1263_v24 = vadd.f32 %v1262_v21, %v1261_v2  ;;  %v937_v21 = vsel %vm115_vm1, %v816_v55, 0.0  ;;  %v817_v50 = vmul.f32 %v2434_v17, %v2434_v17 }
 0x1ad   :  { %v733_v63 = vadd.f32 %v732_v26, %v731_v31  ;;  %v930_v60 = vadd.f32 %v929_v27, %v928_v29  ;;  %v1272_v23 = vsel %vm956_vm2, %v1151_v44, 0.0  ;;  %v740_v15 = vsel %vm115_vm1, %v2434_v17, 0.0 }
 0x1ae   :  { %v1068_v52 = vadd.f32 %v1067_v14, %v1066_v19  ;;  %v1265_v1 = vadd.f32 %v1264_v51, %v1263_v24  ;;  %v1075_v54 = vsel %vm956_vm2, %v2623_v33, 0.0  ;;  %v1152_v25 = vmul.f32 %v2623_v33, %v2623_v33 }
 0x1af   :  { %v735_v3 = vadd.f32 %v734_v36, %v733_v63  ;;  %v932_v40 = vadd.f32 %v931_v62, %v930_v60  ;;  %v939_v14 = vsel %vm115_vm1, %v817_v50, 0.0  ;;  %v818_v10 = vmul.f32 %v2463_v20, %v2463_v20 }
 0x1b0   :  { %v1070_v22 = vadd.f32 %v1069_v30, %v1068_v52  ;;  %v1267_v35 = vadd.f32 %v1266_v12, %v1265_v1  ;;  %v1153_v6 = vmul.f32 %v2704_v28, %v2704_v28  ;;  %v819_v17 = vmul.f32 %v2528_v58, %v2528_v58 }
 0x1b1   :  { %v934_v27 = vadd.f32 %v933_v7, %v932_v40  ;;  %v737_v51 = vadd.f32 %v736_v47, %v735_v3  ;;  %v1274_v33 = vsel %vm956_vm2, %v1152_v25, 0.0  ;;  %v742_v37 = vsel %vm115_vm1, %v2463_v20, 0.0 }
 0x1b2   :  { %v1269_v61 = vadd.f32 %v1268_v42, %v1267_v35  ;;  %v1072_v26 = vadd.f32 %v1071_v45, %v1070_v22  ;;  %v1077_v13 = vsel %vm956_vm2, %v2704_v28, 0.0  ;;  %v1154_v8 = vmul.f32 %v2765_v5, %v2765_v5  ;;  %v555_v39 = vpop.f32.mrf.mxu3 }
 0x1b3   :  { %v936_v57 = vadd.f32 %v935_v53, %v934_v27  ;;  %v739_v62 = vadd.f32 %v738_v41, %v737_v51  ;;  %v941_v36 = vsel %vm115_vm1, %v818_v10, 0.0  ;;  %v1276_v30 = vsel %vm956_vm2, %v1153_v6, 0.0 }
 0x1b4   :  { %v1271_v11 = vadd.f32 %v1270_v59, %v1269_v61  ;;  %v1074_v12 = vadd.f32 %v1073_v38, %v1072_v26  ;;  %v744_v18 = vsel %vm115_vm1, %v2528_v58, 0.0  ;;  %v943_v49 = vsel %vm115_vm1, %v819_v17, 0.0 }
 0x1b5   :  { %v938_v48 = vadd.f32 %v937_v21, %v936_v57  ;;  %v741_v4 = vadd.f32 %v740_v15, %v739_v62  ;;  %v1079_v16 = vsel %vm956_vm2, %v2765_v5, 0.0  ;;  %v1278_v2 = vsel %vm956_vm2, %v1154_v8, 0.0 }
 0x1b6   :  { %v1273_v56 = vadd.f32 %v1272_v23, %v1271_v11  ;;  %v1076_v34 = vadd.f32 %v1075_v54, %v1074_v12  ;;  %v820_v7 = vmul.f32 %v2600_v9, %v2600_v9  ;;  %v1155_v42 = vmul.f32 %v553_v0, %v553_v0 }
 0x1b7   :  { %v940_v20 = vadd.f32 %v939_v14, %v938_v48  ;;  %v743_v43 = vadd.f32 %v742_v37, %v741_v4  ;;  %v746_v29 = vsel %vm115_vm1, %v2600_v9, 0.0  ;;  %v1081_v19 = vsel %vm956_vm2, %v553_v0, 0.0 }
 0x1b8   :  { %v1275_v46 = vadd.f32 %v1274_v33, %v1273_v56  ;;  %v1078_v28 = vadd.f32 %v1077_v13, %v1076_v34  ;;  %v821_v24 = vmul.f32 %v2673_v32, %v2673_v32  ;;  %v1156_v53 = vmul.f32 %v555_v39, %v555_v39 }
 0x1b9   :  { %v942_v47 = vadd.f32 %v941_v36, %v940_v20  ;;  %v745_v31 = vadd.f32 %v744_v18, %v743_v43  ;;  %v945_v63 = vsel %vm115_vm1, %v820_v7, 0.0  ;;  %v1280_v60 = vsel %vm956_vm2, %v1155_v42, 0.0 }
 0x1ba   :  { %v1277_v55 = vadd.f32 %v1276_v30, %v1275_v46  ;;  %v1080_v58 = vadd.f32 %v1079_v16, %v1078_v28  ;;  %v748_v52 = vsel %vm115_vm1, %v2673_v32, 0.0  ;;  %v1083_v1 = vsel %vm956_vm2, %v555_v39, 0.0 }
 0x1bb   :  { %v944_v5 = vadd.f32 %v943_v49, %v942_v47  ;;  %v747_v59 = vadd.f32 %v746_v29, %v745_v31  ;;  %v947_v38 = vsel %vm115_vm1, %v821_v24, 0.0  ;;  %v1282_v50 = vsel %vm956_vm2, %v1156_v53, 0.0 }
 0x1bc   :  { %v1279_v45 = vadd.f32 %v1278_v2, %v1277_v55  ;;  %v1082_v44 = vadd.f32 %v1081_v19, %v1080_v58 }
 0x1bd   :  { %v946_v9 = vadd.f32 %v945_v63, %v944_v5  ;;  %v749_v0 = vadd.f32 %v748_v52, %v747_v59 }
 0x1be   :  { %v1281_v41 = vadd.f32 %v1280_v60, %v1279_v45  ;;  %v1084_v21 = vadd.f32 %v1083_v1, %v1082_v44 }
 0x1bf   :  { %v750_v3 = vrot.slane %v749_v0, 4  ;;  %v948_v40 = vadd.f32 %v947_v38, %v946_v9 }
 0x1c0   :  { %v1085_v22 = vrot.slane %v1084_v21, 4  ;;  %v1283_v35 = vadd.f32 %v1282_v50, %v1281_v41 }
 0x1c1   :  { %v751_v23 = vadd.f32 %v750_v3, %v749_v0  ;;  %v949_v15 = vrot.slane %v948_v40, 4 }
 0x1c2   :  { %v1086_v54 = vadd.f32 %v1085_v22, %v1084_v21  ;;  %v1284_v25 = vrot.slane %v1283_v35, 4 }
 0x1c3   :  { %v752_v27 = vrot.slane %v751_v23, 2  ;;  %v950_v32 = vadd.f32 %v949_v15, %v948_v40 }
 0x1c4   :  { %v1087_v61 = vrot.slane %v1086_v54, 2  ;;  %v1285_v51 = vadd.f32 %v1284_v25, %v1283_v35 }
 0x1c5   :  { %v753_v26 = vadd.f32 %v752_v27, %v751_v23  ;;  %v951_v14 = vrot.slane %v950_v32, 2 }
 0x1c6   :  { %v1088_v10 = vadd.f32 %v1087_v61, %v1086_v54  ;;  %v1286_v6 = vrot.slane %v1285_v51, 2 }
 0x1c7   :  { %v754_v17 = vrot.slane %v753_v26, 1  ;;  %v952_v57 = vadd.f32 %v951_v14, %v950_v32 }
 0x1c8   :  { %v1089_v11 = vrot.slane %v1088_v10, 1  ;;  %v1287_v62 = vadd.f32 %v1286_v6, %v1285_v51 }
 0x1c9   :  { %v755_v12 = vadd.f32 %v754_v17, %v753_v26  ;;  %v953_v33 = vrot.slane %v952_v57, 1 }
 0x1ca   :  { %v1090_v37 = vadd.f32 %v1089_v11, %v1088_v10  ;;  %v1288_v13 = vrot.slane %v1287_v62, 1 }
 0x1cb   :  { %757 = vst.msk [vmem:[%s2866_s4] sm:$0x1] %vm756_vm3, %v755_v12  ;;  %v954_v8 = vadd.f32 %v953_v33, %v952_v57 }
 0x1cc   :  { %v1289_v48 = vadd.f32 %v1288_v13, %v1287_v62  ;;  %1092 = vst.msk [vmem:[%s2867_s5] sm:$0x1] %vm1091_vm4, %v1090_v37 }
 0x1cd   :  { %955 = vst.msk [vmem:[%s2866_s4 + $0x1] sm:$0x1] %vm756_vm3, %v954_v8 }
 0x1ce   :  { %1290 = vst.msk [vmem:[%s2867_s5 + $0x1] sm:$0x1] %vm1091_vm4, %v1289_v48 }

// kernel: bottleneck_forward.6
= control target key start
LH: loop header
LB: loop body
LE: loop exit
PB: predicated region body
PF: predicated region fallthrough
CT: control target
= control target key end

     0   :  { %vm407_vm0 = vcmask 1041408   ;;  %vm310_vm1 = vcmask 31744   ;;  %vm580_vm2 = vcmask 130048   ;;  %vm779_vm3 = vcmask 122880   ;;  %s2104_s2 = inlined_call_operand.vmem [shape: bf16[4,16], index: 2, kind: input, shape index: {}]   ;;  %s2105_s0 = inlined_call_operand.vmem [shape: f32[512,4], index: 0, kind: input, shape index: {}]   ;;  %s2106_s1 = inlined_call_operand.vmem [shape: f32[2,4], index: 1, kind: input, shape index: {}]   ;;  %s2107_s3 = inlined_call_operand.vmem [shape: f32[512,16], index: 3, kind: output, shape index: {0}]   ;;  %s2108_s4 = inlined_call_operand.vmem [shape: f32[8,16], index: 4, kind: output, shape index: {1}]  }
   0x1   :  { %v309_v0 = vld [vmem:[%s2104_s2] sm:$0x3]  ;;  %v18_v2 = vld [vmem:[%s2105_s0 + $0x8] sm:$0xff]  ;;  %v19_v18 = vld [vmem:[%s2105_s0 + $0x10] sm:$0xff] }
   0x2   :  { %v17_v1 = vld [vmem:[%s2105_s0] sm:$0xff]  ;;  %v409_v3 = vsel %vm407_vm0, %v309_v0, 0  ;;  %v34_v9 = vld [vmem:[%s2105_s0 + $0x88] sm:$0xff]  ;;  %v20_v19 = vld [vmem:[%s2105_s0 + $0x18] sm:$0xff] }
   0x3   :  { %v1063_v4 = vld [vmem:[%s2106_s1] ss:$0 sm:$0xff]  ;;  %418 = vmatpush.bf16.msra.mxu0 %v409_v3  ;;  %v1068_v5 = vld [vmem:[%s2106_s1 + $0x1] ss:$0 sm:$0xff]  ;;  %1019 = vmatpush.bf16.msra.mxu1 %v409_v3  ;;  %v35_v24 = vld [vmem:[%s2105_s0 + $0x90] sm:$0xff] }
   0x4   :  { %v83_v6 = vmul.f32 %v1063_v4, %v17_v1  ;;  %v84_v7 = vmul.f32 %v1063_v4, %v18_v2  ;;  %v33_v8 = vld [vmem:[%s2105_s0 + $0x80] sm:$0xff]  ;;  %1020 = vmatpush.bf16.msra.mxu2 %v409_v3  ;;  %v100_v11 = vmul.f32 %v1063_v4, %v34_v9  ;;  %1021 = vmatpush.bf16.msra.mxu3 %v409_v3  ;;  %v36_v25 = vld [vmem:[%s2105_s0 + $0x98] sm:$0xff]  ;;  %v50_v39 = vld [vmem:[%s2105_s0 + $0x108] sm:$0xff] }
   0x5   :  { %v99_v10 = vmul.f32 %v1063_v4, %v33_v8  ;;  %v85_v26 = vmul.f32 %v1063_v4, %v19_v18  ;;  %v86_v27 = vmul.f32 %v1063_v4, %v20_v19  ;;  %v101_v28 = vmul.f32 %v1063_v4, %v35_v24  ;;  %v49_v38 = vld [vmem:[%s2105_s0 + $0x100] sm:$0xff]  ;;  %v22_v46 = vld [vmem:[%s2105_s0 + $0x28] sm:$0xff]  ;;  %v51_v1 = vld [vmem:[%s2105_s0 + $0x110] sm:$0xff] }
   0x6   :  { %v149_v12 = vadd.f32 %v1068_v5, %v83_v6  ;;  %v150_v13 = vadd.f32 %v1068_v5, %v84_v7  ;;  %v166_v15 = vadd.f32 %v1068_v5, %v100_v11  ;;  %v102_v29 = vmul.f32 %v1063_v4, %v36_v25  ;;  %v21_v45 = vld [vmem:[%s2105_s0 + $0x20] sm:$0xff]  ;;  %v38_v51 = vld [vmem:[%s2105_s0 + $0xa8] sm:$0xff]  ;;  %v52_v2 = vld [vmem:[%s2105_s0 + $0x118] sm:$0xff] }
   0x7   :  { %v165_v14 = vadd.f32 %v1068_v5, %v99_v10  ;;  %v151_v30 = vadd.f32 %v1068_v5, %v85_v26  ;;  %v152_v31 = vadd.f32 %v1068_v5, %v86_v27  ;;  %v167_v32 = vadd.f32 %v1068_v5, %v101_v28  ;;  %v37_v50 = vld [vmem:[%s2105_s0 + $0xa0] sm:$0xff]  ;;  %v23_v10 = vld [vmem:[%s2105_s0 + $0x30] sm:$0xff]  ;;  %v24_v11 = vld [vmem:[%s2105_s0 + $0x38] sm:$0xff] }
   0x8   :  { %v213_v16 = vmax.f32 %v149_v12, 0.0  ;;  %v214_v17 = vmax.f32 %v150_v13, 0.0  ;;  %v230_v21 = vmax.f32 %v166_v15, 0.0  ;;  %v168_v33 = vadd.f32 %v1068_v5, %v102_v29  ;;  %v39_v15 = vld [vmem:[%s2105_s0 + $0xb0] sm:$0xff] }
   0x9   :  { %v229_v20 = vmax.f32 %v165_v14, 0.0  ;;  %v215_v34 = vmax.f32 %v151_v30, 0.0  ;;  %v216_v35 = vmax.f32 %v152_v31, 0.0  ;;  %v231_v36 = vmax.f32 %v167_v32, 0.0  ;;  %v53_v30 = vld [vmem:[%s2105_s0 + $0x120] sm:$0xff]  ;;  %v54_v31 = vld [vmem:[%s2105_s0 + $0x128] sm:$0xff] }
   0xa   :  { %v277_v22 = vpack.c.bf16 %v214_v17, %v213_v16  ;;  %v232_v37 = vmax.f32 %v168_v33, 0.0  ;;  %v115_v40 = vmul.f32 %v1063_v4, %v49_v38  ;;  %v116_v41 = vmul.f32 %v1063_v4, %v50_v39  ;;  %v40_v16 = vld [vmem:[%s2105_s0 + $0xb8] sm:$0xff]  ;;  %v65_v32 = vld [vmem:[%s2105_s0 + $0x180] sm:$0xff] }
   0xb   :  { %v285_v23 = vpack.c.bf16 %v230_v21, %v229_v20  ;;  %v278_v42 = vpack.c.bf16 %v216_v35, %v215_v34  ;;  %v87_v52 = vmul.f32 %v1063_v4, %v21_v45  ;;  %v88_v53 = vmul.f32 %v1063_v4, %v22_v46  ;;  %v66_v35 = vld [vmem:[%s2105_s0 + $0x188] sm:$0xff] }
   0xc   :  { %987 = vmatmul.msk.bf16.vlgmr.msra.gmra.mxu0 %vm310_vm1, %v277_v22  ;;  %v181_v43 = vadd.f32 %v1068_v5, %v115_v40  ;;  %v182_v44 = vadd.f32 %v1068_v5, %v116_v41  ;;  %v286_v47 = vpack.c.bf16 %v232_v37, %v231_v36  ;;  %v103_v55 = vmul.f32 %v1063_v4, %v37_v50  ;;  %v41_v50 = vld [vmem:[%s2105_s0 + $0xc0] sm:$0xff] }
   0xd   :  { %995 = vmatmul.msk.bf16.vlgmr.msra.gmra.mxu1 %vm310_vm1, %v285_v23  ;;  %v104_v56 = vmul.f32 %v1063_v4, %v38_v51  ;;  %v153_v57 = vadd.f32 %v1068_v5, %v87_v52  ;;  %v154_v58 = vadd.f32 %v1068_v5, %v88_v53  ;;  %v117_v3 = vmul.f32 %v1063_v4, %v51_v1  ;;  %v42_v51 = vld [vmem:[%s2105_s0 + $0xc8] sm:$0xff] }
   0xe   :  { %v245_v48 = vmax.f32 %v181_v43, 0.0  ;;  %v246_v49 = vmax.f32 %v182_v44, 0.0  ;;  %v169_v59 = vadd.f32 %v1068_v5, %v103_v55  ;;  %v118_v6 = vmul.f32 %v1063_v4, %v52_v2  ;;  %v26_v43 = vld [vmem:[%s2105_s0 + $0x48] sm:$0xff]  ;;  %v55_v2 = vld [vmem:[%s2105_s0 + $0x130] sm:$0xff] }
   0xf   :  { %v170_v60 = vadd.f32 %v1068_v5, %v104_v56  ;;  %v217_v61 = vmax.f32 %v153_v57, 0.0  ;;  %v218_v62 = vmax.f32 %v154_v58, 0.0  ;;  %v183_v8 = vadd.f32 %v1068_v5, %v117_v3  ;;  %v56_v3 = vld [vmem:[%s2105_s0 + $0x138] sm:$0xff] }
  0x10   :  { %v293_v54 = vpack.c.bf16 %v246_v49, %v245_v48  ;;  %v233_v63 = vmax.f32 %v169_v59, 0.0  ;;  %v184_v9 = vadd.f32 %v1068_v5, %v118_v6  ;;  %v89_v17 = vmul.f32 %v1063_v4, %v23_v10  ;;  %v67_v6 = vld [vmem:[%s2105_s0 + $0x190] sm:$0xff] }
  0x11   :  { %v234_v0 = vmax.f32 %v170_v60, 0.0  ;;  %v279_v7 = vpack.c.bf16 %v218_v62, %v217_v61  ;;  %v247_v13 = vmax.f32 %v183_v8, 0.0  ;;  %v90_v18 = vmul.f32 %v1063_v4, %v24_v11 }
  0x12   :  { %1003 = vmatmul.msk.bf16.vlgmr.msra.gmra.mxu2 %vm310_vm1, %v293_v54  ;;  %v248_v14 = vmax.f32 %v184_v9, 0.0  ;;  %v105_v20 = vmul.f32 %v1063_v4, %v39_v15  ;;  %v106_v21 = vmul.f32 %v1063_v4, %v40_v16  ;;  %v155_v22 = vadd.f32 %v1068_v5, %v89_v17  ;;  %v68_v9 = vld [vmem:[%s2105_s0 + $0x198] sm:$0xff]  ;;  %v27_v16 = vld [vmem:[%s2105_s0 + $0x50] sm:$0xff] }
  0x13   :  { %v287_v12 = vpack.c.bf16 %v234_v0, %v233_v63  ;;  %v156_v23 = vadd.f32 %v1068_v5, %v90_v18  ;;  %v119_v33 = vmul.f32 %v1063_v4, %v53_v30  ;;  %v120_v34 = vmul.f32 %v1063_v4, %v54_v31  ;;  %v28_v17 = vld [vmem:[%s2105_s0 + $0x58] sm:$0xff] }
  0x14   :  { %v294_v19 = vpack.c.bf16 %v248_v14, %v247_v13  ;;  %v171_v24 = vadd.f32 %v1068_v5, %v105_v20  ;;  %v172_v25 = vadd.f32 %v1068_v5, %v106_v21  ;;  %v219_v26 = vmax.f32 %v155_v22, 0.0 }
  0x15   :  { %v220_v27 = vmax.f32 %v156_v23, 0.0  ;;  %v131_v36 = vmul.f32 %v1063_v4, %v65_v32  ;;  %v132_v37 = vmul.f32 %v1063_v4, %v66_v35  ;;  %v185_v39 = vadd.f32 %v1068_v5, %v119_v33 }
  0x16   :  { %v235_v28 = vmax.f32 %v171_v24, 0.0  ;;  %v236_v29 = vmax.f32 %v172_v25, 0.0  ;;  %v186_v40 = vadd.f32 %v1068_v5, %v120_v34  ;;  %v92_v53 = vmul.f32 %v1063_v4, %v26_v43  ;;  %v43_v24 = vld [vmem:[%s2105_s0 + $0xd0] sm:$0xff]  ;;  %v44_v25 = vld [vmem:[%s2105_s0 + $0xd8] sm:$0xff] }
  0x17   :  { %v280_v38 = vpack.c.bf16 %v220_v27, %v219_v26  ;;  %v197_v41 = vadd.f32 %v1068_v5, %v131_v36  ;;  %v198_v45 = vadd.f32 %v1068_v5, %v132_v37  ;;  %v249_v46 = vmax.f32 %v185_v39, 0.0 }
  0x18   :  { %v288_v44 = vpack.c.bf16 %v236_v29, %v235_v28  ;;  %v107_v56 = vmul.f32 %v1063_v4, %v41_v50  ;;  %v108_v57 = vmul.f32 %v1063_v4, %v42_v51  ;;  %v158_v59 = vadd.f32 %v1068_v5, %v92_v53  ;;  %v30_v53 = vld [vmem:[%s2105_s0 + $0x68] sm:$0xff] }
  0x19   :  { %v261_v48 = vmax.f32 %v197_v41, 0.0  ;;  %v262_v49 = vmax.f32 %v198_v45, 0.0  ;;  %v122_v8 = vmul.f32 %v1063_v4, %v56_v3  ;;  %v133_v10 = vmul.f32 %v1063_v4, %v67_v6  ;;  %v58_v41 = vld [vmem:[%s2105_s0 + $0x148] sm:$0xff] }
  0x1a   :  { %v173_v60 = vadd.f32 %v1068_v5, %v107_v56  ;;  %v174_v61 = vadd.f32 %v1068_v5, %v108_v57  ;;  %v222_v63 = vmax.f32 %v158_v59, 0.0  ;;  %v134_v11 = vmul.f32 %v1063_v4, %v68_v9  ;;  %v70_v45 = vld [vmem:[%s2105_s0 + $0x1a8] sm:$0xff] }
  0x1b   :  { %v301_v55 = vpack.c.bf16 %v262_v49, %v261_v48  ;;  %v188_v14 = vadd.f32 %v1068_v5, %v122_v8  ;;  %v199_v15 = vadd.f32 %v1068_v5, %v133_v10  ;;  %v93_v26 = vmul.f32 %v1063_v4, %v27_v16  ;;  %v71_v16 = vld [vmem:[%s2105_s0 + $0x1b0] sm:$0xff] }
  0x1c   :  { %988 = vmatmul.msk.bf16.gmra.mxu0 %vm310_vm1, %v278_v42  ;;  %v25_v42 = vld [vmem:[%s2105_s0 + $0x40] sm:$0xff]  ;;  %v237_v0 = vmax.f32 %v173_v60, 0.0  ;;  %v238_v1 = vmax.f32 %v174_v61, 0.0  ;;  %v94_v27 = vmul.f32 %v1063_v4, %v28_v17  ;;  %v109_v30 = vmul.f32 %v1063_v4, %v43_v24  ;;  %v46_v61 = vld [vmem:[%s2105_s0 + $0xe8] sm:$0xff] }
  0x1d   :  { %996 = vmatmul.msk.bf16.gmra.mxu1 %vm310_vm1, %v286_v47  ;;  %v250_v47 = vmax.f32 %v186_v40, 0.0  ;;  %v91_v52 = vmul.f32 %v1063_v4, %v25_v42  ;;  %1011 = vmatmul.msk.bf16.vlgmr.msra.gmra.mxu3 %vm310_vm1, %v301_v55  ;;  %v252_v21 = vmax.f32 %v188_v14, 0.0  ;;  %v263_v22 = vmax.f32 %v199_v15, 0.0  ;;  %v57_v40 = vld [vmem:[%s2105_s0 + $0x140] sm:$0xff]  ;;  %v59_v14 = vld [vmem:[%s2105_s0 + $0x150] sm:$0xff]  ;;  %v60_v15 = vld [vmem:[%s2105_s0 + $0x158] sm:$0xff] }
  0x1e   :  { %v289_v18 = vpack.c.bf16 %v238_v1, %v237_v0  ;;  %v110_v31 = vmul.f32 %v1063_v4, %v44_v25  ;;  %v159_v32 = vadd.f32 %v1068_v5, %v93_v26  ;;  %v160_v33 = vadd.f32 %v1068_v5, %v94_v27  ;;  %v69_v42 = vld [vmem:[%s2105_s0 + $0x1a0] sm:$0xff]  ;;  %v31_v26 = vld [vmem:[%s2105_s0 + $0x70] sm:$0xff]  ;;  %v32_v27 = vld [vmem:[%s2105_s0 + $0x78] sm:$0xff] }
  0x1f   :  { %v295_v54 = vpack.c.bf16 %v250_v47, %v249_v46  ;;  %v157_v58 = vadd.f32 %v1068_v5, %v91_v52  ;;  %v175_v34 = vadd.f32 %v1068_v5, %v109_v30  ;;  %v123_v43 = vmul.f32 %v1063_v4, %v57_v40  ;;  %v29_v52 = vld [vmem:[%s2105_s0 + $0x60] sm:$0xff] }
  0x20   :  { %v176_v35 = vadd.f32 %v1068_v5, %v110_v31  ;;  %v223_v36 = vmax.f32 %v159_v32, 0.0  ;;  %v224_v37 = vmax.f32 %v160_v33, 0.0  ;;  %v135_v46 = vmul.f32 %v1063_v4, %v69_v42  ;;  %v45_v60 = vld [vmem:[%s2105_s0 + $0xe0] sm:$0xff] }
  0x21   :  { %v221_v62 = vmax.f32 %v157_v58, 0.0  ;;  %v136_v47 = vmul.f32 %v1063_v4, %v70_v45  ;;  %v189_v49 = vadd.f32 %v1068_v5, %v123_v43  ;;  %v112_v3 = vmul.f32 %v1063_v4, %v46_v61 }
  0x22   :  { %1004 = vmatmul.msk.bf16.gmra.mxu2 %vm310_vm1, %v294_v19  ;;  %v200_v19 = vadd.f32 %v1068_v5, %v134_v11  ;;  %v240_v39 = vmax.f32 %v176_v35, 0.0  ;;  %v282_v48 = vpack.c.bf16 %v224_v37, %v223_v36  ;;  %v201_v51 = vadd.f32 %v1068_v5, %v135_v46  ;;  %v48_v35 = vld [vmem:[%s2105_s0 + $0xf8] sm:$0xff] }
  0x23   :  { %v202_v55 = vadd.f32 %v1068_v5, %v136_v47  ;;  %v253_v56 = vmax.f32 %v189_v49, 0.0  ;;  %v178_v9 = vadd.f32 %v1068_v5, %v112_v3  ;;  %v125_v17 = vmul.f32 %v1063_v4, %v59_v14 }
  0x24   :  { %v264_v23 = vmax.f32 %v200_v19, 0.0  ;;  %v265_v58 = vmax.f32 %v201_v51, 0.0  ;;  %v72_v19 = vld [vmem:[%s2105_s0 + $0x1b8] sm:$0xff]  ;;  %v97_v36 = vmul.f32 %v1063_v4, %v31_v26  ;;  %v98_v37 = vmul.f32 %v1063_v4, %v32_v27  ;;  %v62_v51 = vld [vmem:[%s2105_s0 + $0x168] sm:$0xff] }
  0x25   :  { %v266_v59 = vmax.f32 %v202_v55, 0.0  ;;  %v74_v55 = vld [vmem:[%s2105_s0 + $0x1c8] sm:$0xff] }
  0x26   :  { %v302_v29 = vpack.c.bf16 %v264_v23, %v263_v22  ;;  %v191_v23 = vadd.f32 %v1068_v5, %v125_v17  ;;  %v163_v42 = vadd.f32 %v1068_v5, %v97_v36  ;;  %v164_v43 = vadd.f32 %v1068_v5, %v98_v37 }
  0x27   :  { %v303_v1 = vpack.c.bf16 %v266_v59, %v265_v58 }
  0x28   :  { %v255_v30 = vmax.f32 %v191_v23, 0.0  ;;  %v227_v46 = vmax.f32 %v163_v42, 0.0  ;;  %v228_v47 = vmax.f32 %v164_v43, 0.0 }
  0x2a   :  { %v284_v58 = vpack.c.bf16 %v228_v47, %v227_v46 }
  0x2c   :  { %989 = vmatmul.msk.bf16.gmra.mxu0 %vm310_vm1, %v279_v7  ;;  %v121_v7 = vmul.f32 %v1063_v4, %v55_v2  ;;  %v111_v2 = vmul.f32 %v1063_v4, %v45_v60 }
  0x2d   :  { %997 = vmatmul.msk.bf16.gmra.mxu1 %vm310_vm1, %v287_v12  ;;  %v281_v12 = vpack.c.bf16 %v222_v63, %v221_v62  ;;  %1012 = vmatmul.msk.bf16.gmra.mxu3 %vm310_vm1, %v302_v29  ;;  %v95_v62 = vmul.f32 %v1063_v4, %v29_v52  ;;  %v96_v63 = vmul.f32 %v1063_v4, %v30_v53  ;;  %v73_v52 = vld [vmem:[%s2105_s0 + $0x1c0] sm:$0xff] }
  0x2e   :  { %v187_v13 = vadd.f32 %v1068_v5, %v121_v7  ;;  %v177_v8 = vadd.f32 %v1068_v5, %v111_v2 }
  0x2f   :  { %v161_v6 = vadd.f32 %v1068_v5, %v95_v62  ;;  %v162_v7 = vadd.f32 %v1068_v5, %v96_v63 }
  0x30   :  { %v251_v20 = vmax.f32 %v187_v13, 0.0  ;;  %v242_v13 = vmax.f32 %v178_v9, 0.0  ;;  %v64_v9 = vld [vmem:[%s2105_s0 + $0x178] sm:$0xff] }
  0x31   :  { %v225_v10 = vmax.f32 %v161_v6, 0.0  ;;  %v226_v11 = vmax.f32 %v162_v7, 0.0 }
  0x32   :  { %1005 = vmatmul.msk.bf16.gmra.mxu2 %vm310_vm1, %v295_v54  ;;  %v296_v28 = vpack.c.bf16 %v252_v21, %v251_v20  ;;  %v137_v20 = vmul.f32 %v1063_v4, %v71_v16  ;;  %v138_v21 = vmul.f32 %v1063_v4, %v72_v19 }
  0x33   :  { %v283_v22 = vpack.c.bf16 %v226_v11, %v225_v10  ;;  %v75_v10 = vld [vmem:[%s2105_s0 + $0x1d0] sm:$0xff] }
  0x34   :  { %v203_v25 = vadd.f32 %v1068_v5, %v137_v20  ;;  %v204_v29 = vadd.f32 %v1068_v5, %v138_v21  ;;  %v141_v14 = vmul.f32 %v1063_v4, %v75_v10 }
  0x36   :  { %v267_v32 = vmax.f32 %v203_v25, 0.0  ;;  %v268_v33 = vmax.f32 %v204_v29, 0.0 }
  0x3c   :  { %990 = vmatmul.msk.bf16.gmra.mxu0 %vm310_vm1, %v280_v38  ;;  %v239_v38 = vmax.f32 %v175_v34, 0.0  ;;  %v47_v34 = vld [vmem:[%s2105_s0 + $0xf0] sm:$0xff] }
  0x3d   :  { %998 = vmatmul.msk.bf16.gmra.mxu1 %vm310_vm1, %v288_v44  ;;  %v124_v44 = vmul.f32 %v1063_v4, %v58_v41  ;;  %1013 = vmatmul.msk.bf16.gmra.mxu3 %vm310_vm1, %v303_v1  ;;  %v113_v40 = vmul.f32 %v1063_v4, %v47_v34  ;;  %v114_v41 = vmul.f32 %v1063_v4, %v48_v35 }
  0x3e   :  { %v290_v54 = vpack.c.bf16 %v240_v39, %v239_v38  ;;  %v304_v39 = vpack.c.bf16 %v268_v33, %v267_v32 }
  0x3f   :  { %v190_v50 = vadd.f32 %v1068_v5, %v124_v44  ;;  %v179_v44 = vadd.f32 %v1068_v5, %v113_v40  ;;  %v180_v45 = vadd.f32 %v1068_v5, %v114_v41 }
  0x41   :  { %v254_v57 = vmax.f32 %v190_v50, 0.0  ;;  %v244_v49 = vmax.f32 %v180_v45, 0.0  ;;  %v61_v50 = vld [vmem:[%s2105_s0 + $0x160] sm:$0xff] }
  0x42   :  { %1006 = vmatmul.msk.bf16.gmra.mxu2 %vm310_vm1, %v296_v28  ;;  %v127_v53 = vmul.f32 %v1063_v4, %v61_v50 }
  0x43   :  { %v297_v0 = vpack.c.bf16 %v254_v57, %v253_v56  ;;  %v139_v56 = vmul.f32 %v1063_v4, %v73_v52  ;;  %v140_v57 = vmul.f32 %v1063_v4, %v74_v55 }
  0x44   :  { %v193_v59 = vadd.f32 %v1068_v5, %v127_v53 }
  0x45   :  { %v205_v61 = vadd.f32 %v1068_v5, %v139_v56  ;;  %v206_v63 = vadd.f32 %v1068_v5, %v140_v57 }
  0x47   :  { %v269_v2 = vmax.f32 %v205_v61, 0.0  ;;  %v270_v3 = vmax.f32 %v206_v63, 0.0  ;;  %v80_v63 = vld [vmem:[%s2105_s0 + $0x1f8] sm:$0xff] }
  0x49   :  { %v305_v7 = vpack.c.bf16 %v270_v3, %v269_v2 }
  0x4c   :  { %991 = vmatmul.msk.bf16.gmra.mxu0 %vm310_vm1, %v281_v12  ;;  %v241_v12 = vmax.f32 %v177_v8, 0.0  ;;  %v63_v8 = vld [vmem:[%s2105_s0 + $0x170] sm:$0xff] }
  0x4d   :  { %999 = vmatmul.msk.bf16.gmra.mxu1 %vm310_vm1, %v289_v18  ;;  %v126_v18 = vmul.f32 %v1063_v4, %v60_v15  ;;  %1014 = vmatmul.msk.bf16.gmra.mxu3 %vm310_vm1, %v304_v39  ;;  %v129_v11 = vmul.f32 %v1063_v4, %v63_v8  ;;  %v78_v39 = vld [vmem:[%s2105_s0 + $0x1e8] sm:$0xff] }
  0x4e   :  { %v291_v28 = vpack.c.bf16 %v242_v13, %v241_v12  ;;  %v130_v12 = vmul.f32 %v1063_v4, %v64_v9  ;;  %v76_v13 = vld [vmem:[%s2105_s0 + $0x1d8] sm:$0xff]  ;;  %v144_v41 = vmul.f32 %v1063_v4, %v78_v39 }
  0x4f   :  { %v192_v24 = vadd.f32 %v1068_v5, %v126_v18  ;;  %v142_v15 = vmul.f32 %v1063_v4, %v76_v13  ;;  %v195_v16 = vadd.f32 %v1068_v5, %v129_v11  ;;  %v207_v18 = vadd.f32 %v1068_v5, %v141_v14 }
  0x50   :  { %v196_v17 = vadd.f32 %v1068_v5, %v130_v12  ;;  %v210_v43 = vadd.f32 %v1068_v5, %v144_v41 }
  0x51   :  { %v256_v31 = vmax.f32 %v192_v24, 0.0  ;;  %v208_v20 = vadd.f32 %v1068_v5, %v142_v15  ;;  %v271_v24 = vmax.f32 %v207_v18, 0.0 }
  0x52   :  { %1007 = vmatmul.msk.bf16.gmra.mxu2 %vm310_vm1, %v297_v0  ;;  %v257_v0 = vmax.f32 %v193_v59, 0.0  ;;  %v260_v23 = vmax.f32 %v196_v17, 0.0 }
  0x53   :  { %v298_v38 = vpack.c.bf16 %v256_v31, %v255_v30  ;;  %v272_v25 = vmax.f32 %v208_v20, 0.0 }
  0x55   :  { %v306_v27 = vpack.c.bf16 %v272_v25, %v271_v24 }
  0x5c   :  { %992 = vmatmul.msk.bf16.gmra.mxu0 %vm310_vm1, %v282_v48  ;;  %v243_v48 = vmax.f32 %v179_v44, 0.0 }
  0x5d   :  { %1000 = vmatmul.msk.bf16.gmra.mxu1 %vm310_vm1, %v290_v54  ;;  %v128_v54 = vmul.f32 %v1063_v4, %v62_v51  ;;  %1015 = vmatmul.msk.bf16.gmra.mxu3 %vm310_vm1, %v305_v7 }
  0x5e   :  { %v292_v62 = vpack.c.bf16 %v244_v49, %v243_v48  ;;  %v274_v49 = vmax.f32 %v210_v43, 0.0 }
  0x5f   :  { %v194_v60 = vadd.f32 %v1068_v5, %v128_v54 }
  0x61   :  { %v258_v1 = vmax.f32 %v194_v60, 0.0 }
  0x62   :  { %1008 = vmatmul.msk.bf16.gmra.mxu2 %vm310_vm1, %v298_v38  ;;  %v77_v38 = vld [vmem:[%s2105_s0 + $0x1e0] sm:$0xff] }
  0x63   :  { %v299_v6 = vpack.c.bf16 %v258_v1, %v257_v0  ;;  %v143_v40 = vmul.f32 %v1063_v4, %v77_v38  ;;  %v146_v1 = vmul.f32 %v1063_v4, %v80_v63 }
  0x65   :  { %v209_v42 = vadd.f32 %v1068_v5, %v143_v40  ;;  %v212_v3 = vadd.f32 %v1068_v5, %v146_v1 }
  0x67   :  { %v273_v48 = vmax.f32 %v209_v42, 0.0  ;;  %v276_v12 = vmax.f32 %v212_v3, 0.0 }
  0x69   :  { %v307_v52 = vpack.c.bf16 %v274_v49, %v273_v48 }
  0x6c   :  { %993 = vmatmul.msk.bf16.gmra.mxu0 %vm310_vm1, %v283_v22  ;;  %v259_v22 = vmax.f32 %v195_v16, 0.0 }
  0x6d   :  { %1001 = vmatmul.msk.bf16.gmra.mxu1 %vm310_vm1, %v291_v28  ;;  %1016 = vmatmul.msk.bf16.gmra.mxu3 %vm310_vm1, %v306_v27 }
  0x6e   :  { %v300_v26 = vpack.c.bf16 %v260_v23, %v259_v22 }
  0x72   :  { %1009 = vmatmul.msk.bf16.gmra.mxu2 %vm310_vm1, %v299_v6 }
  0x7c   :  { %994 = vmatmul.msk.bf16.gmra.mxu0 %vm310_vm1, %v284_v58 }
  0x7d   :  { %1002 = vmatmul.msk.bf16.gmra.mxu1 %vm310_vm1, %v292_v62  ;;  %1017 = vmatmul.msk.bf16.gmra.mxu3 %vm310_vm1, %v307_v52  ;;  %v79_v62 = vld [vmem:[%s2105_s0 + $0x1f0] sm:$0xff] }
  0x7e   :  { %v145_v0 = vmul.f32 %v1063_v4, %v79_v62 }
  0x80   :  { %v211_v2 = vadd.f32 %v1068_v5, %v145_v0 }
  0x82   :  { %1010 = vmatmul.msk.bf16.gmra.mxu2 %vm310_vm1, %v300_v26  ;;  %v275_v4 = vmax.f32 %v211_v2, 0.0 }
  0x84   :  { %v308_v14 = vpack.c.bf16 %v276_v12, %v275_v4 }
  0x89   :  { %v420_v19 = vpop.f32.mrf.mxu0 }
  0x8a   :  { %581 = vst.msk [vmem:[%s2107_s3] sm:$0xff] %vm580_vm2, %v420_v19  ;;  %v1396_v21 = vpop.f32.mrf.mxu1  ;;  %v781_v28 = vmul.f32 %v420_v19, %v420_v19  ;;  %v646_v30 = vsel %vm580_vm2, %v420_v19, 0.0 }
  0x8b   :  { %597 = vst.msk [vmem:[%s2107_s3 + $0x80] sm:$0xff] %vm580_vm2, %v1396_v21 }
  0x8c   :  { %v845_v35 = vsel %vm580_vm2, %v781_v28, 0.0 }
  0x8d   :  { %1018 = vmatmul.msk.bf16.gmra.mxu3 %vm310_vm1, %v308_v14 }
  0x91   :  { %v422_v29 = vpop.f32.mrf.mxu0 }
  0x92   :  { %582 = vst.msk [vmem:[%s2107_s3 + $0x8] sm:$0xff] %vm580_vm2, %v422_v29  ;;  %v647_v31 = vsel %vm580_vm2, %v422_v29, 0.0  ;;  %v782_v32 = vmul.f32 %v422_v29, %v422_v29  ;;  %v1411_v33 = vpop.f32.mrf.mxu1 }
  0x93   :  { %v648_v34 = vadd.f32 %v647_v31, %v646_v30  ;;  %598 = vst.msk [vmem:[%s2107_s3 + $0x88] sm:$0xff] %vm580_vm2, %v1411_v33 }
  0x94   :  { %v846_v36 = vsel %vm580_vm2, %v782_v32, 0.0 }
  0x95   :  { %v847_v37 = vadd.f32 %v846_v36, %v845_v35  ;;  %v1444_v55 = vpop.f32.mrf.mxu2 }
  0x96   :  { %613 = vst.msk [vmem:[%s2107_s3 + $0x100] sm:$0xff] %vm580_vm2, %v1444_v55 }
  0x99   :  { %v425_v44 = vpop.f32.mrf.mxu0 }
  0x9a   :  { %583 = vst.msk [vmem:[%s2107_s3 + $0x10] sm:$0xff] %vm580_vm2, %v425_v44  ;;  %v649_v45 = vsel %vm580_vm2, %v425_v44, 0.0  ;;  %v783_v46 = vmul.f32 %v425_v44, %v425_v44  ;;  %v1435_v47 = vpop.f32.mrf.mxu1 }
  0x9b   :  { %v650_v50 = vadd.f32 %v649_v45, %v648_v34  ;;  %599 = vst.msk [vmem:[%s2107_s3 + $0x90] sm:$0xff] %vm580_vm2, %v1435_v47 }
  0x9c   :  { %v848_v51 = vsel %vm580_vm2, %v783_v46, 0.0 }
  0x9d   :  { %v849_v53 = vadd.f32 %v848_v51, %v847_v37  ;;  %v1474_v7 = vpop.f32.mrf.mxu2 }
  0x9e   :  { %614 = vst.msk [vmem:[%s2107_s3 + $0x108] sm:$0xff] %vm580_vm2, %v1474_v7 }
  0xa0   :  { %v1543_v25 = vpop.f32.mrf.mxu3 }
  0xa1   :  { %v427_v54 = vpop.f32.mrf.mxu0  ;;  %629 = vst.msk [vmem:[%s2107_s3 + $0x180] sm:$0xff] %vm580_vm2, %v1543_v25 }
  0xa2   :  { %584 = vst.msk [vmem:[%s2107_s3 + $0x18] sm:$0xff] %vm580_vm2, %v427_v54  ;;  %v651_v56 = vsel %vm580_vm2, %v427_v54, 0.0  ;;  %v784_v57 = vmul.f32 %v427_v54, %v427_v54  ;;  %v1451_v58 = vpop.f32.mrf.mxu1 }
  0xa3   :  { %v652_v59 = vadd.f32 %v651_v56, %v650_v50  ;;  %600 = vst.msk [vmem:[%s2107_s3 + $0x98] sm:$0xff] %vm580_vm2, %v1451_v58 }
  0xa4   :  { %v850_v60 = vsel %vm580_vm2, %v784_v57, 0.0 }
  0xa5   :  { %v851_v61 = vadd.f32 %v850_v60, %v849_v53  ;;  %v1499_v16 = vpop.f32.mrf.mxu2 }
  0xa6   :  { %615 = vst.msk [vmem:[%s2107_s3 + $0x110] sm:$0xff] %vm580_vm2, %v1499_v16 }
  0xa8   :  { %v1568_v29 = vpop.f32.mrf.mxu3 }
  0xa9   :  { %v430_v6 = vpop.f32.mrf.mxu0  ;;  %630 = vst.msk [vmem:[%s2107_s3 + $0x188] sm:$0xff] %vm580_vm2, %v1568_v29 }
  0xaa   :  { %585 = vst.msk [vmem:[%s2107_s3 + $0x20] sm:$0xff] %vm580_vm2, %v430_v6  ;;  %v653_v8 = vsel %vm580_vm2, %v430_v6, 0.0  ;;  %v785_v9 = vmul.f32 %v430_v6, %v430_v6  ;;  %v1481_v10 = vpop.f32.mrf.mxu1 }
  0xab   :  { %v1483_v11 = vadd.f32 %v653_v8, %v652_v59  ;;  %601 = vst.msk [vmem:[%s2107_s3 + $0xa0] sm:$0xff] %vm580_vm2, %v1481_v10 }
  0xac   :  { %v852_v5 = vsel %vm580_vm2, %v785_v9, 0.0 }
  0xad   :  { %v1496_v13 = vadd.f32 %v852_v5, %v851_v61  ;;  %v1517_v19 = vpop.f32.mrf.mxu2 }
  0xae   :  { %616 = vst.msk [vmem:[%s2107_s3 + $0x118] sm:$0xff] %vm580_vm2, %v1517_v19 }
  0xb0   :  { %v1593_v34 = vpop.f32.mrf.mxu3 }
  0xb1   :  { %v432_v15 = vpop.f32.mrf.mxu0  ;;  %631 = vst.msk [vmem:[%s2107_s3 + $0x190] sm:$0xff] %vm580_vm2, %v1593_v34 }
  0xb2   :  { %586 = vst.msk [vmem:[%s2107_s3 + $0x28] sm:$0xff] %vm580_vm2, %v432_v15  ;;  %v1505_v17 = vpop.f32.mrf.mxu1  ;;  %v786_v45 = vmul.f32 %v432_v15, %v432_v15  ;;  %v655_v49 = vsel %vm580_vm2, %v432_v15, 0.0 }
  0xb3   :  { %602 = vst.msk [vmem:[%s2107_s3 + $0xa8] sm:$0xff] %vm580_vm2, %v1505_v17  ;;  %v656_v54 = vadd.f32 %v655_v49, %v1483_v11 }
  0xb4   :  { %v854_v51 = vsel %vm580_vm2, %v786_v45, 0.0 }
  0xb5   :  { %v1535_v23 = vpop.f32.mrf.mxu2  ;;  %v855_v60 = vadd.f32 %v854_v51, %v1496_v13 }
  0xb6   :  { %617 = vst.msk [vmem:[%s2107_s3 + $0x120] sm:$0xff] %vm580_vm2, %v1535_v23 }
  0xb8   :  { %v1618_v38 = vpop.f32.mrf.mxu3 }
  0xb9   :  { %v435_v18 = vpop.f32.mrf.mxu0  ;;  %632 = vst.msk [vmem:[%s2107_s3 + $0x198] sm:$0xff] %vm580_vm2, %v1618_v38 }
  0xba   :  { %587 = vst.msk [vmem:[%s2107_s3 + $0x30] sm:$0xff] %vm580_vm2, %v435_v18  ;;  %v1523_v20 = vpop.f32.mrf.mxu1  ;;  %v787_v50 = vmul.f32 %v435_v18, %v435_v18  ;;  %v657_v52 = vsel %vm580_vm2, %v435_v18, 0.0 }
  0xbb   :  { %603 = vst.msk [vmem:[%s2107_s3 + $0xb0] sm:$0xff] %vm580_vm2, %v1523_v20  ;;  %v658_v61 = vadd.f32 %v657_v52, %v656_v54 }
  0xbc   :  { %v856_v56 = vsel %vm580_vm2, %v787_v50, 0.0 }
  0xbd   :  { %v1560_v27 = vpop.f32.mrf.mxu2  ;;  %v857_v8 = vadd.f32 %v856_v56, %v855_v60 }
  0xbe   :  { %618 = vst.msk [vmem:[%s2107_s3 + $0x128] sm:$0xff] %vm580_vm2, %v1560_v27 }
  0xc0   :  { %v1643_v42 = vpop.f32.mrf.mxu3 }
  0xc1   :  { %v437_v22 = vpop.f32.mrf.mxu0  ;;  %633 = vst.msk [vmem:[%s2107_s3 + $0x1a0] sm:$0xff] %vm580_vm2, %v1643_v42 }
  0xc2   :  { %588 = vst.msk [vmem:[%s2107_s3 + $0x38] sm:$0xff] %vm580_vm2, %v437_v22  ;;  %v1541_v24 = vpop.f32.mrf.mxu1  ;;  %v788_v53 = vmul.f32 %v437_v22, %v437_v22  ;;  %v659_v57 = vsel %vm580_vm2, %v437_v22, 0.0 }
  0xc3   :  { %604 = vst.msk [vmem:[%s2107_s3 + $0xb8] sm:$0xff] %vm580_vm2, %v1541_v24  ;;  %v660_v9 = vadd.f32 %v659_v57, %v658_v61 }
  0xc4   :  { %v858_v0 = vsel %vm580_vm2, %v788_v53, 0.0 }
  0xc5   :  { %v1585_v31 = vpop.f32.mrf.mxu2  ;;  %v859_v12 = vadd.f32 %v858_v0, %v857_v8 }
  0xc6   :  { %619 = vst.msk [vmem:[%s2107_s3 + $0x130] sm:$0xff] %vm580_vm2, %v1585_v31 }
  0xc8   :  { %v1668_v48 = vpop.f32.mrf.mxu3 }
  0xc9   :  { %v440_v26 = vpop.f32.mrf.mxu0  ;;  %634 = vst.msk [vmem:[%s2107_s3 + $0x1a8] sm:$0xff] %vm580_vm2, %v1668_v48 }
  0xca   :  { %589 = vst.msk [vmem:[%s2107_s3 + $0x40] sm:$0xff] %vm580_vm2, %v440_v26  ;;  %v1566_v28 = vpop.f32.mrf.mxu1  ;;  %v789_v59 = vmul.f32 %v440_v26, %v440_v26  ;;  %v661_v1 = vsel %vm580_vm2, %v440_v26, 0.0 }
  0xcb   :  { %605 = vst.msk [vmem:[%s2107_s3 + $0xc0] sm:$0xff] %vm580_vm2, %v1566_v28  ;;  %v662_v13 = vadd.f32 %v661_v1, %v660_v9 }
  0xcc   :  { %v860_v11 = vsel %vm580_vm2, %v789_v59, 0.0 }
  0xcd   :  { %v1610_v36 = vpop.f32.mrf.mxu2  ;;  %v861_v22 = vadd.f32 %v860_v11, %v859_v12 }
  0xce   :  { %620 = vst.msk [vmem:[%s2107_s3 + $0x138] sm:$0xff] %vm580_vm2, %v1610_v36 }
  0xd0   :  { %v1702_v6 = vpop.f32.mrf.mxu3 }
  0xd1   :  { %v442_v30 = vpop.f32.mrf.mxu0  ;;  %635 = vst.msk [vmem:[%s2107_s3 + $0x1b0] sm:$0xff] %vm580_vm2, %v1702_v6 }
  0xd2   :  { %590 = vst.msk [vmem:[%s2107_s3 + $0x48] sm:$0xff] %vm580_vm2, %v442_v30  ;;  %v1591_v32 = vpop.f32.mrf.mxu1  ;;  %v790_v2 = vmul.f32 %v442_v30, %v442_v30  ;;  %v663_v4 = vsel %vm580_vm2, %v442_v30, 0.0 }
  0xd3   :  { %606 = vst.msk [vmem:[%s2107_s3 + $0xc8] sm:$0xff] %vm580_vm2, %v1591_v32  ;;  %v664_v26 = vadd.f32 %v663_v4, %v662_v13 }
  0xd4   :  { %v862_v14 = vsel %vm580_vm2, %v790_v2, 0.0 }
  0xd5   :  { %v1635_v40 = vpop.f32.mrf.mxu2  ;;  %v863_v50 = vadd.f32 %v862_v14, %v861_v22 }
  0xd6   :  { %621 = vst.msk [vmem:[%s2107_s3 + $0x140] sm:$0xff] %vm580_vm2, %v1635_v40 }
  0xd8   :  { %v1735_v59 = vpop.f32.mrf.mxu3 }
  0xd9   :  { %v445_v35 = vpop.f32.mrf.mxu0  ;;  %636 = vst.msk [vmem:[%s2107_s3 + $0x1b8] sm:$0xff] %vm580_vm2, %v1735_v59 }
  0xda   :  { %591 = vst.msk [vmem:[%s2107_s3 + $0x50] sm:$0xff] %vm580_vm2, %v445_v35  ;;  %v1616_v37 = vpop.f32.mrf.mxu1  ;;  %v791_v5 = vmul.f32 %v445_v35, %v445_v35  ;;  %v665_v15 = vsel %vm580_vm2, %v445_v35, 0.0 }
  0xdb   :  { %607 = vst.msk [vmem:[%s2107_s3 + $0xd0] sm:$0xff] %vm580_vm2, %v1616_v37  ;;  %v666_v51 = vadd.f32 %v665_v15, %v664_v26  ;;  %v797_v15 = vmul.f32 %v1396_v21, %v1396_v21 }
  0xdc   :  { %v864_v30 = vsel %vm580_vm2, %v791_v5, 0.0 }
  0xdd   :  { %v1660_v44 = vpop.f32.mrf.mxu2 }
  0xde   :  { %622 = vst.msk [vmem:[%s2107_s3 + $0x148] sm:$0xff] %vm580_vm2, %v1660_v44 }
  0xe1   :  { %v447_v39 = vpop.f32.mrf.mxu0 }
  0xe2   :  { %592 = vst.msk [vmem:[%s2107_s3 + $0x58] sm:$0xff] %vm580_vm2, %v447_v39  ;;  %v1641_v41 = vpop.f32.mrf.mxu1  ;;  %v792_v18 = vmul.f32 %v447_v39, %v447_v39  ;;  %v667_v45 = vsel %vm580_vm2, %v447_v39, 0.0  ;;  %v865_v39 = vadd.f32 %v864_v30, %v863_v50  ;;  %v1768_v30 = vpop.f32.mrf.mxu3  ;;  %v677_v50 = vsel %vm580_vm2, %v1396_v21, 0.0 }
  0xe3   :  { %608 = vst.msk [vmem:[%s2107_s3 + $0xd8] sm:$0xff] %vm580_vm2, %v1641_v41  ;;  %v668_v60 = vadd.f32 %v667_v45, %v666_v51  ;;  %v798_v51 = vmul.f32 %v1411_v33, %v1411_v33  ;;  %v876_v21 = vsel %vm580_vm2, %v797_v15, 0.0 }
  0xe4   :  { %v866_v54 = vsel %vm580_vm2, %v792_v18, 0.0  ;;  %637 = vst.msk [vmem:[%s2107_s3 + $0x1c0] sm:$0xff] %vm580_vm2, %v1768_v30 }
  0xe5   :  { %v1692_v63 = vpop.f32.mrf.mxu2  ;;  %v867_v1 = vadd.f32 %v866_v54, %v865_v39  ;;  %v799_v39 = vmul.f32 %v1435_v47, %v1435_v47 }
  0xe6   :  { %623 = vst.msk [vmem:[%s2107_s3 + $0x150] sm:$0xff] %vm580_vm2, %v1692_v63 }
  0xe9   :  { %v450_v43 = vpop.f32.mrf.mxu0 }
  0xea   :  { %593 = vst.msk [vmem:[%s2107_s3 + $0x60] sm:$0xff] %vm580_vm2, %v450_v43  ;;  %v1666_v46 = vpop.f32.mrf.mxu1  ;;  %v793_v49 = vmul.f32 %v450_v43, %v450_v43  ;;  %v669_v56 = vsel %vm580_vm2, %v450_v43, 0.0 }
  0xeb   :  { %609 = vst.msk [vmem:[%s2107_s3 + $0xe0] sm:$0xff] %vm580_vm2, %v1666_v46  ;;  %v670_v2 = vadd.f32 %v669_v56, %v668_v60 }
  0xec   :  { %v868_v43 = vsel %vm580_vm2, %v793_v49, 0.0 }
  0xed   :  { %v1725_v53 = vpop.f32.mrf.mxu2 }
  0xee   :  { %624 = vst.msk [vmem:[%s2107_s3 + $0x158] sm:$0xff] %vm580_vm2, %v1725_v53 }
  0xf1   :  { %v452_v62 = vpop.f32.mrf.mxu0 }
  0xf2   :  { %594 = vst.msk [vmem:[%s2107_s3 + $0x68] sm:$0xff] %vm580_vm2, %v452_v62  ;;  %v1700_v3 = vpop.f32.mrf.mxu1  ;;  %v794_v57 = vmul.f32 %v452_v62, %v452_v62  ;;  %v671_v61 = vsel %vm580_vm2, %v452_v62, 0.0  ;;  %v869_v62 = vadd.f32 %v868_v43, %v867_v1  ;;  %v800_v1 = vmul.f32 %v1451_v58, %v1451_v58 }
  0xf3   :  { %610 = vst.msk [vmem:[%s2107_s3 + $0xe8] sm:$0xff] %vm580_vm2, %v1700_v3  ;;  %v672_v11 = vadd.f32 %v671_v61, %v670_v2  ;;  %v878_v61 = vsel %vm580_vm2, %v798_v51, 0.0 }
  0xf4   :  { %v870_v8 = vsel %vm580_vm2, %v794_v57, 0.0  ;;  %v679_v57 = vsel %vm580_vm2, %v1411_v33, 0.0  ;;  %v683_v33 = vsel %vm580_vm2, %v1451_v58, 0.0  ;;  %v882_v58 = vsel %vm580_vm2, %v800_v1, 0.0 }
  0xf5   :  { %v871_v5 = vadd.f32 %v870_v8, %v869_v62  ;;  %v1757_v14 = vpop.f32.mrf.mxu2  ;;  %v880_v62 = vsel %vm580_vm2, %v799_v39, 0.0  ;;  %v806_v1 = vmul.f32 %v1591_v32, %v1591_v32 }
  0xf6   :  { %625 = vst.msk [vmem:[%s2107_s3 + $0x160] sm:$0xff] %vm580_vm2, %v1757_v14 }
  0xf9   :  { %v455_v52 = vpop.f32.mrf.mxu0 }
  0xfa   :  { %595 = vst.msk [vmem:[%s2107_s3 + $0x70] sm:$0xff] %vm580_vm2, %v455_v52  ;;  %v1733_v35 = vpop.f32.mrf.mxu1  ;;  %v795_v0 = vmul.f32 %v455_v52, %v455_v52  ;;  %v673_v9 = vsel %vm580_vm2, %v455_v52, 0.0 }
  0xfb   :  { %611 = vst.msk [vmem:[%s2107_s3 + $0xf0] sm:$0xff] %vm580_vm2, %v1733_v35  ;;  %v674_v12 = vadd.f32 %v673_v9, %v672_v11  ;;  %v801_v11 = vmul.f32 %v1481_v10, %v1481_v10 }
  0xfc   :  { %v872_v4 = vsel %vm580_vm2, %v795_v0, 0.0  ;;  %v681_v0 = vsel %vm580_vm2, %v1435_v47, 0.0  ;;  %v1812_v47 = vpop.f32.mrf.mxu3 }
  0xfd   :  { %v873_v45 = vadd.f32 %v872_v4, %v871_v5  ;;  %v1800_v9 = vpop.f32.mrf.mxu2  ;;  %638 = vst.msk [vmem:[%s2107_s3 + $0x1c8] sm:$0xff] %vm580_vm2, %v1812_v47 }
  0xfe   :  { %626 = vst.msk [vmem:[%s2107_s3 + $0x168] sm:$0xff] %vm580_vm2, %v1800_v9 }
 0x101   :  { %v457_v13 = vpop.f32.mrf.mxu0 }
 0x102   :  { %596 = vst.msk [vmem:[%s2107_s3 + $0x78] sm:$0xff] %vm580_vm2, %v457_v13  ;;  %v675_v18 = vsel %vm580_vm2, %v457_v13, 0.0  ;;  %v796_v22 = vmul.f32 %v457_v13, %v457_v13  ;;  %v1766_v26 = vpop.f32.mrf.mxu1  ;;  %v802_v13 = vmul.f32 %v1505_v17, %v1505_v17 }
 0x103   :  { %v676_v49 = vadd.f32 %v675_v18, %v674_v12  ;;  %612 = vst.msk [vmem:[%s2107_s3 + $0xf8] sm:$0xff] %vm580_vm2, %v1766_v26  ;;  %v685_v12 = vsel %vm580_vm2, %v1481_v10, 0.0  ;;  %v689_v10 = vsel %vm580_vm2, %v1523_v20, 0.0 }
 0x104   :  { %v874_v52 = vsel %vm580_vm2, %v796_v22, 0.0  ;;  %v884_v22 = vsel %vm580_vm2, %v801_v11, 0.0  ;;  %v807_v11 = vmul.f32 %v1616_v37, %v1616_v37 }
 0x105   :  { %v678_v54 = vadd.f32 %v677_v50, %v676_v49  ;;  %v875_v56 = vadd.f32 %v874_v52, %v873_v45  ;;  %v687_v45 = vsel %vm580_vm2, %v1505_v17, 0.0  ;;  %v803_v49 = vmul.f32 %v1523_v20, %v1523_v20  ;;  %v1846_v20 = vpop.f32.mrf.mxu3 }
 0x106   :  { %v886_v52 = vsel %vm580_vm2, %v802_v13, 0.0  ;;  %v691_v17 = vsel %vm580_vm2, %v1541_v24, 0.0  ;;  %639 = vst.msk [vmem:[%s2107_s3 + $0x1d0] sm:$0xff] %vm580_vm2, %v1846_v20 }
 0x107   :  { %v680_v60 = vadd.f32 %v679_v57, %v678_v54  ;;  %v877_v43 = vadd.f32 %v876_v21, %v875_v56  ;;  %v804_v54 = vmul.f32 %v1541_v24, %v1541_v24  ;;  %v1834_v57 = vpop.f32.mrf.mxu2  ;;  %v888_v39 = vsel %vm580_vm2, %v803_v49, 0.0 }
 0x108   :  { %627 = vst.msk [vmem:[%s2107_s3 + $0x170] sm:$0xff] %vm580_vm2, %v1834_v57 }
 0x109   :  { %v682_v2 = vadd.f32 %v681_v0, %v680_v60  ;;  %v879_v8 = vadd.f32 %v878_v61, %v877_v43  ;;  %v805_v60 = vmul.f32 %v1566_v28, %v1566_v28  ;;  %v890_v24 = vsel %vm580_vm2, %v804_v54, 0.0 }
 0x10a   :  { %v693_v0 = vsel %vm580_vm2, %v1566_v28, 0.0  ;;  %v697_v28 = vsel %vm580_vm2, %v1616_v37, 0.0 }
 0x10b   :  { %v684_v4 = vadd.f32 %v683_v33, %v682_v2  ;;  %v881_v5 = vadd.f32 %v880_v62, %v879_v8  ;;  %v892_v62 = vsel %vm580_vm2, %v805_v60, 0.0  ;;  %v695_v33 = vsel %vm580_vm2, %v1591_v32, 0.0 }
 0x10c   :  { %v699_v32 = vsel %vm580_vm2, %v1641_v41, 0.0 }
 0x10d   :  { %v686_v15 = vadd.f32 %v685_v12, %v684_v4  ;;  %v883_v18 = vadd.f32 %v882_v58, %v881_v5  ;;  %v894_v58 = vsel %vm580_vm2, %v806_v1, 0.0  ;;  %v808_v12 = vmul.f32 %v1641_v41, %v1641_v41  ;;  %v1880_v37 = vpop.f32.mrf.mxu3 }
 0x10e   :  { %640 = vst.msk [vmem:[%s2107_s3 + $0x1d8] sm:$0xff] %vm580_vm2, %v1880_v37  ;;  %v813_v1 = vmul.f32 %v1444_v55, %v1444_v55 }
 0x10f   :  { %v688_v50 = vadd.f32 %v687_v45, %v686_v15  ;;  %v885_v51 = vadd.f32 %v884_v22, %v883_v18  ;;  %v1868_v18 = vpop.f32.mrf.mxu2  ;;  %v896_v22 = vsel %vm580_vm2, %v807_v11, 0.0  ;;  %v809_v45 = vmul.f32 %v1666_v46, %v1666_v46 }
 0x110   :  { %628 = vst.msk [vmem:[%s2107_s3 + $0x178] sm:$0xff] %vm580_vm2, %v1868_v18  ;;  %v898_v41 = vsel %vm580_vm2, %v808_v12, 0.0  ;;  %v814_v11 = vmul.f32 %v1474_v7, %v1474_v7  ;;  %v815_v12 = vmul.f32 %v1499_v16, %v1499_v16 }
 0x111   :  { %v887_v56 = vadd.f32 %v886_v52, %v885_v51  ;;  %v690_v21 = vadd.f32 %v689_v10, %v688_v50  ;;  %v701_v51 = vsel %vm580_vm2, %v1666_v46, 0.0  ;;  %v810_v52 = vmul.f32 %v1700_v3, %v1700_v3 }
 0x112   :  { %v705_v46 = vsel %vm580_vm2, %v1733_v35, 0.0 }
 0x113   :  { %v692_v43 = vadd.f32 %v691_v17, %v690_v21  ;;  %v889_v61 = vadd.f32 %v888_v39, %v887_v56  ;;  %v900_v56 = vsel %vm580_vm2, %v809_v45, 0.0  ;;  %v703_v21 = vsel %vm580_vm2, %v1700_v3, 0.0 }
 0x114   :  { %v811_v39 = vmul.f32 %v1733_v35, %v1733_v35  ;;  %v709_v35 = vsel %vm580_vm2, %v1444_v55, 0.0  ;;  %v713_v55 = vsel %vm580_vm2, %v1499_v16, 0.0 }
 0x115   :  { %v694_v2 = vadd.f32 %v693_v0, %v692_v43  ;;  %v891_v8 = vadd.f32 %v890_v24, %v889_v61  ;;  %v902_v43 = vsel %vm580_vm2, %v810_v52, 0.0  ;;  %v812_v61 = vmul.f32 %v1766_v26, %v1766_v26 }
 0x116   :  { %v904_v3 = vsel %vm580_vm2, %v811_v39, 0.0 }
 0x117   :  { %v696_v4 = vadd.f32 %v695_v33, %v694_v2  ;;  %v893_v5 = vadd.f32 %v892_v62, %v891_v8  ;;  %v707_v2 = vsel %vm580_vm2, %v1766_v26, 0.0  ;;  %v1907_v8 = vpop.f32.mrf.mxu3 }
 0x118   :  { %641 = vst.msk [vmem:[%s2107_s3 + $0x1e0] sm:$0xff] %vm580_vm2, %v1907_v8 }
 0x119   :  { %v698_v13 = vadd.f32 %v697_v28, %v696_v4  ;;  %v895_v15 = vadd.f32 %v894_v58, %v893_v5  ;;  %v906_v4 = vsel %vm580_vm2, %v812_v61, 0.0  ;;  %v908_v58 = vsel %vm580_vm2, %v813_v1, 0.0 }
 0x11a   :  { %v711_v28 = vsel %vm580_vm2, %v1474_v7, 0.0  ;;  %v715_v7 = vsel %vm580_vm2, %v1517_v19, 0.0 }
 0x11b   :  { %v700_v49 = vadd.f32 %v699_v32, %v698_v13  ;;  %v897_v50 = vadd.f32 %v896_v22, %v895_v15  ;;  %v910_v22 = vsel %vm580_vm2, %v814_v11, 0.0  ;;  %v816_v32 = vmul.f32 %v1517_v19, %v1517_v19 }
 0x11c   :  { %v818_v19 = vmul.f32 %v1560_v27, %v1560_v27 }
 0x11d   :  { %v702_v10 = vadd.f32 %v701_v51, %v700_v49  ;;  %v899_v54 = vadd.f32 %v898_v41, %v897_v50  ;;  %v912_v50 = vsel %vm580_vm2, %v815_v12, 0.0  ;;  %v817_v41 = vmul.f32 %v1535_v23, %v1535_v23 }
 0x11e   :  { %v914_v16 = vsel %vm580_vm2, %v816_v32, 0.0  ;;  %v918_v61 = vsel %vm580_vm2, %v818_v19, 0.0  ;;  %v735_v19 = vsel %vm580_vm2, %v1800_v9, 0.0 }
 0x11f   :  { %v901_v17 = vadd.f32 %v900_v56, %v899_v54  ;;  %v704_v60 = vadd.f32 %v703_v21, %v702_v10  ;;  %v1934_v51 = vpop.f32.mrf.mxu3  ;;  %v717_v54 = vsel %vm580_vm2, %v1535_v23, 0.0  ;;  %v916_v39 = vsel %vm580_vm2, %v817_v41, 0.0 }
 0x120   :  { %642 = vst.msk [vmem:[%s2107_s3 + $0x1e8] sm:$0xff] %vm580_vm2, %v1934_v51  ;;  %v721_v23 = vsel %vm580_vm2, %v1585_v31, 0.0 }
 0x121   :  { %v903_v24 = vadd.f32 %v902_v43, %v901_v17  ;;  %v706_v0 = vadd.f32 %v705_v46, %v704_v60  ;;  %v719_v17 = vsel %vm580_vm2, %v1560_v27, 0.0  ;;  %v819_v60 = vmul.f32 %v1585_v31, %v1585_v31 }
 0x122   :  { %v723_v27 = vsel %vm580_vm2, %v1610_v36, 0.0  ;;  %v725_v31 = vsel %vm580_vm2, %v1635_v40, 0.0 }
 0x123   :  { %v905_v62 = vadd.f32 %v904_v3, %v903_v24  ;;  %v708_v33 = vadd.f32 %v707_v2, %v706_v0  ;;  %v820_v24 = vmul.f32 %v1610_v36, %v1610_v36  ;;  %v920_v3 = vsel %vm580_vm2, %v819_v60, 0.0 }
 0x124   :  { %v821_v2 = vmul.f32 %v1635_v40, %v1635_v40  ;;  %v828_v60 = vmul.f32 %v1868_v18, %v1868_v18 }
 0x125   :  { %v710_v5 = vadd.f32 %v709_v35, %v708_v33  ;;  %v907_v26 = vadd.f32 %v906_v4, %v905_v62  ;;  %v922_v11 = vsel %vm580_vm2, %v820_v24, 0.0  ;;  %v822_v4 = vmul.f32 %v1660_v44, %v1660_v44 }
 0x127   :  { %v712_v13 = vadd.f32 %v711_v28, %v710_v5  ;;  %v909_v15 = vadd.f32 %v908_v58, %v907_v26  ;;  %v1961_v35 = vpop.f32.mrf.mxu3  ;;  %v924_v26 = vsel %vm580_vm2, %v821_v2, 0.0  ;;  %v727_v58 = vsel %vm580_vm2, %v1660_v44, 0.0 }
 0x128   :  { %643 = vst.msk [vmem:[%s2107_s3 + $0x1f0] sm:$0xff] %vm580_vm2, %v1961_v35  ;;  %v823_v28 = vmul.f32 %v1692_v63, %v1692_v63  ;;  %v731_v44 = vsel %vm580_vm2, %v1725_v53, 0.0 }
 0x129   :  { %v714_v45 = vadd.f32 %v713_v55, %v712_v13  ;;  %v911_v49 = vadd.f32 %v910_v22, %v909_v15  ;;  %v926_v13 = vsel %vm580_vm2, %v822_v4, 0.0  ;;  %v729_v15 = vsel %vm580_vm2, %v1692_v63, 0.0 }
 0x12a   :  { %v824_v22 = vmul.f32 %v1725_v53, %v1725_v53  ;;  %v733_v63 = vsel %vm580_vm2, %v1757_v14, 0.0 }
 0x12b   :  { %v716_v52 = vadd.f32 %v715_v7, %v714_v45  ;;  %v913_v10 = vadd.f32 %v912_v50, %v911_v49  ;;  %v928_v45 = vsel %vm580_vm2, %v823_v28, 0.0  ;;  %v825_v49 = vmul.f32 %v1757_v14, %v1757_v14 }
 0x12d   :  { %v718_v56 = vadd.f32 %v717_v54, %v716_v52  ;;  %v915_v21 = vadd.f32 %v914_v16, %v913_v10  ;;  %v930_v52 = vsel %vm580_vm2, %v824_v22, 0.0  ;;  %v826_v10 = vmul.f32 %v1800_v9, %v1800_v9 }
 0x12e   :  { %v932_v54 = vsel %vm580_vm2, %v825_v49, 0.0  ;;  %v834_v22 = vmul.f32 %v1668_v48, %v1668_v48 }
 0x12f   :  { %v720_v43 = vadd.f32 %v719_v17, %v718_v56  ;;  %v917_v46 = vadd.f32 %v916_v39, %v915_v21  ;;  %v1988_v41 = vpop.f32.mrf.mxu3  ;;  %v827_v56 = vmul.f32 %v1834_v57, %v1834_v57  ;;  %v934_v39 = vsel %vm580_vm2, %v826_v10, 0.0 }
 0x130   :  { %644 = vst.msk [vmem:[%s2107_s3 + $0x1f8] sm:$0xff] %vm580_vm2, %v1988_v41  ;;  %v737_v17 = vsel %vm580_vm2, %v1834_v57, 0.0  ;;  %v830_v57 = vmul.f32 %v1568_v29, %v1568_v29 }
 0x131   :  { %v919_v0 = vadd.f32 %v918_v61, %v917_v46  ;;  %v722_v1 = vadd.f32 %v721_v23, %v720_v43  ;;  %v829_v61 = vmul.f32 %v1543_v25, %v1543_v25  ;;  %v936_v9 = vsel %vm580_vm2, %v827_v56, 0.0 }
 0x132   :  { %v739_v23 = vsel %vm580_vm2, %v1868_v18, 0.0  ;;  %v942_v4 = vsel %vm580_vm2, %v830_v57, 0.0 }
 0x133   :  { %v724_v62 = vadd.f32 %v723_v27, %v722_v1  ;;  %v921_v33 = vadd.f32 %v920_v3, %v919_v0  ;;  %v741_v1 = vsel %vm580_vm2, %v1543_v25, 0.0  ;;  %v938_v3 = vsel %vm580_vm2, %v828_v60, 0.0 }
 0x134   :  { %v1025_v27 = vmov 0.0   ;;  %v940_v18 = vsel %vm580_vm2, %v829_v61, 0.0  ;;  %v831_v25 = vmul.f32 %v1593_v34, %v1593_v34  ;;  %v839_v60 = vmul.f32 %v1846_v20, %v1846_v20 }
 0x135   :  { %v726_v36 = vadd.f32 %v725_v31, %v724_v62  ;;  %v923_v5 = vadd.f32 %v922_v11, %v921_v33  ;;  %645 = vst.msk [vmem:[%s2108_s4] sm:$0xff] %vm580_vm2, %v1025_v27  ;;  %v743_v33 = vsel %vm580_vm2, %v1568_v29, 0.0  ;;  %v747_v29 = vsel %vm580_vm2, %v1618_v38, 0.0 }
 0x136   :  { %v944_v28 = vsel %vm580_vm2, %v831_v25, 0.0  ;;  %v843_v25 = vmul.f32 %v1961_v35, %v1961_v35 }
 0x137   :  { %v728_v40 = vadd.f32 %v727_v58, %v726_v36  ;;  %v925_v12 = vadd.f32 %v924_v26, %v923_v5  ;;  %v745_v36 = vsel %vm580_vm2, %v1593_v34, 0.0  ;;  %v832_v5 = vmul.f32 %v1618_v38, %v1618_v38 }
 0x138   :  { %v749_v34 = vsel %vm580_vm2, %v1643_v42, 0.0  ;;  %v751_v38 = vsel %vm580_vm2, %v1668_v48, 0.0  ;;  %v755_v48 = vsel %vm580_vm2, %v1735_v59, 0.0 }
 0x139   :  { %v730_v55 = vadd.f32 %v729_v15, %v728_v40  ;;  %v927_v32 = vadd.f32 %v926_v13, %v925_v12  ;;  %v833_v40 = vmul.f32 %v1643_v42, %v1643_v42  ;;  %v946_v15 = vsel %vm580_vm2, %v832_v5, 0.0 }
 0x13a   :  { %v753_v42 = vsel %vm580_vm2, %v1702_v6, 0.0 }
 0x13b   :  { %v732_v50 = vadd.f32 %v731_v44, %v730_v55  ;;  %v929_v7 = vadd.f32 %v928_v45, %v927_v32  ;;  %v948_v45 = vsel %vm580_vm2, %v833_v40, 0.0  ;;  %v835_v44 = vmul.f32 %v1702_v6, %v1702_v6 }
 0x13c   :  { %v757_v6 = vsel %vm580_vm2, %v1768_v30, 0.0 }
 0x13d   :  { %v931_v53 = vadd.f32 %v930_v52, %v929_v7  ;;  %v734_v16 = vadd.f32 %v733_v63, %v732_v50  ;;  %v950_v7 = vsel %vm580_vm2, %v834_v22, 0.0  ;;  %v836_v52 = vmul.f32 %v1735_v59, %v1735_v59 }
 0x13e   :  { %v759_v59 = vsel %vm580_vm2, %v1812_v47, 0.0 }
 0x13f   :  { %v933_v14 = vadd.f32 %v932_v54, %v931_v53  ;;  %v736_v21 = vadd.f32 %v735_v19, %v734_v16  ;;  %v952_v53 = vsel %vm580_vm2, %v835_v44, 0.0  ;;  %v837_v16 = vmul.f32 %v1768_v30, %v1768_v30 }
 0x140   :  { %v954_v56 = vsel %vm580_vm2, %v836_v52, 0.0  ;;  %v761_v30 = vsel %vm580_vm2, %v1846_v20, 0.0  ;;  %v765_v20 = vsel %vm580_vm2, %v1907_v8, 0.0 }
 0x141   :  { %v935_v43 = vadd.f32 %v934_v39, %v933_v14  ;;  %v738_v46 = vadd.f32 %v737_v17, %v736_v21  ;;  %v838_v14 = vmul.f32 %v1812_v47, %v1812_v47  ;;  %v956_v17 = vsel %vm580_vm2, %v837_v16, 0.0 }
 0x142   :  { %v763_v47 = vsel %vm580_vm2, %v1880_v37, 0.0 }
 0x143   :  { %v937_v24 = vadd.f32 %v936_v9, %v935_v43  ;;  %v740_v0 = vadd.f32 %v739_v23, %v738_v46  ;;  %v958_v61 = vsel %vm580_vm2, %v838_v14, 0.0  ;;  %v840_v9 = vmul.f32 %v1880_v37, %v1880_v37 }
 0x144   :  { %v767_v37 = vsel %vm580_vm2, %v1934_v51, 0.0 }
 0x145   :  { %v742_v2 = vadd.f32 %v741_v1, %v740_v0  ;;  %v939_v62 = vadd.f32 %v938_v3, %v937_v24  ;;  %v960_v0 = vsel %vm580_vm2, %v839_v60, 0.0  ;;  %v841_v1 = vmul.f32 %v1907_v8, %v1907_v8 }
 0x146   :  { %v962_v27 = vsel %vm580_vm2, %v840_v9, 0.0  ;;  %v769_v8 = vsel %vm580_vm2, %v1961_v35, 0.0 }
 0x147   :  { %v744_v11 = vadd.f32 %v743_v33, %v742_v2  ;;  %v941_v31 = vadd.f32 %v940_v18, %v939_v62  ;;  %v842_v2 = vmul.f32 %v1934_v51, %v1934_v51  ;;  %v964_v33 = vsel %vm580_vm2, %v841_v1, 0.0 }
 0x148   :  { %v771_v51 = vsel %vm580_vm2, %v1988_v41, 0.0 }
 0x149   :  { %v746_v26 = vadd.f32 %v745_v36, %v744_v11  ;;  %v943_v58 = vadd.f32 %v942_v4, %v941_v31  ;;  %v966_v4 = vsel %vm580_vm2, %v842_v2, 0.0  ;;  %v844_v36 = vmul.f32 %v1988_v41, %v1988_v41 }
 0x14b   :  { %v748_v12 = vadd.f32 %v747_v29, %v746_v26  ;;  %v945_v13 = vadd.f32 %v944_v28, %v943_v58  ;;  %v968_v58 = vsel %vm580_vm2, %v843_v25, 0.0  ;;  %v970_v40 = vsel %vm580_vm2, %v844_v36, 0.0 }
 0x14d   :  { %v750_v55 = vadd.f32 %v749_v34, %v748_v12  ;;  %v947_v32 = vadd.f32 %v946_v15, %v945_v13 }
 0x14f   :  { %v752_v49 = vadd.f32 %v751_v38, %v750_v55  ;;  %v949_v50 = vadd.f32 %v948_v45, %v947_v32 }
 0x151   :  { %v951_v63 = vadd.f32 %v950_v7, %v949_v50  ;;  %v754_v10 = vadd.f32 %v753_v42, %v752_v49 }
 0x153   :  { %v756_v54 = vadd.f32 %v755_v48, %v754_v10  ;;  %v953_v19 = vadd.f32 %v952_v53, %v951_v63 }
 0x155   :  { %v758_v21 = vadd.f32 %v757_v6, %v756_v54  ;;  %v955_v39 = vadd.f32 %v954_v56, %v953_v19 }
 0x157   :  { %v760_v43 = vadd.f32 %v759_v59, %v758_v21  ;;  %v957_v46 = vadd.f32 %v956_v17, %v955_v39 }
 0x159   :  { %v762_v23 = vadd.f32 %v761_v30, %v760_v43  ;;  %v959_v24 = vadd.f32 %v958_v61, %v957_v46 }
 0x15b   :  { %v764_v57 = vadd.f32 %v763_v47, %v762_v23  ;;  %v961_v3 = vadd.f32 %v960_v0, %v959_v24 }
 0x15d   :  { %v963_v62 = vadd.f32 %v962_v27, %v961_v3  ;;  %v766_v18 = vadd.f32 %v765_v20, %v764_v57 }
 0x15f   :  { %v965_v11 = vadd.f32 %v964_v33, %v963_v62  ;;  %v768_v31 = vadd.f32 %v767_v37, %v766_v18 }
 0x161   :  { %v967_v5 = vadd.f32 %v966_v4, %v965_v11  ;;  %v770_v26 = vadd.f32 %v769_v8, %v768_v31 }
 0x163   :  { %v969_v28 = vadd.f32 %v968_v58, %v967_v5  ;;  %v772_v29 = vadd.f32 %v771_v51, %v770_v26 }
 0x165   :  { %v773_v12 = vrot.slane %v772_v29, 4  ;;  %v971_v13 = vadd.f32 %v970_v40, %v969_v28 }
 0x167   :  { %v774_v15 = vadd.f32 %v773_v12, %v772_v29  ;;  %v972_v34 = vrot.slane %v971_v13, 4 }
 0x169   :  { %v775_v22 = vrot.slane %v774_v15, 2  ;;  %v973_v35 = vadd.f32 %v972_v34, %v971_v13 }
 0x16b   :  { %v776_v55 = vadd.f32 %v775_v22, %v774_v15  ;;  %v974_v32 = vrot.slane %v973_v35, 2 }
 0x16d   :  { %v777_v45 = vrot.slane %v776_v55, 1  ;;  %v975_v38 = vadd.f32 %v974_v32, %v973_v35 }
 0x16f   :  { %v778_v44 = vadd.f32 %v777_v45, %v776_v55  ;;  %v976_v49 = vrot.slane %v975_v38, 1 }
 0x171   :  { %780 = vst.msk [vmem:[%s2108_s4] sm:$0x1] %vm779_vm3, %v778_v44  ;;  %v977_v41 = vadd.f32 %v976_v49, %v975_v38 }
 0x173   :  { %978 = vst.msk [vmem:[%s2108_s4 + $0x1] sm:$0x1] %vm779_vm3, %v977_v41 }

// kernel: bottleneck_forward.5
= control target key start
LH: loop header
LB: loop body
LE: loop exit
PB: predicated region body
PF: predicated region fallthrough
CT: control target
= control target key end

     0   :  { %s3028_s15 = smov 0   ;;  %s4364_s0 = inlined_call_operand.vmem [shape: f32[512,4], index: 0, kind: input, shape index: {}]   ;;  %s4365_s1 = inlined_call_operand.vmem [shape: f32[2,4], index: 1, kind: input, shape index: {}]   ;;  %s4366_s2 = inlined_call_operand.vmem [shape: bf16[3,3,4,4], index: 2, kind: input, shape index: {}]   ;;  %s4367_s3 = inlined_call_operand.vmem [shape: f32[512,4], index: 3, kind: output, shape index: {0}]   ;;  %s4368_s4 = inlined_call_operand.vmem [shape: f32[16,4], index: 4, kind: output, shape index: {1}]  }
   0x1 LB: > { %s3034_s16 = sadd.s32 4294967295, %s3000_s15   ;;  %p2818_p0 = scmp.ge.s32.totalorder %s3000_s15, 1  ;;  %s3000_s15 = sphi %s3028_s15, %s15_s15  }
   0x2   : > { %p166_p1 = scmp.lt.s32.totalorder %s3000_s15, 3 }
   0x4   : > { %p167_p2 = pnand %p2818_p0, %p166_p1 }
   0x5   : > { %s2819_s19 = sshll.u32 (!%p167_p2), %s3034_s16, 5  ;;  %p208_p4 = scmp.lt.s32.totalorder (!%p167_p2), %s3034_s16, 1 }
   0x6   : > { %170 = sbr.rel (%p167_p2) target bundleno = 843 (0x34b), region = 32  ;;  %p197_p3 = scmp.lt.s32.totalorder (!%p167_p2), %s2819_s19, 63 }
   0xb   : > { %v540_v0 = vld [vmem:[%s4366_s2] sm:$0x3]  ;;  %vm589_vm0 = vcmask 1041408   ;;  %vm354_vm1 = vcmask 24576   ;;  %s4370_s19 = smov (!%p197_p3, %s2819_s19), 63  ;;  %vm345_vm2 = vcmask 31744  }
   0xc   : > { %v591_v1 = vsel %vm589_vm0, %v540_v0, 0  ;;  %v3002_v2 = vmov 0.0   ;;  %v3050_v3 = vld [vmem:[%s4365_s1] ss:$0 sm:$0xff]  ;;  %s2820_s22 = sshll.u32 %s4370_s19, 3  ;;  %vm348_vm3 = vcmask 25600  }
   0xd   : > { %2978 = vmatpush.bf16.msra.mxu1 %v591_v1  ;;  %2979 = vmatpush.bf16.msra.mxu2 %v591_v1  ;;  %359 = vst.msk [vmem:[#allocation2 + $0x60] sm:$0x1] %vm354_vm1, %v3002_v2  ;;  %s3062_s25 = scalar_lea.vmem %s4364_s0, %s2820_s22  ;;  %v3067_v4 = vld [vmem:[%s4365_s1 + $0x1] ss:$0 sm:$0xff]  ;;  %v2840_v16 = vld [vmem:[%s4366_s2 + $0x6] sm:$0x3]  ;;  %s3952_s28 = scalar_lea.vmem %s4367_s3, %s2820_s22 }
   0xe   : > { %2980 = vmatpush.bf16.msra.mxu3 %v591_v1  ;;  %600 = vmatpush.bf16.msra.mxu0 %v591_v1  ;;  %346 = vst.msk [vmem:[#allocation2] sm:$0xff] %vm345_vm2, %v3002_v2  ;;  %v219_v5 = vld [vmem:[%s3062_s25 + $0x30] sm:$0xff]  ;;  %v220_v6 = vld [vmem:[%s3062_s25 + $0x38] sm:$0xff]  ;;  %v2857_v17 = vld [vmem:[%s4366_s2 + $0xc] sm:$0x3]  ;;  %v785_v18 = vsel %vm589_vm0, %v2840_v16, 0 }
   0xf   : > { %347 = vst.msk [vmem:[#allocation2 + $0x8] sm:$0xff] %vm345_vm2, %v3002_v2  ;;  %v253_v7 = vmul.f32 %v3050_v3, %v219_v5  ;;  %v254_v8 = vmul.f32 %v3050_v3, %v220_v6  ;;  %v979_v19 = vsel %vm589_vm0, %v2857_v17, 0  ;;  %v2874_v20 = vld [vmem:[%s4366_s2 + $0x2] sm:$0x3]  ;;  %v227_v22 = vld [vmem:[%s3062_s25 + $0x70] sm:$0xff]  ;;  %v228_v23 = vld [vmem:[%s3062_s25 + $0x78] sm:$0xff] }
  0x10   : > { %351 = vst.msk [vmem:[#allocation2 + $0x198] sm:$0xff] %vm345_vm2, %v3002_v2  ;;  %v1269_v21 = vsel %vm589_vm0, %v2874_v20, 0  ;;  %v261_v24 = vmul.f32 %v3050_v3, %v227_v22  ;;  %v262_v25 = vmul.f32 %v3050_v3, %v228_v23  ;;  %v235_v26 = vld [vmem:[%s3062_s25 + $0xb0] sm:$0xff]  ;;  %v236_v27 = vld [vmem:[%s3062_s25 + $0xb8] sm:$0xff]  ;;  %v221_v28 = vld [vmem:[%s3062_s25 + $0x40] sm:$0xff]  ;;  %s4372_s16 = smov (!%p208_p4, %s3034_s16), 1 }
  0x11   : > { %352 = vst.msk [vmem:[#allocation2 + $0x1a0] sm:$0xff] %vm345_vm2, %v3002_v2  ;;  %v287_v9 = vadd.f32 %v3067_v4, %v253_v7  ;;  %v288_v10 = vadd.f32 %v3067_v4, %v254_v8  ;;  %794 = vmatpush.bf16.msrb.mxu1 %v785_v18  ;;  %988 = vmatpush.bf16.msrb.mxu2 %v979_v19  ;;  %v222_v31 = vld [vmem:[%s3062_s25 + $0x48] sm:$0xff]  ;;  %v229_v34 = vld [vmem:[%s3062_s25 + $0x80] sm:$0xff]  ;;  %v223_v46 = vld [vmem:[%s3062_s25 + $0x50] sm:$0xff]  ;;  %s2823_s19 = sshll.u32 %s4372_s16, 3 }
  0x12   : > { %356 = vst.msk [vmem:[#allocation2 + $0x18] sm:$0x1] %vm354_vm1, %v3002_v2  ;;  %1278 = vmatpush.bf16.msrb.mxu3 %v1269_v21  ;;  %v295_v29 = vadd.f32 %v3067_v4, %v261_v24  ;;  %v269_v30 = vmul.f32 %v3050_v3, %v235_v26  ;;  %v296_v32 = vadd.f32 %v3067_v4, %v262_v25  ;;  %v230_v36 = vld [vmem:[%s3062_s25 + $0x88] sm:$0xff]  ;;  %v237_v38 = vld [vmem:[%s3062_s25 + $0xc0] sm:$0xff]  ;;  %v224_v49 = vld [vmem:[%s3062_s25 + $0x58] sm:$0xff]  ;;  %s4180_s30 = scalar_lea.vmem %s4368_s4, %s2823_s19 }
  0x13   : > { %357 = vst.msk [vmem:[#allocation2 + $0x30] sm:$0x1] %vm354_vm1, %v3002_v2  ;;  %v319_v11 = vmax.f32 %v287_v9, 0.0  ;;  %v320_v12 = vmax.f32 %v288_v10, 0.0  ;;  %v270_v33 = vmul.f32 %v3050_v3, %v236_v27  ;;  %v255_v35 = vmul.f32 %v3050_v3, %v221_v28  ;;  %v238_v42 = vld [vmem:[%s3062_s25 + $0xc8] sm:$0xff]  ;;  %v231_v53 = vld [vmem:[%s3062_s25 + $0x90] sm:$0xff] }
  0x14   : > { %358 = vst.msk [vmem:[#allocation2 + $0x48] sm:$0x1] %vm354_vm1, %v3002_v2  ;;  %v256_v37 = vmul.f32 %v3050_v3, %v222_v31  ;;  %v327_v39 = vmax.f32 %v295_v29, 0.0  ;;  %v303_v40 = vadd.f32 %v3067_v4, %v269_v30  ;;  %v263_v41 = vmul.f32 %v3050_v3, %v229_v34  ;;  %v2891_v52 = vld [vmem:[%s4366_s2 + $0x8] sm:$0x3]  ;;  %v232_v58 = vld [vmem:[%s3062_s25 + $0x98] sm:$0xff] }
  0x15   : > { %360 = vst.msk [vmem:[#allocation2 + $0x78] sm:$0x1] %vm354_vm1, %v3002_v2  ;;  %v328_v43 = vmax.f32 %v296_v32, 0.0  ;;  %v304_v44 = vadd.f32 %v3067_v4, %v270_v33  ;;  %v264_v45 = vmul.f32 %v3050_v3, %v230_v36  ;;  %v289_v47 = vadd.f32 %v3067_v4, %v255_v35  ;;  %v213_v62 = vld [vmem:[%s3062_s25] sm:$0xff]  ;;  %v214_v5 = vld [vmem:[%s3062_s25 + $0x8] sm:$0xff]  ;;  %v239_v9 = vld [vmem:[%s3062_s25 + $0xd0] sm:$0xff] }
  0x16   : > { %361 = vst.msk [vmem:[#allocation2 + $0x90] sm:$0x1] %vm354_vm1, %v3002_v2  ;;  %v271_v48 = vmul.f32 %v3050_v3, %v237_v38  ;;  %v290_v50 = vadd.f32 %v3067_v4, %v256_v37  ;;  %v272_v51 = vmul.f32 %v3050_v3, %v238_v42  ;;  %v335_v54 = vmax.f32 %v303_v40, 0.0  ;;  %v240_v10 = vld [vmem:[%s3062_s25 + $0xd8] sm:$0xff]  ;;  %v457_v23 = vld [vmem:[#allocation2 + $0x8] sm:$0xff]  ;;  %v225_v37 = vld [vmem:[%s3062_s25 + $0x60] sm:$0xff] }
  0x17   : > { %362 = vst.msk [vmem:[#allocation2 + $0xa8] sm:$0x1] %vm354_vm1, %v3002_v2  ;;  %v297_v55 = vadd.f32 %v3067_v4, %v263_v41  ;;  %v1463_v56 = vsel %vm589_vm0, %v2891_v52, 0  ;;  %v257_v57 = vmul.f32 %v3050_v3, %v223_v46  ;;  %v336_v59 = vmax.f32 %v304_v44, 0.0  ;;  %v226_v38 = vld [vmem:[%s3062_s25 + $0x68] sm:$0xff] }
  0x18   : > { %398 = vst.msk [vmem:[#allocation2 + $0x61] sm:$0xff] %vm345_vm2, %v319_v11  ;;  %v298_v60 = vadd.f32 %v3067_v4, %v264_v45  ;;  %1472 = vmatpush.bf16.msrb.mxu0 %v1463_v56  ;;  %v258_v61 = vmul.f32 %v3050_v3, %v224_v49  ;;  %v321_v63 = vmax.f32 %v289_v47, 0.0  ;;  %v305_v0 = vadd.f32 %v3067_v4, %v271_v48  ;;  %v234_v44 = vld [vmem:[%s3062_s25 + $0xa8] sm:$0xff] }
  0x19   : > { %399 = vst.msk [vmem:[#allocation2 + $0x69] sm:$0xff] %vm345_vm2, %v320_v12  ;;  %v265_v1 = vmul.f32 %v3050_v3, %v231_v53  ;;  %v322_v6 = vmax.f32 %v290_v50, 0.0  ;;  %v306_v7 = vadd.f32 %v3067_v4, %v272_v51  ;;  %v266_v8 = vmul.f32 %v3050_v3, %v232_v58 }
  0x1a   : > { %363 = vst.msk [vmem:[#allocation2 + $0xc0] sm:$0x1] %vm354_vm1, %v3002_v2  ;;  %v329_v11 = vmax.f32 %v297_v55, 0.0  ;;  %v291_v12 = vadd.f32 %v3067_v4, %v257_v57  ;;  %v292_v16 = vadd.f32 %v3067_v4, %v258_v61  ;;  %v248_v17 = vmul.f32 %v3050_v3, %v214_v5  ;;  %v215_v61 = vld [vmem:[%s3062_s25 + $0x10] sm:$0xff]  ;;  %v241_v5 = vld [vmem:[%s3062_s25 + $0xe0] sm:$0xff] }
  0x1b   : > { %364 = vst.msk [vmem:[#allocation2 + $0xd8] sm:$0x1] %vm354_vm1, %v3002_v2  ;;  %v337_v18 = vmax.f32 %v305_v0, 0.0  ;;  %v299_v19 = vadd.f32 %v3067_v4, %v265_v1  ;;  %v273_v20 = vmul.f32 %v3050_v3, %v239_v9  ;;  %v274_v21 = vmul.f32 %v3050_v3, %v240_v10 }
  0x1c   : > { %365 = vst.msk [vmem:[#allocation2 + $0xf0] sm:$0x1] %vm354_vm1, %v3002_v2  ;;  %v338_v24 = vmax.f32 %v306_v7, 0.0  ;;  %v300_v25 = vadd.f32 %v3067_v4, %v266_v8  ;;  %v323_v27 = vmax.f32 %v291_v12, 0.0  ;;  %v324_v31 = vmax.f32 %v292_v16, 0.0 }
  0x1d   : > { %366 = vst.msk [vmem:[#allocation2 + $0x108] sm:$0x1] %vm354_vm1, %v3002_v2  ;;  %v282_v32 = vadd.f32 %v3067_v4, %v248_v17  ;;  %v331_v34 = vmax.f32 %v299_v19, 0.0  ;;  %v307_v35 = vadd.f32 %v3067_v4, %v273_v20  ;;  %v308_v36 = vadd.f32 %v3067_v4, %v274_v21 }
  0x1e   : > { %367 = vst.msk [vmem:[#allocation2 + $0x120] sm:$0x1] %vm354_vm1, %v3002_v2  ;;  %v332_v41 = vmax.f32 %v300_v25, 0.0  ;;  %v259_v42 = vmul.f32 %v3050_v3, %v225_v37  ;;  %v268_v48 = vmul.f32 %v3050_v3, %v234_v44  ;;  %v249_v0 = vmul.f32 %v3050_v3, %v215_v61 }
  0x1f   : > { %v464_v13 = vld [vmem:[#allocation2 + $0x60] sm:$0xff]  ;;  %368 = vst.msk [vmem:[#allocation2 + $0x138] sm:$0x1] %vm354_vm1, %v3002_v2  ;;  %v314_v51 = vmax.f32 %v282_v32, 0.0  ;;  %v339_v55 = vmax.f32 %v307_v35, 0.0  ;;  %v340_v58 = vmax.f32 %v308_v36, 0.0  ;;  %v275_v8 = vmul.f32 %v3050_v3, %v241_v5 }
  0x20   : > { %v465_v14 = vld [vmem:[#allocation2 + $0x68] sm:$0xff]  ;;  %369 = vst.msk [vmem:[#allocation2 + $0x150] sm:$0x1] %vm354_vm1, %v3002_v2  ;;  %v293_v52 = vadd.f32 %v3067_v4, %v259_v42 }
  0x21   : > { %v3107_v15 = vpack.c.bf16 %v465_v14, %v464_v13  ;;  %370 = vst.msk [vmem:[#allocation2 + $0x168] sm:$0x1] %vm354_vm1, %v3002_v2  ;;  %v247_v13 = vmul.f32 %v3050_v3, %v213_v62  ;;  %v330_v14 = vmax.f32 %v298_v60, 0.0  ;;  %v216_v62 = vld [vmem:[%s3062_s25 + $0x18] sm:$0xff]  ;;  %v309_v16 = vadd.f32 %v3067_v4, %v275_v8 }
  0x22   : > { %371 = vst.msk [vmem:[#allocation2 + $0x180] sm:$0x1] %vm354_vm1, %v3002_v2  ;;  %v325_v60 = vmax.f32 %v293_v52, 0.0  ;;  %v250_v1 = vmul.f32 %v3050_v3, %v216_v62  ;;  %v2925_v52 = vld [vmem:[%s4366_s2 + $0x4] sm:$0x3] }
  0x23   : > { %2828 = vmatmul.msk.bf16.vlgmr.msra.gmra.mxu1 %vm345_vm2, %v3107_v15  ;;  %374 = vst.msk [vmem:[#allocation2 + $0x29] sm:$0x1] %vm354_vm1, %v3002_v2  ;;  %v281_v28 = vadd.f32 %v3067_v4, %v247_v13  ;;  %v341_v20 = vmax.f32 %v309_v16, 0.0 }
  0x24   : > { %375 = vst.msk [vmem:[#allocation2 + $0x41] sm:$0x1] %vm354_vm1, %v3002_v2  ;;  %v284_v12 = vadd.f32 %v3067_v4, %v250_v1 }
  0x25   : > { %376 = vst.msk [vmem:[#allocation2 + $0x59] sm:$0x1] %vm354_vm1, %v3002_v2  ;;  %v313_v47 = vmax.f32 %v281_v28, 0.0 }
  0x26   : > { %377 = vst.msk [vmem:[#allocation2 + $0x71] sm:$0x1] %vm354_vm1, %v3002_v2  ;;  %v316_v19 = vmax.f32 %v284_v12, 0.0 }
  0x27   : > { %378 = vst.msk [vmem:[#allocation2 + $0x89] sm:$0x1] %vm354_vm1, %v3002_v2 }
  0x28   : > { %379 = vst.msk [vmem:[#allocation2 + $0xa1] sm:$0x1] %vm354_vm1, %v3002_v2 }
  0x29   : > { %380 = vst.msk [vmem:[#allocation2 + $0xb9] sm:$0x1] %vm354_vm1, %v3002_v2 }
  0x2a   : > { %381 = vst.msk [vmem:[#allocation2 + $0xd1] sm:$0x1] %vm354_vm1, %v3002_v2 }
  0x2b   : > { %382 = vst.msk [vmem:[#allocation2 + $0xe9] sm:$0x1] %vm354_vm1, %v3002_v2 }
  0x2c   : > { %383 = vst.msk [vmem:[#allocation2 + $0x101] sm:$0x1] %vm354_vm1, %v3002_v2 }
  0x2d   : > { %384 = vst.msk [vmem:[#allocation2 + $0x119] sm:$0x1] %vm354_vm1, %v3002_v2 }
  0x2e   : > { %385 = vst.msk [vmem:[#allocation2 + $0x131] sm:$0x1] %vm354_vm1, %v3002_v2 }
  0x2f   : > { %386 = vst.msk [vmem:[#allocation2 + $0x149] sm:$0x1] %vm354_vm1, %v3002_v2 }
  0x30   : > { %387 = vst.msk [vmem:[#allocation2 + $0x161] sm:$0x1] %vm354_vm1, %v3002_v2 }
  0x31   : > { %388 = vst.msk [vmem:[#allocation2 + $0x179] sm:$0x1] %vm354_vm1, %v3002_v2 }
  0x32   : > { %389 = vst.msk [vmem:[#allocation2 + $0x191] sm:$0x1] %vm354_vm1, %v3002_v2 }
  0x33   : > { %424 = vst.msk [vmem:[#allocation3] sm:$0xff] %vm345_vm2, %v3002_v2 }
  0x34   : > { %425 = vst.msk [vmem:[#allocation3 + $0x8] sm:$0xff] %vm345_vm2, %v3002_v2 }
  0x35   : > { %426 = vst.msk [vmem:[#allocation3 + $0x10] sm:$0xff] %vm345_vm2, %v3002_v2 }
  0x36   : > { %427 = vst.msk [vmem:[#allocation3 + $0x18] sm:$0xff] %vm345_vm2, %v3002_v2 }
  0x37   : > { %428 = vst.msk [vmem:[#allocation3 + $0x20] sm:$0xff] %vm345_vm2, %v3002_v2 }
  0x38   : > { %429 = vst.msk [vmem:[#allocation3 + $0x28] sm:$0xff] %vm345_vm2, %v3002_v2 }
  0x39   : > { %430 = vst.msk [vmem:[#allocation3 + $0x30] sm:$0xff] %vm345_vm2, %v3002_v2 }
  0x3a   : > { %431 = vst.msk [vmem:[#allocation3 + $0x38] sm:$0xff] %vm345_vm2, %v3002_v2 }
  0x3b   : > { %432 = vst.msk [vmem:[#allocation3 + $0x40] sm:$0xff] %vm345_vm2, %v3002_v2 }
  0x3c   : > { %433 = vst.msk [vmem:[#allocation3 + $0x48] sm:$0xff] %vm345_vm2, %v3002_v2 }
  0x3d   : > { %434 = vst.msk [vmem:[#allocation3 + $0x50] sm:$0xff] %vm345_vm2, %v3002_v2 }
  0x3e   : > { %435 = vst.msk [vmem:[#allocation3 + $0x58] sm:$0xff] %vm345_vm2, %v3002_v2 }
  0x3f   : > { %436 = vst.msk [vmem:[#allocation3 + $0x60] sm:$0xff] %vm345_vm2, %v3002_v2 }
  0x40   : > { %437 = vst.msk [vmem:[#allocation3 + $0x68] sm:$0xff] %vm345_vm2, %v3002_v2 }
  0x41   : > { %438 = vst.msk [vmem:[#allocation3 + $0x70] sm:$0xff] %vm345_vm2, %v3002_v2 }
  0x42   : > { %439 = vst.msk [vmem:[#allocation3 + $0x78] sm:$0xff] %vm345_vm2, %v3002_v2 }
  0x43   : > { %440 = vst.msk [vmem:[#allocation3 + $0x80] sm:$0xff] %vm345_vm2, %v3002_v2 }
  0x44   : > { %441 = vst.msk [vmem:[#allocation3 + $0x88] sm:$0xff] %vm345_vm2, %v3002_v2 }
  0x45   : > { %442 = vst.msk [vmem:[#allocation3 + $0x90] sm:$0xff] %vm345_vm2, %v3002_v2 }
  0x46   : > { %443 = vst.msk [vmem:[#allocation3 + $0x98] sm:$0xff] %vm345_vm2, %v3002_v2 }
  0x47   : > { %444 = vst.msk [vmem:[#allocation3 + $0xa0] sm:$0xff] %vm345_vm2, %v3002_v2 }
  0x48   : > { %445 = vst.msk [vmem:[#allocation3 + $0xa8] sm:$0xff] %vm345_vm2, %v3002_v2 }
  0x49   : > { %446 = vst.msk [vmem:[#allocation3 + $0xb0] sm:$0xff] %vm345_vm2, %v3002_v2 }
  0x4a   : > { %447 = vst.msk [vmem:[#allocation3 + $0xb8] sm:$0xff] %vm345_vm2, %v3002_v2 }
  0x4b   : > { %448 = vst.msk [vmem:[#allocation3 + $0xc0] sm:$0xff] %vm345_vm2, %v3002_v2 }
  0x4c   : > { %449 = vst.msk [vmem:[#allocation3 + $0xc8] sm:$0xff] %vm345_vm2, %v3002_v2 }
  0x4d   : > { %450 = vst.msk [vmem:[#allocation3 + $0xd0] sm:$0xff] %vm345_vm2, %v3002_v2 }
  0x4e   : > { %451 = vst.msk [vmem:[#allocation3 + $0xd8] sm:$0xff] %vm345_vm2, %v3002_v2 }
  0x4f   : > { %452 = vst.msk [vmem:[#allocation3 + $0xe0] sm:$0xff] %vm345_vm2, %v3002_v2 }
  0x50   : > { %453 = vst.msk [vmem:[#allocation3 + $0xe8] sm:$0xff] %vm345_vm2, %v3002_v2 }
  0x51   : > { %454 = vst.msk [vmem:[#allocation3 + $0xf0] sm:$0xff] %vm345_vm2, %v3002_v2 }
  0x52   : > { %455 = vst.msk [vmem:[#allocation3 + $0xf8] sm:$0xff] %vm345_vm2, %v3002_v2 }
  0x53   : > { %406 = vst.msk [vmem:[#allocation2 + $0xc1] sm:$0xff] %vm345_vm2, %v327_v39  ;;  %v233_v39 = vld [vmem:[%s3062_s25 + $0xa0] sm:$0xff] }
  0x54   : > { %407 = vst.msk [vmem:[#allocation2 + $0xc9] sm:$0xff] %vm345_vm2, %v328_v43  ;;  %v260_v43 = vmul.f32 %v3050_v3, %v226_v38  ;;  %v267_v45 = vmul.f32 %v3050_v3, %v233_v39 }
  0x55   : > { %355 = vst.msk [vmem:[#allocation2] sm:$0x1] %vm354_vm1, %v3002_v2 }
  0x56   : > { %372 = vst.msk [vmem:[#allocation2 + $0x198] sm:$0x1] %vm354_vm1, %v3002_v2  ;;  %v294_v53 = vadd.f32 %v3067_v4, %v260_v43  ;;  %v301_v56 = vadd.f32 %v3067_v4, %v267_v45 }
  0x57   : > { %414 = vst.msk [vmem:[#allocation2 + $0x121] sm:$0xff] %vm345_vm2, %v335_v54 }
  0x58   : > { %415 = vst.msk [vmem:[#allocation2 + $0x129] sm:$0xff] %vm345_vm2, %v336_v59  ;;  %v302_v59 = vadd.f32 %v3067_v4, %v268_v48  ;;  %v333_v7 = vmax.f32 %v301_v56, 0.0  ;;  %v2942_v56 = vld [vmem:[%s4366_s2 + $0xa] sm:$0x3] }
  0x59   : > { %400 = vst.msk [vmem:[#allocation2 + $0x79] sm:$0xff] %vm345_vm2, %v321_v63  ;;  %v326_v63 = vmax.f32 %v294_v53, 0.0 }
  0x5a   : > { %v472_v22 = vld [vmem:[#allocation2 + $0xc0] sm:$0xff]  ;;  %401 = vst.msk [vmem:[#allocation2 + $0x81] sm:$0xff] %vm345_vm2, %v322_v6  ;;  %v242_v6 = vld [vmem:[%s3062_s25 + $0xe8] sm:$0xff]  ;;  %v334_v10 = vmax.f32 %v302_v59, 0.0 }
  0x5b   : > { %v473_v26 = vld [vmem:[#allocation2 + $0xc8] sm:$0xff]  ;;  %408 = vst.msk [vmem:[#allocation2 + $0xd9] sm:$0xff] %vm345_vm2, %v329_v11  ;;  %v276_v9 = vmul.f32 %v3050_v3, %v242_v6  ;;  %v283_v11 = vadd.f32 %v3067_v4, %v249_v0 }
  0x5c   : > { %v3289_v29 = vpack.c.bf16 %v473_v26, %v472_v22  ;;  %409 = vst.msk [vmem:[#allocation2 + $0xe1] sm:$0xff] %vm345_vm2, %v330_v14  ;;  %v456_v30 = vld [vmem:[#allocation2] sm:$0xff] }
  0x5d   : > { %v492_v33 = vpack.c.bf16 %v457_v23, %v456_v30  ;;  %416 = vst.msk [vmem:[#allocation2 + $0x139] sm:$0xff] %vm345_vm2, %v337_v18  ;;  %v310_v17 = vadd.f32 %v3067_v4, %v276_v9  ;;  %v315_v18 = vmax.f32 %v283_v11, 0.0  ;;  %v1134_v11 = vld [vmem:[#allocation2 + $0x1] sm:$0xff] }
  0x5e   : > { %2832 = vmatmul.msk.bf16.vlgmr.msra.gmra.mxu2 %vm345_vm2, %v3289_v29  ;;  %v480_v40 = vld [vmem:[#allocation2 + $0x120] sm:$0xff]  ;;  %417 = vst.msk [vmem:[#allocation2 + $0x141] sm:$0xff] %vm345_vm2, %v338_v24 }
  0x5f   : > { %v481_v46 = vld [vmem:[#allocation2 + $0x128] sm:$0xff]  ;;  %2824 = vmatmul.msk.bf16.vlgmr.msra.gmra.mxu0 %vm345_vm2, %v492_v33  ;;  %402 = vst.msk [vmem:[#allocation2 + $0x91] sm:$0xff] %vm345_vm2, %v323_v27  ;;  %v342_v23 = vmax.f32 %v310_v17, 0.0  ;;  %v217_v33 = vld [vmem:[%s3062_s25 + $0x20] sm:$0xff] }
  0x60   : > { %v3309_v49 = vpack.c.bf16 %v481_v46, %v480_v40  ;;  %v466_v50 = vld [vmem:[#allocation2 + $0x78] sm:$0xff]  ;;  %403 = vst.msk [vmem:[#allocation2 + $0x99] sm:$0xff] %vm345_vm2, %v324_v31  ;;  %v251_v35 = vmul.f32 %v3050_v3, %v217_v33  ;;  %v1143_v33 = vld [vmem:[#allocation2 + $0x69] sm:$0xff] }
  0x61   : > { %v467_v54 = vld [vmem:[#allocation2 + $0x80] sm:$0xff]  ;;  %410 = vst.msk [vmem:[#allocation2 + $0xf1] sm:$0xff] %vm345_vm2, %v331_v34  ;;  %v218_v34 = vld [vmem:[%s3062_s25 + $0x28] sm:$0xff] }
  0x62   : > { %2836 = vmatmul.msk.bf16.vlgmr.msra.gmra.mxu3 %vm345_vm2, %v3309_v49  ;;  %v3318_v57 = vpack.c.bf16 %v467_v54, %v466_v50  ;;  %411 = vst.msk [vmem:[#allocation2 + $0xf9] sm:$0xff] %vm345_vm2, %v332_v41  ;;  %v474_v13 = vld [vmem:[#allocation2 + $0xd8] sm:$0xff]  ;;  %v252_v36 = vmul.f32 %v3050_v3, %v218_v34  ;;  %v285_v37 = vadd.f32 %v3067_v4, %v251_v35  ;;  %v1947_v54 = vsel %vm589_vm0, %v2925_v52, 0  ;;  %v1145_v35 = vld [vmem:[#allocation2 + $0x81] sm:$0xff] }
  0x63   : > { %392 = vst.msk [vmem:[#allocation2 + $0x19] sm:$0xff] %vm345_vm2, %v313_v47  ;;  %v475_v14 = vld [vmem:[#allocation2 + $0xe0] sm:$0xff]  ;;  %1956 = vmatpush.bf16.msra.mxu2 %v1947_v54  ;;  %v525_v52 = vld [vmem:[#allocation3 + $0x88] sm:$0xff] }
  0x64   : > { %2829 = vmatmul.msk.bf16.gmra.mxu1 %vm345_vm2, %v3318_v57  ;;  %393 = vst.msk [vmem:[#allocation2 + $0x21] sm:$0xff] %vm345_vm2, %v314_v51  ;;  %v3343_v21 = vpack.c.bf16 %v475_v14, %v474_v13  ;;  %v482_v24 = vld [vmem:[#allocation2 + $0x138] sm:$0xff]  ;;  %v286_v38 = vadd.f32 %v3067_v4, %v252_v36  ;;  %v317_v43 = vmax.f32 %v285_v37, 0.0  ;;  %v2908_v51 = vld [vmem:[%s4366_s2 + $0xe] sm:$0x3]  ;;  %v508_v36 = vld [vmem:[#allocation3] sm:$0xff] }
  0x65   : > { %418 = vst.msk [vmem:[#allocation2 + $0x151] sm:$0xff] %vm345_vm2, %v339_v55  ;;  %v483_v25 = vld [vmem:[#allocation2 + $0x140] sm:$0xff]  ;;  %v1657_v53 = vsel %vm589_vm0, %v2908_v51, 0 }
  0x66   : > { %419 = vst.msk [vmem:[#allocation2 + $0x159] sm:$0xff] %vm345_vm2, %v340_v58  ;;  %v468_v28 = vld [vmem:[#allocation2 + $0x90] sm:$0xff]  ;;  %v3353_v31 = vpack.c.bf16 %v483_v25, %v482_v24  ;;  %v318_v44 = vmax.f32 %v286_v38, 0.0  ;;  %1666 = vmatpush.bf16.msra.mxu1 %v1657_v53  ;;  %v2141_v58 = vsel %vm589_vm0, %v2942_v56, 0  ;;  %v519_v53 = vld [vmem:[#allocation3 + $0x58] sm:$0xff] }
  0x67   : > { %404 = vst.msk [vmem:[#allocation2 + $0xa9] sm:$0xff] %vm345_vm2, %v325_v60  ;;  %v469_v30 = vld [vmem:[#allocation2 + $0x98] sm:$0xff]  ;;  %2150 = vmatpush.bf16.msra.mxu3 %v2141_v58 }
  0x68   : > { %405 = vst.msk [vmem:[#allocation2 + $0xb1] sm:$0xff] %vm345_vm2, %v326_v63  ;;  %v3358_v32 = vpack.c.bf16 %v469_v30, %v468_v28  ;;  %v476_v39 = vld [vmem:[#allocation2 + $0xf0] sm:$0xff]  ;;  %v1142_v30 = vld [vmem:[#allocation2 + $0x61] sm:$0xff]  ;;  %v1147_v56 = vld [vmem:[#allocation2 + $0x99] sm:$0xff] }
  0x69   : > { %412 = vst.msk [vmem:[#allocation2 + $0x109] sm:$0xff] %vm345_vm2, %v333_v7  ;;  %v477_v40 = vld [vmem:[#allocation2 + $0xf8] sm:$0xff]  ;;  %v2959_v7 = vld [vmem:[%s4366_s2 + $0x10] sm:$0x3]  ;;  %v3443_v34 = vpack.c.bf16 %v1143_v33, %v1142_v30 }
  0x6a   : > { %v458_v22 = vld [vmem:[#allocation2 + $0x18] sm:$0xff]  ;;  %413 = vst.msk [vmem:[#allocation2 + $0x111] sm:$0xff] %vm345_vm2, %v334_v10  ;;  %v3370_v45 = vpack.c.bf16 %v477_v40, %v476_v39  ;;  %v2335_v8 = vsel %vm589_vm0, %v2959_v7, 0  ;;  %v524_v40 = vld [vmem:[#allocation3 + $0x80] sm:$0xff] }
  0x6b   : > { %v459_v26 = vld [vmem:[#allocation2 + $0x20] sm:$0xff]  ;;  %394 = vst.msk [vmem:[#allocation2 + $0x31] sm:$0xff] %vm345_vm2, %v315_v18  ;;  %2344 = vmatpush.bf16.msra.mxu0 %v2335_v8  ;;  %v1146_v54 = vld [vmem:[#allocation2 + $0x91] sm:$0xff] }
  0x6c   : > { %v3347_v27 = vpack.c.bf16 %v459_v26, %v458_v22  ;;  %395 = vst.msk [vmem:[#allocation2 + $0x39] sm:$0xff] %vm345_vm2, %v316_v19  ;;  %v484_v46 = vld [vmem:[#allocation2 + $0x150] sm:$0xff]  ;;  %v1136_v9 = vld [vmem:[#allocation2 + $0x19] sm:$0xff]  ;;  %v1137_v10 = vld [vmem:[#allocation2 + $0x21] sm:$0xff] }
  0x6d   : > { %420 = vst.msk [vmem:[#allocation2 + $0x169] sm:$0xff] %vm345_vm2, %v341_v20  ;;  %v485_v47 = vld [vmem:[#allocation2 + $0x158] sm:$0xff]  ;;  %v1171_v13 = vpack.c.bf16 %v1137_v10, %v1136_v9  ;;  %v516_v19 = vld [vmem:[#allocation3 + $0x40] sm:$0xff]  ;;  %v526_v9 = vld [vmem:[#allocation3 + $0x90] sm:$0xff] }
  0x6e   : > { %2833 = vmatmul.msk.bf16.gmra.mxu2 %vm345_vm2, %v3343_v21  ;;  %421 = vst.msk [vmem:[#allocation2 + $0x171] sm:$0xff] %vm345_vm2, %v342_v23  ;;  %v470_v3 = vld [vmem:[#allocation2 + $0xa8] sm:$0xff]  ;;  %v3380_v50 = vpack.c.bf16 %v485_v47, %v484_v46  ;;  %v517_v26 = vld [vmem:[#allocation3 + $0x48] sm:$0xff]  ;;  %v532_v47 = vld [vmem:[#allocation3 + $0xc0] sm:$0xff] }
  0x6f   : > { %2825 = vmatmul.msk.bf16.gmra.mxu0 %vm345_vm2, %v3347_v27  ;;  %396 = vst.msk [vmem:[#allocation2 + $0x49] sm:$0xff] %vm345_vm2, %v317_v43  ;;  %v471_v4 = vld [vmem:[#allocation2 + $0xb0] sm:$0xff]  ;;  %v509_v46 = vld [vmem:[#allocation3 + $0x8] sm:$0xff] }
  0x70   : > { %397 = vst.msk [vmem:[#allocation2 + $0x51] sm:$0xff] %vm345_vm2, %v318_v44  ;;  %v3393_v55 = vpack.c.bf16 %v471_v4, %v470_v3  ;;  %v478_v59 = vld [vmem:[#allocation2 + $0x108] sm:$0xff]  ;;  %v520_v10 = vld [vmem:[#allocation3 + $0x60] sm:$0xff] }
  0x71   : > { %349 = vst.msk [vmem:[#allocation2 + $0x10] sm:$0x3] %vm348_vm3, %v3002_v2  ;;  %v479_v60 = vld [vmem:[#allocation2 + $0x110] sm:$0xff] }
  0x72   : > { %2837 = vmatmul.msk.bf16.gmra.mxu3 %vm345_vm2, %v3353_v31  ;;  %v460_v41 = vld [vmem:[#allocation2 + $0x30] sm:$0xff]  ;;  %373 = vst.msk [vmem:[#allocation2 + $0x11] sm:$0x1] %vm354_vm1, %v3002_v2  ;;  %v3405_v63 = vpack.c.bf16 %v479_v60, %v478_v59 }
  0x73   : > { %v461_v42 = vld [vmem:[#allocation2 + $0x38] sm:$0xff]  ;;  %353 = vst.msk [vmem:[#allocation2 + $0x1a8] sm:$0x3] %vm348_vm3, %v3002_v2 }
  0x74   : > { %2830 = vmatmul.msk.bf16.gmra.mxu1 %vm345_vm2, %v3358_v32  ;;  %v494_v48 = vpack.c.bf16 %v461_v42, %v460_v41  ;;  %390 = vst.msk [vmem:[#allocation2 + $0x1a9] sm:$0x1] %vm354_vm1, %v3002_v2  ;;  %v486_v0 = vld [vmem:[#allocation2 + $0x168] sm:$0xff]  ;;  %v1138_v16 = vld [vmem:[#allocation2 + $0x31] sm:$0xff]  ;;  %v1139_v17 = vld [vmem:[#allocation2 + $0x39] sm:$0xff] }
  0x75   : > { %v487_v1 = vld [vmem:[#allocation2 + $0x170] sm:$0xff]  ;;  %v3424_v18 = vpack.c.bf16 %v1139_v17, %v1138_v16  ;;  %v518_v41 = vld [vmem:[#allocation3 + $0x50] sm:$0xff]  ;;  %v511_v16 = vld [vmem:[#allocation3 + $0x18] sm:$0xff]  ;;  %2554 = vst.msk [vmem:[%s4180_s30] sm:$0xff] %vm345_vm2, %v3002_v2 }
  0x76   : > { %v462_v61 = vld [vmem:[#allocation2 + $0x48] sm:$0xff]  ;;  %v3409_v6 = vpack.c.bf16 %v487_v1, %v486_v0  ;;  %v3468_v0 = vpack.c.bf16 %v1147_v56, %v1146_v54  ;;  %v534_v17 = vld [vmem:[#allocation3 + $0xd0] sm:$0xff]  ;;  %v529_v56 = vld [vmem:[#allocation3 + $0xa8] sm:$0xff] }
  0x77   : > { %v463_v62 = vld [vmem:[#allocation2 + $0x50] sm:$0xff] }
  0x78   : > { %v495_v5 = vpack.c.bf16 %v463_v62, %v462_v61  ;;  %v1135_v12 = vld [vmem:[#allocation2 + $0x9] sm:$0xff]  ;;  %v1141_v24 = vld [vmem:[#allocation2 + $0x51] sm:$0xff]  ;;  %v510_v62 = vld [vmem:[#allocation3 + $0x10] sm:$0xff] }
  0x79   : > { %v1170_v14 = vpack.c.bf16 %v1135_v12, %v1134_v11  ;;  %v1140_v23 = vld [vmem:[#allocation2 + $0x49] sm:$0xff] }
  0x7a   : > { %v3432_v25 = vpack.c.bf16 %v1141_v24, %v1140_v23  ;;  %v527_v24 = vld [vmem:[#allocation3 + $0x98] sm:$0xff] }
  0x7e   : > { %2834 = vmatmul.msk.bf16.gmra.mxu2 %vm345_vm2, %v3370_v45 }
  0x7f   : > { %2826 = vmatmul.msk.bf16.gmra.mxu0 %vm345_vm2, %v494_v48 }
  0x82   : > { %2838 = vmatmul.msk.bf16.gmra.mxu3 %vm345_vm2, %v3380_v50 }
  0x84   : > { %2831 = vmatmul.msk.bf16.gmra.mxu1 %vm345_vm2, %v3393_v55 }
  0x8e   : > { %2835 = vmatmul.msk.bf16.gmra.mxu2 %vm345_vm2, %v3405_v63 }
  0x8f   : > { %2827 = vmatmul.msk.bf16.gmra.mxu0 %vm345_vm2, %v495_v5 }
  0x92   : > { %2839 = vmatmul.msk.bf16.gmra.mxu3 %vm345_vm2, %v3409_v6 }
  0x94   : > { %2841 = vmatmul.msk.bf16.vlgmr.msrb.gmra.mxu1 %vm345_vm2, %v3347_v27 }
  0x9e   : > { %2858 = vmatmul.msk.bf16.vlgmr.msrb.gmra.mxu2 %vm345_vm2, %v494_v48 }
  0x9f   : > { %2892 = vmatmul.msk.bf16.vlgmr.msrb.gmra.mxu0 %vm345_vm2, %v1171_v13 }
  0xa0   : > { %v622_v20 = vpop.f32.mrf.mxu1 }
  0xa1   : > { %v690_v22 = vadd.f32 %v622_v20, %v516_v19 }
  0xa2   : > { %2875 = vmatmul.msk.bf16.vlgmr.msrb.gmra.mxu3 %vm345_vm2, %v1170_v14 }
  0xa3   : > { %722 = vst.msk [vmem:[#allocation3 + $0x40] sm:$0xff] %vm345_vm2, %v690_v22 }
  0xa4   : > { %2842 = vmatmul.msk.bf16.gmra.mxu1 %vm345_vm2, %v494_v48 }
  0xa8   : > { %v624_v27 = vpop.f32.mrf.mxu1 }
  0xa9   : > { %v691_v28 = vadd.f32 %v624_v27, %v517_v26  ;;  %v521_v26 = vld [vmem:[#allocation3 + $0x68] sm:$0xff]  ;;  %v1148_v27 = vld [vmem:[#allocation2 + $0xa9] sm:$0xff] }
  0xab   : > { %723 = vst.msk [vmem:[#allocation3 + $0x48] sm:$0xff] %vm345_vm2, %v691_v28  ;;  %v1149_v28 = vld [vmem:[#allocation2 + $0xb1] sm:$0xff] }
  0xae   : > { %2859 = vmatmul.msk.bf16.gmra.mxu2 %vm345_vm2, %v495_v5 }
  0xaf   : > { %2893 = vmatmul.msk.bf16.gmra.mxu0 %vm345_vm2, %v3424_v18 }
  0xb2   : > { %2876 = vmatmul.msk.bf16.gmra.mxu3 %vm345_vm2, %v1171_v13 }
  0xb4   : > { %2843 = vmatmul.msk.bf16.gmra.mxu1 %vm345_vm2, %v495_v5 }
  0xbe   : > { %2860 = vmatmul.msk.bf16.gmra.mxu2 %vm345_vm2, %v3107_v15 }
  0xbf   : > { %2894 = vmatmul.msk.bf16.gmra.mxu0 %vm345_vm2, %v3432_v25 }
  0xc2   : > { %2877 = vmatmul.msk.bf16.gmra.mxu3 %vm345_vm2, %v3424_v18 }
  0xc4   : > { %2844 = vmatmul.msk.bf16.gmra.mxu1 %vm345_vm2, %v3107_v15  ;;  %v1144_v15 = vld [vmem:[#allocation2 + $0x79] sm:$0xff] }
  0xc5   : > { %v3453_v37 = vpack.c.bf16 %v1145_v35, %v1144_v15 }
  0xce   : > { %2861 = vmatmul.msk.bf16.gmra.mxu2 %vm345_vm2, %v3318_v57 }
  0xcf   : > { %2895 = vmatmul.msk.bf16.gmra.mxu0 %vm345_vm2, %v3443_v34 }
  0xd2   : > { %2878 = vmatmul.msk.bf16.gmra.mxu3 %vm345_vm2, %v3432_v25 }
  0xd4   : > { %2845 = vmatmul.msk.bf16.gmra.mxu1 %vm345_vm2, %v3318_v57 }
  0xdc   : > { %v602_v38 = vpop.f32.mrf.mxu0 }
  0xdd   : > { %v682_v39 = vadd.f32 %v602_v38, %v508_v36  ;;  %v512_v36 = vld [vmem:[#allocation3 + $0x20] sm:$0xff]  ;;  %v3486_v38 = vpack.c.bf16 %v1149_v28, %v1148_v27  ;;  %v531_v28 = vld [vmem:[#allocation3 + $0xb8] sm:$0xff] }
  0xde   : > { %2862 = vmatmul.msk.bf16.gmra.mxu2 %vm345_vm2, %v3358_v32 }
  0xdf   : > { %714 = vst.msk [vmem:[#allocation3] sm:$0xff] %vm345_vm2, %v682_v39  ;;  %2896 = vmatmul.msk.bf16.gmra.mxu0 %vm345_vm2, %v3453_v37 }
  0xe1   : > { %v642_v42 = vpop.f32.mrf.mxu2  ;;  %v627_v43 = vpop.f32.mrf.mxu1 }
  0xe2   : > { %v698_v57 = vadd.f32 %v642_v42, %v524_v40  ;;  %2879 = vmatmul.msk.bf16.gmra.mxu3 %vm345_vm2, %v3443_v34  ;;  %v692_v44 = vadd.f32 %v627_v43, %v518_v41  ;;  %v528_v43 = vld [vmem:[#allocation3 + $0xa0] sm:$0xff] }
  0xe4   : > { %730 = vst.msk [vmem:[#allocation3 + $0x80] sm:$0xff] %vm345_vm2, %v698_v57  ;;  %2846 = vmatmul.msk.bf16.gmra.mxu1 %vm345_vm2, %v3358_v32  ;;  %v604_v48 = vpop.f32.mrf.mxu0  ;;  %v533_v32 = vld [vmem:[#allocation3 + $0xc8] sm:$0xff]  ;;  %v522_v57 = vld [vmem:[#allocation3 + $0x70] sm:$0xff] }
  0xe5   : > { %v662_v3 = vpop.f32.mrf.mxu3  ;;  %724 = vst.msk [vmem:[#allocation3 + $0x50] sm:$0xff] %vm345_vm2, %v692_v44  ;;  %v683_v4 = vadd.f32 %v604_v48, %v509_v46 }
  0xe6   : > { %v706_v51 = vadd.f32 %v662_v3, %v532_v47  ;;  %v513_v3 = vld [vmem:[#allocation3 + $0x28] sm:$0xff] }
  0xe7   : > { %715 = vst.msk [vmem:[#allocation3 + $0x8] sm:$0xff] %vm345_vm2, %v683_v4  ;;  %v536_v4 = vld [vmem:[#allocation3 + $0xe0] sm:$0xff] }
  0xe8   : > { %738 = vst.msk [vmem:[#allocation3 + $0xc0] sm:$0xff] %vm345_vm2, %v706_v51 }
  0xe9   : > { %v644_v58 = vpop.f32.mrf.mxu2  ;;  %v629_v59 = vpop.f32.mrf.mxu1 }
  0xea   : > { %v699_v60 = vadd.f32 %v644_v58, %v525_v52  ;;  %v693_v61 = vadd.f32 %v629_v59, %v519_v53  ;;  %v523_v58 = vld [vmem:[#allocation3 + $0x78] sm:$0xff] }
  0xeb   : > { %v1150_v59 = vld [vmem:[#allocation2 + $0xc1] sm:$0xff] }
  0xec   : > { %731 = vst.msk [vmem:[#allocation3 + $0x88] sm:$0xff] %vm345_vm2, %v699_v60  ;;  %v607_v1 = vpop.f32.mrf.mxu0  ;;  %v1151_v60 = vld [vmem:[#allocation2 + $0xc9] sm:$0xff] }
  0xed   : > { %v664_v5 = vpop.f32.mrf.mxu3  ;;  %725 = vst.msk [vmem:[#allocation3 + $0x58] sm:$0xff] %vm345_vm2, %v693_v61  ;;  %v684_v7 = vadd.f32 %v607_v1, %v510_v62 }
  0xee   : > { %2863 = vmatmul.msk.bf16.gmra.mxu2 %vm345_vm2, %v3393_v55  ;;  %v707_v8 = vadd.f32 %v664_v5, %v533_v32  ;;  %v514_v5 = vld [vmem:[#allocation3 + $0x30] sm:$0xff] }
  0xef   : > { %716 = vst.msk [vmem:[#allocation3 + $0x10] sm:$0xff] %vm345_vm2, %v684_v7  ;;  %2897 = vmatmul.msk.bf16.gmra.mxu0 %vm345_vm2, %v3468_v0  ;;  %v3504_v7 = vpack.c.bf16 %v1151_v60, %v1150_v59 }
  0xf0   : > { %739 = vst.msk [vmem:[#allocation3 + $0xc8] sm:$0xff] %vm345_vm2, %v707_v8 }
  0xf1   : > { %v647_v11 = vpop.f32.mrf.mxu2  ;;  %v632_v12 = vpop.f32.mrf.mxu1 }
  0xf2   : > { %v700_v13 = vadd.f32 %v647_v11, %v526_v9  ;;  %2880 = vmatmul.msk.bf16.gmra.mxu3 %vm345_vm2, %v3453_v37  ;;  %v694_v14 = vadd.f32 %v632_v12, %v520_v10  ;;  %v530_v12 = vld [vmem:[#allocation3 + $0xb0] sm:$0xff] }
  0xf4   : > { %732 = vst.msk [vmem:[#allocation3 + $0x90] sm:$0xff] %vm345_vm2, %v700_v13  ;;  %2847 = vmatmul.msk.bf16.gmra.mxu1 %vm345_vm2, %v3393_v55  ;;  %v609_v19 = vpop.f32.mrf.mxu0  ;;  %v535_v55 = vld [vmem:[#allocation3 + $0xd8] sm:$0xff] }
  0xf5   : > { %v667_v20 = vpop.f32.mrf.mxu3  ;;  %726 = vst.msk [vmem:[#allocation3 + $0x60] sm:$0xff] %vm345_vm2, %v694_v14  ;;  %v685_v22 = vadd.f32 %v609_v19, %v511_v16  ;;  %v747_v14 = vld [vmem:[#allocation3] sm:$0xff] }
  0xf6   : > { %v708_v23 = vadd.f32 %v667_v20, %v534_v17  ;;  %v515_v20 = vld [vmem:[#allocation3 + $0x38] sm:$0xff] }
  0xf7   : > { %717 = vst.msk [vmem:[#allocation3 + $0x18] sm:$0xff] %vm345_vm2, %v685_v22  ;;  %v538_v22 = vld [vmem:[#allocation3 + $0xf0] sm:$0xff] }
  0xf8   : > { %740 = vst.msk [vmem:[#allocation3 + $0xd0] sm:$0xff] %vm345_vm2, %v708_v23 }
  0xf9   : > { %v649_v30 = vpop.f32.mrf.mxu2  ;;  %v634_v33 = vpop.f32.mrf.mxu1 }
  0xfa   : > { %v701_v15 = vadd.f32 %v649_v30, %v527_v24  ;;  %v695_v35 = vadd.f32 %v634_v33, %v521_v26  ;;  %v1152_v30 = vld [vmem:[#allocation2 + $0xd9] sm:$0xff]  ;;  %v1153_v33 = vld [vmem:[#allocation2 + $0xe1] sm:$0xff] }
  0xfc   : > { %733 = vst.msk [vmem:[#allocation3 + $0x98] sm:$0xff] %vm345_vm2, %v701_v15  ;;  %v612_v39 = vpop.f32.mrf.mxu0 }
  0xfd   : > { %v669_v40 = vpop.f32.mrf.mxu3  ;;  %727 = vst.msk [vmem:[#allocation3 + $0x68] sm:$0xff] %vm345_vm2, %v695_v35  ;;  %v686_v41 = vadd.f32 %v612_v39, %v512_v36  ;;  %v748_v35 = vld [vmem:[#allocation3 + $0x8] sm:$0xff] }
  0xfe   : > { %2864 = vmatmul.msk.bf16.gmra.mxu2 %vm345_vm2, %v3289_v29  ;;  %v709_v42 = vadd.f32 %v669_v40, %v535_v55  ;;  %v539_v40 = vld [vmem:[#allocation3 + $0xf8] sm:$0xff] }
  0xff   : > { %718 = vst.msk [vmem:[#allocation3 + $0x20] sm:$0xff] %vm345_vm2, %v686_v41  ;;  %2898 = vmatmul.msk.bf16.gmra.mxu0 %vm345_vm2, %v3486_v38 }
 0x100   : > { %741 = vst.msk [vmem:[#allocation3 + $0xd8] sm:$0xff] %vm345_vm2, %v709_v42 }
 0x101   : > { %v652_v44 = vpop.f32.mrf.mxu2  ;;  %v637_v46 = vpop.f32.mrf.mxu1 }
 0x102   : > { %v702_v47 = vadd.f32 %v652_v44, %v528_v43  ;;  %2881 = vmatmul.msk.bf16.gmra.mxu3 %vm345_vm2, %v3468_v0  ;;  %v696_v48 = vadd.f32 %v637_v46, %v522_v57  ;;  %v749_v46 = vld [vmem:[#allocation3 + $0x10] sm:$0xff] }
 0x104   : > { %734 = vst.msk [vmem:[#allocation3 + $0xa0] sm:$0xff] %vm345_vm2, %v702_v47  ;;  %2848 = vmatmul.msk.bf16.gmra.mxu1 %vm345_vm2, %v3289_v29  ;;  %v614_v51 = vpop.f32.mrf.mxu0  ;;  %v537_v29 = vld [vmem:[#allocation3 + $0xe8] sm:$0xff] }
 0x105   : > { %v672_v52 = vpop.f32.mrf.mxu3  ;;  %728 = vst.msk [vmem:[#allocation3 + $0x70] sm:$0xff] %vm345_vm2, %v696_v48  ;;  %v687_v53 = vadd.f32 %v614_v51, %v513_v3 }
 0x106   : > { %v710_v54 = vadd.f32 %v672_v52, %v536_v4 }
 0x107   : > { %719 = vst.msk [vmem:[#allocation3 + $0x28] sm:$0xff] %vm345_vm2, %v687_v53  ;;  %v1154_v53 = vld [vmem:[#allocation2 + $0xf1] sm:$0xff] }
 0x108   : > { %742 = vst.msk [vmem:[#allocation3 + $0xe0] sm:$0xff] %vm345_vm2, %v710_v54  ;;  %v1155_v54 = vld [vmem:[#allocation2 + $0xf9] sm:$0xff] }
 0x109   : > { %v654_v61 = vpop.f32.mrf.mxu2  ;;  %v639_v62 = vpop.f32.mrf.mxu1 }
 0x10a   : > { %v703_v32 = vadd.f32 %v654_v61, %v529_v56  ;;  %v697_v1 = vadd.f32 %v639_v62, %v523_v58  ;;  %v750_v58 = vld [vmem:[#allocation3 + $0x18] sm:$0xff] }
 0x10c   : > { %735 = vst.msk [vmem:[#allocation3 + $0xa8] sm:$0xff] %vm345_vm2, %v703_v32  ;;  %v617_v8 = vpop.f32.mrf.mxu0  ;;  %v3537_v32 = vpack.c.bf16 %v1155_v54, %v1154_v53  ;;  %v1158_v54 = vld [vmem:[#allocation2 + $0x121] sm:$0xff] }
 0x10d   : > { %v674_v9 = vpop.f32.mrf.mxu3  ;;  %729 = vst.msk [vmem:[#allocation3 + $0x78] sm:$0xff] %vm345_vm2, %v697_v1  ;;  %v688_v10 = vadd.f32 %v617_v8, %v514_v5 }
 0x10e   : > { %2865 = vmatmul.msk.bf16.gmra.mxu2 %vm345_vm2, %v3343_v21  ;;  %v711_v11 = vadd.f32 %v674_v9, %v537_v29  ;;  %v751_v9 = vld [vmem:[#allocation3 + $0x20] sm:$0xff] }
 0x10f   : > { %720 = vst.msk [vmem:[#allocation3 + $0x30] sm:$0xff] %vm345_vm2, %v688_v10  ;;  %2899 = vmatmul.msk.bf16.gmra.mxu0 %vm345_vm2, %v3504_v7 }
 0x110   : > { %743 = vst.msk [vmem:[#allocation3 + $0xe8] sm:$0xff] %vm345_vm2, %v711_v11 }
 0x111   : > { %v657_v13 = vpop.f32.mrf.mxu2  ;;  %v796_v16 = vpop.f32.mrf.mxu1 }
 0x112   : > { %v704_v17 = vadd.f32 %v657_v13, %v530_v12  ;;  %2882 = vmatmul.msk.bf16.gmra.mxu3 %vm345_vm2, %v3486_v38  ;;  %v876_v19 = vadd.f32 %v796_v16, %v747_v14 }
 0x114   : > { %736 = vst.msk [vmem:[#allocation3 + $0xb0] sm:$0xff] %vm345_vm2, %v704_v17  ;;  %2849 = vmatmul.msk.bf16.gmra.mxu1 %vm345_vm2, %v3343_v21  ;;  %v619_v23 = vpop.f32.mrf.mxu0  ;;  %v3522_v21 = vpack.c.bf16 %v1153_v33, %v1152_v30 }
 0x115   : > { %v677_v24 = vpop.f32.mrf.mxu3  ;;  %908 = vst.msk [vmem:[#allocation3] sm:$0xff] %vm345_vm2, %v876_v19  ;;  %v689_v26 = vadd.f32 %v619_v23, %v515_v20  ;;  %v1156_v23 = vld [vmem:[#allocation2 + $0x109] sm:$0xff] }
 0x116   : > { %v712_v27 = vadd.f32 %v677_v24, %v538_v22  ;;  %v1157_v24 = vld [vmem:[#allocation2 + $0x111] sm:$0xff] }
 0x117   : > { %721 = vst.msk [vmem:[#allocation3 + $0x38] sm:$0xff] %vm345_vm2, %v689_v26 }
 0x118   : > { %744 = vst.msk [vmem:[#allocation3 + $0xf0] sm:$0xff] %vm345_vm2, %v712_v27  ;;  %v752_v27 = vld [vmem:[#allocation3 + $0x28] sm:$0xff] }
 0x119   : > { %v659_v15 = vpop.f32.mrf.mxu2  ;;  %v798_v36 = vpop.f32.mrf.mxu1 }
 0x11a   : > { %v705_v55 = vadd.f32 %v659_v15, %v531_v28  ;;  %v877_v39 = vadd.f32 %v798_v36, %v748_v35  ;;  %v3556_v15 = vpack.c.bf16 %v1157_v24, %v1156_v23 }
 0x11c   : > { %737 = vst.msk [vmem:[#allocation3 + $0xb8] sm:$0xff] %vm345_vm2, %v705_v55  ;;  %v1474_v41 = vpop.f32.mrf.mxu0  ;;  %v941_v57 = vld [vmem:[#allocation3] sm:$0xff] }
 0x11d   : > { %v679_v42 = vpop.f32.mrf.mxu3  ;;  %909 = vst.msk [vmem:[#allocation3 + $0x8] sm:$0xff] %vm345_vm2, %v877_v39 }
 0x11e   : > { %2866 = vmatmul.msk.bf16.gmra.mxu2 %vm345_vm2, %v3370_v45  ;;  %v713_v43 = vadd.f32 %v679_v42, %v539_v40 }
 0x11f   : > { %2900 = vmatmul.msk.bf16.gmra.mxu0 %vm345_vm2, %v3522_v21 }
 0x120   : > { %745 = vst.msk [vmem:[#allocation3 + $0xf8] sm:$0xff] %vm345_vm2, %v713_v43  ;;  %v753_v43 = vld [vmem:[#allocation3 + $0x30] sm:$0xff] }
 0x121   : > { %v990_v44 = vpop.f32.mrf.mxu2  ;;  %v801_v47 = vpop.f32.mrf.mxu1 }
 0x122   : > { %v1070_v48 = vadd.f32 %v990_v44, %v941_v57  ;;  %2883 = vmatmul.msk.bf16.gmra.mxu3 %vm345_vm2, %v3504_v7  ;;  %v878_v3 = vadd.f32 %v801_v47, %v749_v46 }
 0x124   : > { %1102 = vst.msk [vmem:[#allocation3] sm:$0xff] %vm345_vm2, %v1070_v48  ;;  %2850 = vmatmul.msk.bf16.gmra.mxu1 %vm345_vm2, %v3370_v45  ;;  %v1476_v4 = vpop.f32.mrf.mxu0  ;;  %v942_v52 = vld [vmem:[#allocation3 + $0x8] sm:$0xff] }
 0x125   : > { %v1280_v51 = vpop.f32.mrf.mxu3  ;;  %910 = vst.msk [vmem:[#allocation3 + $0x10] sm:$0xff] %vm345_vm2, %v878_v3 }
 0x129   : > { %v992_v56 = vpop.f32.mrf.mxu2  ;;  %v803_v59 = vpop.f32.mrf.mxu1 }
 0x12a   : > { %v1071_v60 = vadd.f32 %v992_v56, %v942_v52  ;;  %v879_v61 = vadd.f32 %v803_v59, %v750_v58  ;;  %v1159_v56 = vld [vmem:[#allocation2 + $0x129] sm:$0xff] }
 0x12b   : > { %v1186_v62 = vld [vmem:[#allocation3] sm:$0xff]  ;;  %v754_v59 = vld [vmem:[#allocation3 + $0x38] sm:$0xff] }
 0x12c   : > { %v1360_v1 = vadd.f32 %v1280_v51, %v1186_v62  ;;  %1103 = vst.msk [vmem:[#allocation3 + $0x8] sm:$0xff] %vm345_vm2, %v1071_v60  ;;  %v1479_v5 = vpop.f32.mrf.mxu0  ;;  %v943_v29 = vld [vmem:[#allocation3 + $0x10] sm:$0xff] }
 0x12d   : > { %v1282_v45 = vpop.f32.mrf.mxu3  ;;  %911 = vst.msk [vmem:[#allocation3 + $0x18] sm:$0xff] %vm345_vm2, %v879_v61 }
 0x12e   : > { %1392 = vst.msk [vmem:[#allocation3] sm:$0xff] %vm345_vm2, %v1360_v1  ;;  %2867 = vmatmul.msk.bf16.gmra.mxu2 %vm345_vm2, %v3405_v63  ;;  %v3578_v1 = vpack.c.bf16 %v1159_v56, %v1158_v54 }
 0x12f   : > { %2901 = vmatmul.msk.bf16.gmra.mxu0 %vm345_vm2, %v3537_v32 }
 0x131   : > { %v995_v8 = vpop.f32.mrf.mxu2  ;;  %v806_v10 = vpop.f32.mrf.mxu1 }
 0x132   : > { %v1072_v11 = vadd.f32 %v995_v8, %v943_v29  ;;  %2884 = vmatmul.msk.bf16.gmra.mxu3 %vm345_vm2, %v3522_v21  ;;  %v880_v12 = vadd.f32 %v806_v10, %v751_v9  ;;  %v243_v9 = vld [vmem:[%s3062_s25 + $0xf0] sm:$0xff]  ;;  %v244_v10 = vld [vmem:[%s3062_s25 + $0xf8] sm:$0xff] }
 0x133   : > { %v1187_v13 = vld [vmem:[#allocation3 + $0x8] sm:$0xff] }
 0x134   : > { %v1361_v14 = vadd.f32 %v1282_v45, %v1187_v13  ;;  %1104 = vst.msk [vmem:[#allocation3 + $0x10] sm:$0xff] %vm345_vm2, %v1072_v11  ;;  %2851 = vmatmul.msk.bf16.gmra.mxu1 %vm345_vm2, %v3405_v63  ;;  %v3551_v16 = vpop.f32.mrf.mxu0  ;;  %v944_v22 = vld [vmem:[#allocation3 + $0x18] sm:$0xff] }
 0x135   : > { %v1425_v17 = vld [vmem:[#allocation3] sm:$0xff]  ;;  %v1285_v19 = vpop.f32.mrf.mxu3  ;;  %912 = vst.msk [vmem:[#allocation3 + $0x20] sm:$0xff] %vm345_vm2, %v880_v12  ;;  %v2992_v12 = vld [vmem:[%s4365_s1] ss:$0 sm:$0xff] }
 0x136   : > { %1393 = vst.msk [vmem:[#allocation3 + $0x8] sm:$0xff] %vm345_vm2, %v1361_v14  ;;  %v1554_v20 = vadd.f32 %v1474_v41, %v1425_v17  ;;  %v277_v13 = vmul.f32 %v2992_v12, %v243_v9  ;;  %v278_v14 = vmul.f32 %v2992_v12, %v244_v10  ;;  %v1163_v12 = vld [vmem:[#allocation2 + $0x159] sm:$0xff] }
 0x138   : > { %1586 = vst.msk [vmem:[#allocation3] sm:$0xff] %vm345_vm2, %v1554_v20 }
 0x139   : > { %v997_v26 = vpop.f32.mrf.mxu2  ;;  %v808_v28 = vpop.f32.mrf.mxu1 }
 0x13a   : > { %v1073_v30 = vadd.f32 %v997_v26, %v944_v22  ;;  %v881_v33 = vadd.f32 %v808_v28, %v752_v27  ;;  %v755_v22 = vld [vmem:[#allocation3 + $0x40] sm:$0xff] }
 0x13b   : > { %v1188_v63 = vld [vmem:[#allocation3 + $0x10] sm:$0xff] }
 0x13c   : > { %v1362_v35 = vadd.f32 %v1285_v19, %v1188_v63  ;;  %1105 = vst.msk [vmem:[#allocation3 + $0x18] sm:$0xff] %vm345_vm2, %v1073_v30  ;;  %v3559_v36 = vpop.f32.mrf.mxu0  ;;  %v945_v41 = vld [vmem:[#allocation3 + $0x20] sm:$0xff]  ;;  %v2993_v19 = vld [vmem:[%s4365_s1 + $0x1] ss:$0 sm:$0xff] }
 0x13d   : > { %v1426_v55 = vld [vmem:[#allocation3 + $0x8] sm:$0xff]  ;;  %v1287_v39 = vpop.f32.mrf.mxu3  ;;  %913 = vst.msk [vmem:[#allocation3 + $0x28] sm:$0xff] %vm345_vm2, %v881_v33  ;;  %v312_v24 = vadd.f32 %v2993_v19, %v278_v14  ;;  %v758_v14 = vld [vmem:[#allocation3 + $0x58] sm:$0xff] }
 0x13e   : > { %1394 = vst.msk [vmem:[#allocation3 + $0x10] sm:$0xff] %vm345_vm2, %v1362_v35  ;;  %v1555_v40 = vadd.f32 %v1476_v4, %v1426_v55  ;;  %2868 = vmatmul.msk.bf16.gmra.mxu2 %vm345_vm2, %v3309_v49 }
 0x13f   : > { %2902 = vmatmul.msk.bf16.gmra.mxu0 %vm345_vm2, %v3556_v15 }
 0x140   : > { %1587 = vst.msk [vmem:[#allocation3 + $0x8] sm:$0xff] %vm345_vm2, %v1555_v40 }
 0x141   : > { %v1000_v42 = vpop.f32.mrf.mxu2  ;;  %v811_v57 = vpop.f32.mrf.mxu1 }
 0x142   : > { %v1074_v44 = vadd.f32 %v1000_v42, %v945_v41  ;;  %2885 = vmatmul.msk.bf16.gmra.mxu3 %vm345_vm2, %v3537_v32  ;;  %v882_v46 = vadd.f32 %v811_v57, %v753_v43  ;;  %v1160_v42 = vld [vmem:[#allocation2 + $0x139] sm:$0xff]  ;;  %v1161_v43 = vld [vmem:[#allocation2 + $0x141] sm:$0xff] }
 0x143   : > { %v1189_v47 = vld [vmem:[#allocation3 + $0x18] sm:$0xff] }
 0x144   : > { %v1363_v48 = vadd.f32 %v1287_v39, %v1189_v47  ;;  %1106 = vst.msk [vmem:[#allocation3 + $0x20] sm:$0xff] %vm345_vm2, %v1074_v44  ;;  %2852 = vmatmul.msk.bf16.gmra.mxu1 %vm345_vm2, %v3309_v49  ;;  %v3573_v3 = vpop.f32.mrf.mxu0  ;;  %v946_v53 = vld [vmem:[#allocation3 + $0x28] sm:$0xff]  ;;  %v344_v39 = vmax.f32 %v312_v24, 0.0 }
 0x145   : > { %v1427_v4 = vld [vmem:[#allocation3 + $0x10] sm:$0xff]  ;;  %v1290_v51 = vpop.f32.mrf.mxu3  ;;  %914 = vst.msk [vmem:[#allocation3 + $0x30] sm:$0xff] %vm345_vm2, %v882_v46 }
 0x146   : > { %1395 = vst.msk [vmem:[#allocation3 + $0x18] sm:$0xff] %vm345_vm2, %v1363_v48  ;;  %v1556_v52 = vadd.f32 %v1479_v5, %v1427_v4  ;;  %v3612_v4 = vpack.c.bf16 %v1161_v43, %v1160_v42 }
 0x147   : > { %423 = vst.msk [vmem:[#allocation2 + $0x189] sm:$0xff] %vm345_vm2, %v344_v39 }
 0x148   : > { %1588 = vst.msk [vmem:[#allocation3 + $0x10] sm:$0xff] %vm345_vm2, %v1556_v52 }
 0x149   : > { %v1002_v58 = vpop.f32.mrf.mxu2  ;;  %v813_v60 = vpop.f32.mrf.mxu1 }
 0x14a   : > { %v1075_v49 = vadd.f32 %v1002_v58, %v946_v53  ;;  %v883_v61 = vadd.f32 %v813_v60, %v754_v59  ;;  %v757_v59 = vld [vmem:[#allocation3 + $0x50] sm:$0xff] }
 0x14b   : > { %v1190_v62 = vld [vmem:[#allocation3 + $0x20] sm:$0xff] }
 0x14c   : > { %v1364_v45 = vadd.f32 %v1290_v51, %v1190_v62  ;;  %1107 = vst.msk [vmem:[#allocation3 + $0x28] sm:$0xff] %vm345_vm2, %v1075_v49  ;;  %v3581_v29 = vpop.f32.mrf.mxu0  ;;  %v947_v17 = vld [vmem:[#allocation3 + $0x30] sm:$0xff] }
 0x14d   : > { %v1428_v5 = vld [vmem:[#allocation3 + $0x18] sm:$0xff]  ;;  %v1292_v8 = vpop.f32.mrf.mxu3  ;;  %915 = vst.msk [vmem:[#allocation3 + $0x38] sm:$0xff] %vm345_vm2, %v883_v61 }
 0x14e   : > { %1396 = vst.msk [vmem:[#allocation3 + $0x20] sm:$0xff] %vm345_vm2, %v1364_v45  ;;  %v1557_v11 = vadd.f32 %v3551_v16, %v1428_v5  ;;  %2869 = vmatmul.msk.bf16.gmra.mxu2 %vm345_vm2, %v3353_v31  ;;  %v311_v16 = vadd.f32 %v2993_v19, %v277_v13 }
 0x14f   : > { %2903 = vmatmul.msk.bf16.gmra.mxu0 %vm345_vm2, %v3578_v1 }
 0x150   : > { %1589 = vst.msk [vmem:[#allocation3 + $0x18] sm:$0xff] %vm345_vm2, %v1557_v11  ;;  %v343_v30 = vmax.f32 %v311_v16, 0.0  ;;  %v1162_v11 = vld [vmem:[#allocation2 + $0x151] sm:$0xff] }
 0x151   : > { %v1005_v20 = vpop.f32.mrf.mxu2  ;;  %v816_v23 = vpop.f32.mrf.mxu1 }
 0x152   : > { %v1076_v26 = vadd.f32 %v1005_v20, %v947_v17  ;;  %2886 = vmatmul.msk.bf16.gmra.mxu3 %vm345_vm2, %v3556_v15  ;;  %v884_v27 = vadd.f32 %v816_v23, %v755_v22  ;;  %422 = vst.msk [vmem:[#allocation2 + $0x181] sm:$0xff] %vm345_vm2, %v343_v30  ;;  %v3636_v20 = vpack.c.bf16 %v1163_v12, %v1162_v11  ;;  %v759_v30 = vld [vmem:[#allocation3 + $0x60] sm:$0xff] }
 0x153   : > { %v1191_v28 = vld [vmem:[#allocation3 + $0x28] sm:$0xff] }
 0x154   : > { %v1365_v33 = vadd.f32 %v1292_v8, %v1191_v28  ;;  %1108 = vst.msk [vmem:[#allocation3 + $0x30] sm:$0xff] %vm345_vm2, %v1076_v26  ;;  %2853 = vmatmul.msk.bf16.gmra.mxu1 %vm345_vm2, %v3353_v31  ;;  %v3604_v63 = vpop.f32.mrf.mxu0  ;;  %v948_v41 = vld [vmem:[#allocation3 + $0x38] sm:$0xff]  ;;  %v756_v31 = vld [vmem:[#allocation3 + $0x48] sm:$0xff] }
 0x155   : > { %v1429_v35 = vld [vmem:[#allocation3 + $0x20] sm:$0xff]  ;;  %v1295_v55 = vpop.f32.mrf.mxu3  ;;  %916 = vst.msk [vmem:[#allocation3 + $0x40] sm:$0xff] %vm345_vm2, %v884_v27 }
 0x156   : > { %1397 = vst.msk [vmem:[#allocation3 + $0x28] sm:$0xff] %vm345_vm2, %v1365_v33  ;;  %v1558_v40 = vadd.f32 %v3559_v36, %v1429_v35 }
 0x158   : > { %1590 = vst.msk [vmem:[#allocation3 + $0x20] sm:$0xff] %vm345_vm2, %v1558_v40 }
 0x159   : > { %v1007_v57 = vpop.f32.mrf.mxu2  ;;  %v818_v44 = vpop.f32.mrf.mxu1 }
 0x15a   : > { %v1077_v46 = vadd.f32 %v1007_v57, %v948_v41  ;;  %v885_v47 = vadd.f32 %v818_v44, %v756_v31  ;;  %v488_v31 = vld [vmem:[#allocation2 + $0x180] sm:$0xff]  ;;  %v489_v44 = vld [vmem:[#allocation2 + $0x188] sm:$0xff] }
 0x15b   : > { %v1192_v48 = vld [vmem:[#allocation3 + $0x30] sm:$0xff] }
 0x15c   : > { %v1366_v51 = vadd.f32 %v1295_v55, %v1192_v48  ;;  %1109 = vst.msk [vmem:[#allocation3 + $0x38] sm:$0xff] %vm345_vm2, %v1077_v46  ;;  %v3615_v36 = vpop.f32.mrf.mxu0  ;;  %v949_v56 = vld [vmem:[#allocation3 + $0x40] sm:$0xff] }
 0x15d   : > { %v1430_v52 = vld [vmem:[#allocation3 + $0x28] sm:$0xff]  ;;  %v1297_v53 = vpop.f32.mrf.mxu3  ;;  %917 = vst.msk [vmem:[#allocation3 + $0x48] sm:$0xff] %vm345_vm2, %v885_v47  ;;  %v1164_v46 = vld [vmem:[#allocation2 + $0x169] sm:$0xff] }
 0x15e   : > { %1398 = vst.msk [vmem:[#allocation3 + $0x30] sm:$0xff] %vm345_vm2, %v1366_v51  ;;  %v1559_v54 = vadd.f32 %v3573_v3, %v1430_v52  ;;  %2870 = vmatmul.msk.bf16.gmra.mxu2 %vm345_vm2, %v3380_v50  ;;  %v1165_v47 = vld [vmem:[#allocation2 + $0x171] sm:$0xff] }
 0x15f   : > { %2904 = vmatmul.msk.bf16.gmra.mxu0 %vm345_vm2, %v3612_v4  ;;  %v760_v51 = vld [vmem:[#allocation3 + $0x68] sm:$0xff] }
 0x160   : > { %1591 = vst.msk [vmem:[#allocation3 + $0x28] sm:$0xff] %vm345_vm2, %v1559_v54 }
 0x161   : > { %v1010_v58 = vpop.f32.mrf.mxu2  ;;  %v821_v60 = vpop.f32.mrf.mxu1 }
 0x162   : > { %v1078_v49 = vadd.f32 %v1010_v58, %v949_v56  ;;  %2887 = vmatmul.msk.bf16.gmra.mxu3 %vm345_vm2, %v3578_v1  ;;  %v886_v61 = vadd.f32 %v821_v60, %v757_v59  ;;  %v3660_v58 = vpack.c.bf16 %v1165_v47, %v1164_v46 }
 0x163   : > { %v1193_v62 = vld [vmem:[#allocation3 + $0x38] sm:$0xff] }
 0x164   : > { %v1367_v45 = vadd.f32 %v1297_v53, %v1193_v62  ;;  %1110 = vst.msk [vmem:[#allocation3 + $0x40] sm:$0xff] %vm345_vm2, %v1078_v49  ;;  %2854 = vmatmul.msk.bf16.gmra.mxu1 %vm345_vm2, %v3380_v50  ;;  %v3630_v3 = vpop.f32.mrf.mxu0  ;;  %v950_v10 = vld [vmem:[#allocation3 + $0x48] sm:$0xff]  ;;  %v746_v53 = vpack.c.bf16 %v489_v44, %v488_v31  ;;  %v763_v31 = vld [vmem:[#allocation3 + $0x80] sm:$0xff] }
 0x165   : > { %v1431_v5 = vld [vmem:[#allocation3 + $0x30] sm:$0xff]  ;;  %v1300_v8 = vpop.f32.mrf.mxu3  ;;  %918 = vst.msk [vmem:[#allocation3 + $0x50] sm:$0xff] %vm345_vm2, %v886_v61 }
 0x166   : > { %1399 = vst.msk [vmem:[#allocation3 + $0x38] sm:$0xff] %vm345_vm2, %v1367_v45  ;;  %v1560_v9 = vadd.f32 %v3581_v29, %v1431_v5  ;;  %v761_v5 = vld [vmem:[#allocation3 + $0x70] sm:$0xff] }
 0x168   : > { %1592 = vst.msk [vmem:[#allocation3 + $0x30] sm:$0xff] %vm345_vm2, %v1560_v9 }
 0x169   : > { %v1012_v13 = vpop.f32.mrf.mxu2  ;;  %v823_v17 = vpop.f32.mrf.mxu1 }
 0x16a   : > { %v1079_v19 = vadd.f32 %v1012_v13, %v950_v10  ;;  %v887_v50 = vadd.f32 %v823_v17, %v758_v14 }
 0x16b   : > { %v1194_v16 = vld [vmem:[#allocation3 + $0x40] sm:$0xff] }
 0x16c   : > { %v1368_v22 = vadd.f32 %v1300_v8, %v1194_v16  ;;  %1111 = vst.msk [vmem:[#allocation3 + $0x48] sm:$0xff] %vm345_vm2, %v1079_v19  ;;  %v3639_v23 = vpop.f32.mrf.mxu0  ;;  %v951_v27 = vld [vmem:[#allocation3 + $0x50] sm:$0xff] }
 0x16d   : > { %v1432_v24 = vld [vmem:[#allocation3 + $0x38] sm:$0xff]  ;;  %v1302_v29 = vpop.f32.mrf.mxu3  ;;  %919 = vst.msk [vmem:[#allocation3 + $0x58] sm:$0xff] %vm345_vm2, %v887_v50  ;;  %v490_v50 = vld [vmem:[#allocation2 + $0x198] sm:$0xff]  ;;  %v491_v16 = vld [vmem:[#allocation2 + $0x1a0] sm:$0xff] }
 0x16e   : > { %1400 = vst.msk [vmem:[#allocation3 + $0x40] sm:$0xff] %vm345_vm2, %v1368_v22  ;;  %v1561_v26 = vadd.f32 %v3604_v63, %v1432_v24  ;;  %2871 = vmatmul.msk.bf16.gmra.mxu2 %vm345_vm2, %v3409_v6  ;;  %v1166_v22 = vld [vmem:[#allocation2 + $0x181] sm:$0xff]  ;;  %v1167_v24 = vld [vmem:[#allocation2 + $0x189] sm:$0xff] }
 0x16f   : > { %2905 = vmatmul.msk.bf16.gmra.mxu0 %vm345_vm2, %v3636_v20 }
 0x170   : > { %1593 = vst.msk [vmem:[#allocation3 + $0x38] sm:$0xff] %vm345_vm2, %v1561_v26  ;;  %v762_v26 = vld [vmem:[#allocation3 + $0x78] sm:$0xff] }
 0x171   : > { %v1015_v28 = vpop.f32.mrf.mxu2  ;;  %v826_v33 = vpop.f32.mrf.mxu1 }
 0x172   : > { %v1080_v35 = vadd.f32 %v1015_v28, %v951_v27  ;;  %2888 = vmatmul.msk.bf16.gmra.mxu3 %vm345_vm2, %v3612_v4  ;;  %v888_v55 = vadd.f32 %v826_v33, %v759_v30  ;;  %v940_v30 = vpack.c.bf16 %v491_v16, %v490_v50 }
 0x173   : > { %v1195_v39 = vld [vmem:[#allocation3 + $0x48] sm:$0xff] }
 0x174   : > { %v1369_v40 = vadd.f32 %v1302_v29, %v1195_v39  ;;  %1112 = vst.msk [vmem:[#allocation3 + $0x50] sm:$0xff] %vm345_vm2, %v1080_v35  ;;  %2855 = vmatmul.msk.bf16.gmra.mxu1 %vm345_vm2, %v3409_v6  ;;  %v3654_v63 = vpop.f32.mrf.mxu0  ;;  %v952_v57 = vld [vmem:[#allocation3 + $0x58] sm:$0xff] }
 0x175   : > { %v1433_v41 = vld [vmem:[#allocation3 + $0x40] sm:$0xff]  ;;  %v1305_v42 = vpop.f32.mrf.mxu3  ;;  %920 = vst.msk [vmem:[#allocation3 + $0x60] sm:$0xff] %vm345_vm2, %v888_v55  ;;  %v3682_v55 = vpack.c.bf16 %v1167_v24, %v1166_v22  ;;  %v765_v24 = vld [vmem:[#allocation3 + $0x90] sm:$0xff] }
 0x176   : > { %1401 = vst.msk [vmem:[#allocation3 + $0x48] sm:$0xff] %vm345_vm2, %v1369_v40  ;;  %v1562_v43 = vadd.f32 %v3615_v36, %v1433_v41 }
 0x178   : > { %1594 = vst.msk [vmem:[#allocation3 + $0x40] sm:$0xff] %vm345_vm2, %v1562_v43 }
 0x179   : > { %v1017_v48 = vpop.f32.mrf.mxu2  ;;  %v828_v6 = vpop.f32.mrf.mxu1 }
 0x17a   : > { %v1081_v52 = vadd.f32 %v1017_v48, %v952_v57  ;;  %v889_v54 = vadd.f32 %v828_v6, %v760_v51 }
 0x17b   : > { %v1196_v56 = vld [vmem:[#allocation3 + $0x50] sm:$0xff] }
 0x17c   : > { %v1370_v59 = vadd.f32 %v1305_v42, %v1196_v56  ;;  %1113 = vst.msk [vmem:[#allocation3 + $0x58] sm:$0xff] %vm345_vm2, %v1081_v52  ;;  %v3663_v36 = vpop.f32.mrf.mxu0  ;;  %v953_v62 = vld [vmem:[#allocation3 + $0x60] sm:$0xff]  ;;  %v1812_v56 = vld [vmem:[#allocation2 + $0x2] sm:$0xff] }
 0x17d   : > { %v1434_v60 = vld [vmem:[#allocation3 + $0x48] sm:$0xff]  ;;  %v1307_v49 = vpop.f32.mrf.mxu3  ;;  %921 = vst.msk [vmem:[#allocation3 + $0x68] sm:$0xff] %vm345_vm2, %v889_v54 }
 0x17e   : > { %1402 = vst.msk [vmem:[#allocation3 + $0x50] sm:$0xff] %vm345_vm2, %v1370_v59  ;;  %v1563_v61 = vadd.f32 %v3630_v3, %v1434_v60  ;;  %2872 = vmatmul.msk.bf16.gmra.mxu2 %vm345_vm2, %v746_v53  ;;  %v1813_v59 = vld [vmem:[#allocation2 + $0xa] sm:$0xff]  ;;  %v1816_v60 = vld [vmem:[#allocation2 + $0x32] sm:$0xff] }
 0x17f   : > { %2906 = vmatmul.msk.bf16.gmra.mxu0 %vm345_vm2, %v3660_v58 }
 0x180   : > { %1595 = vst.msk [vmem:[#allocation3 + $0x48] sm:$0xff] %vm345_vm2, %v1563_v61 }
 0x181   : > { %v1020_v45 = vpop.f32.mrf.mxu2  ;;  %v831_v8 = vpop.f32.mrf.mxu1 }
 0x182   : > { %v1082_v9 = vadd.f32 %v1020_v45, %v953_v62  ;;  %2889 = vmatmul.msk.bf16.gmra.mxu3 %vm345_vm2, %v3636_v20  ;;  %v890_v10 = vadd.f32 %v831_v8, %v761_v5  ;;  %v764_v62 = vld [vmem:[#allocation3 + $0x88] sm:$0xff]  ;;  %v1848_v5 = vpack.c.bf16 %v1813_v59, %v1812_v56  ;;  %v767_v56 = vld [vmem:[#allocation3 + $0xa0] sm:$0xff] }
 0x183   : > { %v1197_v11 = vld [vmem:[#allocation3 + $0x58] sm:$0xff] }
 0x184   : > { %v1371_v12 = vadd.f32 %v1307_v49, %v1197_v11  ;;  %1114 = vst.msk [vmem:[#allocation3 + $0x60] sm:$0xff] %vm345_vm2, %v1082_v9  ;;  %2856 = vmatmul.msk.bf16.gmra.mxu1 %vm345_vm2, %v746_v53  ;;  %v3676_v3 = vpop.f32.mrf.mxu0  ;;  %v954_v19 = vld [vmem:[#allocation3 + $0x68] sm:$0xff]  ;;  %v1815_v11 = vld [vmem:[#allocation2 + $0x22] sm:$0xff] }
 0x185   : > { %v1435_v13 = vld [vmem:[#allocation3 + $0x50] sm:$0xff]  ;;  %v1310_v14 = vpop.f32.mrf.mxu3  ;;  %922 = vst.msk [vmem:[#allocation3 + $0x70] sm:$0xff] %vm345_vm2, %v890_v10 }
 0x186   : > { %1403 = vst.msk [vmem:[#allocation3 + $0x58] sm:$0xff] %vm345_vm2, %v1371_v12  ;;  %v1564_v17 = vadd.f32 %v3639_v23, %v1435_v13  ;;  %v1817_v49 = vld [vmem:[#allocation2 + $0x3a] sm:$0xff] }
 0x187   : > { %v1814_v10 = vld [vmem:[#allocation2 + $0x1a] sm:$0xff]  ;;  %v3705_v12 = vpack.c.bf16 %v1817_v49, %v1816_v60 }
 0x188   : > { %1596 = vst.msk [vmem:[#allocation3 + $0x50] sm:$0xff] %vm345_vm2, %v1564_v17  ;;  %v1849_v50 = vpack.c.bf16 %v1815_v11, %v1814_v10  ;;  %v1821_v10 = vld [vmem:[#allocation2 + $0x6a] sm:$0xff] }
 0x189   : > { %v1022_v29 = vpop.f32.mrf.mxu2  ;;  %v833_v27 = vpop.f32.mrf.mxu1 }
 0x18a   : > { %v1083_v28 = vadd.f32 %v1022_v29, %v954_v19  ;;  %v891_v33 = vadd.f32 %v833_v27, %v762_v26 }
 0x18b   : > { %v1198_v35 = vld [vmem:[#allocation3 + $0x60] sm:$0xff] }
 0x18c   : > { %v1372_v39 = vadd.f32 %v1310_v14, %v1198_v35  ;;  %1115 = vst.msk [vmem:[#allocation3 + $0x68] sm:$0xff] %vm345_vm2, %v1083_v28  ;;  %v3685_v23 = vpop.f32.mrf.mxu0  ;;  %v955_v43 = vld [vmem:[#allocation3 + $0x70] sm:$0xff] }
 0x18d   : > { %v1436_v40 = vld [vmem:[#allocation3 + $0x58] sm:$0xff]  ;;  %v1312_v41 = vpop.f32.mrf.mxu3  ;;  %923 = vst.msk [vmem:[#allocation3 + $0x78] sm:$0xff] %vm345_vm2, %v891_v33 }
 0x18e   : > { %1404 = vst.msk [vmem:[#allocation3 + $0x60] sm:$0xff] %vm345_vm2, %v1372_v39  ;;  %v1565_v42 = vadd.f32 %v3654_v63, %v1436_v40  ;;  %2873 = vmatmul.msk.bf16.gmra.mxu2 %vm345_vm2, %v940_v30 }
 0x18f   : > { %2907 = vmatmul.msk.bf16.gmra.mxu0 %vm345_vm2, %v3682_v55 }
 0x190   : > { %1597 = vst.msk [vmem:[#allocation3 + $0x58] sm:$0xff] %vm345_vm2, %v1565_v42  ;;  %v1819_v42 = vld [vmem:[#allocation2 + $0x52] sm:$0xff] }
 0x191   : > { %v1025_v57 = vpop.f32.mrf.mxu2  ;;  %v836_v44 = vpop.f32.mrf.mxu1 }
 0x192   : > { %v1084_v46 = vadd.f32 %v1025_v57, %v955_v43  ;;  %2890 = vmatmul.msk.bf16.gmra.mxu3 %vm345_vm2, %v3660_v58  ;;  %v892_v47 = vadd.f32 %v836_v44, %v763_v31  ;;  %v766_v57 = vld [vmem:[#allocation3 + $0x98] sm:$0xff] }
 0x193   : > { %v1199_v48 = vld [vmem:[#allocation3 + $0x68] sm:$0xff] }
 0x194   : > { %v1373_v51 = vadd.f32 %v1312_v41, %v1199_v48  ;;  %1116 = vst.msk [vmem:[#allocation3 + $0x70] sm:$0xff] %vm345_vm2, %v1084_v46  ;;  %2909 = vmatmul.msk.bf16.vlgmr.msra.gmra.mxu1 %vm345_vm2, %v3424_v18  ;;  %v3699_v63 = vpop.f32.mrf.mxu0  ;;  %v956_v54 = vld [vmem:[#allocation3 + $0x78] sm:$0xff] }
 0x195   : > { %v1437_v6 = vld [vmem:[#allocation3 + $0x60] sm:$0xff]  ;;  %v1315_v52 = vpop.f32.mrf.mxu3  ;;  %924 = vst.msk [vmem:[#allocation3 + $0x80] sm:$0xff] %vm345_vm2, %v892_v47 }
 0x196   : > { %1405 = vst.msk [vmem:[#allocation3 + $0x68] sm:$0xff] %vm345_vm2, %v1373_v51  ;;  %v1566_v53 = vadd.f32 %v3663_v36, %v1437_v6  ;;  %v1818_v41 = vld [vmem:[#allocation2 + $0x4a] sm:$0xff] }
 0x197   : > { %v3727_v47 = vpack.c.bf16 %v1819_v42, %v1818_v41 }
 0x198   : > { %1598 = vst.msk [vmem:[#allocation3 + $0x60] sm:$0xff] %vm345_vm2, %v1566_v53 }
 0x199   : > { %v1027_v61 = vpop.f32.mrf.mxu2  ;;  %v838_v18 = vpop.f32.mrf.mxu1 }
 0x19a   : > { %v1085_v45 = vadd.f32 %v1027_v61, %v956_v54  ;;  %v893_v8 = vadd.f32 %v838_v18, %v764_v62 }
 0x19b   : > { %v1200_v9 = vld [vmem:[#allocation3 + $0x70] sm:$0xff] }
 0x19c   : > { %v1374_v13 = vadd.f32 %v1315_v52, %v1200_v9  ;;  %1117 = vst.msk [vmem:[#allocation3 + $0x78] sm:$0xff] %vm345_vm2, %v1085_v45  ;;  %v3708_v36 = vpop.f32.mrf.mxu0  ;;  %v957_v16 = vld [vmem:[#allocation3 + $0x80] sm:$0xff]  ;;  %v1820_v9 = vld [vmem:[#allocation2 + $0x62] sm:$0xff] }
 0x19d   : > { %v1438_v14 = vld [vmem:[#allocation3 + $0x68] sm:$0xff]  ;;  %v1317_v17 = vpop.f32.mrf.mxu3  ;;  %925 = vst.msk [vmem:[#allocation3 + $0x88] sm:$0xff] %vm345_vm2, %v893_v8 }
 0x19e   : > { %1406 = vst.msk [vmem:[#allocation3 + $0x70] sm:$0xff] %vm345_vm2, %v1374_v13  ;;  %v1567_v19 = vadd.f32 %v3676_v3, %v1438_v14  ;;  %2926 = vmatmul.msk.bf16.vlgmr.msra.gmra.mxu2 %vm345_vm2, %v1848_v5  ;;  %v768_v13 = vld [vmem:[#allocation3 + $0xa8] sm:$0xff] }
 0x19f   : > { %2960 = vmatmul.msk.bf16.vlgmr.msra.gmra.mxu0 %vm345_vm2, %v3705_v12 }
 0x1a0   : > { %1599 = vst.msk [vmem:[#allocation3 + $0x68] sm:$0xff] %vm345_vm2, %v1567_v19 }
 0x1a1   : > { %v1030_v22 = vpop.f32.mrf.mxu2  ;;  %v841_v29 = vpop.f32.mrf.mxu1 }
 0x1a2   : > { %v1086_v26 = vadd.f32 %v1030_v22, %v957_v16  ;;  %2943 = vmatmul.msk.bf16.vlgmr.msra.gmra.mxu3 %vm345_vm2, %v1849_v50  ;;  %v894_v27 = vadd.f32 %v841_v29, %v765_v24 }
 0x1a3   : > { %v1201_v28 = vld [vmem:[#allocation3 + $0x78] sm:$0xff] }
 0x1a4   : > { %v1375_v30 = vadd.f32 %v1317_v17, %v1201_v28  ;;  %1118 = vst.msk [vmem:[#allocation3 + $0x80] sm:$0xff] %vm345_vm2, %v1086_v26  ;;  %2910 = vmatmul.msk.bf16.gmra.mxu1 %vm345_vm2, %v3432_v25  ;;  %v3721_v3 = vpop.f32.mrf.mxu0  ;;  %v958_v40 = vld [vmem:[#allocation3 + $0x88] sm:$0xff]  ;;  %v769_v28 = vld [vmem:[#allocation3 + $0xb0] sm:$0xff] }
 0x1a5   : > { %v1439_v33 = vld [vmem:[#allocation3 + $0x70] sm:$0xff]  ;;  %v1320_v35 = vpop.f32.mrf.mxu3  ;;  %926 = vst.msk [vmem:[#allocation3 + $0x90] sm:$0xff] %vm345_vm2, %v894_v27 }
 0x1a6   : > { %1407 = vst.msk [vmem:[#allocation3 + $0x78] sm:$0xff] %vm345_vm2, %v1375_v30  ;;  %v1568_v39 = vadd.f32 %v3685_v23, %v1439_v33 }
 0x1a8   : > { %1600 = vst.msk [vmem:[#allocation3 + $0x70] sm:$0xff] %vm345_vm2, %v1568_v39 }
 0x1a9   : > { %v1032_v43 = vpop.f32.mrf.mxu2  ;;  %v843_v31 = vpop.f32.mrf.mxu1 }
 0x1aa   : > { %v1087_v44 = vadd.f32 %v1032_v43, %v958_v40  ;;  %v895_v25 = vadd.f32 %v843_v31, %v766_v57  ;;  %v1822_v57 = vld [vmem:[#allocation2 + $0x7a] sm:$0xff]  ;;  %v1823_v31 = vld [vmem:[#allocation2 + $0x82] sm:$0xff] }
 0x1ab   : > { %v1202_v46 = vld [vmem:[#allocation3 + $0x80] sm:$0xff] }
 0x1ac   : > { %v1376_v48 = vadd.f32 %v1320_v35, %v1202_v46  ;;  %1119 = vst.msk [vmem:[#allocation3 + $0x88] sm:$0xff] %vm345_vm2, %v1087_v44  ;;  %v3730_v51 = vpop.f32.mrf.mxu0  ;;  %v959_v53 = vld [vmem:[#allocation3 + $0x90] sm:$0xff] }
 0x1ad   : > { %v1440_v6 = vld [vmem:[#allocation3 + $0x78] sm:$0xff]  ;;  %v1322_v23 = vpop.f32.mrf.mxu3  ;;  %927 = vst.msk [vmem:[#allocation3 + $0x98] sm:$0xff] %vm345_vm2, %v895_v25 }
 0x1ae   : > { %1408 = vst.msk [vmem:[#allocation3 + $0x80] sm:$0xff] %vm345_vm2, %v1376_v48  ;;  %v1569_v52 = vadd.f32 %v3699_v63, %v1440_v6  ;;  %2927 = vmatmul.msk.bf16.gmra.mxu2 %vm345_vm2, %v1849_v50  ;;  %v3750_v50 = vpack.c.bf16 %v1821_v10, %v1820_v9  ;;  %v770_v25 = vld [vmem:[#allocation3 + $0xb8] sm:$0xff] }
 0x1af   : > { %2961 = vmatmul.msk.bf16.gmra.mxu0 %vm345_vm2, %v3727_v47 }
 0x1b0   : > { %1601 = vst.msk [vmem:[#allocation3 + $0x78] sm:$0xff] %vm345_vm2, %v1569_v52 }
 0x1b1   : > { %v1035_v54 = vpop.f32.mrf.mxu2  ;;  %v846_v59 = vpop.f32.mrf.mxu1 }
 0x1b2   : > { %v1088_v60 = vadd.f32 %v1035_v54, %v959_v53  ;;  %2944 = vmatmul.msk.bf16.gmra.mxu3 %vm345_vm2, %v3705_v12  ;;  %v896_v49 = vadd.f32 %v846_v59, %v767_v56 }
 0x1b3   : > { %v1203_v61 = vld [vmem:[#allocation3 + $0x88] sm:$0xff] }
 0x1b4   : > { %v1377_v62 = vadd.f32 %v1322_v23, %v1203_v61  ;;  %1120 = vst.msk [vmem:[#allocation3 + $0x90] sm:$0xff] %vm345_vm2, %v1088_v60  ;;  %2911 = vmatmul.msk.bf16.gmra.mxu1 %vm345_vm2, %v3443_v34  ;;  %v3744_v63 = vpop.f32.mrf.mxu0  ;;  %v960_v8 = vld [vmem:[#allocation3 + $0x98] sm:$0xff]  ;;  %v3774_v23 = vpack.c.bf16 %v1823_v31, %v1822_v57 }
 0x1b5   : > { %v1441_v18 = vld [vmem:[#allocation3 + $0x80] sm:$0xff]  ;;  %v1325_v45 = vpop.f32.mrf.mxu3  ;;  %928 = vst.msk [vmem:[#allocation3 + $0xa0] sm:$0xff] %vm345_vm2, %v896_v49 }
 0x1b6   : > { %1409 = vst.msk [vmem:[#allocation3 + $0x88] sm:$0xff] %vm345_vm2, %v1377_v62  ;;  %v1570_v5 = vadd.f32 %v3708_v36, %v1441_v18  ;;  %v771_v49 = vld [vmem:[#allocation3 + $0xc0] sm:$0xff] }
 0x1b7   : > { %v1826_v31 = vld [vmem:[#allocation2 + $0xaa] sm:$0xff] }
 0x1b8   : > { %1602 = vst.msk [vmem:[#allocation3 + $0x80] sm:$0xff] %vm345_vm2, %v1570_v5 }
 0x1b9   : > { %v1037_v11 = vpop.f32.mrf.mxu2  ;;  %v848_v14 = vpop.f32.mrf.mxu1 }
 0x1ba   : > { %v1089_v17 = vadd.f32 %v1037_v11, %v960_v8  ;;  %v897_v34 = vadd.f32 %v848_v14, %v768_v13  ;;  %v1824_v11 = vld [vmem:[#allocation2 + $0x92] sm:$0xff]  ;;  %v1825_v13 = vld [vmem:[#allocation2 + $0x9a] sm:$0xff] }
 0x1bb   : > { %v1204_v19 = vld [vmem:[#allocation3 + $0x90] sm:$0xff] }
 0x1bc   : > { %v1378_v16 = vadd.f32 %v1325_v45, %v1204_v19  ;;  %1121 = vst.msk [vmem:[#allocation3 + $0x98] sm:$0xff] %vm345_vm2, %v1089_v17  ;;  %v3753_v22 = vpop.f32.mrf.mxu0  ;;  %v961_v26 = vld [vmem:[#allocation3 + $0xa0] sm:$0xff]  ;;  %v772_v17 = vld [vmem:[#allocation3 + $0xc8] sm:$0xff] }
 0x1bd   : > { %v1442_v24 = vld [vmem:[#allocation3 + $0x88] sm:$0xff]  ;;  %v1327_v36 = vpop.f32.mrf.mxu3  ;;  %929 = vst.msk [vmem:[#allocation3 + $0xa8] sm:$0xff] %vm345_vm2, %v897_v34 }
 0x1be   : > { %1410 = vst.msk [vmem:[#allocation3 + $0x90] sm:$0xff] %vm345_vm2, %v1378_v16  ;;  %v1571_v29 = vadd.f32 %v3721_v3, %v1442_v24  ;;  %2928 = vmatmul.msk.bf16.gmra.mxu2 %vm345_vm2, %v3705_v12  ;;  %v3798_v24 = vpack.c.bf16 %v1825_v13, %v1824_v11  ;;  %v1828_v11 = vld [vmem:[#allocation2 + $0xc2] sm:$0xff]  ;;  %v1829_v13 = vld [vmem:[#allocation2 + $0xca] sm:$0xff] }
 0x1bf   : > { %2962 = vmatmul.msk.bf16.gmra.mxu0 %vm345_vm2, %v3750_v50 }
 0x1c0   : > { %1603 = vst.msk [vmem:[#allocation3 + $0x88] sm:$0xff] %vm345_vm2, %v1571_v29 }
 0x1c1   : > { %v1040_v27 = vpop.f32.mrf.mxu2  ;;  %v851_v30 = vpop.f32.mrf.mxu1 }
 0x1c2   : > { %v1090_v33 = vadd.f32 %v1040_v27, %v961_v26  ;;  %2945 = vmatmul.msk.bf16.gmra.mxu3 %vm345_vm2, %v3727_v47  ;;  %v898_v35 = vadd.f32 %v851_v30, %v769_v28 }
 0x1c3   : > { %v1205_v39 = vld [vmem:[#allocation3 + $0x98] sm:$0xff] }
 0x1c4   : > { %v1379_v40 = vadd.f32 %v1327_v36, %v1205_v39  ;;  %1122 = vst.msk [vmem:[#allocation3 + $0xa0] sm:$0xff] %vm345_vm2, %v1090_v33  ;;  %2912 = vmatmul.msk.bf16.gmra.mxu1 %vm345_vm2, %v3453_v37  ;;  %v3768_v12 = vpop.f32.mrf.mxu0  ;;  %v962_v43 = vld [vmem:[#allocation3 + $0xa8] sm:$0xff]  ;;  %v773_v33 = vld [vmem:[#allocation3 + $0xd0] sm:$0xff] }
 0x1c5   : > { %v1443_v3 = vld [vmem:[#allocation3 + $0x90] sm:$0xff]  ;;  %v1330_v41 = vpop.f32.mrf.mxu3  ;;  %930 = vst.msk [vmem:[#allocation3 + $0xb0] sm:$0xff] %vm345_vm2, %v898_v35 }
 0x1c6   : > { %1411 = vst.msk [vmem:[#allocation3 + $0x98] sm:$0xff] %vm345_vm2, %v1379_v40  ;;  %v1572_v42 = vadd.f32 %v3730_v51, %v1443_v3 }
 0x1c8   : > { %1604 = vst.msk [vmem:[#allocation3 + $0x90] sm:$0xff] %vm345_vm2, %v1572_v42 }
 0x1c9   : > { %v1042_v44 = vpop.f32.mrf.mxu2  ;;  %v853_v46 = vpop.f32.mrf.mxu1 }
 0x1ca   : > { %v1091_v48 = vadd.f32 %v1042_v44, %v962_v43  ;;  %v899_v37 = vadd.f32 %v853_v46, %v770_v25  ;;  %v1827_v44 = vld [vmem:[#allocation2 + $0xb2] sm:$0xff]  ;;  %v774_v46 = vld [vmem:[#allocation3 + $0xd8] sm:$0xff] }
 0x1cb   : > { %v1206_v6 = vld [vmem:[#allocation3 + $0xa0] sm:$0xff] }
 0x1cc   : > { %v1380_v52 = vadd.f32 %v1330_v41, %v1206_v6  ;;  %1123 = vst.msk [vmem:[#allocation3 + $0xa8] sm:$0xff] %vm345_vm2, %v1091_v48  ;;  %v3777_v53 = vpop.f32.mrf.mxu0  ;;  %v963_v59 = vld [vmem:[#allocation3 + $0xb0] sm:$0xff] }
 0x1cd   : > { %v1444_v54 = vld [vmem:[#allocation3 + $0x98] sm:$0xff]  ;;  %v1332_v51 = vpop.f32.mrf.mxu3  ;;  %931 = vst.msk [vmem:[#allocation3 + $0xb8] sm:$0xff] %vm345_vm2, %v899_v37 }
 0x1ce   : > { %1412 = vst.msk [vmem:[#allocation3 + $0xa0] sm:$0xff] %vm345_vm2, %v1380_v52  ;;  %v1573_v56 = vadd.f32 %v3744_v63, %v1444_v54  ;;  %2929 = vmatmul.msk.bf16.gmra.mxu2 %vm345_vm2, %v3727_v47  ;;  %v3822_v52 = vpack.c.bf16 %v1827_v44, %v1826_v31  ;;  %v1831_v31 = vld [vmem:[#allocation2 + $0xe2] sm:$0xff] }
 0x1cf   : > { %2963 = vmatmul.msk.bf16.gmra.mxu0 %vm345_vm2, %v3774_v23 }
 0x1d0   : > { %1605 = vst.msk [vmem:[#allocation3 + $0x98] sm:$0xff] %vm345_vm2, %v1573_v56 }
 0x1d1   : > { %v1045_v60 = vpop.f32.mrf.mxu2  ;;  %v856_v61 = vpop.f32.mrf.mxu1 }
 0x1d2   : > { %v1092_v62 = vadd.f32 %v1045_v60, %v963_v59  ;;  %2946 = vmatmul.msk.bf16.gmra.mxu3 %vm345_vm2, %v3750_v50  ;;  %v900_v18 = vadd.f32 %v856_v61, %v771_v49  ;;  %v775_v61 = vld [vmem:[#allocation3 + $0xe0] sm:$0xff] }
 0x1d3   : > { %v1207_v45 = vld [vmem:[#allocation3 + $0xa8] sm:$0xff] }
 0x1d4   : > { %v1381_v5 = vadd.f32 %v1332_v51, %v1207_v45  ;;  %1124 = vst.msk [vmem:[#allocation3 + $0xb0] sm:$0xff] %vm345_vm2, %v1092_v62  ;;  %2913 = vmatmul.msk.bf16.gmra.mxu1 %vm345_vm2, %v3468_v0  ;;  %v3792_v47 = vpop.f32.mrf.mxu0  ;;  %v964_v10 = vld [vmem:[#allocation3 + $0xb8] sm:$0xff] }
 0x1d5   : > { %v1445_v63 = vld [vmem:[#allocation3 + $0xa0] sm:$0xff]  ;;  %v1335_v8 = vpop.f32.mrf.mxu3  ;;  %932 = vst.msk [vmem:[#allocation3 + $0xc0] sm:$0xff] %vm345_vm2, %v900_v18 }
 0x1d6   : > { %1413 = vst.msk [vmem:[#allocation3 + $0xa8] sm:$0xff] %vm345_vm2, %v1381_v5  ;;  %v1574_v9 = vadd.f32 %v3753_v22, %v1445_v63 }
 0x1d8   : > { %1606 = vst.msk [vmem:[#allocation3 + $0xa0] sm:$0xff] %vm345_vm2, %v1574_v9 }
 0x1d9   : > { %v1047_v14 = vpop.f32.mrf.mxu2  ;;  %v858_v34 = vpop.f32.mrf.mxu1 }
 0x1da   : > { %v1093_v19 = vadd.f32 %v1047_v14, %v964_v10  ;;  %v901_v0 = vadd.f32 %v858_v34, %v772_v17  ;;  %v776_v17 = vld [vmem:[#allocation3 + $0xe8] sm:$0xff] }
 0x1db   : > { %v1208_v16 = vld [vmem:[#allocation3 + $0xb0] sm:$0xff] }
 0x1dc   : > { %v1382_v36 = vadd.f32 %v1335_v8, %v1208_v16  ;;  %1125 = vst.msk [vmem:[#allocation3 + $0xb8] sm:$0xff] %vm345_vm2, %v1093_v19  ;;  %v3801_v29 = vpop.f32.mrf.mxu0  ;;  %v965_v28 = vld [vmem:[#allocation3 + $0xc0] sm:$0xff]  ;;  %v3846_v16 = vpack.c.bf16 %v1829_v13, %v1828_v11  ;;  %v1620_v13 = vld [vmem:[#allocation3 + $0x8] sm:$0xff] }
 0x1dd   : > { %v1446_v26 = vld [vmem:[#allocation3 + $0xa8] sm:$0xff]  ;;  %v1337_v22 = vpop.f32.mrf.mxu3  ;;  %933 = vst.msk [vmem:[#allocation3 + $0xc8] sm:$0xff] %vm345_vm2, %v901_v0 }
 0x1de   : > { %1414 = vst.msk [vmem:[#allocation3 + $0xb0] sm:$0xff] %vm345_vm2, %v1382_v36  ;;  %v1575_v27 = vadd.f32 %v3768_v12, %v1446_v26  ;;  %2930 = vmatmul.msk.bf16.gmra.mxu2 %vm345_vm2, %v3750_v50 }
 0x1df   : > { %2964 = vmatmul.msk.bf16.gmra.mxu0 %vm345_vm2, %v3798_v24 }
 0x1e0   : > { %1607 = vst.msk [vmem:[#allocation3 + $0xa8] sm:$0xff] %vm345_vm2, %v1575_v27 }
 0x1e1   : > { %v1050_v30 = vpop.f32.mrf.mxu2  ;;  %v861_v35 = vpop.f32.mrf.mxu1 }
 0x1e2   : > { %v1094_v39 = vadd.f32 %v1050_v30, %v965_v28  ;;  %2947 = vmatmul.msk.bf16.gmra.mxu3 %vm345_vm2, %v3774_v23  ;;  %v902_v40 = vadd.f32 %v861_v35, %v773_v33  ;;  %v777_v33 = vld [vmem:[#allocation3 + $0xf0] sm:$0xff] }
 0x1e3   : > { %v1209_v3 = vld [vmem:[#allocation3 + $0xb8] sm:$0xff] }
 0x1e4   : > { %v1383_v41 = vadd.f32 %v1337_v22, %v1209_v3  ;;  %1126 = vst.msk [vmem:[#allocation3 + $0xc0] sm:$0xff] %vm345_vm2, %v1094_v39  ;;  %2914 = vmatmul.msk.bf16.gmra.mxu1 %vm345_vm2, %v3486_v38  ;;  %v3816_v50 = vpop.f32.mrf.mxu0  ;;  %v966_v57 = vld [vmem:[#allocation3 + $0xc8] sm:$0xff] }
 0x1e5   : > { %v1447_v12 = vld [vmem:[#allocation3 + $0xb0] sm:$0xff]  ;;  %v1340_v42 = vpop.f32.mrf.mxu3  ;;  %934 = vst.msk [vmem:[#allocation3 + $0xd0] sm:$0xff] %vm345_vm2, %v902_v40 }
 0x1e6   : > { %1415 = vst.msk [vmem:[#allocation3 + $0xb8] sm:$0xff] %vm345_vm2, %v1383_v41  ;;  %v1576_v43 = vadd.f32 %v3777_v53, %v1447_v12 }
 0x1e8   : > { %1608 = vst.msk [vmem:[#allocation3 + $0xb0] sm:$0xff] %vm345_vm2, %v1576_v43 }
 0x1e9   : > { %v1052_v25 = vpop.f32.mrf.mxu2  ;;  %v863_v48 = vpop.f32.mrf.mxu1 }
 0x1ea   : > { %v1095_v37 = vadd.f32 %v1052_v25, %v966_v57  ;;  %v903_v38 = vadd.f32 %v863_v48, %v774_v46  ;;  %v1830_v57 = vld [vmem:[#allocation2 + $0xda] sm:$0xff]  ;;  %v778_v25 = vld [vmem:[#allocation3 + $0xf8] sm:$0xff] }
 0x1eb   : > { %v1210_v6 = vld [vmem:[#allocation3 + $0xc0] sm:$0xff] }
 0x1ec   : > { %v1384_v54 = vadd.f32 %v1340_v42, %v1210_v6  ;;  %1127 = vst.msk [vmem:[#allocation3 + $0xc8] sm:$0xff] %vm345_vm2, %v1095_v37  ;;  %v3825_v51 = vpop.f32.mrf.mxu0  ;;  %v967_v60 = vld [vmem:[#allocation3 + $0xd0] sm:$0xff] }
 0x1ed   : > { %v1448_v56 = vld [vmem:[#allocation3 + $0xb8] sm:$0xff]  ;;  %v1342_v53 = vpop.f32.mrf.mxu3  ;;  %935 = vst.msk [vmem:[#allocation3 + $0xd8] sm:$0xff] %vm345_vm2, %v903_v38  ;;  %v3870_v38 = vpack.c.bf16 %v1831_v31, %v1830_v57 }
 0x1ee   : > { %1416 = vst.msk [vmem:[#allocation3 + $0xc0] sm:$0xff] %vm345_vm2, %v1384_v54  ;;  %v1577_v59 = vadd.f32 %v3792_v47, %v1448_v56  ;;  %2931 = vmatmul.msk.bf16.gmra.mxu2 %vm345_vm2, %v3774_v23  ;;  %v1622_v57 = vld [vmem:[#allocation3 + $0x18] sm:$0xff] }
 0x1ef   : > { %2965 = vmatmul.msk.bf16.gmra.mxu0 %vm345_vm2, %v3822_v52 }
 0x1f0   : > { %1609 = vst.msk [vmem:[#allocation3 + $0xb8] sm:$0xff] %vm345_vm2, %v1577_v59 }
 0x1f1   : > { %v1055_v49 = vpop.f32.mrf.mxu2  ;;  %v866_v62 = vpop.f32.mrf.mxu1 }
 0x1f2   : > { %v1096_v18 = vadd.f32 %v1055_v49, %v967_v60  ;;  %2948 = vmatmul.msk.bf16.gmra.mxu3 %vm345_vm2, %v3798_v24  ;;  %v904_v45 = vadd.f32 %v866_v62, %v775_v61  ;;  %v1619_v49 = vld [vmem:[#allocation3] sm:$0xff] }
 0x1f3   : > { %v1211_v5 = vld [vmem:[#allocation3 + $0xc8] sm:$0xff] }
 0x1f4   : > { %v1385_v63 = vadd.f32 %v1342_v53, %v1211_v5  ;;  %1128 = vst.msk [vmem:[#allocation3 + $0xd0] sm:$0xff] %vm345_vm2, %v1096_v18  ;;  %2915 = vmatmul.msk.bf16.gmra.mxu1 %vm345_vm2, %v3504_v7  ;;  %v3840_v23 = vpop.f32.mrf.mxu0  ;;  %v968_v10 = vld [vmem:[#allocation3 + $0xd8] sm:$0xff] }
 0x1f5   : > { %v1449_v47 = vld [vmem:[#allocation3 + $0xc0] sm:$0xff]  ;;  %v1345_v8 = vpop.f32.mrf.mxu3  ;;  %936 = vst.msk [vmem:[#allocation3 + $0xe0] sm:$0xff] %vm345_vm2, %v904_v45 }
 0x1f6   : > { %1417 = vst.msk [vmem:[#allocation3 + $0xc8] sm:$0xff] %vm345_vm2, %v1385_v63  ;;  %v1578_v9 = vadd.f32 %v3801_v29, %v1449_v47 }
 0x1f8   : > { %1610 = vst.msk [vmem:[#allocation3 + $0xc0] sm:$0xff] %vm345_vm2, %v1578_v9  ;;  %v1832_v9 = vld [vmem:[#allocation2 + $0xf2] sm:$0xff] }
 0x1f9   : > { %v1057_v14 = vpop.f32.mrf.mxu2  ;;  %v868_v34 = vpop.f32.mrf.mxu1 }
 0x1fa   : > { %v1097_v19 = vadd.f32 %v1057_v14, %v968_v10  ;;  %v905_v7 = vadd.f32 %v868_v34, %v776_v17  ;;  %v1833_v10 = vld [vmem:[#allocation2 + $0xfa] sm:$0xff] }
 0x1fb   : > { %v1212_v0 = vld [vmem:[#allocation3 + $0xd0] sm:$0xff] }
 0x1fc   : > { %v1386_v36 = vadd.f32 %v1345_v8, %v1212_v0  ;;  %1129 = vst.msk [vmem:[#allocation3 + $0xd8] sm:$0xff] %vm345_vm2, %v1097_v19  ;;  %v3849_v26 = vpop.f32.mrf.mxu0  ;;  %v969_v28 = vld [vmem:[#allocation3 + $0xe0] sm:$0xff]  ;;  %v3894_v19 = vpack.c.bf16 %v1833_v10, %v1832_v9 }
 0x1fd   : > { %v1450_v22 = vld [vmem:[#allocation3 + $0xc8] sm:$0xff]  ;;  %v1347_v29 = vpop.f32.mrf.mxu3  ;;  %937 = vst.msk [vmem:[#allocation3 + $0xe8] sm:$0xff] %vm345_vm2, %v905_v7 }
 0x1fe   : > { %1418 = vst.msk [vmem:[#allocation3 + $0xd0] sm:$0xff] %vm345_vm2, %v1386_v36  ;;  %v1579_v27 = vadd.f32 %v3816_v50, %v1450_v22  ;;  %2932 = vmatmul.msk.bf16.gmra.mxu2 %vm345_vm2, %v3798_v24 }
 0x1ff   : > { %2966 = vmatmul.msk.bf16.gmra.mxu0 %vm345_vm2, %v3846_v16 }
 0x200   : > { %1611 = vst.msk [vmem:[#allocation3 + $0xc8] sm:$0xff] %vm345_vm2, %v1579_v27 }
 0x201   : > { %v1060_v30 = vpop.f32.mrf.mxu2  ;;  %v871_v35 = vpop.f32.mrf.mxu1 }
 0x202   : > { %v1098_v39 = vadd.f32 %v1060_v30, %v969_v28  ;;  %2949 = vmatmul.msk.bf16.gmra.mxu3 %vm345_vm2, %v3822_v52  ;;  %v906_v40 = vadd.f32 %v871_v35, %v777_v33  ;;  %v1621_v28 = vld [vmem:[#allocation3 + $0x10] sm:$0xff] }
 0x203   : > { %v1213_v3 = vld [vmem:[#allocation3 + $0xd8] sm:$0xff] }
 0x204   : > { %v1387_v41 = vadd.f32 %v1347_v29, %v1213_v3  ;;  %1130 = vst.msk [vmem:[#allocation3 + $0xe0] sm:$0xff] %vm345_vm2, %v1098_v39  ;;  %2916 = vmatmul.msk.bf16.gmra.mxu1 %vm345_vm2, %v3522_v21  ;;  %v3864_v24 = vpop.f32.mrf.mxu0  ;;  %v970_v43 = vld [vmem:[#allocation3 + $0xe8] sm:$0xff] }
 0x205   : > { %v1451_v50 = vld [vmem:[#allocation3 + $0xd0] sm:$0xff]  ;;  %v1350_v12 = vpop.f32.mrf.mxu3  ;;  %938 = vst.msk [vmem:[#allocation3 + $0xf0] sm:$0xff] %vm345_vm2, %v906_v40 }
 0x206   : > { %1419 = vst.msk [vmem:[#allocation3 + $0xd8] sm:$0xff] %vm345_vm2, %v1387_v41  ;;  %v1580_v42 = vadd.f32 %v3825_v51, %v1451_v50 }
 0x208   : > { %1612 = vst.msk [vmem:[#allocation3 + $0xd0] sm:$0xff] %vm345_vm2, %v1580_v42  ;;  %v1835_v42 = vld [vmem:[#allocation2 + $0x112] sm:$0xff] }
 0x209   : > { %v1062_v44 = vpop.f32.mrf.mxu2  ;;  %v873_v46 = vpop.f32.mrf.mxu1 }
 0x20a   : > { %v1099_v48 = vadd.f32 %v1062_v44, %v970_v43  ;;  %v907_v21 = vadd.f32 %v873_v46, %v778_v25 }
 0x20b   : > { %v1214_v37 = vld [vmem:[#allocation3 + $0xe0] sm:$0xff] }
 0x20c   : > { %v1388_v6 = vadd.f32 %v1350_v12, %v1214_v37  ;;  %1131 = vst.msk [vmem:[#allocation3 + $0xe8] sm:$0xff] %vm345_vm2, %v1099_v48  ;;  %v3873_v54 = vpop.f32.mrf.mxu0  ;;  %v971_v59 = vld [vmem:[#allocation3 + $0xf0] sm:$0xff]  ;;  %v1834_v12 = vld [vmem:[#allocation2 + $0x10a] sm:$0xff] }
 0x20d   : > { %v1452_v56 = vld [vmem:[#allocation3 + $0xd8] sm:$0xff]  ;;  %v1352_v51 = vpop.f32.mrf.mxu3  ;;  %939 = vst.msk [vmem:[#allocation3 + $0xf8] sm:$0xff] %vm345_vm2, %v907_v21  ;;  %v3918_v46 = vpack.c.bf16 %v1835_v42, %v1834_v12 }
 0x20e   : > { %1420 = vst.msk [vmem:[#allocation3 + $0xe0] sm:$0xff] %vm345_vm2, %v1388_v6  ;;  %v1581_v53 = vadd.f32 %v3840_v23, %v1452_v56  ;;  %2933 = vmatmul.msk.bf16.gmra.mxu2 %vm345_vm2, %v3822_v52 }
 0x20f   : > { %2967 = vmatmul.msk.bf16.gmra.mxu0 %vm345_vm2, %v3870_v38 }
 0x210   : > { %1613 = vst.msk [vmem:[#allocation3 + $0xd8] sm:$0xff] %vm345_vm2, %v1581_v53  ;;  %v1623_v53 = vld [vmem:[#allocation3 + $0x20] sm:$0xff] }
 0x211   : > { %v1065_v60 = vpop.f32.mrf.mxu2  ;;  %v1668_v61 = vpop.f32.mrf.mxu1 }
 0x212   : > { %v1100_v62 = vadd.f32 %v1065_v60, %v971_v59  ;;  %2950 = vmatmul.msk.bf16.gmra.mxu3 %vm345_vm2, %v3846_v16  ;;  %v1748_v18 = vadd.f32 %v1668_v61, %v1619_v49 }
 0x213   : > { %v1215_v45 = vld [vmem:[#allocation3 + $0xe8] sm:$0xff] }
 0x214   : > { %v1389_v5 = vadd.f32 %v1352_v51, %v1215_v45  ;;  %1132 = vst.msk [vmem:[#allocation3 + $0xf0] sm:$0xff] %vm345_vm2, %v1100_v62  ;;  %2917 = vmatmul.msk.bf16.gmra.mxu1 %vm345_vm2, %v3537_v32  ;;  %v3888_v52 = vpop.f32.mrf.mxu0  ;;  %v972_v8 = vld [vmem:[#allocation3 + $0xf8] sm:$0xff] }
 0x215   : > { %v1453_v63 = vld [vmem:[#allocation3 + $0xe0] sm:$0xff]  ;;  %v1355_v23 = vpop.f32.mrf.mxu3  ;;  %1780 = vst.msk [vmem:[#allocation3] sm:$0xff] %vm345_vm2, %v1748_v18 }
 0x216   : > { %1421 = vst.msk [vmem:[#allocation3 + $0xe8] sm:$0xff] %vm345_vm2, %v1389_v5  ;;  %v1582_v47 = vadd.f32 %v3849_v26, %v1453_v63  ;;  %v1836_v63 = vld [vmem:[#allocation2 + $0x122] sm:$0xff] }
 0x218   : > { %1614 = vst.msk [vmem:[#allocation3 + $0xe0] sm:$0xff] %vm345_vm2, %v1582_v47 }
 0x219   : > { %v1067_v11 = vpop.f32.mrf.mxu2  ;;  %v1670_v14 = vpop.f32.mrf.mxu1 }
 0x21a   : > { %v1101_v17 = vadd.f32 %v1067_v11, %v972_v8  ;;  %v1749_v32 = vadd.f32 %v1670_v14, %v1620_v13  ;;  %v1624_v8 = vld [vmem:[#allocation3 + $0x28] sm:$0xff] }
 0x21b   : > { %v1216_v34 = vld [vmem:[#allocation3 + $0xf0] sm:$0xff] }
 0x21c   : > { %v1390_v7 = vadd.f32 %v1355_v23, %v1216_v34  ;;  %1133 = vst.msk [vmem:[#allocation3 + $0xf8] sm:$0xff] %vm345_vm2, %v1101_v17  ;;  %v3897_v0 = vpop.f32.mrf.mxu0  ;;  %v1864_v29 = vld [vmem:[#allocation3] sm:$0xff] }
 0x21d   : > { %v1454_v36 = vld [vmem:[#allocation3 + $0xe8] sm:$0xff]  ;;  %v1357_v26 = vpop.f32.mrf.mxu3  ;;  %1781 = vst.msk [vmem:[#allocation3 + $0x8] sm:$0xff] %vm345_vm2, %v1749_v32  ;;  %v1837_v23 = vld [vmem:[#allocation2 + $0x12a] sm:$0xff] }
 0x21e   : > { %1422 = vst.msk [vmem:[#allocation3 + $0xf0] sm:$0xff] %vm345_vm2, %v1390_v7  ;;  %v1583_v22 = vadd.f32 %v3864_v24, %v1454_v36  ;;  %2934 = vmatmul.msk.bf16.gmra.mxu2 %vm345_vm2, %v3846_v16  ;;  %v3942_v13 = vpack.c.bf16 %v1837_v23, %v1836_v63 }
 0x21f   : > { %2968 = vmatmul.msk.bf16.gmra.mxu0 %vm345_vm2, %v3894_v19 }
 0x220   : > { %1615 = vst.msk [vmem:[#allocation3 + $0xe8] sm:$0xff] %vm345_vm2, %v1583_v22  ;;  %v1625_v22 = vld [vmem:[#allocation3 + $0x30] sm:$0xff] }
 0x221   : > { %v1958_v27 = vpop.f32.mrf.mxu2  ;;  %v1673_v30 = vpop.f32.mrf.mxu1 }
 0x222   : > { %v2038_v33 = vadd.f32 %v1958_v27, %v1864_v29  ;;  %2951 = vmatmul.msk.bf16.gmra.mxu3 %vm345_vm2, %v3870_v38  ;;  %v1750_v35 = vadd.f32 %v1673_v30, %v1621_v28 }
 0x223   : > { %v1217_v39 = vld [vmem:[#allocation3 + $0xf8] sm:$0xff] }
 0x224   : > { %v1391_v40 = vadd.f32 %v1357_v26, %v1217_v39  ;;  %2070 = vst.msk [vmem:[#allocation3] sm:$0xff] %vm345_vm2, %v2038_v33  ;;  %2918 = vmatmul.msk.bf16.gmra.mxu1 %vm345_vm2, %v3556_v15  ;;  %v3912_v16 = vpop.f32.mrf.mxu0  ;;  %v1865_v50 = vld [vmem:[#allocation3 + $0x8] sm:$0xff] }
 0x225   : > { %v1455_v3 = vld [vmem:[#allocation3 + $0xf0] sm:$0xff]  ;;  %v2152_v41 = vpop.f32.mrf.mxu3  ;;  %1782 = vst.msk [vmem:[#allocation3 + $0x10] sm:$0xff] %vm345_vm2, %v1750_v35 }
 0x226   : > { %1423 = vst.msk [vmem:[#allocation3 + $0xf8] sm:$0xff] %vm345_vm2, %v1391_v40  ;;  %v1584_v24 = vadd.f32 %v3873_v54, %v1455_v3 }
 0x228   : > { %1616 = vst.msk [vmem:[#allocation3 + $0xf0] sm:$0xff] %vm345_vm2, %v1584_v24  ;;  %v1838_v24 = vld [vmem:[#allocation2 + $0x13a] sm:$0xff] }
 0x229   : > { %v1960_v43 = vpop.f32.mrf.mxu2  ;;  %v1675_v31 = vpop.f32.mrf.mxu1 }
 0x22a   : > { %v2039_v44 = vadd.f32 %v1960_v43, %v1865_v50  ;;  %v1751_v15 = vadd.f32 %v1675_v31, %v1622_v57  ;;  %v1839_v50 = vld [vmem:[#allocation2 + $0x142] sm:$0xff] }
 0x22b   : > { %v2103_v25 = vld [vmem:[#allocation3] sm:$0xff]  ;;  %v1626_v57 = vld [vmem:[#allocation3 + $0x38] sm:$0xff] }
 0x22c   : > { %v2232_v48 = vadd.f32 %v2152_v41, %v2103_v25  ;;  %2071 = vst.msk [vmem:[#allocation3 + $0x8] sm:$0xff] %vm345_vm2, %v2039_v44  ;;  %v3921_v21 = vpop.f32.mrf.mxu0  ;;  %v1866_v56 = vld [vmem:[#allocation3 + $0x10] sm:$0xff] }
 0x22d   : > { %v1456_v37 = vld [vmem:[#allocation3 + $0xf8] sm:$0xff]  ;;  %v2154_v6 = vpop.f32.mrf.mxu3  ;;  %1783 = vst.msk [vmem:[#allocation3 + $0x18] sm:$0xff] %vm345_vm2, %v1751_v15 }
 0x22e   : > { %2264 = vst.msk [vmem:[#allocation3] sm:$0xff] %vm345_vm2, %v2232_v48  ;;  %v1585_v54 = vadd.f32 %v3888_v52, %v1456_v37  ;;  %2935 = vmatmul.msk.bf16.gmra.mxu2 %vm345_vm2, %v3870_v38 }
 0x22f   : > { %2969 = vmatmul.msk.bf16.gmra.mxu0 %vm345_vm2, %v3918_v46 }
 0x230   : > { %1617 = vst.msk [vmem:[#allocation3 + $0xf8] sm:$0xff] %vm345_vm2, %v1585_v54 }
 0x231   : > { %v1963_v51 = vpop.f32.mrf.mxu2  ;;  %v1678_v59 = vpop.f32.mrf.mxu1 }
 0x232   : > { %v2040_v60 = vadd.f32 %v1963_v51, %v1866_v56  ;;  %2952 = vmatmul.msk.bf16.gmra.mxu3 %vm345_vm2, %v3894_v19  ;;  %v1752_v49 = vadd.f32 %v1678_v59, %v1623_v53 }
 0x233   : > { %v2104_v61 = vld [vmem:[#allocation3 + $0x8] sm:$0xff] }
 0x234   : > { %v2233_v62 = vadd.f32 %v2154_v6, %v2104_v61  ;;  %2072 = vst.msk [vmem:[#allocation3 + $0x10] sm:$0xff] %vm345_vm2, %v2040_v60  ;;  %2919 = vmatmul.msk.bf16.gmra.mxu1 %vm345_vm2, %v3578_v1  ;;  %v3936_v38 = vpop.f32.mrf.mxu0  ;;  %v1867_v52 = vld [vmem:[#allocation3 + $0x18] sm:$0xff]  ;;  %v3981_v6 = vpack.c.bf16 %v1839_v50, %v1838_v24 }
 0x235   : > { %v2297_v18 = vld [vmem:[#allocation3] sm:$0xff]  ;;  %v2157_v45 = vpop.f32.mrf.mxu3  ;;  %1784 = vst.msk [vmem:[#allocation3 + $0x20] sm:$0xff] %vm345_vm2, %v1752_v49 }
 0x236   : > { %2265 = vst.msk [vmem:[#allocation3 + $0x8] sm:$0xff] %vm345_vm2, %v2233_v62  ;;  %v2426_v5 = vadd.f32 %v3897_v0, %v2297_v18 }
 0x238   : > { %2458 = vst.msk [vmem:[#allocation3] sm:$0xff] %vm345_vm2, %v2426_v5 }
 0x239   : > { %v1965_v47 = vpop.f32.mrf.mxu2  ;;  %v1680_v9 = vpop.f32.mrf.mxu1 }
 0x23a   : > { %v2041_v1 = vadd.f32 %v1965_v47, %v1867_v52  ;;  %v1753_v10 = vadd.f32 %v1680_v9, %v1624_v8  ;;  %v1627_v52 = vld [vmem:[#allocation3 + $0x40] sm:$0xff] }
 0x23b   : > { %v2105_v11 = vld [vmem:[#allocation3 + $0x10] sm:$0xff] }
 0x23c   : > { %v2234_v14 = vadd.f32 %v2157_v45, %v2105_v11  ;;  %2073 = vst.msk [vmem:[#allocation3 + $0x18] sm:$0xff] %vm345_vm2, %v2041_v1  ;;  %v3945_v17 = vpop.f32.mrf.mxu0  ;;  %v1868_v36 = vld [vmem:[#allocation3 + $0x20] sm:$0xff] }
 0x23d   : > { %v2298_v32 = vld [vmem:[#allocation3 + $0x8] sm:$0xff]  ;;  %v2159_v34 = vpop.f32.mrf.mxu3  ;;  %1785 = vst.msk [vmem:[#allocation3 + $0x28] sm:$0xff] %vm345_vm2, %v1753_v10 }
 0x23e   : > { %2266 = vst.msk [vmem:[#allocation3 + $0x10] sm:$0xff] %vm345_vm2, %v2234_v14  ;;  %v2427_v7 = vadd.f32 %v3912_v16, %v2298_v32  ;;  %2936 = vmatmul.msk.bf16.gmra.mxu2 %vm345_vm2, %v3894_v19 }
 0x23f   : > { %v2490_v0 = vld [vmem:[#allocation3] sm:$0xff]  ;;  %2970 = vmatmul.msk.bf16.gmra.mxu0 %vm345_vm2, %v3942_v13 }
 0x240   : > { %2522 = vst.msk [vmem:[%s3952_s28] sm:$0xff] %vm345_vm2, %v2490_v0  ;;  %v2625_v16 = vmul.f32 %v2490_v0, %v2490_v0  ;;  %v2555_v12 = vsel %vm345_vm2, %v2490_v0, 0.0  ;;  %v1841_v0 = vld [vmem:[#allocation2 + $0x15a] sm:$0xff] }
 0x241   : > { %2459 = vst.msk [vmem:[#allocation3 + $0x8] sm:$0xff] %vm345_vm2, %v2427_v7  ;;  %v1968_v26 = vpop.f32.mrf.mxu2  ;;  %v1683_v29 = vpop.f32.mrf.mxu1  ;;  %v1840_v7 = vld [vmem:[#allocation2 + $0x152] sm:$0xff] }
 0x242   : > { %v2042_v27 = vadd.f32 %v1968_v26, %v1868_v36  ;;  %2953 = vmatmul.msk.bf16.gmra.mxu3 %vm345_vm2, %v3918_v46  ;;  %v1754_v28 = vadd.f32 %v1683_v29, %v1625_v22  ;;  %v2657_v48 = vsel %vm345_vm2, %v2625_v16, 0.0  ;;  %v1628_v22 = vld [vmem:[#allocation3 + $0x48] sm:$0xff] }
 0x243   : > { %v2106_v30 = vld [vmem:[#allocation3 + $0x18] sm:$0xff] }
 0x244   : > { %v2235_v33 = vadd.f32 %v2159_v34, %v2106_v30  ;;  %2074 = vst.msk [vmem:[#allocation3 + $0x20] sm:$0xff] %vm345_vm2, %v2042_v27  ;;  %2920 = vmatmul.msk.bf16.gmra.mxu1 %vm345_vm2, %v3612_v4  ;;  %v3969_v19 = vpop.f32.mrf.mxu0  ;;  %v1869_v3 = vld [vmem:[#allocation3 + $0x28] sm:$0xff] }
 0x245   : > { %v2299_v35 = vld [vmem:[#allocation3 + $0x10] sm:$0xff]  ;;  %v2162_v39 = vpop.f32.mrf.mxu3  ;;  %1786 = vst.msk [vmem:[#allocation3 + $0x30] sm:$0xff] %vm345_vm2, %v1754_v28 }
 0x246   : > { %2267 = vst.msk [vmem:[#allocation3 + $0x18] sm:$0xff] %vm345_vm2, %v2235_v33  ;;  %v2428_v40 = vadd.f32 %v3921_v21, %v2299_v35  ;;  %v4013_v35 = vpack.c.bf16 %v1841_v0, %v1840_v7 }
 0x248   : > { %v2491_v41 = vld [vmem:[#allocation3 + $0x8] sm:$0xff]  ;;  %2460 = vst.msk [vmem:[#allocation3 + $0x10] sm:$0xff] %vm345_vm2, %v2428_v40 }
 0x249   : > { %2523 = vst.msk [vmem:[%s3952_s28 + $0x8] sm:$0xff] %vm345_vm2, %v2491_v41  ;;  %v2556_v4 = vsel %vm345_vm2, %v2491_v41, 0.0  ;;  %v2626_v42 = vmul.f32 %v2491_v41, %v2491_v41  ;;  %v1970_v43 = vpop.f32.mrf.mxu2  ;;  %v1685_v31 = vpop.f32.mrf.mxu1 }
 0x24a   : > { %v2557_v44 = vadd.f32 %v2556_v4, %v2555_v12  ;;  %v2043_v15 = vadd.f32 %v1970_v43, %v1869_v3  ;;  %v1755_v25 = vadd.f32 %v1685_v31, %v1626_v57  ;;  %v1629_v31 = vld [vmem:[#allocation3 + $0x50] sm:$0xff] }
 0x24b   : > { %v2658_v21 = vsel %vm345_vm2, %v2626_v42, 0.0  ;;  %v2107_v37 = vld [vmem:[#allocation3 + $0x20] sm:$0xff] }
 0x24c   : > { %v2659_v54 = vadd.f32 %v2658_v21, %v2657_v48  ;;  %v2236_v56 = vadd.f32 %v2162_v39, %v2107_v37  ;;  %2075 = vst.msk [vmem:[#allocation3 + $0x28] sm:$0xff] %vm345_vm2, %v2043_v15  ;;  %v3984_v51 = vpop.f32.mrf.mxu0  ;;  %v1870_v61 = vld [vmem:[#allocation3 + $0x30] sm:$0xff] }
 0x24d   : > { %v2300_v53 = vld [vmem:[#allocation3 + $0x18] sm:$0xff]  ;;  %v2164_v59 = vpop.f32.mrf.mxu3  ;;  %1787 = vst.msk [vmem:[#allocation3 + $0x38] sm:$0xff] %vm345_vm2, %v1755_v25 }
 0x24e   : > { %2268 = vst.msk [vmem:[#allocation3 + $0x20] sm:$0xff] %vm345_vm2, %v2236_v56  ;;  %v2429_v60 = vadd.f32 %v3936_v38, %v2300_v53  ;;  %2937 = vmatmul.msk.bf16.gmra.mxu2 %vm345_vm2, %v3918_v46 }
 0x24f   : > { %v2492_v49 = vld [vmem:[#allocation3 + $0x10] sm:$0xff]  ;;  %2971 = vmatmul.msk.bf16.gmra.mxu0 %vm345_vm2, %v3981_v6 }
 0x250   : > { %2524 = vst.msk [vmem:[%s3952_s28 + $0x10] sm:$0xff] %vm345_vm2, %v2492_v49  ;;  %v2558_v62 = vsel %vm345_vm2, %v2492_v49, 0.0  ;;  %v2627_v18 = vmul.f32 %v2492_v49, %v2492_v49  ;;  %v1842_v49 = vld [vmem:[#allocation2 + $0x16a] sm:$0xff] }
 0x251   : > { %v2559_v45 = vadd.f32 %v2558_v62, %v2557_v44  ;;  %2461 = vst.msk [vmem:[#allocation3 + $0x18] sm:$0xff] %vm345_vm2, %v2429_v60  ;;  %v1973_v5 = vpop.f32.mrf.mxu2  ;;  %v1688_v63 = vpop.f32.mrf.mxu1 }
 0x252   : > { %v2660_v38 = vsel %vm345_vm2, %v2627_v18, 0.0  ;;  %v2044_v23 = vadd.f32 %v1973_v5, %v1870_v61  ;;  %2954 = vmatmul.msk.bf16.gmra.mxu3 %vm345_vm2, %v3942_v13  ;;  %v1756_v46 = vadd.f32 %v1688_v63, %v1627_v52  ;;  %v1843_v61 = vld [vmem:[#allocation2 + $0x172] sm:$0xff] }
 0x253   : > { %v2661_v47 = vadd.f32 %v2660_v38, %v2659_v54  ;;  %v2108_v8 = vld [vmem:[#allocation3 + $0x28] sm:$0xff] }
 0x254   : > { %v2237_v9 = vadd.f32 %v2164_v59, %v2108_v8  ;;  %2076 = vst.msk [vmem:[#allocation3 + $0x30] sm:$0xff] %vm345_vm2, %v2044_v23  ;;  %2921 = vmatmul.msk.bf16.gmra.mxu1 %vm345_vm2, %v3636_v20  ;;  %v4003_v1 = vpop.f32.mrf.mxu0  ;;  %v1871_v32 = vld [vmem:[#allocation3 + $0x38] sm:$0xff] }
 0x255   : > { %v2301_v10 = vld [vmem:[#allocation3 + $0x20] sm:$0xff]  ;;  %v2167_v11 = vpop.f32.mrf.mxu3  ;;  %1788 = vst.msk [vmem:[#allocation3 + $0x40] sm:$0xff] %vm345_vm2, %v1756_v46  ;;  %v4045_v46 = vpack.c.bf16 %v1843_v61, %v1842_v49 }
 0x256   : > { %2269 = vst.msk [vmem:[#allocation3 + $0x28] sm:$0xff] %vm345_vm2, %v2237_v9  ;;  %v2430_v14 = vadd.f32 %v3945_v17, %v2301_v10 }
 0x258   : > { %v2493_v34 = vld [vmem:[#allocation3 + $0x18] sm:$0xff]  ;;  %2462 = vst.msk [vmem:[#allocation3 + $0x20] sm:$0xff] %vm345_vm2, %v2430_v14 }
 0x259   : > { %2525 = vst.msk [vmem:[%s3952_s28 + $0x18] sm:$0xff] %vm345_vm2, %v2493_v34  ;;  %v2560_v20 = vsel %vm345_vm2, %v2493_v34, 0.0  ;;  %v2628_v36 = vmul.f32 %v2493_v34, %v2493_v34  ;;  %v1975_v26 = vpop.f32.mrf.mxu2  ;;  %v1690_v29 = vpop.f32.mrf.mxu1 }
 0x25a   : > { %v2561_v27 = vadd.f32 %v2560_v20, %v2559_v45  ;;  %v2045_v28 = vadd.f32 %v1975_v26, %v1871_v32  ;;  %v1757_v30 = vadd.f32 %v1690_v29, %v1628_v22  ;;  %v1630_v45 = vld [vmem:[#allocation3 + $0x58] sm:$0xff]  ;;  %v1631_v26 = vld [vmem:[#allocation3 + $0x60] sm:$0xff] }
 0x25b   : > { %v2662_v33 = vsel %vm345_vm2, %v2628_v36, 0.0  ;;  %v2109_v17 = vld [vmem:[#allocation3 + $0x30] sm:$0xff] }
 0x25c   : > { %v2663_v39 = vadd.f32 %v2662_v33, %v2661_v47  ;;  %v2238_v40 = vadd.f32 %v2167_v11, %v2109_v17  ;;  %2077 = vst.msk [vmem:[#allocation3 + $0x38] sm:$0xff] %vm345_vm2, %v2045_v28  ;;  %v4016_v16 = vpop.f32.mrf.mxu0  ;;  %v1872_v12 = vld [vmem:[#allocation3 + $0x40] sm:$0xff] }
 0x25d   : > { %v2302_v3 = vld [vmem:[#allocation3 + $0x28] sm:$0xff]  ;;  %v2169_v41 = vpop.f32.mrf.mxu3  ;;  %1789 = vst.msk [vmem:[#allocation3 + $0x48] sm:$0xff] %vm345_vm2, %v1757_v30 }
 0x25e   : > { %2270 = vst.msk [vmem:[#allocation3 + $0x30] sm:$0xff] %vm345_vm2, %v2238_v40  ;;  %v2431_v24 = vadd.f32 %v3969_v19, %v2302_v3  ;;  %2938 = vmatmul.msk.bf16.gmra.mxu2 %vm345_vm2, %v3942_v13 }
 0x25f   : > { %v2494_v50 = vld [vmem:[#allocation3 + $0x20] sm:$0xff]  ;;  %2972 = vmatmul.msk.bf16.gmra.mxu0 %vm345_vm2, %v4013_v35 }
 0x260   : > { %2526 = vst.msk [vmem:[%s3952_s28 + $0x20] sm:$0xff] %vm345_vm2, %v2494_v50  ;;  %v2562_v4 = vsel %vm345_vm2, %v2494_v50, 0.0  ;;  %v2629_v42 = vmul.f32 %v2494_v50, %v2494_v50  ;;  %v1845_v50 = vld [vmem:[#allocation2 + $0x18a] sm:$0xff] }
 0x261   : > { %v2563_v43 = vadd.f32 %v2562_v4, %v2561_v27  ;;  %2463 = vst.msk [vmem:[#allocation3 + $0x28] sm:$0xff] %vm345_vm2, %v2431_v24  ;;  %v1978_v57 = vpop.f32.mrf.mxu2  ;;  %v1693_v44 = vpop.f32.mrf.mxu1  ;;  %v1844_v24 = vld [vmem:[#allocation2 + $0x182] sm:$0xff] }
 0x262   : > { %v2664_v19 = vsel %vm345_vm2, %v2629_v42, 0.0  ;;  %v2046_v15 = vadd.f32 %v1978_v57, %v1872_v12  ;;  %2955 = vmatmul.msk.bf16.gmra.mxu3 %vm345_vm2, %v3981_v6  ;;  %v1758_v13 = vadd.f32 %v1693_v44, %v1629_v31  ;;  %v1632_v42 = vld [vmem:[#allocation3 + $0x68] sm:$0xff] }
 0x263   : > { %v2665_v25 = vadd.f32 %v2664_v19, %v2663_v39  ;;  %v2110_v48 = vld [vmem:[#allocation3 + $0x38] sm:$0xff] }
 0x264   : > { %v2239_v21 = vadd.f32 %v2169_v41, %v2110_v48  ;;  %2078 = vst.msk [vmem:[#allocation3 + $0x40] sm:$0xff] %vm345_vm2, %v2046_v15  ;;  %2922 = vmatmul.msk.bf16.gmra.mxu1 %vm345_vm2, %v3660_v58  ;;  %v4035_v37 = vpop.f32.mrf.mxu0  ;;  %v1873_v59 = vld [vmem:[#allocation3 + $0x48] sm:$0xff]  ;;  %v4077_v15 = vpack.c.bf16 %v1845_v50, %v1844_v24 }
 0x265   : > { %v2303_v54 = vld [vmem:[#allocation3 + $0x30] sm:$0xff]  ;;  %v2172_v56 = vpop.f32.mrf.mxu3  ;;  %1790 = vst.msk [vmem:[#allocation3 + $0x50] sm:$0xff] %vm345_vm2, %v1758_v13 }
 0x266   : > { %2271 = vst.msk [vmem:[#allocation3 + $0x38] sm:$0xff] %vm345_vm2, %v2239_v21  ;;  %v2432_v53 = vadd.f32 %v3984_v51, %v2303_v54 }
 0x268   : > { %v2495_v60 = vld [vmem:[#allocation3 + $0x28] sm:$0xff]  ;;  %2464 = vst.msk [vmem:[#allocation3 + $0x30] sm:$0xff] %vm345_vm2, %v2432_v53  ;;  %v1169_v53 = vld [vmem:[#allocation2 + $0x1a1] sm:$0xff] }
 0x269   : > { %2527 = vst.msk [vmem:[%s3952_s28 + $0x28] sm:$0xff] %vm345_vm2, %v2495_v60  ;;  %v2564_v58 = vsel %vm345_vm2, %v2495_v60, 0.0  ;;  %v2630_v62 = vmul.f32 %v2495_v60, %v2495_v60  ;;  %v1980_v18 = vpop.f32.mrf.mxu2  ;;  %v1695_v5 = vpop.f32.mrf.mxu1 }
 0x26a   : > { %v2565_v52 = vadd.f32 %v2564_v58, %v2563_v43  ;;  %v2047_v63 = vadd.f32 %v1980_v18, %v1873_v59  ;;  %v1759_v38 = vadd.f32 %v1695_v5, %v1630_v45  ;;  %v1633_v5 = vld [vmem:[#allocation3 + $0x70] sm:$0xff] }
 0x26b   : > { %v2666_v23 = vsel %vm345_vm2, %v2630_v62, 0.0  ;;  %v2111_v51 = vld [vmem:[#allocation3 + $0x40] sm:$0xff] }
 0x26c   : > { %v2667_v47 = vadd.f32 %v2666_v23, %v2665_v25  ;;  %v2240_v8 = vadd.f32 %v2172_v56, %v2111_v51  ;;  %2079 = vst.msk [vmem:[#allocation3 + $0x48] sm:$0xff] %vm345_vm2, %v2047_v63  ;;  %v4048_v9 = vpop.f32.mrf.mxu0  ;;  %v1874_v34 = vld [vmem:[#allocation3 + $0x50] sm:$0xff] }
 0x26d   : > { %v2304_v10 = vld [vmem:[#allocation3 + $0x38] sm:$0xff]  ;;  %v2174_v11 = vpop.f32.mrf.mxu3  ;;  %1791 = vst.msk [vmem:[#allocation3 + $0x58] sm:$0xff] %vm345_vm2, %v1759_v38  ;;  %v1168_v56 = vld [vmem:[#allocation2 + $0x199] sm:$0xff] }
 0x26e   : > { %2272 = vst.msk [vmem:[#allocation3 + $0x40] sm:$0xff] %vm345_vm2, %v2240_v8  ;;  %v2433_v14 = vadd.f32 %v4003_v1, %v2304_v10  ;;  %2939 = vmatmul.msk.bf16.gmra.mxu2 %vm345_vm2, %v3981_v6  ;;  %v1618_v62 = vpack.c.bf16 %v1169_v53, %v1168_v56 }
 0x26f   : > { %v2496_v32 = vld [vmem:[#allocation3 + $0x30] sm:$0xff]  ;;  %2973 = vmatmul.msk.bf16.gmra.mxu0 %vm345_vm2, %v4045_v46 }
 0x270   : > { %2528 = vst.msk [vmem:[%s3952_s28 + $0x30] sm:$0xff] %vm345_vm2, %v2496_v32  ;;  %v2566_v7 = vsel %vm345_vm2, %v2496_v32, 0.0  ;;  %v2631_v0 = vmul.f32 %v2496_v32, %v2496_v32 }
 0x271   : > { %v2567_v20 = vadd.f32 %v2566_v7, %v2565_v52  ;;  %2465 = vst.msk [vmem:[#allocation3 + $0x38] sm:$0xff] %vm345_vm2, %v2433_v14  ;;  %v1983_v36 = vpop.f32.mrf.mxu2  ;;  %v1698_v22 = vpop.f32.mrf.mxu1  ;;  %v1847_v7 = vld [vmem:[#allocation2 + $0x1a2] sm:$0xff] }
 0x272   : > { %v2668_v1 = vsel %vm345_vm2, %v2631_v0, 0.0  ;;  %v2048_v29 = vadd.f32 %v1983_v36, %v1874_v34  ;;  %2956 = vmatmul.msk.bf16.gmra.mxu3 %vm345_vm2, %v4013_v35  ;;  %v1760_v6 = vadd.f32 %v1698_v22, %v1631_v26  ;;  %v1846_v34 = vld [vmem:[#allocation2 + $0x19a] sm:$0xff]  ;;  %v1634_v26 = vld [vmem:[#allocation3 + $0x78] sm:$0xff] }
 0x273   : > { %v2669_v27 = vadd.f32 %v2668_v1, %v2667_v47  ;;  %v2112_v28 = vld [vmem:[#allocation3 + $0x48] sm:$0xff] }
 0x274   : > { %v2241_v30 = vadd.f32 %v2174_v11, %v2112_v28  ;;  %2080 = vst.msk [vmem:[#allocation3 + $0x50] sm:$0xff] %vm345_vm2, %v2048_v29  ;;  %2923 = vmatmul.msk.bf16.gmra.mxu1 %vm345_vm2, %v3682_v55  ;;  %v4067_v33 = vpop.f32.mrf.mxu0  ;;  %v1875_v3 = vld [vmem:[#allocation3 + $0x58] sm:$0xff]  ;;  %v2296_v28 = vpack.c.bf16 %v1847_v7, %v1846_v34 }
 0x275   : > { %v2305_v17 = vld [vmem:[#allocation3 + $0x40] sm:$0xff]  ;;  %v2177_v39 = vpop.f32.mrf.mxu3  ;;  %1792 = vst.msk [vmem:[#allocation3 + $0x60] sm:$0xff] %vm345_vm2, %v1760_v6 }
 0x276   : > { %2273 = vst.msk [vmem:[#allocation3 + $0x48] sm:$0xff] %vm345_vm2, %v2241_v30  ;;  %v2434_v40 = vadd.f32 %v4016_v16, %v2305_v17 }
 0x278   : > { %v2497_v41 = vld [vmem:[#allocation3 + $0x38] sm:$0xff]  ;;  %2466 = vst.msk [vmem:[#allocation3 + $0x40] sm:$0xff] %vm345_vm2, %v2434_v40 }
 0x279   : > { %2529 = vst.msk [vmem:[%s3952_s28 + $0x38] sm:$0xff] %vm345_vm2, %v2497_v41  ;;  %v2568_v55 = vsel %vm345_vm2, %v2497_v41, 0.0  ;;  %v2632_v12 = vmul.f32 %v2497_v41, %v2497_v41  ;;  %v1985_v4 = vpop.f32.mrf.mxu2  ;;  %v1700_v43 = vpop.f32.mrf.mxu1 }
 0x27a   : > { %v2569_v57 = vadd.f32 %v2568_v55, %v2567_v20  ;;  %v2049_v31 = vadd.f32 %v1985_v4, %v1875_v3  ;;  %v1761_v44 = vadd.f32 %v1700_v43, %v1632_v42  ;;  %v1635_v43 = vld [vmem:[#allocation3 + $0x80] sm:$0xff] }
 0x27b   : > { %v2670_v19 = vsel %vm345_vm2, %v2632_v12, 0.0  ;;  %v2113_v16 = vld [vmem:[#allocation3 + $0x50] sm:$0xff] }
 0x27c   : > { %v2671_v13 = vadd.f32 %v2670_v19, %v2669_v27  ;;  %v2242_v25 = vadd.f32 %v2177_v39, %v2113_v16  ;;  %2081 = vst.msk [vmem:[#allocation3 + $0x58] sm:$0xff] %vm345_vm2, %v2049_v31  ;;  %v4080_v48 = vpop.f32.mrf.mxu0  ;;  %v1876_v49 = vld [vmem:[#allocation3 + $0x60] sm:$0xff] }
 0x27d   : > { %v2306_v21 = vld [vmem:[#allocation3 + $0x48] sm:$0xff]  ;;  %v2179_v54 = vpop.f32.mrf.mxu3  ;;  %1793 = vst.msk [vmem:[#allocation3 + $0x68] sm:$0xff] %vm345_vm2, %v1761_v44 }
 0x27e   : > { %2274 = vst.msk [vmem:[#allocation3 + $0x50] sm:$0xff] %vm345_vm2, %v2242_v25  ;;  %v2435_v59 = vadd.f32 %v4035_v37, %v2306_v21  ;;  %2940 = vmatmul.msk.bf16.gmra.mxu2 %vm345_vm2, %v4013_v35 }
 0x27f   : > { %v2498_v60 = vld [vmem:[#allocation3 + $0x40] sm:$0xff]  ;;  %2974 = vmatmul.msk.bf16.gmra.mxu0 %vm345_vm2, %v4077_v15 }
 0x280   : > { %2530 = vst.msk [vmem:[%s3952_s28 + $0x40] sm:$0xff] %vm345_vm2, %v2498_v60  ;;  %v2570_v61 = vsel %vm345_vm2, %v2498_v60, 0.0  ;;  %v2633_v58 = vmul.f32 %v2498_v60, %v2498_v60 }
 0x281   : > { %v2571_v18 = vadd.f32 %v2570_v61, %v2569_v57  ;;  %2467 = vst.msk [vmem:[#allocation3 + $0x48] sm:$0xff] %vm345_vm2, %v2435_v59  ;;  %v1988_v45 = vpop.f32.mrf.mxu2  ;;  %v1703_v37 = vpop.f32.mrf.mxu1 }
 0x282   : > { %v2672_v52 = vsel %vm345_vm2, %v2633_v58, 0.0  ;;  %v2050_v35 = vadd.f32 %v1988_v45, %v1876_v49  ;;  %2957 = vmatmul.msk.bf16.gmra.mxu3 %vm345_vm2, %v4045_v46  ;;  %v1762_v63 = vadd.f32 %v1703_v37, %v1633_v5  ;;  %v1636_v49 = vld [vmem:[#allocation3 + $0x88] sm:$0xff] }
 0x283   : > { %v2673_v38 = vadd.f32 %v2672_v52, %v2671_v13  ;;  %v2114_v23 = vld [vmem:[#allocation3 + $0x58] sm:$0xff] }
 0x284   : > { %v2243_v51 = vadd.f32 %v2179_v54, %v2114_v23  ;;  %2082 = vst.msk [vmem:[#allocation3 + $0x60] sm:$0xff] %vm345_vm2, %v2050_v35  ;;  %2924 = vmatmul.msk.bf16.gmra.mxu1 %vm345_vm2, %v1618_v62  ;;  %v4098_v47 = vpop.f32.mrf.mxu0  ;;  %v1877_v14 = vld [vmem:[#allocation3 + $0x68] sm:$0xff] }
 0x285   : > { %v2307_v8 = vld [vmem:[#allocation3 + $0x50] sm:$0xff]  ;;  %v2182_v10 = vpop.f32.mrf.mxu3  ;;  %1794 = vst.msk [vmem:[#allocation3 + $0x70] sm:$0xff] %vm345_vm2, %v1762_v63 }
 0x286   : > { %2275 = vst.msk [vmem:[#allocation3 + $0x58] sm:$0xff] %vm345_vm2, %v2243_v51  ;;  %v2436_v11 = vadd.f32 %v4048_v9, %v2307_v8 }
 0x288   : > { %v2499_v32 = vld [vmem:[#allocation3 + $0x48] sm:$0xff]  ;;  %2468 = vst.msk [vmem:[#allocation3 + $0x50] sm:$0xff] %vm345_vm2, %v2436_v11 }
 0x289   : > { %2531 = vst.msk [vmem:[%s3952_s28 + $0x48] sm:$0xff] %vm345_vm2, %v2499_v32  ;;  %v2572_v0 = vsel %vm345_vm2, %v2499_v32, 0.0  ;;  %v2634_v20 = vmul.f32 %v2499_v32, %v2499_v32  ;;  %v1990_v36 = vpop.f32.mrf.mxu2  ;;  %v1705_v22 = vpop.f32.mrf.mxu1  ;;  %v1637_v32 = vld [vmem:[#allocation3 + $0x90] sm:$0xff] }
 0x28a   : > { %v2573_v1 = vadd.f32 %v2572_v0, %v2571_v18  ;;  %v2051_v29 = vadd.f32 %v1990_v36, %v1877_v14  ;;  %v1763_v6 = vadd.f32 %v1705_v22, %v1634_v26 }
 0x28b   : > { %v2674_v27 = vsel %vm345_vm2, %v2634_v20, 0.0  ;;  %v2115_v9 = vld [vmem:[#allocation3 + $0x60] sm:$0xff] }
 0x28c   : > { %v2675_v30 = vadd.f32 %v2674_v27, %v2673_v38  ;;  %v2244_v17 = vadd.f32 %v2182_v10, %v2115_v9  ;;  %2083 = vst.msk [vmem:[#allocation3 + $0x68] sm:$0xff] %vm345_vm2, %v2051_v29  ;;  %v4109_v39 = vpop.f32.mrf.mxu0  ;;  %v1878_v50 = vld [vmem:[#allocation3 + $0x70] sm:$0xff] }
 0x28d   : > { %v2308_v40 = vld [vmem:[#allocation3 + $0x58] sm:$0xff]  ;;  %v2184_v3 = vpop.f32.mrf.mxu3  ;;  %1795 = vst.msk [vmem:[#allocation3 + $0x78] sm:$0xff] %vm345_vm2, %v1763_v6 }
 0x28e   : > { %2276 = vst.msk [vmem:[#allocation3 + $0x60] sm:$0xff] %vm345_vm2, %v2244_v17  ;;  %v2437_v41 = vadd.f32 %v4067_v33, %v2308_v40  ;;  %2941 = vmatmul.msk.bf16.gmra.mxu2 %vm345_vm2, %v4045_v46  ;;  %v1638_v40 = vld [vmem:[#allocation3 + $0x98] sm:$0xff] }
 0x28f   : > { %v2500_v24 = vld [vmem:[#allocation3 + $0x50] sm:$0xff]  ;;  %2975 = vmatmul.msk.bf16.gmra.mxu0 %vm345_vm2, %v2296_v28 }
 0x290   : > { %2532 = vst.msk [vmem:[%s3952_s28 + $0x50] sm:$0xff] %vm345_vm2, %v2500_v24  ;;  %v2574_v55 = vsel %vm345_vm2, %v2500_v24, 0.0  ;;  %v2635_v12 = vmul.f32 %v2500_v24, %v2500_v24 }
 0x291   : > { %v2575_v4 = vadd.f32 %v2574_v55, %v2573_v1  ;;  %2469 = vst.msk [vmem:[#allocation3 + $0x58] sm:$0xff] %vm345_vm2, %v2437_v41  ;;  %v1993_v42 = vpop.f32.mrf.mxu2  ;;  %v1708_v57 = vpop.f32.mrf.mxu1 }
 0x292   : > { %v2676_v33 = vsel %vm345_vm2, %v2635_v12, 0.0  ;;  %v2052_v31 = vadd.f32 %v1993_v42, %v1878_v50  ;;  %2958 = vmatmul.msk.bf16.gmra.mxu3 %vm345_vm2, %v4077_v15  ;;  %v1764_v46 = vadd.f32 %v1708_v57, %v1635_v43 }
 0x293   : > { %v2677_v44 = vadd.f32 %v2676_v33, %v2675_v30  ;;  %v2116_v19 = vld [vmem:[#allocation3 + $0x68] sm:$0xff] }
 0x294   : > { %v2245_v16 = vadd.f32 %v2184_v3, %v2116_v19  ;;  %2084 = vst.msk [vmem:[#allocation3 + $0x70] sm:$0xff] %vm345_vm2, %v2052_v31  ;;  %v4125_v13 = vpop.f32.mrf.mxu0  ;;  %v1879_v56 = vld [vmem:[#allocation3 + $0x78] sm:$0xff] }
 0x295   : > { %v2309_v25 = vld [vmem:[#allocation3 + $0x60] sm:$0xff]  ;;  %v2187_v21 = vpop.f32.mrf.mxu3  ;;  %1796 = vst.msk [vmem:[#allocation3 + $0x80] sm:$0xff] %vm345_vm2, %v1764_v46 }
 0x296   : > { %2277 = vst.msk [vmem:[#allocation3 + $0x68] sm:$0xff] %vm345_vm2, %v2245_v16  ;;  %v2438_v54 = vadd.f32 %v4080_v48, %v2309_v25 }
 0x298   : > { %v2501_v53 = vld [vmem:[#allocation3 + $0x58] sm:$0xff]  ;;  %2470 = vst.msk [vmem:[#allocation3 + $0x60] sm:$0xff] %vm345_vm2, %v2438_v54 }
 0x299   : > { %2533 = vst.msk [vmem:[%s3952_s28 + $0x58] sm:$0xff] %vm345_vm2, %v2501_v53  ;;  %v2576_v15 = vsel %vm345_vm2, %v2501_v53, 0.0  ;;  %v2636_v59 = vmul.f32 %v2501_v53, %v2501_v53  ;;  %v1995_v60 = vpop.f32.mrf.mxu2  ;;  %v1710_v61 = vpop.f32.mrf.mxu1 }
 0x29a   : > { %v2577_v58 = vadd.f32 %v2576_v15, %v2575_v4  ;;  %v2053_v62 = vadd.f32 %v1995_v60, %v1879_v56  ;;  %v1765_v18 = vadd.f32 %v1710_v61, %v1636_v49 }
 0x29b   : > { %v2678_v45 = vsel %vm345_vm2, %v2636_v59, 0.0  ;;  %v2117_v5 = vld [vmem:[#allocation3 + $0x70] sm:$0xff] }
 0x29c   : > { %v2679_v48 = vadd.f32 %v2678_v45, %v2677_v44  ;;  %v2246_v37 = vadd.f32 %v2187_v21, %v2117_v5  ;;  %2085 = vst.msk [vmem:[#allocation3 + $0x78] sm:$0xff] %vm345_vm2, %v2053_v62  ;;  %v4136_v52 = vpop.f32.mrf.mxu0  ;;  %v1880_v51 = vld [vmem:[#allocation3 + $0x80] sm:$0xff] }
 0x29d   : > { %v2310_v35 = vld [vmem:[#allocation3 + $0x68] sm:$0xff]  ;;  %v2189_v63 = vpop.f32.mrf.mxu3  ;;  %1797 = vst.msk [vmem:[#allocation3 + $0x88] sm:$0xff] %vm345_vm2, %v1765_v18  ;;  %v1639_v21 = vld [vmem:[#allocation3 + $0xa0] sm:$0xff] }
 0x29e   : > { %2278 = vst.msk [vmem:[#allocation3 + $0x70] sm:$0xff] %vm345_vm2, %v2246_v37  ;;  %v2439_v38 = vadd.f32 %v4098_v47, %v2310_v35  ;;  %v1640_v35 = vld [vmem:[#allocation3 + $0xa8] sm:$0xff] }
 0x29f   : > { %v2502_v23 = vld [vmem:[#allocation3 + $0x60] sm:$0xff] }
 0x2a0   : > { %2534 = vst.msk [vmem:[%s3952_s28 + $0x60] sm:$0xff] %vm345_vm2, %v2502_v23  ;;  %v2578_v8 = vsel %vm345_vm2, %v2502_v23, 0.0  ;;  %v2637_v10 = vmul.f32 %v2502_v23, %v2502_v23 }
 0x2a1   : > { %v2579_v11 = vadd.f32 %v2578_v8, %v2577_v58  ;;  %2471 = vst.msk [vmem:[#allocation3 + $0x68] sm:$0xff] %vm345_vm2, %v2439_v38  ;;  %v1998_v14 = vpop.f32.mrf.mxu2  ;;  %v1713_v34 = vpop.f32.mrf.mxu1 }
 0x2a2   : > { %v2680_v7 = vsel %vm345_vm2, %v2637_v10, 0.0  ;;  %v2054_v0 = vadd.f32 %v1998_v14, %v1880_v51  ;;  %v1766_v20 = vadd.f32 %v1713_v34, %v1637_v32 }
 0x2a3   : > { %v2681_v36 = vadd.f32 %v2680_v7, %v2679_v48  ;;  %v2118_v47 = vld [vmem:[#allocation3 + $0x78] sm:$0xff] }
 0x2a4   : > { %v2247_v26 = vadd.f32 %v2189_v63, %v2118_v47  ;;  %2086 = vst.msk [vmem:[#allocation3 + $0x80] sm:$0xff] %vm345_vm2, %v2054_v0  ;;  %v4147_v22 = vpop.f32.mrf.mxu0  ;;  %v1881_v27 = vld [vmem:[#allocation3 + $0x88] sm:$0xff] }
 0x2a5   : > { %v2311_v1 = vld [vmem:[#allocation3 + $0x70] sm:$0xff]  ;;  %v2192_v29 = vpop.f32.mrf.mxu3  ;;  %1798 = vst.msk [vmem:[#allocation3 + $0x90] sm:$0xff] %vm345_vm2, %v1766_v20 }
 0x2a6   : > { %2279 = vst.msk [vmem:[#allocation3 + $0x78] sm:$0xff] %vm345_vm2, %v2247_v26  ;;  %v2440_v6 = vadd.f32 %v4109_v39, %v2311_v1  ;;  %v1641_v1 = vld [vmem:[#allocation3 + $0xb0] sm:$0xff] }
 0x2a8   : > { %v2503_v9 = vld [vmem:[#allocation3 + $0x68] sm:$0xff]  ;;  %2472 = vst.msk [vmem:[#allocation3 + $0x70] sm:$0xff] %vm345_vm2, %v2440_v6 }
 0x2a9   : > { %2535 = vst.msk [vmem:[%s3952_s28 + $0x68] sm:$0xff] %vm345_vm2, %v2503_v9  ;;  %v2580_v28 = vsel %vm345_vm2, %v2503_v9, 0.0  ;;  %v2638_v30 = vmul.f32 %v2503_v9, %v2503_v9  ;;  %v2000_v17 = vpop.f32.mrf.mxu2  ;;  %v1715_v3 = vpop.f32.mrf.mxu1 }
 0x2aa   : > { %v2581_v41 = vadd.f32 %v2580_v28, %v2579_v11  ;;  %v2055_v24 = vadd.f32 %v2000_v17, %v1881_v27  ;;  %v1767_v50 = vadd.f32 %v1715_v3, %v1638_v40 }
 0x2ab   : > { %v2682_v55 = vsel %vm345_vm2, %v2638_v30, 0.0  ;;  %v2119_v12 = vld [vmem:[#allocation3 + $0x80] sm:$0xff] }
 0x2ac   : > { %v2683_v39 = vadd.f32 %v2682_v55, %v2681_v36  ;;  %v2248_v4 = vadd.f32 %v2192_v29, %v2119_v12  ;;  %2087 = vst.msk [vmem:[#allocation3 + $0x88] sm:$0xff] %vm345_vm2, %v2055_v24  ;;  %v4158_v42 = vpop.f32.mrf.mxu0  ;;  %v1882_v46 = vld [vmem:[#allocation3 + $0x90] sm:$0xff] }
 0x2ad   : > { %v2312_v43 = vld [vmem:[#allocation3 + $0x78] sm:$0xff]  ;;  %v2194_v57 = vpop.f32.mrf.mxu3  ;;  %1799 = vst.msk [vmem:[#allocation3 + $0x98] sm:$0xff] %vm345_vm2, %v1767_v50 }
 0x2ae   : > { %2280 = vst.msk [vmem:[#allocation3 + $0x80] sm:$0xff] %vm345_vm2, %v2248_v4  ;;  %v2441_v33 = vadd.f32 %v4125_v13, %v2312_v43  ;;  %v1642_v4 = vld [vmem:[#allocation3 + $0xb8] sm:$0xff] }
 0x2af   : > { %v2504_v31 = vld [vmem:[#allocation3 + $0x70] sm:$0xff] }
 0x2b0   : > { %2536 = vst.msk [vmem:[%s3952_s28 + $0x70] sm:$0xff] %vm345_vm2, %v2504_v31  ;;  %v2582_v44 = vsel %vm345_vm2, %v2504_v31, 0.0  ;;  %v2639_v19 = vmul.f32 %v2504_v31, %v2504_v31 }
 0x2b1   : > { %v2583_v16 = vadd.f32 %v2582_v44, %v2581_v41  ;;  %2473 = vst.msk [vmem:[#allocation3 + $0x78] sm:$0xff] %vm345_vm2, %v2441_v33  ;;  %v2003_v25 = vpop.f32.mrf.mxu2  ;;  %v1718_v54 = vpop.f32.mrf.mxu1 }
 0x2b2   : > { %v2684_v56 = vsel %vm345_vm2, %v2639_v19, 0.0  ;;  %v2056_v53 = vadd.f32 %v2003_v25, %v1882_v46  ;;  %v1768_v15 = vadd.f32 %v1718_v54, %v1639_v21 }
 0x2b3   : > { %v2685_v13 = vadd.f32 %v2684_v56, %v2683_v39  ;;  %v2120_v59 = vld [vmem:[#allocation3 + $0x88] sm:$0xff] }
 0x2b4   : > { %v2249_v60 = vadd.f32 %v2194_v57, %v2120_v59  ;;  %2088 = vst.msk [vmem:[#allocation3 + $0x90] sm:$0xff] %vm345_vm2, %v2056_v53  ;;  %v4170_v49 = vpop.f32.mrf.mxu0  ;;  %v1883_v18 = vld [vmem:[#allocation3 + $0x98] sm:$0xff] }
 0x2b5   : > { %v2313_v61 = vld [vmem:[#allocation3 + $0x80] sm:$0xff]  ;;  %v2197_v58 = vpop.f32.mrf.mxu3  ;;  %1800 = vst.msk [vmem:[#allocation3 + $0xa0] sm:$0xff] %vm345_vm2, %v1768_v15 }
 0x2b6   : > { %2281 = vst.msk [vmem:[#allocation3 + $0x88] sm:$0xff] %vm345_vm2, %v2249_v60  ;;  %v2442_v62 = vadd.f32 %v4136_v52, %v2313_v61  ;;  %v1643_v60 = vld [vmem:[#allocation3 + $0xc0] sm:$0xff] }
 0x2b8   : > { %v2505_v45 = vld [vmem:[#allocation3 + $0x78] sm:$0xff]  ;;  %2474 = vst.msk [vmem:[#allocation3 + $0x80] sm:$0xff] %vm345_vm2, %v2442_v62 }
 0x2b9   : > { %2537 = vst.msk [vmem:[%s3952_s28 + $0x78] sm:$0xff] %vm345_vm2, %v2505_v45  ;;  %v2584_v5 = vsel %vm345_vm2, %v2505_v45, 0.0  ;;  %v2640_v48 = vmul.f32 %v2505_v45, %v2505_v45  ;;  %v2005_v37 = vpop.f32.mrf.mxu2  ;;  %v1720_v63 = vpop.f32.mrf.mxu1 }
 0x2ba   : > { %v2585_v52 = vadd.f32 %v2584_v5, %v2583_v16  ;;  %v2057_v38 = vadd.f32 %v2005_v37, %v1883_v18  ;;  %v1769_v23 = vadd.f32 %v1720_v63, %v1640_v35 }
 0x2bb   : > { %v2686_v51 = vsel %vm345_vm2, %v2640_v48, 0.0  ;;  %v2121_v8 = vld [vmem:[#allocation3 + $0x90] sm:$0xff] }
 0x2bc   : > { %v2687_v10 = vadd.f32 %v2686_v51, %v2685_v13  ;;  %v2250_v11 = vadd.f32 %v2197_v58, %v2121_v8  ;;  %2089 = vst.msk [vmem:[#allocation3 + $0x98] sm:$0xff] %vm345_vm2, %v2057_v38  ;;  %v4193_v7 = vpop.f32.mrf.mxu0  ;;  %v1884_v20 = vld [vmem:[#allocation3 + $0xa0] sm:$0xff] }
 0x2bd   : > { %v2314_v14 = vld [vmem:[#allocation3 + $0x88] sm:$0xff]  ;;  %v2199_v32 = vpop.f32.mrf.mxu3  ;;  %1801 = vst.msk [vmem:[#allocation3 + $0xa8] sm:$0xff] %vm345_vm2, %v1769_v23 }
 0x2be   : > { %2282 = vst.msk [vmem:[#allocation3 + $0x90] sm:$0xff] %vm345_vm2, %v2250_v11  ;;  %v2443_v34 = vadd.f32 %v4147_v22, %v2314_v14 }
 0x2bf   : > { %v2506_v0 = vld [vmem:[#allocation3 + $0x80] sm:$0xff] }
 0x2c0   : > { %2538 = vst.msk [vmem:[%s3952_s28 + $0x80] sm:$0xff] %vm345_vm2, %v2506_v0  ;;  %v2586_v2 = vsel %vm345_vm2, %v2506_v0, 0.0  ;;  %v2641_v36 = vmul.f32 %v2506_v0, %v2506_v0 }
 0x2c1   : > { %v2587_v47 = vadd.f32 %v2586_v2, %v2585_v52  ;;  %2475 = vst.msk [vmem:[#allocation3 + $0x88] sm:$0xff] %vm345_vm2, %v2443_v34  ;;  %v2008_v26 = vpop.f32.mrf.mxu2  ;;  %v1723_v29 = vpop.f32.mrf.mxu1 }
 0x2c2   : > { %v2688_v6 = vsel %vm345_vm2, %v2641_v36, 0.0  ;;  %v2058_v27 = vadd.f32 %v2008_v26, %v1884_v20  ;;  %v1770_v22 = vadd.f32 %v1723_v29, %v1641_v1 }
 0x2c3   : > { %v2689_v9 = vadd.f32 %v2688_v6, %v2687_v10  ;;  %v2122_v28 = vld [vmem:[#allocation3 + $0x98] sm:$0xff]  ;;  %v1644_v10 = vld [vmem:[#allocation3 + $0xc8] sm:$0xff] }
 0x2c4   : > { %v2251_v30 = vadd.f32 %v2199_v32, %v2122_v28  ;;  %2090 = vst.msk [vmem:[#allocation3 + $0xa0] sm:$0xff] %vm345_vm2, %v2058_v27  ;;  %v1885_v41 = vld [vmem:[#allocation3 + $0xa8] sm:$0xff]  ;;  %v4205_v50 = vpop.f32.mrf.mxu0 }
 0x2c5   : > { %v2315_v17 = vld [vmem:[#allocation3 + $0x90] sm:$0xff]  ;;  %v2202_v40 = vpop.f32.mrf.mxu3  ;;  %1802 = vst.msk [vmem:[#allocation3 + $0xb0] sm:$0xff] %vm345_vm2, %v1770_v22 }
 0x2c6   : > { %2283 = vst.msk [vmem:[#allocation3 + $0x98] sm:$0xff] %vm345_vm2, %v2251_v30  ;;  %v2444_v3 = vadd.f32 %v4158_v42, %v2315_v17  ;;  %v1645_v30 = vld [vmem:[#allocation3 + $0xd0] sm:$0xff] }
 0x2c8   : > { %v2507_v24 = vld [vmem:[#allocation3 + $0x88] sm:$0xff]  ;;  %2476 = vst.msk [vmem:[#allocation3 + $0x90] sm:$0xff] %vm345_vm2, %v2444_v3 }
 0x2c9   : > { %2539 = vst.msk [vmem:[%s3952_s28 + $0x88] sm:$0xff] %vm345_vm2, %v2507_v24  ;;  %v2588_v55 = vsel %vm345_vm2, %v2507_v24, 0.0  ;;  %v2642_v12 = vmul.f32 %v2507_v24, %v2507_v24  ;;  %v2010_v39 = vpop.f32.mrf.mxu2  ;;  %v1725_v43 = vpop.f32.mrf.mxu1 }
 0x2ca   : > { %v2589_v57 = vadd.f32 %v2588_v55, %v2587_v47  ;;  %v2059_v33 = vadd.f32 %v2010_v39, %v1885_v41  ;;  %v1771_v31 = vadd.f32 %v1725_v43, %v1642_v4 }
 0x2cb   : > { %v2690_v42 = vsel %vm345_vm2, %v2642_v12, 0.0  ;;  %v2123_v46 = vld [vmem:[#allocation3 + $0xa0] sm:$0xff] }
 0x2cc   : > { %v2691_v44 = vadd.f32 %v2690_v42, %v2689_v9  ;;  %v2252_v19 = vadd.f32 %v2202_v40, %v2123_v46  ;;  %2091 = vst.msk [vmem:[#allocation3 + $0xa8] sm:$0xff] %vm345_vm2, %v2059_v33  ;;  %v1886_v56 = vld [vmem:[#allocation3 + $0xb0] sm:$0xff]  ;;  %v2401_v45 = vpop.f32.mrf.mxu0  ;;  %v1646_v42 = vld [vmem:[#allocation3 + $0xd8] sm:$0xff] }
 0x2cd   : > { %v2316_v16 = vld [vmem:[#allocation3 + $0x98] sm:$0xff]  ;;  %v2204_v25 = vpop.f32.mrf.mxu3  ;;  %1803 = vst.msk [vmem:[#allocation3 + $0xb8] sm:$0xff] %vm345_vm2, %v1771_v31 }
 0x2ce   : > { %2284 = vst.msk [vmem:[#allocation3 + $0xa0] sm:$0xff] %vm345_vm2, %v2252_v19  ;;  %v2445_v21 = vadd.f32 %v4170_v49, %v2316_v16 }
 0x2cf   : > { %v2508_v54 = vld [vmem:[#allocation3 + $0x90] sm:$0xff] }
 0x2d0   : > { %2540 = vst.msk [vmem:[%s3952_s28 + $0x90] sm:$0xff] %vm345_vm2, %v2508_v54  ;;  %v2590_v53 = vsel %vm345_vm2, %v2508_v54, 0.0  ;;  %v2643_v15 = vmul.f32 %v2508_v54, %v2508_v54 }
 0x2d1   : > { %v2591_v13 = vadd.f32 %v2590_v53, %v2589_v57  ;;  %2477 = vst.msk [vmem:[#allocation3 + $0x98] sm:$0xff] %vm345_vm2, %v2445_v21  ;;  %v2013_v59 = vpop.f32.mrf.mxu2  ;;  %v1728_v61 = vpop.f32.mrf.mxu1 }
 0x2d2   : > { %v2692_v58 = vsel %vm345_vm2, %v2643_v15, 0.0  ;;  %v2060_v62 = vadd.f32 %v2013_v59, %v1886_v56  ;;  %v1772_v18 = vadd.f32 %v1728_v61, %v1643_v60  ;;  %v1647_v60 = vld [vmem:[#allocation3 + $0xe0] sm:$0xff] }
 0x2d3   : > { %v2693_v49 = vadd.f32 %v2692_v58, %v2691_v44  ;;  %v2124_v5 = vld [vmem:[#allocation3 + $0xa8] sm:$0xff] }
 0x2d4   : > { %v2253_v48 = vadd.f32 %v2204_v25, %v2124_v5  ;;  %2092 = vst.msk [vmem:[#allocation3 + $0xb0] sm:$0xff] %vm345_vm2, %v2060_v62  ;;  %v1887_v52 = vld [vmem:[#allocation3 + $0xb8] sm:$0xff]  ;;  %v2403_v36 = vpop.f32.mrf.mxu0 }
 0x2d5   : > { %v2317_v37 = vld [vmem:[#allocation3 + $0xa0] sm:$0xff]  ;;  %v2207_v35 = vpop.f32.mrf.mxu3  ;;  %1804 = vst.msk [vmem:[#allocation3 + $0xc0] sm:$0xff] %vm345_vm2, %v1772_v18 }
 0x2d6   : > { %2285 = vst.msk [vmem:[#allocation3 + $0xa8] sm:$0xff] %vm345_vm2, %v2253_v48  ;;  %v2446_v63 = vadd.f32 %v4193_v7, %v2317_v37 }
 0x2d8   : > { %v2509_v38 = vld [vmem:[#allocation3 + $0x98] sm:$0xff]  ;;  %2478 = vst.msk [vmem:[#allocation3 + $0xa0] sm:$0xff] %vm345_vm2, %v2446_v63 }
 0x2d9   : > { %2541 = vst.msk [vmem:[%s3952_s28 + $0x98] sm:$0xff] %vm345_vm2, %v2509_v38  ;;  %v2592_v23 = vsel %vm345_vm2, %v2509_v38, 0.0  ;;  %v2644_v51 = vmul.f32 %v2509_v38, %v2509_v38  ;;  %v2015_v8 = vpop.f32.mrf.mxu2  ;;  %v1730_v11 = vpop.f32.mrf.mxu1 }
 0x2da   : > { %v2593_v14 = vadd.f32 %v2592_v23, %v2591_v13  ;;  %v2061_v32 = vadd.f32 %v2015_v8, %v1887_v52  ;;  %v1773_v34 = vadd.f32 %v1730_v11, %v1644_v10  ;;  %v1648_v52 = vld [vmem:[#allocation3 + $0xe8] sm:$0xff] }
 0x2db   : > { %v2694_v0 = vsel %vm345_vm2, %v2644_v51, 0.0  ;;  %v2125_v20 = vld [vmem:[#allocation3 + $0xb0] sm:$0xff] }
 0x2dc   : > { %v2695_v7 = vadd.f32 %v2694_v0, %v2693_v49  ;;  %v2254_v2 = vadd.f32 %v2207_v35, %v2125_v20  ;;  %2093 = vst.msk [vmem:[#allocation3 + $0xb8] sm:$0xff] %vm345_vm2, %v2061_v32  ;;  %v1888_v6 = vld [vmem:[#allocation3 + $0xc0] sm:$0xff]  ;;  %v2406_v43 = vpop.f32.mrf.mxu0 }
 0x2dd   : > { %v2318_v47 = vld [vmem:[#allocation3 + $0xa8] sm:$0xff]  ;;  %v2209_v26 = vpop.f32.mrf.mxu3  ;;  %1805 = vst.msk [vmem:[#allocation3 + $0xc8] sm:$0xff] %vm345_vm2, %v1773_v34 }
 0x2de   : > { %2286 = vst.msk [vmem:[#allocation3 + $0xb0] sm:$0xff] %vm345_vm2, %v2254_v2  ;;  %v2447_v1 = vadd.f32 %v4205_v50, %v2318_v47  ;;  %v1649_v2 = vld [vmem:[#allocation3 + $0xf0] sm:$0xff] }
 0x2df   : > { %v2510_v29 = vld [vmem:[#allocation3 + $0xa0] sm:$0xff] }
 0x2e0   : > { %2542 = vst.msk [vmem:[%s3952_s28 + $0xa0] sm:$0xff] %vm345_vm2, %v2510_v29  ;;  %v2594_v27 = vsel %vm345_vm2, %v2510_v29, 0.0  ;;  %v2645_v22 = vmul.f32 %v2510_v29, %v2510_v29 }
 0x2e1   : > { %v4236_v9 = vadd.f32 %v2594_v27, %v2593_v14  ;;  %2479 = vst.msk [vmem:[#allocation3 + $0xa8] sm:$0xff] %vm345_vm2, %v2447_v1  ;;  %v2018_v28 = vpop.f32.mrf.mxu2  ;;  %v1733_v17 = vpop.f32.mrf.mxu1 }
 0x2e2   : > { %v2696_v40 = vsel %vm345_vm2, %v2645_v22, 0.0  ;;  %v2062_v3 = vadd.f32 %v2018_v28, %v1888_v6  ;;  %v1774_v41 = vadd.f32 %v1733_v17, %v1645_v30 }
 0x2e3   : > { %v4240_v24 = vadd.f32 %v2696_v40, %v2695_v7  ;;  %v2126_v50 = vld [vmem:[#allocation3 + $0xb8] sm:$0xff] }
 0x2e4   : > { %v2255_v55 = vadd.f32 %v2209_v26, %v2126_v50  ;;  %2094 = vst.msk [vmem:[#allocation3 + $0xc0] sm:$0xff] %vm345_vm2, %v2062_v3  ;;  %v1889_v57 = vld [vmem:[#allocation3 + $0xc8] sm:$0xff]  ;;  %v2408_v13 = vpop.f32.mrf.mxu0  ;;  %v1650_v3 = vld [vmem:[#allocation3 + $0xf8] sm:$0xff] }
 0x2e5   : > { %v2319_v12 = vld [vmem:[#allocation3 + $0xb0] sm:$0xff]  ;;  %v2212_v39 = vpop.f32.mrf.mxu3  ;;  %1806 = vst.msk [vmem:[#allocation3 + $0xd0] sm:$0xff] %vm345_vm2, %v1774_v41 }
 0x2e6   : > { %2287 = vst.msk [vmem:[#allocation3 + $0xb8] sm:$0xff] %vm345_vm2, %v2255_v55  ;;  %v2448_v4 = vadd.f32 %v2401_v45, %v2319_v12 }
 0x2e8   : > { %v4245_v33 = vld [vmem:[#allocation3 + $0xa8] sm:$0xff]  ;;  %2480 = vst.msk [vmem:[#allocation3 + $0xb0] sm:$0xff] %vm345_vm2, %v2448_v4 }
 0x2e9   : > { %2543 = vst.msk [vmem:[%s3952_s28 + $0xa8] sm:$0xff] %vm345_vm2, %v4245_v33  ;;  %v2020_v31 = vpop.f32.mrf.mxu2  ;;  %v1735_v46 = vpop.f32.mrf.mxu1 }
 0x2ea   : > { %v2063_v44 = vadd.f32 %v2020_v31, %v1889_v57  ;;  %v1775_v19 = vadd.f32 %v1735_v46, %v1646_v42 }
 0x2eb   : > { %v2127_v16 = vld [vmem:[#allocation3 + $0xc0] sm:$0xff] }
 0x2ec   : > { %v2256_v25 = vadd.f32 %v2212_v39, %v2127_v16  ;;  %2095 = vst.msk [vmem:[#allocation3 + $0xc8] sm:$0xff] %vm345_vm2, %v2063_v44  ;;  %v1890_v15 = vld [vmem:[#allocation3 + $0xd0] sm:$0xff]  ;;  %v2411_v51 = vpop.f32.mrf.mxu0 }
 0x2ed   : > { %v2320_v21 = vld [vmem:[#allocation3 + $0xb8] sm:$0xff]  ;;  %v2214_v54 = vpop.f32.mrf.mxu3  ;;  %1807 = vst.msk [vmem:[#allocation3 + $0xd8] sm:$0xff] %vm345_vm2, %v1775_v19 }
 0x2ee   : > { %2288 = vst.msk [vmem:[#allocation3 + $0xc0] sm:$0xff] %vm345_vm2, %v2256_v25  ;;  %v2449_v56 = vadd.f32 %v2403_v36, %v2320_v21 }
 0x2ef   : > { %v4254_v53 = vld [vmem:[#allocation3 + $0xb0] sm:$0xff] }
 0x2f0   : > { %2544 = vst.msk [vmem:[%s3952_s28 + $0xb0] sm:$0xff] %vm345_vm2, %v4254_v53 }
 0x2f1   : > { %2481 = vst.msk [vmem:[#allocation3 + $0xb8] sm:$0xff] %vm345_vm2, %v2449_v56  ;;  %v2023_v59 = vpop.f32.mrf.mxu2  ;;  %v1738_v61 = vpop.f32.mrf.mxu1 }
 0x2f2   : > { %v2064_v58 = vadd.f32 %v2023_v59, %v1890_v15  ;;  %v1776_v62 = vadd.f32 %v1738_v61, %v1647_v60 }
 0x2f3   : > { %v2128_v18 = vld [vmem:[#allocation3 + $0xc8] sm:$0xff] }
 0x2f4   : > { %v2257_v45 = vadd.f32 %v2214_v54, %v2128_v18  ;;  %2096 = vst.msk [vmem:[#allocation3 + $0xd0] sm:$0xff] %vm345_vm2, %v2064_v58  ;;  %v1891_v37 = vld [vmem:[#allocation3 + $0xd8] sm:$0xff]  ;;  %v2413_v6 = vpop.f32.mrf.mxu0 }
 0x2f5   : > { %v2321_v49 = vld [vmem:[#allocation3 + $0xc0] sm:$0xff]  ;;  %v2217_v5 = vpop.f32.mrf.mxu3  ;;  %1808 = vst.msk [vmem:[#allocation3 + $0xe0] sm:$0xff] %vm345_vm2, %v1776_v62 }
 0x2f6   : > { %2289 = vst.msk [vmem:[#allocation3 + $0xc8] sm:$0xff] %vm345_vm2, %v2257_v45  ;;  %v2450_v48 = vadd.f32 %v2406_v43, %v2321_v49 }
 0x2f8   : > { %v4263_v35 = vld [vmem:[#allocation3 + $0xb8] sm:$0xff]  ;;  %2482 = vst.msk [vmem:[#allocation3 + $0xc0] sm:$0xff] %vm345_vm2, %v2450_v48  ;;  %v2596_v48 = vsel %vm345_vm2, %v4245_v33, 0.0 }
 0x2f9   : > { %2545 = vst.msk [vmem:[%s3952_s28 + $0xb8] sm:$0xff] %vm345_vm2, %v4263_v35  ;;  %v2025_v63 = vpop.f32.mrf.mxu2  ;;  %v1740_v38 = vpop.f32.mrf.mxu1 }
 0x2fa   : > { %v2065_v23 = vadd.f32 %v2025_v63, %v1891_v37  ;;  %v1777_v8 = vadd.f32 %v1740_v38, %v1648_v52  ;;  %v2647_v37 = vmul.f32 %v4254_v53, %v4254_v53 }
 0x2fb   : > { %v2129_v10 = vld [vmem:[#allocation3 + $0xd0] sm:$0xff] }
 0x2fc   : > { %v2258_v11 = vadd.f32 %v2217_v5, %v2129_v10  ;;  %2097 = vst.msk [vmem:[#allocation3 + $0xd8] sm:$0xff] %vm345_vm2, %v2065_v23  ;;  %v1892_v20 = vld [vmem:[#allocation3 + $0xe0] sm:$0xff]  ;;  %v2416_v57 = vpop.f32.mrf.mxu0  ;;  %v2646_v5 = vmul.f32 %v4245_v33, %v4245_v33  ;;  %v2648_v10 = vmul.f32 %v4263_v35, %v4263_v35 }
 0x2fd   : > { %v2322_v14 = vld [vmem:[#allocation3 + $0xc8] sm:$0xff]  ;;  %v2219_v32 = vpop.f32.mrf.mxu3  ;;  %1809 = vst.msk [vmem:[#allocation3 + $0xe8] sm:$0xff] %vm345_vm2, %v1777_v8  ;;  %v2598_v8 = vsel %vm345_vm2, %v4254_v53, 0.0 }
 0x2fe   : > { %2290 = vst.msk [vmem:[#allocation3 + $0xd0] sm:$0xff] %vm345_vm2, %v2258_v11  ;;  %v2451_v34 = vadd.f32 %v2408_v13, %v2322_v14  ;;  %v2597_v14 = vadd.f32 %v2596_v48, %v4236_v9 }
 0x2ff   : > { %v4272_v0 = vld [vmem:[#allocation3 + $0xc0] sm:$0xff] }
 0x300   : > { %2546 = vst.msk [vmem:[%s3952_s28 + $0xc0] sm:$0xff] %vm345_vm2, %v4272_v0  ;;  %v2602_v9 = vsel %vm345_vm2, %v4272_v0, 0.0 }
 0x301   : > { %2483 = vst.msk [vmem:[#allocation3 + $0xc8] sm:$0xff] %vm345_vm2, %v2451_v34  ;;  %v2028_v7 = vpop.f32.mrf.mxu2  ;;  %v1743_v36 = vpop.f32.mrf.mxu1  ;;  %v2600_v34 = vsel %vm345_vm2, %v4263_v35, 0.0 }
 0x302   : > { %v2066_v47 = vadd.f32 %v2028_v7, %v1892_v20  ;;  %v1778_v26 = vadd.f32 %v1743_v36, %v1649_v2  ;;  %v2649_v20 = vmul.f32 %v4272_v0, %v4272_v0  ;;  %v2599_v7 = vadd.f32 %v2598_v8, %v2597_v14 }
 0x303   : > { %v2130_v1 = vld [vmem:[#allocation3 + $0xd8] sm:$0xff]  ;;  %v2702_v36 = vsel %vm345_vm2, %v2648_v10, 0.0 }
 0x304   : > { %v2259_v29 = vadd.f32 %v2219_v32, %v2130_v1  ;;  %2098 = vst.msk [vmem:[#allocation3 + $0xe0] sm:$0xff] %vm345_vm2, %v2066_v47  ;;  %v1893_v30 = vld [vmem:[#allocation3 + $0xe8] sm:$0xff]  ;;  %v2418_v13 = vpop.f32.mrf.mxu0  ;;  %v2700_v32 = vsel %vm345_vm2, %v2647_v37, 0.0  ;;  %v2704_v1 = vsel %vm345_vm2, %v2649_v20, 0.0 }
 0x305   : > { %v2323_v27 = vld [vmem:[#allocation3 + $0xd0] sm:$0xff]  ;;  %v2222_v22 = vpop.f32.mrf.mxu3  ;;  %1810 = vst.msk [vmem:[#allocation3 + $0xf0] sm:$0xff] %vm345_vm2, %v1778_v26  ;;  %v2601_v26 = vadd.f32 %v2600_v34, %v2599_v7 }
 0x306   : > { %2291 = vst.msk [vmem:[#allocation3 + $0xd8] sm:$0xff] %vm345_vm2, %v2259_v29  ;;  %v2452_v28 = vadd.f32 %v2411_v51, %v2323_v27  ;;  %v2698_v51 = vsel %vm345_vm2, %v2646_v5, 0.0 }
 0x307   : > { %v2699_v53 = vadd.f32 %v2698_v51, %v4240_v24  ;;  %v2603_v27 = vadd.f32 %v2602_v9, %v2601_v26 }
 0x308   : > { %v4281_v17 = vld [vmem:[#allocation3 + $0xc8] sm:$0xff]  ;;  %2484 = vst.msk [vmem:[#allocation3 + $0xd0] sm:$0xff] %vm345_vm2, %v2452_v28 }
 0x309   : > { %2547 = vst.msk [vmem:[%s3952_s28 + $0xc8] sm:$0xff] %vm345_vm2, %v4281_v17  ;;  %v2030_v40 = vpop.f32.mrf.mxu2  ;;  %v1745_v41 = vpop.f32.mrf.mxu1  ;;  %v2650_v47 = vmul.f32 %v4281_v17, %v4281_v17  ;;  %v2701_v35 = vadd.f32 %v2700_v32, %v2699_v53  ;;  %v2604_v24 = vsel %vm345_vm2, %v4281_v17, 0.0 }
 0x30a   : > { %v2067_v50 = vadd.f32 %v2030_v40, %v1893_v30  ;;  %v1779_v55 = vadd.f32 %v1745_v41, %v1650_v3  ;;  %v2605_v41 = vadd.f32 %v2604_v24, %v2603_v27 }
 0x30b   : > { %v2131_v12 = vld [vmem:[#allocation3 + $0xe0] sm:$0xff]  ;;  %v2706_v0 = vsel %vm345_vm2, %v2650_v47, 0.0 }
 0x30c   : > { %v2260_v39 = vadd.f32 %v2222_v22, %v2131_v12  ;;  %2099 = vst.msk [vmem:[#allocation3 + $0xe8] sm:$0xff] %vm345_vm2, %v2067_v50  ;;  %v1894_v46 = vld [vmem:[#allocation3 + $0xf0] sm:$0xff]  ;;  %v2421_v38 = vpop.f32.mrf.mxu0 }
 0x30d   : > { %v2324_v4 = vld [vmem:[#allocation3 + $0xd8] sm:$0xff]  ;;  %1811 = vst.msk [vmem:[#allocation3 + $0xf8] sm:$0xff] %vm345_vm2, %v1779_v55  ;;  %v2224_v42 = vpop.f32.mrf.mxu3 }
 0x30e   : > { %2292 = vst.msk [vmem:[#allocation3 + $0xe0] sm:$0xff] %vm345_vm2, %v2260_v39  ;;  %v2453_v43 = vadd.f32 %v2413_v6, %v2324_v4  ;;  %v2703_v6 = vadd.f32 %v2702_v36, %v2701_v35 }
 0x30f   : > { %v4290_v31 = vld [vmem:[#allocation3 + $0xd0] sm:$0xff] }
 0x310   : > { %2548 = vst.msk [vmem:[%s3952_s28 + $0xd0] sm:$0xff] %vm345_vm2, %v4290_v31  ;;  %v2651_v29 = vmul.f32 %v4290_v31, %v4290_v31  ;;  %v2606_v22 = vsel %vm345_vm2, %v4290_v31, 0.0  ;;  %v2705_v3 = vadd.f32 %v2704_v1, %v2703_v6 }
 0x311   : > { %2485 = vst.msk [vmem:[#allocation3 + $0xd8] sm:$0xff] %vm345_vm2, %v2453_v43  ;;  %v2033_v44 = vpop.f32.mrf.mxu2  ;;  %v2607_v43 = vadd.f32 %v2606_v22, %v2605_v41 }
 0x312   : > { %v2068_v19 = vadd.f32 %v2033_v44, %v1894_v46  ;;  %v2708_v55 = vsel %vm345_vm2, %v2651_v29, 0.0  ;;  %v2707_v4 = vadd.f32 %v2706_v0, %v2705_v3 }
 0x313   : > { %v2132_v16 = vld [vmem:[#allocation3 + $0xe8] sm:$0xff] }
 0x314   : > { %v2261_v25 = vadd.f32 %v2224_v42, %v2132_v16  ;;  %2100 = vst.msk [vmem:[#allocation3 + $0xf0] sm:$0xff] %vm345_vm2, %v2068_v19  ;;  %v1895_v56 = vld [vmem:[#allocation3 + $0xf8] sm:$0xff]  ;;  %v2423_v40 = vpop.f32.mrf.mxu0  ;;  %v2709_v46 = vadd.f32 %v2708_v55, %v2707_v4 }
 0x315   : > { %v2325_v21 = vld [vmem:[#allocation3 + $0xe0] sm:$0xff]  ;;  %v2227_v59 = vpop.f32.mrf.mxu3 }
 0x316   : > { %2293 = vst.msk [vmem:[#allocation3 + $0xe8] sm:$0xff] %vm345_vm2, %v2261_v25  ;;  %v2454_v54 = vadd.f32 %v2416_v57, %v2325_v21 }
 0x318   : > { %v2517_v15 = vld [vmem:[#allocation3 + $0xd8] sm:$0xff]  ;;  %2486 = vst.msk [vmem:[#allocation3 + $0xe0] sm:$0xff] %vm345_vm2, %v2454_v54 }
 0x319   : > { %2549 = vst.msk [vmem:[%s3952_s28 + $0xd8] sm:$0xff] %vm345_vm2, %v2517_v15  ;;  %v2035_v60 = vpop.f32.mrf.mxu2  ;;  %v2652_v28 = vmul.f32 %v2517_v15, %v2517_v15  ;;  %v2608_v17 = vsel %vm345_vm2, %v2517_v15, 0.0 }
 0x31a   : > { %v2069_v61 = vadd.f32 %v2035_v60, %v1895_v56  ;;  %v2609_v44 = vadd.f32 %v2608_v17, %v2607_v43 }
 0x31b   : > { %v2133_v58 = vld [vmem:[#allocation3 + $0xf0] sm:$0xff]  ;;  %v2710_v57 = vsel %vm345_vm2, %v2652_v28, 0.0 }
 0x31c   : > { %v2262_v62 = vadd.f32 %v2227_v59, %v2133_v58  ;;  %2101 = vst.msk [vmem:[#allocation3 + $0xf8] sm:$0xff] %vm345_vm2, %v2069_v61  ;;  %v2711_v21 = vadd.f32 %v2710_v57, %v2709_v46 }
 0x31d   : > { %v2326_v18 = vld [vmem:[#allocation3 + $0xe8] sm:$0xff]  ;;  %v2229_v52 = vpop.f32.mrf.mxu3 }
 0x31e   : > { %2294 = vst.msk [vmem:[#allocation3 + $0xf0] sm:$0xff] %vm345_vm2, %v2262_v62  ;;  %v2455_v45 = vadd.f32 %v2418_v13, %v2326_v18 }
 0x31f   : > { %v2518_v49 = vld [vmem:[#allocation3 + $0xe0] sm:$0xff] }
 0x320   : > { %2550 = vst.msk [vmem:[%s3952_s28 + $0xe0] sm:$0xff] %vm345_vm2, %v2518_v49  ;;  %v2653_v12 = vmul.f32 %v2518_v49, %v2518_v49  ;;  %v2610_v31 = vsel %vm345_vm2, %v2518_v49, 0.0 }
 0x321   : > { %2487 = vst.msk [vmem:[#allocation3 + $0xe8] sm:$0xff] %vm345_vm2, %v2455_v45  ;;  %v2611_v54 = vadd.f32 %v2610_v31, %v2609_v44 }
 0x322   : > { %v2712_v19 = vsel %vm345_vm2, %v2653_v12, 0.0 }
 0x323   : > { %v2134_v63 = vld [vmem:[#allocation3 + $0xf8] sm:$0xff]  ;;  %v2713_v13 = vadd.f32 %v2712_v19, %v2711_v21 }
 0x324   : > { %v2263_v23 = vadd.f32 %v2229_v52, %v2134_v63 }
 0x325   : > { %v2327_v11 = vld [vmem:[#allocation3 + $0xf0] sm:$0xff] }
 0x326   : > { %2295 = vst.msk [vmem:[#allocation3 + $0xf8] sm:$0xff] %vm345_vm2, %v2263_v23  ;;  %v2456_v33 = vadd.f32 %v2421_v38, %v2327_v11 }
 0x328   : > { %v2519_v2 = vld [vmem:[#allocation3 + $0xe8] sm:$0xff]  ;;  %2488 = vst.msk [vmem:[#allocation3 + $0xf0] sm:$0xff] %vm345_vm2, %v2456_v33 }
 0x329   : > { %2551 = vst.msk [vmem:[%s3952_s28 + $0xe8] sm:$0xff] %vm345_vm2, %v2519_v2  ;;  %v2654_v42 = vmul.f32 %v2519_v2, %v2519_v2  ;;  %v2612_v16 = vsel %vm345_vm2, %v2519_v2, 0.0 }
 0x32a   : > { %v2613_v59 = vadd.f32 %v2612_v16, %v2611_v54 }
 0x32b   : > { %v2714_v56 = vsel %vm345_vm2, %v2654_v42, 0.0 }
 0x32c   : > { %v2715_v61 = vadd.f32 %v2714_v56, %v2713_v13 }
 0x32d   : > { %v2328_v30 = vld [vmem:[#allocation3 + $0xf8] sm:$0xff] }
 0x32e   : > { %v2457_v50 = vadd.f32 %v2423_v40, %v2328_v30 }
 0x32f   : > { %v2520_v39 = vld [vmem:[#allocation3 + $0xf0] sm:$0xff] }
 0x330   : > { %2552 = vst.msk [vmem:[%s3952_s28 + $0xf0] sm:$0xff] %vm345_vm2, %v2520_v39  ;;  %v2655_v25 = vmul.f32 %v2520_v39, %v2520_v39  ;;  %v2614_v15 = vsel %vm345_vm2, %v2520_v39, 0.0 }
 0x331   : > { %2489 = vst.msk [vmem:[#allocation3 + $0xf8] sm:$0xff] %vm345_vm2, %v2457_v50  ;;  %v2615_v58 = vadd.f32 %v2614_v15, %v2613_v59 }
 0x332   : > { %v2716_v60 = vsel %vm345_vm2, %v2655_v25, 0.0 }
 0x333   : > { %v2717_v49 = vadd.f32 %v2716_v60, %v2715_v61 }
 0x338   : > { %v2521_v62 = vld [vmem:[#allocation3 + $0xf8] sm:$0xff] }
 0x339   : > { %2553 = vst.msk [vmem:[%s3952_s28 + $0xf8] sm:$0xff] %vm345_vm2, %v2521_v62  ;;  %v2616_v18 = vsel %vm345_vm2, %v2521_v62, 0.0  ;;  %v2656_v45 = vmul.f32 %v2521_v62, %v2521_v62 }
 0x33a   : > { %v2617_v5 = vadd.f32 %v2616_v18, %v2615_v58 }
 0x33b   : > { %v2718_v48 = vsel %vm345_vm2, %v2656_v45, 0.0 }
 0x33c   : > { %v2618_v37 = vrot.slane %v2617_v5, 4  ;;  %v2719_v63 = vadd.f32 %v2718_v48, %v2717_v49 }
 0x33e   : > { %v2619_v52 = vadd.f32 %v2618_v37, %v2617_v5  ;;  %v2720_v38 = vrot.slane %v2719_v63, 4 }
 0x340   : > { %v2620_v23 = vrot.slane %v2619_v52, 2  ;;  %v2721_v51 = vadd.f32 %v2720_v38, %v2719_v63 }
 0x342   : > { %v2621_v8 = vadd.f32 %v2620_v23, %v2619_v52  ;;  %v2722_v10 = vrot.slane %v2721_v51, 2 }
 0x344   : > { %v2622_v11 = vrot.slane %v2621_v8, 1  ;;  %v2723_v14 = vadd.f32 %v2722_v10, %v2721_v51 }
 0x346   : > { %v2623_v33 = vadd.f32 %v2622_v11, %v2621_v8  ;;  %v2724_v32 = vrot.slane %v2723_v14, 1 }
 0x348   : > { %2624 = vst.msk [vmem:[%s4180_s30] sm:$0x1] %vm354_vm1, %v2623_v33  ;;  %v2725_v34 = vadd.f32 %v2724_v32, %v2723_v14 }
 0x34a   : > { %2726 = vst.msk [vmem:[%s4180_s30 + $0x1] sm:$0x1] %vm354_vm1, %v2725_v34 }
 0x34b PF: > { %s15_s15 = sadd.s32 1, %s3000_s15  }
 0x34c   : > { %p12_p5 = scmp.ge.s32.totalorder %s15_s15, 4  }
 0x34e   :  { %14 = sbr.rel (!%p12_p5) target bundleno = 1 (0x1), region = 84 }

</bundles_post_ra>
